<compile_context>
chip_gen: v7x
topology: tpu7x:2x2x1
jax: 0.10.0
libtpu: 0.0.40
codegen_flags: <defaults>
</compile_context>

<pallas_src>
import functools
import numpy as np
import jax
import jax.numpy as jnp
from jax import lax
from jax.experimental import pallas as pl
from jax.experimental.pallas import tpu as pltpu


# ----------------------------- fused Pallas kernel -----------------------------

def _natten_fused_kernel(x_ref, w1_ref, b1_ref, wq_ref, bq_ref, wk_ref, bk_ref,
                         wvp_ref, bvp_ref, bias_ref, bproj_ref, o_ref,
                         *, n_head, n_layers):
    # Front-end Linear + ReLU.  Padded lanes of w1/b1 are zero -> padded lanes stay 0.
    act = jnp.dot(x_ref[0], w1_ref[...], preferred_element_type=jnp.float32) + b1_ref[...]
    act = jnp.maximum(act, 0.0)                                        # (N, Cp)

    # Contract last dims of q and k directly (A @ B^T without materializing B^T).
    qk_dims = (((1,), (1,)), ((), ()))

    # The n_layers attention layers share ONE weight set (same module repeated in the
    # nn.Sequential), so we just iterate the layer body; statically unrolled for
    # scheduler visibility (n_layers is tiny).
    for _ in range(n_layers):
        y = None
        for h in range(n_head):                                        # static unroll
            # Per-head projections (softmax scale folded into wq/bq host-side).
            q = jnp.dot(act, wq_ref[h], preferred_element_type=jnp.float32) + bq_ref[h]     # (N, hd_p)
            k = jnp.dot(act, wk_ref[h], preferred_element_type=jnp.float32) + bk_ref[h]     # (N, hd_p)
            # Value path with the output projection already folded in: x @ (Wv_h @ Wproj_h).
            vp = jnp.dot(act, wvp_ref[h], preferred_element_type=jnp.float32) + bvp_ref[h]  # (N, Cp)

            # Scores + additive neighborhood bias (rpb in-window, -1e30 outside).
            s = lax.dot_general(q, k, qk_dims, preferred_element_type=jnp.float32)          # (N, N)
            s = s + bias_ref[h]
            s = s - jnp.max(s, axis=-1, keepdims=True)
            p = jnp.exp(s)
            denom = jnp.sum(p, axis=-1, keepdims=True)
            r = pl.reciprocal(denom, approx=True)      # EUP slot (nearly free)
            r = r * (2.0 - denom * r)                  # one Newton step -> ~f32 accuracy
            p = p * r

            contrib = jnp.dot(p, vp, preferred_element_type=jnp.float32)                    # (N, Cp)
            y = contrib if y is None else y + contrib
        act = y + bproj_ref[...]

    o_ref[0] = act                                                      # lane-dense (N, 128) store


def natten_forward(x, fp, *, n_head, n_layers, n_unit):
    """x: (B, T, P, cin) float32 -> (B, T, P, n_unit) float32."""
    B, T, P, cin = x.shape
    N = T * P
    Cp = fp["w1"].shape[1]
    hd_p = fp["wq"].shape[2]

    kernel = functools.partial(_natten_fused_kernel, n_head=n_head, n_layers=n_layers)
    out = pl.pallas_call(
        kernel,
        out_shape=jax.ShapeDtypeStruct((B, N, Cp), jnp.float32),
        grid=(B,),
        in_specs=[
            pl.BlockSpec((1, N, cin), lambda b: (b, 0, 0)),          # x
            pl.BlockSpec((cin, Cp), lambda b: (0, 0)),               # w1
            pl.BlockSpec((1, Cp), lambda b: (0, 0)),                 # b1
            pl.BlockSpec((n_head, Cp, hd_p), lambda b: (0, 0, 0)),   # wq (scale folded)
            pl.BlockSpec((n_head, 1, hd_p), lambda b: (0, 0, 0)),    # bq
            pl.BlockSpec((n_head, Cp, hd_p), lambda b: (0, 0, 0)),   # wk
            pl.BlockSpec((n_head, 1, hd_p), lambda b: (0, 0, 0)),    # bk
            pl.BlockSpec((n_head, Cp, Cp), lambda b: (0, 0, 0)),     # wv @ wproj (folded)
            pl.BlockSpec((n_head, 1, Cp), lambda b: (0, 0, 0)),      # bv @ wproj (folded)
            pl.BlockSpec((n_head, N, N), lambda b: (0, 0, 0)),       # neighborhood bias
            pl.BlockSpec((1, Cp), lambda b: (0, 0)),                 # bproj
        ],
        out_specs=pl.BlockSpec((1, N, Cp), lambda b: (b, 0, 0)),
        compiler_params=pltpu.CompilerParams(dimension_semantics=("parallel",)),
    )(x.reshape(B, N, cin), fp["w1"], fp["b1"], fp["wq"], fp["bq"], fp["wk"], fp["bk"],
      fp["wvp"], fp["bvp"], fp["attn_bias"], fp["bproj"])

    return out[:, :, :n_unit].reshape(B, T, P, n_unit)   # strip lane padding outside kernel


# -------------------------- parameters / host-side prep --------------------------

def build_attn_bias(rpb, H, W, window):
    """Dense (heads, H*W, H*W) additive bias: rpb for in-window keys, -1e30 outside.

    Vectorized construction (no O(H^2 W^2) Python loop).
    """
    k = window
    c = k // 2
    iq = np.arange(H)[:, None]; ik = np.arange(H)[None, :]
    jq = np.arange(W)[:, None]; jk = np.arange(W)[None, :]
    si = np.clip(iq - c, 0, H - k)
    sj = np.clip(jq - c, 0, W - k)
    in_i = (ik >= si) & (ik < si + k)                          # (H, H)
    in_j = (jk >= sj) & (jk < sj + k)                          # (W, W)
    ri = np.clip(ik - iq + (k - 1), 0, 2 * k - 2)              # (H, H) rel index into rpb
    rj = np.clip(jk - jq + (k - 1), 0, 2 * k - 2)              # (W, W)
    vals = rpb[:, ri[:, None, :, None], rj[None, :, None, :]]  # (heads, H, W, H, W)
    mask = in_i[:, None, :, None] & in_j[None, :, None, :]     # (H, W, H, W)
    bias = np.where(mask[None], vals, np.float32(-1e30)).astype(np.float32)
    return bias.reshape(rpb.shape[0], H * W, H * W)


def init_raw_params(key, cin, window, n_unit, n_head):
    ks = jax.random.split(key, 7)
    return {
        "w1": jax.random.normal(ks[0], (cin, n_unit), jnp.float32) / np.sqrt(cin),
        "b1": 0.01 * jax.random.normal(ks[1], (n_unit,), jnp.float32),
        "wqkv": jax.random.normal(ks[2], (n_unit, 3 * n_unit), jnp.float32) / np.sqrt(n_unit),
        "bqkv": 0.01 * jax.random.normal(ks[3], (3 * n_unit,), jnp.float32),
        "rpb": 0.02 * jax.random.normal(ks[4], (n_head, 2 * window - 1, 2 * window - 1), jnp.float32),
        "wproj": jax.random.normal(ks[5], (n_unit, n_unit), jnp.float32) / np.sqrt(n_unit),
        "bproj": 0.01 * jax.random.normal(ks[6], (n_unit,), jnp.float32),
    }


def prepare_fused_params(raw, H, W, window, n_unit, n_head, Cp=128, hd_p=32):
    """Pad the feature axis lane-dense, split qkv per head, fold scale into q and the
    output projection into the value path."""
    hd = n_unit // n_head
    scale = float(hd) ** -0.5
    w1 = np.asarray(raw["w1"], np.float32);     b1 = np.asarray(raw["b1"], np.float32)
    wqkv = np.asarray(raw["wqkv"], np.float32); bqkv = np.asarray(raw["bqkv"], np.float32)
    wproj = np.asarray(raw["wproj"], np.float32); bproj = np.asarray(raw["bproj"], np.float32)
    rpb = np.asarray(raw["rpb"], np.float32)

    cin = w1.shape[0]
    w1p = np.zeros((cin, Cp), np.float32); w1p[:, :n_unit] = w1
    b1p = np.zeros((1, Cp), np.float32);   b1p[0, :n_unit] = b1

    wq_p = np.zeros((n_head, Cp, hd_p), np.float32)
    bq_p = np.zeros((n_head, 1, hd_p), np.float32)
    wk_p = np.zeros((n_head, Cp, hd_p), np.float32)
    bk_p = np.zeros((n_head, 1, hd_p), np.float32)
    wvp_p = np.zeros((n_head, Cp, Cp), np.float32)
    bvp_p = np.zeros((n_head, 1, Cp), np.float32)
    wq_all = wqkv[:, 0 * n_unit:1 * n_unit]
    wk_all = wqkv[:, 1 * n_unit:2 * n_unit]
    wv_all = wqkv[:, 2 * n_unit:3 * n_unit]
    bq_all = bqkv[0 * n_unit:1 * n_unit]
    bk_all = bqkv[1 * n_unit:2 * n_unit]
    bv_all = bqkv[2 * n_unit:3 * n_unit]
    for h in range(n_head):
        sl = slice(h * hd, (h + 1) * hd)
        wq_p[h, :n_unit, :hd] = wq_all[:, sl] * scale
        bq_p[h, 0, :hd] = bq_all[sl] * scale
        wk_p[h, :n_unit, :hd] = wk_all[:, sl]
        bk_p[h, 0, :hd] = bk_all[sl]
        # fold output projection into the value path
        wvp_p[h, :n_unit, :n_unit] = wv_all[:, sl] @ wproj[sl, :]
        bvp_p[h, 0, :n_unit] = bv_all[sl] @ wproj[sl, :]
    bproj_p = np.zeros((1, Cp), np.float32); bproj_p[0, :n_unit] = bproj

    return {
        "w1": jnp.asarray(w1p), "b1": jnp.asarray(b1p),
        "wq": jnp.asarray(wq_p), "bq": jnp.asarray(bq_p),
        "wk": jnp.asarray(wk_p), "bk": jnp.asarray(bk_p),
        "wvp": jnp.asarray(wvp_p), "bvp": jnp.asarray(bvp_p),
        "bproj": jnp.asarray(bproj_p),
        "attn_bias": jnp.asarray(build_attn_bias(rpb, H, W, window)),
    }


# ------------------------------ numpy reference ------------------------------

def _ref_na_layer(x, wqkv, bqkv, rpb, wproj, bproj, n_head, window):
    B, H, W, C = x.shape
    hd = C // n_head
    k = window
    c = k // 2
    scale = hd ** -0.5
    qkv = x @ wqkv + bqkv
    qkv = qkv.reshape(B, H, W, 3, n_head, hd)
    q = qkv[..., 0, :, :] * scale
    kk = qkv[..., 1, :, :]
    v = qkv[..., 2, :, :]
    out = np.zeros((B, H, W, n_head, hd), np.float32)
    for iq in range(H):
        si = min(max(iq - c, 0), H - k)
        for jq in range(W):
            sj = min(max(jq - c, 0), W - k)
            kwin = kk[:, si:si + k, sj:sj + k]
            vwin = v[:, si:si + k, sj:sj + k]
            qvec = q[:, iq, jq]
            s = np.einsum("bnd,bijnd->bnij", qvec, kwin)
            bias = rpb[:, si - iq + k - 1: si - iq + 2 * k - 1,
                          sj - jq + k - 1: sj - jq + 2 * k - 1]
            s = (s + bias[None]).reshape(B, n_head, k * k)
            s = s - s.max(-1, keepdims=True)
            pr = np.exp(s)
            pr = pr / pr.sum(-1, keepdims=True)
            pr = pr.reshape(B, n_head, k, k)
            out[:, iq, jq] = np.einsum("bnij,bijnd->bnd", pr, vwin)
    return out.reshape(B, H, W, C) @ wproj + bproj


def reference_forward(raw, x, n_head, n_layers, window):
    pn = {k: np.asarray(v, np.float32) for k, v in raw.items()}
    xn = np.asarray(x, np.float32)
    out = np.maximum(xn @ pn["w1"] + pn["b1"], 0.0)
    for _ in range(n_layers):
        out = _ref_na_layer(out, pn["wqkv"], pn["bqkv"], pn["rpb"],
                            pn["wproj"], pn["bproj"], n_head, window)
    return out


# ------------------------------------ main ------------------------------------

if __name__ == "__main__":
    B, T, P = 2, 16, 8                 # batch, time, pitch -> NA runs on the (T, P) grid
    hidden_per_pitch = 27              # linear input features = hidden_per_pitch + 5 = 32
    window = 5                         # neighborhood kernel size (<= min(T, P), odd)
    n_unit = 24
    n_head = 4                         # module hard-codes 4 heads in NeighborhoodAttention2D
    n_layers = 2

    cin = hidden_per_pitch + 5
    key = jax.random.PRNGKey(0)
    kx, kp = jax.random.split(key)
    x = jax.random.normal(kx, (B, T, P, cin), jnp.float32)

    raw = init_raw_params(kp, cin, window, n_unit, n_head)
    fused = prepare_fused_params(raw, T, P, window, n_unit, n_head)

    out = natten_forward(x, fused, n_head=n_head, n_layers=n_layers, n_unit=n_unit)
    out = jax.block_until_ready(out)
    assert out.shape == (B, T, P, n_unit)

    ref = reference_forward(raw, x, n_head=n_head, n_layers=n_layers, window=window)
    np.testing.assert_allclose(np.asarray(out), ref, rtol=2e-3, atol=2e-3)

    print("KERNEL_OK")
</pallas_src>

<mosaic_0001>
module attributes {stable_mosaic.version = 11 : i64} {
  func.func @_natten_fused_kernel(%arg0: i32, %arg1: memref<1x128x32xf32, #tpu.memory_space<vmem>>, %arg2: memref<32x128xf32, #tpu.memory_space<vmem>>, %arg3: memref<1x128xf32, #tpu.memory_space<vmem>>, %arg4: memref<4x128x32xf32, #tpu.memory_space<vmem>>, %arg5: memref<4x1x32xf32, #tpu.memory_space<vmem>>, %arg6: memref<4x128x32xf32, #tpu.memory_space<vmem>>, %arg7: memref<4x1x32xf32, #tpu.memory_space<vmem>>, %arg8: memref<4x128x128xf32, #tpu.memory_space<vmem>>, %arg9: memref<4x1x128xf32, #tpu.memory_space<vmem>>, %arg10: memref<4x128x128xf32, #tpu.memory_space<vmem>>, %arg11: memref<1x128xf32, #tpu.memory_space<vmem>>, %arg12: memref<1x128x128xf32, #tpu.memory_space<vmem>>) attributes {dimension_semantics = [#tpu.dimension_semantics<parallel>], iteration_bounds = array<i64: 2>, scalar_prefetch = 0 : i64, scratch_operands = 0 : i64, tpu.core_type = #tpu.core_type<tc>, window_params = [{transform_indices = @transform_0, window_bounds = array<i64: 1, 128, 32>}, {pipeline_mode = #tpu.pipeline_mode<synchronous>, transform_indices = @transform_1, window_bounds = array<i64: 32, 128>}, {pipeline_mode = #tpu.pipeline_mode<synchronous>, transform_indices = @transform_2, window_bounds = array<i64: 1, 128>}, {pipeline_mode = #tpu.pipeline_mode<synchronous>, transform_indices = @transform_3, window_bounds = array<i64: 4, 128, 32>}, {pipeline_mode = #tpu.pipeline_mode<synchronous>, transform_indices = @transform_4, window_bounds = array<i64: 4, 1, 32>}, {pipeline_mode = #tpu.pipeline_mode<synchronous>, transform_indices = @transform_5, window_bounds = array<i64: 4, 128, 32>}, {pipeline_mode = #tpu.pipeline_mode<synchronous>, transform_indices = @transform_6, window_bounds = array<i64: 4, 1, 32>}, {pipeline_mode = #tpu.pipeline_mode<synchronous>, transform_indices = @transform_7, window_bounds = array<i64: 4, 128, 128>}, {pipeline_mode = #tpu.pipeline_mode<synchronous>, transform_indices = @transform_8, window_bounds = array<i64: 4, 1, 128>}, {pipeline_mode = #tpu.pipeline_mode<synchronous>, transform_indices = @transform_9, window_bounds = array<i64: 4, 128, 128>}, {pipeline_mode = #tpu.pipeline_mode<synchronous>, transform_indices = @transform_10, window_bounds = array<i64: 1, 128>}, {transform_indices = @transform_11, window_bounds = array<i64: 1, 128, 128>}]} {
    %c0 = arith.constant 0 : index
    %c0_0 = arith.constant 0 : index
    %c0_1 = arith.constant 0 : index
    %0 = vector.load %arg1[%c0, %c0_0, %c0_1] : memref<1x128x32xf32, #tpu.memory_space<vmem>>, vector<1x128x32xf32>
    %1 = vector.shape_cast %0 : vector<1x128x32xf32> to vector<128x32xf32>
    %c0_2 = arith.constant 0 : index
    %c0_3 = arith.constant 0 : index
    %2 = vector.load %arg2[%c0_2, %c0_3] : memref<32x128xf32, #tpu.memory_space<vmem>>, vector<32x128xf32>
    %cst = arith.constant dense<0.000000e+00> : vector<128x128xf32>
    %3 = tpu.matmul %1, %2, %cst {dimension_numbers = #tpu.dot_dimension_numbers<[1], [0], [0], [1], [0, 0, 1, 1], [], []>} : vector<128x32xf32>, vector<32x128xf32>, vector<128x128xf32> -> vector<128x128xf32>
    %c0_4 = arith.constant 0 : index
    %c0_5 = arith.constant 0 : index
    %4 = vector.load %arg3[%c0_4, %c0_5] : memref<1x128xf32, #tpu.memory_space<vmem>>, vector<1x128xf32>
    %5 = vector.broadcast %4 : vector<1x128xf32> to vector<128x128xf32>
    %6 = arith.addf %3, %5 : vector<128x128xf32>
    %cst_6 = arith.constant 0.000000e+00 : f32
    %7 = vector.broadcast %cst_6 : f32 to vector<128x128xf32>
    %8 = arith.maximumf %6, %7 : vector<128x128xf32>
    %c0_7 = arith.constant 0 : index
    %c0_8 = arith.constant 0 : index
    %c0_9 = arith.constant 0 : index
    %9 = vector.load %arg4[%c0_7, %c0_8, %c0_9] : memref<4x128x32xf32, #tpu.memory_space<vmem>>, vector<1x128x32xf32>
    %10 = vector.shape_cast %9 : vector<1x128x32xf32> to vector<128x32xf32>
    %cst_10 = arith.constant dense<0.000000e+00> : vector<128x32xf32>
    %11 = tpu.matmul %8, %10, %cst_10 {dimension_numbers = #tpu.dot_dimension_numbers<[1], [0], [0], [1], [0, 0, 1, 1], [], []>} : vector<128x128xf32>, vector<128x32xf32>, vector<128x32xf32> -> vector<128x32xf32>
    %c0_11 = arith.constant 0 : index
    %c0_12 = arith.constant 0 : index
    %c0_13 = arith.constant 0 : index
    %12 = vector.load %arg5[%c0_11, %c0_12, %c0_13] : memref<4x1x32xf32, #tpu.memory_space<vmem>>, vector<1x1x32xf32>
    %13 = vector.shape_cast %12 : vector<1x1x32xf32> to vector<1x32xf32>
    %14 = vector.broadcast %13 : vector<1x32xf32> to vector<128x32xf32>
    %15 = arith.addf %11, %14 : vector<128x32xf32>
    %c0_14 = arith.constant 0 : index
    %c0_15 = arith.constant 0 : index
    %c0_16 = arith.constant 0 : index
    %16 = vector.load %arg6[%c0_14, %c0_15, %c0_16] : memref<4x128x32xf32, #tpu.memory_space<vmem>>, vector<1x128x32xf32>
    %17 = vector.shape_cast %16 : vector<1x128x32xf32> to vector<128x32xf32>
    %cst_17 = arith.constant dense<0.000000e+00> : vector<128x32xf32>
    %18 = tpu.matmul %8, %17, %cst_17 {dimension_numbers = #tpu.dot_dimension_numbers<[1], [0], [0], [1], [0, 0, 1, 1], [], []>} : vector<128x128xf32>, vector<128x32xf32>, vector<128x32xf32> -> vector<128x32xf32>
    %c0_18 = arith.constant 0 : index
    %c0_19 = arith.constant 0 : index
    %c0_20 = arith.constant 0 : index
    %19 = vector.load %arg7[%c0_18, %c0_19, %c0_20] : memref<4x1x32xf32, #tpu.memory_space<vmem>>, vector<1x1x32xf32>
    %20 = vector.shape_cast %19 : vector<1x1x32xf32> to vector<1x32xf32>
    %21 = vector.broadcast %20 : vector<1x32xf32> to vector<128x32xf32>
    %22 = arith.addf %18, %21 : vector<128x32xf32>
    %c0_21 = arith.constant 0 : index
    %c0_22 = arith.constant 0 : index
    %c0_23 = arith.constant 0 : index
    %23 = vector.load %arg8[%c0_21, %c0_22, %c0_23] : memref<4x128x128xf32, #tpu.memory_space<vmem>>, vector<1x128x128xf32>
    %24 = vector.shape_cast %23 : vector<1x128x128xf32> to vector<128x128xf32>
    %cst_24 = arith.constant dense<0.000000e+00> : vector<128x128xf32>
    %25 = tpu.matmul %8, %24, %cst_24 {dimension_numbers = #tpu.dot_dimension_numbers<[1], [0], [0], [1], [0, 0, 1, 1], [], []>} : vector<128x128xf32>, vector<128x128xf32>, vector<128x128xf32> -> vector<128x128xf32>
    %c0_25 = arith.constant 0 : index
    %c0_26 = arith.constant 0 : index
    %c0_27 = arith.constant 0 : index
    %26 = vector.load %arg9[%c0_25, %c0_26, %c0_27] : memref<4x1x128xf32, #tpu.memory_space<vmem>>, vector<1x1x128xf32>
    %27 = vector.shape_cast %26 : vector<1x1x128xf32> to vector<1x128xf32>
    %28 = vector.broadcast %27 : vector<1x128xf32> to vector<128x128xf32>
    %29 = arith.addf %25, %28 : vector<128x128xf32>
    %cst_28 = arith.constant dense<0.000000e+00> : vector<128x128xf32>
    %30 = tpu.matmul %15, %22, %cst_28 {dimension_numbers = #tpu.dot_dimension_numbers<[1], [1], [0], [0], [0, 0, 1, 0], [], []>} : vector<128x32xf32>, vector<128x32xf32>, vector<128x128xf32> -> vector<128x128xf32>
    %c0_29 = arith.constant 0 : index
    %c0_30 = arith.constant 0 : index
    %c0_31 = arith.constant 0 : index
    %31 = vector.load %arg10[%c0_29, %c0_30, %c0_31] : memref<4x128x128xf32, #tpu.memory_space<vmem>>, vector<1x128x128xf32>
    %32 = vector.shape_cast %31 : vector<1x128x128xf32> to vector<128x128xf32>
    %33 = arith.addf %30, %32 : vector<128x128xf32>
    %cst_32 = arith.constant dense<0xFF800000> : vector<128xf32>
    %34 = vector.multi_reduction <maximumf>, %33, %cst_32 [1] : vector<128x128xf32> to vector<128xf32>
    %35 = vector.shape_cast %34 : vector<128xf32> to vector<128x1xf32>
    %36 = vector.broadcast %35 : vector<128x1xf32> to vector<128x128xf32>
    %37 = arith.subf %33, %36 : vector<128x128xf32>
    %38 = math.exp %37 : vector<128x128xf32>
    %cst_33 = arith.constant dense<0.000000e+00> : vector<128xf32>
    %39 = vector.multi_reduction <add>, %38, %cst_33 [1] : vector<128x128xf32> to vector<128xf32>
    %40 = vector.shape_cast %39 : vector<128xf32> to vector<128x1xf32>
    %41 = tpu.reciprocal %40 {approx = true} : vector<128x1xf32> -> vector<128x1xf32>
    %42 = arith.mulf %40, %41 : vector<128x1xf32>
    %cst_34 = arith.constant 2.000000e+00 : f32
    %43 = vector.broadcast %cst_34 : f32 to vector<128x1xf32>
    %44 = arith.subf %43, %42 : vector<128x1xf32>
    %45 = arith.mulf %41, %44 : vector<128x1xf32>
    %46 = vector.broadcast %45 : vector<128x1xf32> to vector<128x128xf32>
    %47 = arith.mulf %38, %46 : vector<128x128xf32>
    %cst_35 = arith.constant dense<0.000000e+00> : vector<128x128xf32>
    %48 = tpu.matmul %47, %29, %cst_35 {dimension_numbers = #tpu.dot_dimension_numbers<[1], [0], [0], [1], [0, 0, 1, 1], [], []>} : vector<128x128xf32>, vector<128x128xf32>, vector<128x128xf32> -> vector<128x128xf32>
    %c1 = arith.constant 1 : index
    %c0_36 = arith.constant 0 : index
    %c0_37 = arith.constant 0 : index
    %49 = vector.load %arg4[%c1, %c0_36, %c0_37] : memref<4x128x32xf32, #tpu.memory_space<vmem>>, vector<1x128x32xf32>
    %50 = vector.shape_cast %49 : vector<1x128x32xf32> to vector<128x32xf32>
    %cst_38 = arith.constant dense<0.000000e+00> : vector<128x32xf32>
    %51 = tpu.matmul %8, %50, %cst_38 {dimension_numbers = #tpu.dot_dimension_numbers<[1], [0], [0], [1], [0, 0, 1, 1], [], []>} : vector<128x128xf32>, vector<128x32xf32>, vector<128x32xf32> -> vector<128x32xf32>
    %c1_39 = arith.constant 1 : index
    %c0_40 = arith.constant 0 : index
    %c0_41 = arith.constant 0 : index
    %52 = vector.load %arg5[%c1_39, %c0_40, %c0_41] : memref<4x1x32xf32, #tpu.memory_space<vmem>>, vector<1x1x32xf32>
    %53 = vector.shape_cast %52 : vector<1x1x32xf32> to vector<1x32xf32>
    %54 = vector.broadcast %53 : vector<1x32xf32> to vector<128x32xf32>
    %55 = arith.addf %51, %54 : vector<128x32xf32>
    %c1_42 = arith.constant 1 : index
    %c0_43 = arith.constant 0 : index
    %c0_44 = arith.constant 0 : index
    %56 = vector.load %arg6[%c1_42, %c0_43, %c0_44] : memref<4x128x32xf32, #tpu.memory_space<vmem>>, vector<1x128x32xf32>
    %57 = vector.shape_cast %56 : vector<1x128x32xf32> to vector<128x32xf32>
    %cst_45 = arith.constant dense<0.000000e+00> : vector<128x32xf32>
    %58 = tpu.matmul %8, %57, %cst_45 {dimension_numbers = #tpu.dot_dimension_numbers<[1], [0], [0], [1], [0, 0, 1, 1], [], []>} : vector<128x128xf32>, vector<128x32xf32>, vector<128x32xf32> -> vector<128x32xf32>
    %c1_46 = arith.constant 1 : index
    %c0_47 = arith.constant 0 : index
    %c0_48 = arith.constant 0 : index
    %59 = vector.load %arg7[%c1_46, %c0_47, %c0_48] : memref<4x1x32xf32, #tpu.memory_space<vmem>>, vector<1x1x32xf32>
    %60 = vector.shape_cast %59 : vector<1x1x32xf32> to vector<1x32xf32>
    %61 = vector.broadcast %60 : vector<1x32xf32> to vector<128x32xf32>
    %62 = arith.addf %58, %61 : vector<128x32xf32>
    %c1_49 = arith.constant 1 : index
    %c0_50 = arith.constant 0 : index
    %c0_51 = arith.constant 0 : index
    %63 = vector.load %arg8[%c1_49, %c0_50, %c0_51] : memref<4x128x128xf32, #tpu.memory_space<vmem>>, vector<1x128x128xf32>
    %64 = vector.shape_cast %63 : vector<1x128x128xf32> to vector<128x128xf32>
    %cst_52 = arith.constant dense<0.000000e+00> : vector<128x128xf32>
    %65 = tpu.matmul %8, %64, %cst_52 {dimension_numbers = #tpu.dot_dimension_numbers<[1], [0], [0], [1], [0, 0, 1, 1], [], []>} : vector<128x128xf32>, vector<128x128xf32>, vector<128x128xf32> -> vector<128x128xf32>
    %c1_53 = arith.constant 1 : index
    %c0_54 = arith.constant 0 : index
    %c0_55 = arith.constant 0 : index
    %66 = vector.load %arg9[%c1_53, %c0_54, %c0_55] : memref<4x1x128xf32, #tpu.memory_space<vmem>>, vector<1x1x128xf32>
    %67 = vector.shape_cast %66 : vector<1x1x128xf32> to vector<1x128xf32>
    %68 = vector.broadcast %67 : vector<1x128xf32> to vector<128x128xf32>
    %69 = arith.addf %65, %68 : vector<128x128xf32>
    %cst_56 = arith.constant dense<0.000000e+00> : vector<128x128xf32>
    %70 = tpu.matmul %55, %62, %cst_56 {dimension_numbers = #tpu.dot_dimension_numbers<[1], [1], [0], [0], [0, 0, 1, 0], [], []>} : vector<128x32xf32>, vector<128x32xf32>, vector<128x128xf32> -> vector<128x128xf32>
    %c1_57 = arith.constant 1 : index
    %c0_58 = arith.constant 0 : index
    %c0_59 = arith.constant 0 : index
    %71 = vector.load %arg10[%c1_57, %c0_58, %c0_59] : memref<4x128x128xf32, #tpu.memory_space<vmem>>, vector<1x128x128xf32>
    %72 = vector.shape_cast %71 : vector<1x128x128xf32> to vector<128x128xf32>
    %73 = arith.addf %70, %72 : vector<128x128xf32>
    %cst_60 = arith.constant dense<0xFF800000> : vector<128xf32>
    %74 = vector.multi_reduction <maximumf>, %73, %cst_60 [1] : vector<128x128xf32> to vector<128xf32>
    %75 = vector.shape_cast %74 : vector<128xf32> to vector<128x1xf32>
    %76 = vector.broadcast %75 : vector<128x1xf32> to vector<128x128xf32>
    %77 = arith.subf %73, %76 : vector<128x128xf32>
    %78 = math.exp %77 : vector<128x128xf32>
    %cst_61 = arith.constant dense<0.000000e+00> : vector<128xf32>
    %79 = vector.multi_reduction <add>, %78, %cst_61 [1] : vector<128x128xf32> to vector<128xf32>
    %80 = vector.shape_cast %79 : vector<128xf32> to vector<128x1xf32>
    %81 = tpu.reciprocal %80 {approx = true} : vector<128x1xf32> -> vector<128x1xf32>
    %82 = arith.mulf %80, %81 : vector<128x1xf32>
    %cst_62 = arith.constant 2.000000e+00 : f32
    %83 = vector.broadcast %cst_62 : f32 to vector<128x1xf32>
    %84 = arith.subf %83, %82 : vector<128x1xf32>
    %85 = arith.mulf %81, %84 : vector<128x1xf32>
    %86 = vector.broadcast %85 : vector<128x1xf32> to vector<128x128xf32>
    %87 = arith.mulf %78, %86 : vector<128x128xf32>
    %cst_63 = arith.constant dense<0.000000e+00> : vector<128x128xf32>
    %88 = tpu.matmul %87, %69, %cst_63 {dimension_numbers = #tpu.dot_dimension_numbers<[1], [0], [0], [1], [0, 0, 1, 1], [], []>} : vector<128x128xf32>, vector<128x128xf32>, vector<128x128xf32> -> vector<128x128xf32>
    %89 = arith.addf %48, %88 : vector<128x128xf32>
    %c2 = arith.constant 2 : index
    %c0_64 = arith.constant 0 : index
    %c0_65 = arith.constant 0 : index
    %90 = vector.load %arg4[%c2, %c0_64, %c0_65] : memref<4x128x32xf32, #tpu.memory_space<vmem>>, vector<1x128x32xf32>
    %91 = vector.shape_cast %90 : vector<1x128x32xf32> to vector<128x32xf32>
    %cst_66 = arith.constant dense<0.000000e+00> : vector<128x32xf32>
    %92 = tpu.matmul %8, %91, %cst_66 {dimension_numbers = #tpu.dot_dimension_numbers<[1], [0], [0], [1], [0, 0, 1, 1], [], []>} : vector<128x128xf32>, vector<128x32xf32>, vector<128x32xf32> -> vector<128x32xf32>
    %c2_67 = arith.constant 2 : index
    %c0_68 = arith.constant 0 : index
    %c0_69 = arith.constant 0 : index
    %93 = vector.load %arg5[%c2_67, %c0_68, %c0_69] : memref<4x1x32xf32, #tpu.memory_space<vmem>>, vector<1x1x32xf32>
    %94 = vector.shape_cast %93 : vector<1x1x32xf32> to vector<1x32xf32>
    %95 = vector.broadcast %94 : vector<1x32xf32> to vector<128x32xf32>
    %96 = arith.addf %92, %95 : vector<128x32xf32>
    %c2_70 = arith.constant 2 : index
    %c0_71 = arith.constant 0 : index
    %c0_72 = arith.constant 0 : index
    %97 = vector.load %arg6[%c2_70, %c0_71, %c0_72] : memref<4x128x32xf32, #tpu.memory_space<vmem>>, vector<1x128x32xf32>
    %98 = vector.shape_cast %97 : vector<1x128x32xf32> to vector<128x32xf32>
    %cst_73 = arith.constant dense<0.000000e+00> : vector<128x32xf32>
    %99 = tpu.matmul %8, %98, %cst_73 {dimension_numbers = #tpu.dot_dimension_numbers<[1], [0], [0], [1], [0, 0, 1, 1], [], []>} : vector<128x128xf32>, vector<128x32xf32>, vector<128x32xf32> -> vector<128x32xf32>
    %c2_74 = arith.constant 2 : index
    %c0_75 = arith.constant 0 : index
    %c0_76 = arith.constant 0 : index
    %100 = vector.load %arg7[%c2_74, %c0_75, %c0_76] : memref<4x1x32xf32, #tpu.memory_space<vmem>>, vector<1x1x32xf32>
    %101 = vector.shape_cast %100 : vector<1x1x32xf32> to vector<1x32xf32>
    %102 = vector.broadcast %101 : vector<1x32xf32> to vector<128x32xf32>
    %103 = arith.addf %99, %102 : vector<128x32xf32>
    %c2_77 = arith.constant 2 : index
    %c0_78 = arith.constant 0 : index
    %c0_79 = arith.constant 0 : index
    %104 = vector.load %arg8[%c2_77, %c0_78, %c0_79] : memref<4x128x128xf32, #tpu.memory_space<vmem>>, vector<1x128x128xf32>
    %105 = vector.shape_cast %104 : vector<1x128x128xf32> to vector<128x128xf32>
    %cst_80 = arith.constant dense<0.000000e+00> : vector<128x128xf32>
    %106 = tpu.matmul %8, %105, %cst_80 {dimension_numbers = #tpu.dot_dimension_numbers<[1], [0], [0], [1], [0, 0, 1, 1], [], []>} : vector<128x128xf32>, vector<128x128xf32>, vector<128x128xf32> -> vector<128x128xf32>
    %c2_81 = arith.constant 2 : index
    %c0_82 = arith.constant 0 : index
    %c0_83 = arith.constant 0 : index
    %107 = vector.load %arg9[%c2_81, %c0_82, %c0_83] : memref<4x1x128xf32, #tpu.memory_space<vmem>>, vector<1x1x128xf32>
    %108 = vector.shape_cast %107 : vector<1x1x128xf32> to vector<1x128xf32>
    %109 = vector.broadcast %108 : vector<1x128xf32> to vector<128x128xf32>
    %110 = arith.addf %106, %109 : vector<128x128xf32>
    %cst_84 = arith.constant dense<0.000000e+00> : vector<128x128xf32>
    %111 = tpu.matmul %96, %103, %cst_84 {dimension_numbers = #tpu.dot_dimension_numbers<[1], [1], [0], [0], [0, 0, 1, 0], [], []>} : vector<128x32xf32>, vector<128x32xf32>, vector<128x128xf32> -> vector<128x128xf32>
    %c2_85 = arith.constant 2 : index
    %c0_86 = arith.constant 0 : index
    %c0_87 = arith.constant 0 : index
    %112 = vector.load %arg10[%c2_85, %c0_86, %c0_87] : memref<4x128x128xf32, #tpu.memory_space<vmem>>, vector<1x128x128xf32>
    %113 = vector.shape_cast %112 : vector<1x128x128xf32> to vector<128x128xf32>
    %114 = arith.addf %111, %113 : vector<128x128xf32>
    %cst_88 = arith.constant dense<0xFF800000> : vector<128xf32>
    %115 = vector.multi_reduction <maximumf>, %114, %cst_88 [1] : vector<128x128xf32> to vector<128xf32>
    %116 = vector.shape_cast %115 : vector<128xf32> to vector<128x1xf32>
    %117 = vector.broadcast %116 : vector<128x1xf32> to vector<128x128xf32>
    %118 = arith.subf %114, %117 : vector<128x128xf32>
    %119 = math.exp %118 : vector<128x128xf32>
    %cst_89 = arith.constant dense<0.000000e+00> : vector<128xf32>
    %120 = vector.multi_reduction <add>, %119, %cst_89 [1] : vector<128x128xf32> to vector<128xf32>
    %121 = vector.shape_cast %120 : vector<128xf32> to vector<128x1xf32>
    %122 = tpu.reciprocal %121 {approx = true} : vector<128x1xf32> -> vector<128x1xf32>
    %123 = arith.mulf %121, %122 : vector<128x1xf32>
    %cst_90 = arith.constant 2.000000e+00 : f32
    %124 = vector.broadcast %cst_90 : f32 to vector<128x1xf32>
    %125 = arith.subf %124, %123 : vector<128x1xf32>
    %126 = arith.mulf %122, %125 : vector<128x1xf32>
    %127 = vector.broadcast %126 : vector<128x1xf32> to vector<128x128xf32>
    %128 = arith.mulf %119, %127 : vector<128x128xf32>
    %cst_91 = arith.constant dense<0.000000e+00> : vector<128x128xf32>
    %129 = tpu.matmul %128, %110, %cst_91 {dimension_numbers = #tpu.dot_dimension_numbers<[1], [0], [0], [1], [0, 0, 1, 1], [], []>} : vector<128x128xf32>, vector<128x128xf32>, vector<128x128xf32> -> vector<128x128xf32>
    %130 = arith.addf %89, %129 : vector<128x128xf32>
    %c3 = arith.constant 3 : index
    %c0_92 = arith.constant 0 : index
    %c0_93 = arith.constant 0 : index
    %131 = vector.load %arg4[%c3, %c0_92, %c0_93] : memref<4x128x32xf32, #tpu.memory_space<vmem>>, vector<1x128x32xf32>
    %132 = vector.shape_cast %131 : vector<1x128x32xf32> to vector<128x32xf32>
    %cst_94 = arith.constant dense<0.000000e+00> : vector<128x32xf32>
    %133 = tpu.matmul %8, %132, %cst_94 {dimension_numbers = #tpu.dot_dimension_numbers<[1], [0], [0], [1], [0, 0, 1, 1], [], []>} : vector<128x128xf32>, vector<128x32xf32>, vector<128x32xf32> -> vector<128x32xf32>
    %c3_95 = arith.constant 3 : index
    %c0_96 = arith.constant 0 : index
    %c0_97 = arith.constant 0 : index
    %134 = vector.load %arg5[%c3_95, %c0_96, %c0_97] : memref<4x1x32xf32, #tpu.memory_space<vmem>>, vector<1x1x32xf32>
    %135 = vector.shape_cast %134 : vector<1x1x32xf32> to vector<1x32xf32>
    %136 = vector.broadcast %135 : vector<1x32xf32> to vector<128x32xf32>
    %137 = arith.addf %133, %136 : vector<128x32xf32>
    %c3_98 = arith.constant 3 : index
    %c0_99 = arith.constant 0 : index
    %c0_100 = arith.constant 0 : index
    %138 = vector.load %arg6[%c3_98, %c0_99, %c0_100] : memref<4x128x32xf32, #tpu.memory_space<vmem>>, vector<1x128x32xf32>
    %139 = vector.shape_cast %138 : vector<1x128x32xf32> to vector<128x32xf32>
    %cst_101 = arith.constant dense<0.000000e+00> : vector<128x32xf32>
    %140 = tpu.matmul %8, %139, %cst_101 {dimension_numbers = #tpu.dot_dimension_numbers<[1], [0], [0], [1], [0, 0, 1, 1], [], []>} : vector<128x128xf32>, vector<128x32xf32>, vector<128x32xf32> -> vector<128x32xf32>
    %c3_102 = arith.constant 3 : index
    %c0_103 = arith.constant 0 : index
    %c0_104 = arith.constant 0 : index
    %141 = vector.load %arg7[%c3_102, %c0_103, %c0_104] : memref<4x1x32xf32, #tpu.memory_space<vmem>>, vector<1x1x32xf32>
    %142 = vector.shape_cast %141 : vector<1x1x32xf32> to vector<1x32xf32>
    %143 = vector.broadcast %142 : vector<1x32xf32> to vector<128x32xf32>
    %144 = arith.addf %140, %143 : vector<128x32xf32>
    %c3_105 = arith.constant 3 : index
    %c0_106 = arith.constant 0 : index
    %c0_107 = arith.constant 0 : index
    %145 = vector.load %arg8[%c3_105, %c0_106, %c0_107] : memref<4x128x128xf32, #tpu.memory_space<vmem>>, vector<1x128x128xf32>
    %146 = vector.shape_cast %145 : vector<1x128x128xf32> to vector<128x128xf32>
    %cst_108 = arith.constant dense<0.000000e+00> : vector<128x128xf32>
    %147 = tpu.matmul %8, %146, %cst_108 {dimension_numbers = #tpu.dot_dimension_numbers<[1], [0], [0], [1], [0, 0, 1, 1], [], []>} : vector<128x128xf32>, vector<128x128xf32>, vector<128x128xf32> -> vector<128x128xf32>
    %c3_109 = arith.constant 3 : index
    %c0_110 = arith.constant 0 : index
    %c0_111 = arith.constant 0 : index
    %148 = vector.load %arg9[%c3_109, %c0_110, %c0_111] : memref<4x1x128xf32, #tpu.memory_space<vmem>>, vector<1x1x128xf32>
    %149 = vector.shape_cast %148 : vector<1x1x128xf32> to vector<1x128xf32>
    %150 = vector.broadcast %149 : vector<1x128xf32> to vector<128x128xf32>
    %151 = arith.addf %147, %150 : vector<128x128xf32>
    %cst_112 = arith.constant dense<0.000000e+00> : vector<128x128xf32>
    %152 = tpu.matmul %137, %144, %cst_112 {dimension_numbers = #tpu.dot_dimension_numbers<[1], [1], [0], [0], [0, 0, 1, 0], [], []>} : vector<128x32xf32>, vector<128x32xf32>, vector<128x128xf32> -> vector<128x128xf32>
    %c3_113 = arith.constant 3 : index
    %c0_114 = arith.constant 0 : index
    %c0_115 = arith.constant 0 : index
    %153 = vector.load %arg10[%c3_113, %c0_114, %c0_115] : memref<4x128x128xf32, #tpu.memory_space<vmem>>, vector<1x128x128xf32>
    %154 = vector.shape_cast %153 : vector<1x128x128xf32> to vector<128x128xf32>
    %155 = arith.addf %152, %154 : vector<128x128xf32>
    %cst_116 = arith.constant dense<0xFF800000> : vector<128xf32>
    %156 = vector.multi_reduction <maximumf>, %155, %cst_116 [1] : vector<128x128xf32> to vector<128xf32>
    %157 = vector.shape_cast %156 : vector<128xf32> to vector<128x1xf32>
    %158 = vector.broadcast %157 : vector<128x1xf32> to vector<128x128xf32>
    %159 = arith.subf %155, %158 : vector<128x128xf32>
    %160 = math.exp %159 : vector<128x128xf32>
    %cst_117 = arith.constant dense<0.000000e+00> : vector<128xf32>
    %161 = vector.multi_reduction <add>, %160, %cst_117 [1] : vector<128x128xf32> to vector<128xf32>
    %162 = vector.shape_cast %161 : vector<128xf32> to vector<128x1xf32>
    %163 = tpu.reciprocal %162 {approx = true} : vector<128x1xf32> -> vector<128x1xf32>
    %164 = arith.mulf %162, %163 : vector<128x1xf32>
    %cst_118 = arith.constant 2.000000e+00 : f32
    %165 = vector.broadcast %cst_118 : f32 to vector<128x1xf32>
    %166 = arith.subf %165, %164 : vector<128x1xf32>
    %167 = arith.mulf %163, %166 : vector<128x1xf32>
    %168 = vector.broadcast %167 : vector<128x1xf32> to vector<128x128xf32>
    %169 = arith.mulf %160, %168 : vector<128x128xf32>
    %cst_119 = arith.constant dense<0.000000e+00> : vector<128x128xf32>
    %170 = tpu.matmul %169, %151, %cst_119 {dimension_numbers = #tpu.dot_dimension_numbers<[1], [0], [0], [1], [0, 0, 1, 1], [], []>} : vector<128x128xf32>, vector<128x128xf32>, vector<128x128xf32> -> vector<128x128xf32>
    %171 = arith.addf %130, %170 : vector<128x128xf32>
    %c0_120 = arith.constant 0 : index
    %c0_121 = arith.constant 0 : index
    %172 = vector.load %arg11[%c0_120, %c0_121] : memref<1x128xf32, #tpu.memory_space<vmem>>, vector<1x128xf32>
    %173 = vector.broadcast %172 : vector<1x128xf32> to vector<128x128xf32>
    %174 = arith.addf %171, %173 : vector<128x128xf32>
    %c0_122 = arith.constant 0 : index
    %c0_123 = arith.constant 0 : index
    %c0_124 = arith.constant 0 : index
    %175 = vector.load %arg4[%c0_122, %c0_123, %c0_124] : memref<4x128x32xf32, #tpu.memory_space<vmem>>, vector<1x128x32xf32>
    %176 = vector.shape_cast %175 : vector<1x128x32xf32> to vector<128x32xf32>
    %cst_125 = arith.constant dense<0.000000e+00> : vector<128x32xf32>
    %177 = tpu.matmul %174, %176, %cst_125 {dimension_numbers = #tpu.dot_dimension_numbers<[1], [0], [0], [1], [0, 0, 1, 1], [], []>} : vector<128x128xf32>, vector<128x32xf32>, vector<128x32xf32> -> vector<128x32xf32>
    %c0_126 = arith.constant 0 : index
    %c0_127 = arith.constant 0 : index
    %c0_128 = arith.constant 0 : index
    %178 = vector.load %arg5[%c0_126, %c0_127, %c0_128] : memref<4x1x32xf32, #tpu.memory_space<vmem>>, vector<1x1x32xf32>
    %179 = vector.shape_cast %178 : vector<1x1x32xf32> to vector<1x32xf32>
    %180 = vector.broadcast %179 : vector<1x32xf32> to vector<128x32xf32>
    %181 = arith.addf %177, %180 : vector<128x32xf32>
    %c0_129 = arith.constant 0 : index
    %c0_130 = arith.constant 0 : index
    %c0_131 = arith.constant 0 : index
    %182 = vector.load %arg6[%c0_129, %c0_130, %c0_131] : memref<4x128x32xf32, #tpu.memory_space<vmem>>, vector<1x128x32xf32>
    %183 = vector.shape_cast %182 : vector<1x128x32xf32> to vector<128x32xf32>
    %cst_132 = arith.constant dense<0.000000e+00> : vector<128x32xf32>
    %184 = tpu.matmul %174, %183, %cst_132 {dimension_numbers = #tpu.dot_dimension_numbers<[1], [0], [0], [1], [0, 0, 1, 1], [], []>} : vector<128x128xf32>, vector<128x32xf32>, vector<128x32xf32> -> vector<128x32xf32>
    %c0_133 = arith.constant 0 : index
    %c0_134 = arith.constant 0 : index
    %c0_135 = arith.constant 0 : index
    %185 = vector.load %arg7[%c0_133, %c0_134, %c0_135] : memref<4x1x32xf32, #tpu.memory_space<vmem>>, vector<1x1x32xf32>
    %186 = vector.shape_cast %185 : vector<1x1x32xf32> to vector<1x32xf32>
    %187 = vector.broadcast %186 : vector<1x32xf32> to vector<128x32xf32>
    %188 = arith.addf %184, %187 : vector<128x32xf32>
    %c0_136 = arith.constant 0 : index
    %c0_137 = arith.constant 0 : index
    %c0_138 = arith.constant 0 : index
    %189 = vector.load %arg8[%c0_136, %c0_137, %c0_138] : memref<4x128x128xf32, #tpu.memory_space<vmem>>, vector<1x128x128xf32>
    %190 = vector.shape_cast %189 : vector<1x128x128xf32> to vector<128x128xf32>
    %cst_139 = arith.constant dense<0.000000e+00> : vector<128x128xf32>
    %191 = tpu.matmul %174, %190, %cst_139 {dimension_numbers = #tpu.dot_dimension_numbers<[1], [0], [0], [1], [0, 0, 1, 1], [], []>} : vector<128x128xf32>, vector<128x128xf32>, vector<128x128xf32> -> vector<128x128xf32>
    %c0_140 = arith.constant 0 : index
    %c0_141 = arith.constant 0 : index
    %c0_142 = arith.constant 0 : index
    %192 = vector.load %arg9[%c0_140, %c0_141, %c0_142] : memref<4x1x128xf32, #tpu.memory_space<vmem>>, vector<1x1x128xf32>
    %193 = vector.shape_cast %192 : vector<1x1x128xf32> to vector<1x128xf32>
    %194 = vector.broadcast %193 : vector<1x128xf32> to vector<128x128xf32>
    %195 = arith.addf %191, %194 : vector<128x128xf32>
    %cst_143 = arith.constant dense<0.000000e+00> : vector<128x128xf32>
    %196 = tpu.matmul %181, %188, %cst_143 {dimension_numbers = #tpu.dot_dimension_numbers<[1], [1], [0], [0], [0, 0, 1, 0], [], []>} : vector<128x32xf32>, vector<128x32xf32>, vector<128x128xf32> -> vector<128x128xf32>
    %c0_144 = arith.constant 0 : index
    %c0_145 = arith.constant 0 : index
    %c0_146 = arith.constant 0 : index
    %197 = vector.load %arg10[%c0_144, %c0_145, %c0_146] : memref<4x128x128xf32, #tpu.memory_space<vmem>>, vector<1x128x128xf32>
    %198 = vector.shape_cast %197 : vector<1x128x128xf32> to vector<128x128xf32>
    %199 = arith.addf %196, %198 : vector<128x128xf32>
    %cst_147 = arith.constant dense<0xFF800000> : vector<128xf32>
    %200 = vector.multi_reduction <maximumf>, %199, %cst_147 [1] : vector<128x128xf32> to vector<128xf32>
    %201 = vector.shape_cast %200 : vector<128xf32> to vector<128x1xf32>
    %202 = vector.broadcast %201 : vector<128x1xf32> to vector<128x128xf32>
    %203 = arith.subf %199, %202 : vector<128x128xf32>
    %204 = math.exp %203 : vector<128x128xf32>
    %cst_148 = arith.constant dense<0.000000e+00> : vector<128xf32>
    %205 = vector.multi_reduction <add>, %204, %cst_148 [1] : vector<128x128xf32> to vector<128xf32>
    %206 = vector.shape_cast %205 : vector<128xf32> to vector<128x1xf32>
    %207 = tpu.reciprocal %206 {approx = true} : vector<128x1xf32> -> vector<128x1xf32>
    %208 = arith.mulf %206, %207 : vector<128x1xf32>
    %cst_149 = arith.constant 2.000000e+00 : f32
    %209 = vector.broadcast %cst_149 : f32 to vector<128x1xf32>
    %210 = arith.subf %209, %208 : vector<128x1xf32>
    %211 = arith.mulf %207, %210 : vector<128x1xf32>
    %212 = vector.broadcast %211 : vector<128x1xf32> to vector<128x128xf32>
    %213 = arith.mulf %204, %212 : vector<128x128xf32>
    %cst_150 = arith.constant dense<0.000000e+00> : vector<128x128xf32>
    %214 = tpu.matmul %213, %195, %cst_150 {dimension_numbers = #tpu.dot_dimension_numbers<[1], [0], [0], [1], [0, 0, 1, 1], [], []>} : vector<128x128xf32>, vector<128x128xf32>, vector<128x128xf32> -> vector<128x128xf32>
    %c1_151 = arith.constant 1 : index
    %c0_152 = arith.constant 0 : index
    %c0_153 = arith.constant 0 : index
    %215 = vector.load %arg4[%c1_151, %c0_152, %c0_153] : memref<4x128x32xf32, #tpu.memory_space<vmem>>, vector<1x128x32xf32>
    %216 = vector.shape_cast %215 : vector<1x128x32xf32> to vector<128x32xf32>
    %cst_154 = arith.constant dense<0.000000e+00> : vector<128x32xf32>
    %217 = tpu.matmul %174, %216, %cst_154 {dimension_numbers = #tpu.dot_dimension_numbers<[1], [0], [0], [1], [0, 0, 1, 1], [], []>} : vector<128x128xf32>, vector<128x32xf32>, vector<128x32xf32> -> vector<128x32xf32>
    %c1_155 = arith.constant 1 : index
    %c0_156 = arith.constant 0 : index
    %c0_157 = arith.constant 0 : index
    %218 = vector.load %arg5[%c1_155, %c0_156, %c0_157] : memref<4x1x32xf32, #tpu.memory_space<vmem>>, vector<1x1x32xf32>
    %219 = vector.shape_cast %218 : vector<1x1x32xf32> to vector<1x32xf32>
    %220 = vector.broadcast %219 : vector<1x32xf32> to vector<128x32xf32>
    %221 = arith.addf %217, %220 : vector<128x32xf32>
    %c1_158 = arith.constant 1 : index
    %c0_159 = arith.constant 0 : index
    %c0_160 = arith.constant 0 : index
    %222 = vector.load %arg6[%c1_158, %c0_159, %c0_160] : memref<4x128x32xf32, #tpu.memory_space<vmem>>, vector<1x128x32xf32>
    %223 = vector.shape_cast %222 : vector<1x128x32xf32> to vector<128x32xf32>
    %cst_161 = arith.constant dense<0.000000e+00> : vector<128x32xf32>
    %224 = tpu.matmul %174, %223, %cst_161 {dimension_numbers = #tpu.dot_dimension_numbers<[1], [0], [0], [1], [0, 0, 1, 1], [], []>} : vector<128x128xf32>, vector<128x32xf32>, vector<128x32xf32> -> vector<128x32xf32>
    %c1_162 = arith.constant 1 : index
    %c0_163 = arith.constant 0 : index
    %c0_164 = arith.constant 0 : index
    %225 = vector.load %arg7[%c1_162, %c0_163, %c0_164] : memref<4x1x32xf32, #tpu.memory_space<vmem>>, vector<1x1x32xf32>
    %226 = vector.shape_cast %225 : vector<1x1x32xf32> to vector<1x32xf32>
    %227 = vector.broadcast %226 : vector<1x32xf32> to vector<128x32xf32>
    %228 = arith.addf %224, %227 : vector<128x32xf32>
    %c1_165 = arith.constant 1 : index
    %c0_166 = arith.constant 0 : index
    %c0_167 = arith.constant 0 : index
    %229 = vector.load %arg8[%c1_165, %c0_166, %c0_167] : memref<4x128x128xf32, #tpu.memory_space<vmem>>, vector<1x128x128xf32>
    %230 = vector.shape_cast %229 : vector<1x128x128xf32> to vector<128x128xf32>
    %cst_168 = arith.constant dense<0.000000e+00> : vector<128x128xf32>
    %231 = tpu.matmul %174, %230, %cst_168 {dimension_numbers = #tpu.dot_dimension_numbers<[1], [0], [0], [1], [0, 0, 1, 1], [], []>} : vector<128x128xf32>, vector<128x128xf32>, vector<128x128xf32> -> vector<128x128xf32>
    %c1_169 = arith.constant 1 : index
    %c0_170 = arith.constant 0 : index
    %c0_171 = arith.constant 0 : index
    %232 = vector.load %arg9[%c1_169, %c0_170, %c0_171] : memref<4x1x128xf32, #tpu.memory_space<vmem>>, vector<1x1x128xf32>
    %233 = vector.shape_cast %232 : vector<1x1x128xf32> to vector<1x128xf32>
    %234 = vector.broadcast %233 : vector<1x128xf32> to vector<128x128xf32>
    %235 = arith.addf %231, %234 : vector<128x128xf32>
    %cst_172 = arith.constant dense<0.000000e+00> : vector<128x128xf32>
    %236 = tpu.matmul %221, %228, %cst_172 {dimension_numbers = #tpu.dot_dimension_numbers<[1], [1], [0], [0], [0, 0, 1, 0], [], []>} : vector<128x32xf32>, vector<128x32xf32>, vector<128x128xf32> -> vector<128x128xf32>
    %c1_173 = arith.constant 1 : index
    %c0_174 = arith.constant 0 : index
    %c0_175 = arith.constant 0 : index
    %237 = vector.load %arg10[%c1_173, %c0_174, %c0_175] : memref<4x128x128xf32, #tpu.memory_space<vmem>>, vector<1x128x128xf32>
    %238 = vector.shape_cast %237 : vector<1x128x128xf32> to vector<128x128xf32>
    %239 = arith.addf %236, %238 : vector<128x128xf32>
    %cst_176 = arith.constant dense<0xFF800000> : vector<128xf32>
    %240 = vector.multi_reduction <maximumf>, %239, %cst_176 [1] : vector<128x128xf32> to vector<128xf32>
    %241 = vector.shape_cast %240 : vector<128xf32> to vector<128x1xf32>
    %242 = vector.broadcast %241 : vector<128x1xf32> to vector<128x128xf32>
    %243 = arith.subf %239, %242 : vector<128x128xf32>
    %244 = math.exp %243 : vector<128x128xf32>
    %cst_177 = arith.constant dense<0.000000e+00> : vector<128xf32>
    %245 = vector.multi_reduction <add>, %244, %cst_177 [1] : vector<128x128xf32> to vector<128xf32>
    %246 = vector.shape_cast %245 : vector<128xf32> to vector<128x1xf32>
    %247 = tpu.reciprocal %246 {approx = true} : vector<128x1xf32> -> vector<128x1xf32>
    %248 = arith.mulf %246, %247 : vector<128x1xf32>
    %cst_178 = arith.constant 2.000000e+00 : f32
    %249 = vector.broadcast %cst_178 : f32 to vector<128x1xf32>
    %250 = arith.subf %249, %248 : vector<128x1xf32>
    %251 = arith.mulf %247, %250 : vector<128x1xf32>
    %252 = vector.broadcast %251 : vector<128x1xf32> to vector<128x128xf32>
    %253 = arith.mulf %244, %252 : vector<128x128xf32>
    %cst_179 = arith.constant dense<0.000000e+00> : vector<128x128xf32>
    %254 = tpu.matmul %253, %235, %cst_179 {dimension_numbers = #tpu.dot_dimension_numbers<[1], [0], [0], [1], [0, 0, 1, 1], [], []>} : vector<128x128xf32>, vector<128x128xf32>, vector<128x128xf32> -> vector<128x128xf32>
    %255 = arith.addf %214, %254 : vector<128x128xf32>
    %c2_180 = arith.constant 2 : index
    %c0_181 = arith.constant 0 : index
    %c0_182 = arith.constant 0 : index
    %256 = vector.load %arg4[%c2_180, %c0_181, %c0_182] : memref<4x128x32xf32, #tpu.memory_space<vmem>>, vector<1x128x32xf32>
    %257 = vector.shape_cast %256 : vector<1x128x32xf32> to vector<128x32xf32>
    %cst_183 = arith.constant dense<0.000000e+00> : vector<128x32xf32>
    %258 = tpu.matmul %174, %257, %cst_183 {dimension_numbers = #tpu.dot_dimension_numbers<[1], [0], [0], [1], [0, 0, 1, 1], [], []>} : vector<128x128xf32>, vector<128x32xf32>, vector<128x32xf32> -> vector<128x32xf32>
    %c2_184 = arith.constant 2 : index
    %c0_185 = arith.constant 0 : index
    %c0_186 = arith.constant 0 : index
    %259 = vector.load %arg5[%c2_184, %c0_185, %c0_186] : memref<4x1x32xf32, #tpu.memory_space<vmem>>, vector<1x1x32xf32>
    %260 = vector.shape_cast %259 : vector<1x1x32xf32> to vector<1x32xf32>
    %261 = vector.broadcast %260 : vector<1x32xf32> to vector<128x32xf32>
    %262 = arith.addf %258, %261 : vector<128x32xf32>
    %c2_187 = arith.constant 2 : index
    %c0_188 = arith.constant 0 : index
    %c0_189 = arith.constant 0 : index
    %263 = vector.load %arg6[%c2_187, %c0_188, %c0_189] : memref<4x128x32xf32, #tpu.memory_space<vmem>>, vector<1x128x32xf32>
    %264 = vector.shape_cast %263 : vector<1x128x32xf32> to vector<128x32xf32>
    %cst_190 = arith.constant dense<0.000000e+00> : vector<128x32xf32>
    %265 = tpu.matmul %174, %264, %cst_190 {dimension_numbers = #tpu.dot_dimension_numbers<[1], [0], [0], [1], [0, 0, 1, 1], [], []>} : vector<128x128xf32>, vector<128x32xf32>, vector<128x32xf32> -> vector<128x32xf32>
    %c2_191 = arith.constant 2 : index
    %c0_192 = arith.constant 0 : index
    %c0_193 = arith.constant 0 : index
    %266 = vector.load %arg7[%c2_191, %c0_192, %c0_193] : memref<4x1x32xf32, #tpu.memory_space<vmem>>, vector<1x1x32xf32>
    %267 = vector.shape_cast %266 : vector<1x1x32xf32> to vector<1x32xf32>
    %268 = vector.broadcast %267 : vector<1x32xf32> to vector<128x32xf32>
    %269 = arith.addf %265, %268 : vector<128x32xf32>
    %c2_194 = arith.constant 2 : index
    %c0_195 = arith.constant 0 : index
    %c0_196 = arith.constant 0 : index
    %270 = vector.load %arg8[%c2_194, %c0_195, %c0_196] : memref<4x128x128xf32, #tpu.memory_space<vmem>>, vector<1x128x128xf32>
    %271 = vector.shape_cast %270 : vector<1x128x128xf32> to vector<128x128xf32>
    %cst_197 = arith.constant dense<0.000000e+00> : vector<128x128xf32>
    %272 = tpu.matmul %174, %271, %cst_197 {dimension_numbers = #tpu.dot_dimension_numbers<[1], [0], [0], [1], [0, 0, 1, 1], [], []>} : vector<128x128xf32>, vector<128x128xf32>, vector<128x128xf32> -> vector<128x128xf32>
    %c2_198 = arith.constant 2 : index
    %c0_199 = arith.constant 0 : index
    %c0_200 = arith.constant 0 : index
    %273 = vector.load %arg9[%c2_198, %c0_199, %c0_200] : memref<4x1x128xf32, #tpu.memory_space<vmem>>, vector<1x1x128xf32>
    %274 = vector.shape_cast %273 : vector<1x1x128xf32> to vector<1x128xf32>
    %275 = vector.broadcast %274 : vector<1x128xf32> to vector<128x128xf32>
    %276 = arith.addf %272, %275 : vector<128x128xf32>
    %cst_201 = arith.constant dense<0.000000e+00> : vector<128x128xf32>
    %277 = tpu.matmul %262, %269, %cst_201 {dimension_numbers = #tpu.dot_dimension_numbers<[1], [1], [0], [0], [0, 0, 1, 0], [], []>} : vector<128x32xf32>, vector<128x32xf32>, vector<128x128xf32> -> vector<128x128xf32>
    %c2_202 = arith.constant 2 : index
    %c0_203 = arith.constant 0 : index
    %c0_204 = arith.constant 0 : index
    %278 = vector.load %arg10[%c2_202, %c0_203, %c0_204] : memref<4x128x128xf32, #tpu.memory_space<vmem>>, vector<1x128x128xf32>
    %279 = vector.shape_cast %278 : vector<1x128x128xf32> to vector<128x128xf32>
    %280 = arith.addf %277, %279 : vector<128x128xf32>
    %cst_205 = arith.constant dense<0xFF800000> : vector<128xf32>
    %281 = vector.multi_reduction <maximumf>, %280, %cst_205 [1] : vector<128x128xf32> to vector<128xf32>
    %282 = vector.shape_cast %281 : vector<128xf32> to vector<128x1xf32>
    %283 = vector.broadcast %282 : vector<128x1xf32> to vector<128x128xf32>
    %284 = arith.subf %280, %283 : vector<128x128xf32>
    %285 = math.exp %284 : vector<128x128xf32>
    %cst_206 = arith.constant dense<0.000000e+00> : vector<128xf32>
    %286 = vector.multi_reduction <add>, %285, %cst_206 [1] : vector<128x128xf32> to vector<128xf32>
    %287 = vector.shape_cast %286 : vector<128xf32> to vector<128x1xf32>
    %288 = tpu.reciprocal %287 {approx = true} : vector<128x1xf32> -> vector<128x1xf32>
    %289 = arith.mulf %287, %288 : vector<128x1xf32>
    %cst_207 = arith.constant 2.000000e+00 : f32
    %290 = vector.broadcast %cst_207 : f32 to vector<128x1xf32>
    %291 = arith.subf %290, %289 : vector<128x1xf32>
    %292 = arith.mulf %288, %291 : vector<128x1xf32>
    %293 = vector.broadcast %292 : vector<128x1xf32> to vector<128x128xf32>
    %294 = arith.mulf %285, %293 : vector<128x128xf32>
    %cst_208 = arith.constant dense<0.000000e+00> : vector<128x128xf32>
    %295 = tpu.matmul %294, %276, %cst_208 {dimension_numbers = #tpu.dot_dimension_numbers<[1], [0], [0], [1], [0, 0, 1, 1], [], []>} : vector<128x128xf32>, vector<128x128xf32>, vector<128x128xf32> -> vector<128x128xf32>
    %296 = arith.addf %255, %295 : vector<128x128xf32>
    %c3_209 = arith.constant 3 : index
    %c0_210 = arith.constant 0 : index
    %c0_211 = arith.constant 0 : index
    %297 = vector.load %arg4[%c3_209, %c0_210, %c0_211] : memref<4x128x32xf32, #tpu.memory_space<vmem>>, vector<1x128x32xf32>
    %298 = vector.shape_cast %297 : vector<1x128x32xf32> to vector<128x32xf32>
    %cst_212 = arith.constant dense<0.000000e+00> : vector<128x32xf32>
    %299 = tpu.matmul %174, %298, %cst_212 {dimension_numbers = #tpu.dot_dimension_numbers<[1], [0], [0], [1], [0, 0, 1, 1], [], []>} : vector<128x128xf32>, vector<128x32xf32>, vector<128x32xf32> -> vector<128x32xf32>
    %c3_213 = arith.constant 3 : index
    %c0_214 = arith.constant 0 : index
    %c0_215 = arith.constant 0 : index
    %300 = vector.load %arg5[%c3_213, %c0_214, %c0_215] : memref<4x1x32xf32, #tpu.memory_space<vmem>>, vector<1x1x32xf32>
    %301 = vector.shape_cast %300 : vector<1x1x32xf32> to vector<1x32xf32>
    %302 = vector.broadcast %301 : vector<1x32xf32> to vector<128x32xf32>
    %303 = arith.addf %299, %302 : vector<128x32xf32>
    %c3_216 = arith.constant 3 : index
    %c0_217 = arith.constant 0 : index
    %c0_218 = arith.constant 0 : index
    %304 = vector.load %arg6[%c3_216, %c0_217, %c0_218] : memref<4x128x32xf32, #tpu.memory_space<vmem>>, vector<1x128x32xf32>
    %305 = vector.shape_cast %304 : vector<1x128x32xf32> to vector<128x32xf32>
    %cst_219 = arith.constant dense<0.000000e+00> : vector<128x32xf32>
    %306 = tpu.matmul %174, %305, %cst_219 {dimension_numbers = #tpu.dot_dimension_numbers<[1], [0], [0], [1], [0, 0, 1, 1], [], []>} : vector<128x128xf32>, vector<128x32xf32>, vector<128x32xf32> -> vector<128x32xf32>
    %c3_220 = arith.constant 3 : index
    %c0_221 = arith.constant 0 : index
    %c0_222 = arith.constant 0 : index
    %307 = vector.load %arg7[%c3_220, %c0_221, %c0_222] : memref<4x1x32xf32, #tpu.memory_space<vmem>>, vector<1x1x32xf32>
    %308 = vector.shape_cast %307 : vector<1x1x32xf32> to vector<1x32xf32>
    %309 = vector.broadcast %308 : vector<1x32xf32> to vector<128x32xf32>
    %310 = arith.addf %306, %309 : vector<128x32xf32>
    %c3_223 = arith.constant 3 : index
    %c0_224 = arith.constant 0 : index
    %c0_225 = arith.constant 0 : index
    %311 = vector.load %arg8[%c3_223, %c0_224, %c0_225] : memref<4x128x128xf32, #tpu.memory_space<vmem>>, vector<1x128x128xf32>
    %312 = vector.shape_cast %311 : vector<1x128x128xf32> to vector<128x128xf32>
    %cst_226 = arith.constant dense<0.000000e+00> : vector<128x128xf32>
    %313 = tpu.matmul %174, %312, %cst_226 {dimension_numbers = #tpu.dot_dimension_numbers<[1], [0], [0], [1], [0, 0, 1, 1], [], []>} : vector<128x128xf32>, vector<128x128xf32>, vector<128x128xf32> -> vector<128x128xf32>
    %c3_227 = arith.constant 3 : index
    %c0_228 = arith.constant 0 : index
    %c0_229 = arith.constant 0 : index
    %314 = vector.load %arg9[%c3_227, %c0_228, %c0_229] : memref<4x1x128xf32, #tpu.memory_space<vmem>>, vector<1x1x128xf32>
    %315 = vector.shape_cast %314 : vector<1x1x128xf32> to vector<1x128xf32>
    %316 = vector.broadcast %315 : vector<1x128xf32> to vector<128x128xf32>
    %317 = arith.addf %313, %316 : vector<128x128xf32>
    %cst_230 = arith.constant dense<0.000000e+00> : vector<128x128xf32>
    %318 = tpu.matmul %303, %310, %cst_230 {dimension_numbers = #tpu.dot_dimension_numbers<[1], [1], [0], [0], [0, 0, 1, 0], [], []>} : vector<128x32xf32>, vector<128x32xf32>, vector<128x128xf32> -> vector<128x128xf32>
    %c3_231 = arith.constant 3 : index
    %c0_232 = arith.constant 0 : index
    %c0_233 = arith.constant 0 : index
    %319 = vector.load %arg10[%c3_231, %c0_232, %c0_233] : memref<4x128x128xf32, #tpu.memory_space<vmem>>, vector<1x128x128xf32>
    %320 = vector.shape_cast %319 : vector<1x128x128xf32> to vector<128x128xf32>
    %321 = arith.addf %318, %320 : vector<128x128xf32>
    %cst_234 = arith.constant dense<0xFF800000> : vector<128xf32>
    %322 = vector.multi_reduction <maximumf>, %321, %cst_234 [1] : vector<128x128xf32> to vector<128xf32>
    %323 = vector.shape_cast %322 : vector<128xf32> to vector<128x1xf32>
    %324 = vector.broadcast %323 : vector<128x1xf32> to vector<128x128xf32>
    %325 = arith.subf %321, %324 : vector<128x128xf32>
    %326 = math.exp %325 : vector<128x128xf32>
    %cst_235 = arith.constant dense<0.000000e+00> : vector<128xf32>
    %327 = vector.multi_reduction <add>, %326, %cst_235 [1] : vector<128x128xf32> to vector<128xf32>
    %328 = vector.shape_cast %327 : vector<128xf32> to vector<128x1xf32>
    %329 = tpu.reciprocal %328 {approx = true} : vector<128x1xf32> -> vector<128x1xf32>
    %330 = arith.mulf %328, %329 : vector<128x1xf32>
    %cst_236 = arith.constant 2.000000e+00 : f32
    %331 = vector.broadcast %cst_236 : f32 to vector<128x1xf32>
    %332 = arith.subf %331, %330 : vector<128x1xf32>
    %333 = arith.mulf %329, %332 : vector<128x1xf32>
    %334 = vector.broadcast %333 : vector<128x1xf32> to vector<128x128xf32>
    %335 = arith.mulf %326, %334 : vector<128x128xf32>
    %cst_237 = arith.constant dense<0.000000e+00> : vector<128x128xf32>
    %336 = tpu.matmul %335, %317, %cst_237 {dimension_numbers = #tpu.dot_dimension_numbers<[1], [0], [0], [1], [0, 0, 1, 1], [], []>} : vector<128x128xf32>, vector<128x128xf32>, vector<128x128xf32> -> vector<128x128xf32>
    %337 = arith.addf %296, %336 : vector<128x128xf32>
    %c0_238 = arith.constant 0 : index
    %c0_239 = arith.constant 0 : index
    %338 = vector.load %arg11[%c0_238, %c0_239] : memref<1x128xf32, #tpu.memory_space<vmem>>, vector<1x128xf32>
    %339 = vector.broadcast %338 : vector<1x128xf32> to vector<128x128xf32>
    %340 = arith.addf %337, %339 : vector<128x128xf32>
    %c0_240 = arith.constant 0 : index
    %c0_241 = arith.constant 0 : index
    %c0_242 = arith.constant 0 : index
    %341 = vector.load %arg12[%c0_240, %c0_241, %c0_242] : memref<1x128x128xf32, #tpu.memory_space<vmem>>, vector<1x128x128xf32>
    %342 = vector.shape_cast %341 : vector<1x128x128xf32> to vector<128x128xf32>
    %343 = vector.shape_cast %340 : vector<128x128xf32> to vector<1x128x128xf32>
    tpu.vector_store %arg12[%c0_240, %c0_241, %c0_242], %343 {strides = array<i32>} : memref<1x128x128xf32, #tpu.memory_space<vmem>>, vector<1x128x128xf32>,
    return
  }
  func.func @transform_0(%arg0: i32) -> (i32, i32, i32) {
    %c0_i32 = arith.constant 0 : i32
    %c0_i32_0 = arith.constant 0 : i32
    %c0_i32_1 = arith.constant 0 : i32
    return %arg0, %c0_i32, %c0_i32_0 : i32, i32, i32
  }
  func.func @transform_1(%arg0: i32) -> (i32, i32) {
    %c0_i32 = arith.constant 0 : i32
    %c0_i32_0 = arith.constant 0 : i32
    %c0_i32_1 = arith.constant 0 : i32
    return %c0_i32, %c0_i32_0 : i32, i32
  }
  func.func @transform_2(%arg0: i32) -> (i32, i32) {
    %c0_i32 = arith.constant 0 : i32
    %c0_i32_0 = arith.constant 0 : i32
    %c0_i32_1 = arith.constant 0 : i32
    return %c0_i32, %c0_i32_0 : i32, i32
  }
  func.func @transform_3(%arg0: i32) -> (i32, i32, i32) {
    %c0_i32 = arith.constant 0 : i32
    %c0_i32_0 = arith.constant 0 : i32
    %c0_i32_1 = arith.constant 0 : i32
    %c0_i32_2 = arith.constant 0 : i32
    return %c0_i32, %c0_i32_0, %c0_i32_1 : i32, i32, i32
  }
  func.func @transform_4(%arg0: i32) -> (i32, i32, i32) {
    %c0_i32 = arith.constant 0 : i32
    %c0_i32_0 = arith.constant 0 : i32
    %c0_i32_1 = arith.constant 0 : i32
    %c0_i32_2 = arith.constant 0 : i32
    return %c0_i32, %c0_i32_0, %c0_i32_1 : i32, i32, i32
  }
  func.func @transform_5(%arg0: i32) -> (i32, i32, i32) {
    %c0_i32 = arith.constant 0 : i32
    %c0_i32_0 = arith.constant 0 : i32
    %c0_i32_1 = arith.constant 0 : i32
    %c0_i32_2 = arith.constant 0 : i32
    return %c0_i32, %c0_i32_0, %c0_i32_1 : i32, i32, i32
  }
  func.func @transform_6(%arg0: i32) -> (i32, i32, i32) {
    %c0_i32 = arith.constant 0 : i32
    %c0_i32_0 = arith.constant 0 : i32
    %c0_i32_1 = arith.constant 0 : i32
    %c0_i32_2 = arith.constant 0 : i32
    return %c0_i32, %c0_i32_0, %c0_i32_1 : i32, i32, i32
  }
  func.func @transform_7(%arg0: i32) -> (i32, i32, i32) {
    %c0_i32 = arith.constant 0 : i32
    %c0_i32_0 = arith.constant 0 : i32
    %c0_i32_1 = arith.constant 0 : i32
    %c0_i32_2 = arith.constant 0 : i32
    return %c0_i32, %c0_i32_0, %c0_i32_1 : i32, i32, i32
  }
  func.func @transform_8(%arg0: i32) -> (i32, i32, i32) {
    %c0_i32 = arith.constant 0 : i32
    %c0_i32_0 = arith.constant 0 : i32
    %c0_i32_1 = arith.constant 0 : i32
    %c0_i32_2 = arith.constant 0 : i32
    return %c0_i32, %c0_i32_0, %c0_i32_1 : i32, i32, i32
  }
  func.func @transform_9(%arg0: i32) -> (i32, i32, i32) {
    %c0_i32 = arith.constant 0 : i32
    %c0_i32_0 = arith.constant 0 : i32
    %c0_i32_1 = arith.constant 0 : i32
    %c0_i32_2 = arith.constant 0 : i32
    return %c0_i32, %c0_i32_0, %c0_i32_1 : i32, i32, i32
  }
  func.func @transform_10(%arg0: i32) -> (i32, i32) {
    %c0_i32 = arith.constant 0 : i32
    %c0_i32_0 = arith.constant 0 : i32
    %c0_i32_1 = arith.constant 0 : i32
    return %c0_i32, %c0_i32_0 : i32, i32
  }
  func.func @transform_11(%arg0: i32) -> (i32, i32, i32) {
    %c0_i32 = arith.constant 0 : i32
    %c0_i32_0 = arith.constant 0 : i32
    %c0_i32_1 = arith.constant 0 : i32
    return %arg0, %c0_i32, %c0_i32_0 : i32, i32, i32
  }
}

</mosaic_0001>

<bundles_post_ra>
// kernel: tpu_custom_call.1
= control target key start
LH: loop header
LB: loop body
LE: loop exit
PB: predicated region body
PF: predicated region fallthrough
CT: control target
= control target key end

     0   :  { %16 = vsyncpa [#allocation3], 0  ;;  %s20283_s0 = inlined_call_operand.vmem [shape: f32[2,128,32], index: 0, kind: input, shape index: {}]   ;;  %s20284_s1 = inlined_call_operand.vmem [shape: f32[32,128], index: 1, kind: input, shape index: {}]   ;;  %s20285_s2 = inlined_call_operand.vmem [shape: f32[1,128], index: 2, kind: input, shape index: {}]   ;;  %s20286_s3 = inlined_call_operand.vmem [shape: f32[4,128,32], index: 3, kind: input, shape index: {}]   ;;  %s20287_s4 = inlined_call_operand.vmem [shape: f32[4,1,32], index: 4, kind: input, shape index: {}]   ;;  %s20288_s5 = inlined_call_operand.vmem [shape: f32[4,128,32], index: 5, kind: input, shape index: {}]   ;;  %s20289_s6 = inlined_call_operand.vmem [shape: f32[4,1,32], index: 6, kind: input, shape index: {}]   ;;  %s20290_s7 = inlined_call_operand.vmem [shape: f32[4,128,128], index: 7, kind: input, shape index: {}]   ;;  %s20291_s8 = inlined_call_operand.vmem [shape: f32[4,1,128], index: 8, kind: input, shape index: {}]   ;;  %s20292_s9 = inlined_call_operand.vmem [shape: f32[4,128,128], index: 9, kind: input, shape index: {}]   ;;  %s20293_s10 = inlined_call_operand.vmem [shape: f32[1,128], index: 10, kind: input, shape index: {}]   ;;  %s20294_s11 = inlined_call_operand.hbm [shape: f32[2,128,128], index: 11, kind: output, shape index: {}]  }
   0x1   :  { %18 = vsyncpa [#allocation3 + $0x1], 0  ;;  %s15640_s17 = smov 0   ;;  %s15642_s18 = smov 0  }
   0x2   :  { %s15644_s19 = smov 0   ;;  %s15646_s20 = smov 0  }
   0x3 LB: > { %s15661_s21 = sadd.s32 4294967295, %s15575_s20   ;;  %s9282_s22 = sadd.s32 4294967294, %s15575_s20   ;;  %s15575_s20 = sphi %s15646_s20, %s21051_s20   ;;  %s15571_s19 = sphi %s15644_s19, %s21050_s19   ;;  %s15567_s18 = sphi %s15642_s18, %s21049_s18   ;;  %s15563_s17 = sphi %s15640_s17, %s21048_s17  }
   0x4   : > { %s15665_s23 = sadd.s32 1, %s15575_s20   ;;  %s267_s24 = sadd.s32 1, %s15571_s19 }
   0x5   : > { %s264_s25 = ssub.s32 %s15575_s20, %s15665_s23  ;;  %p277_p0 = scmp.ne.s32.totalorder %s15571_s19, %s15567_s18 }
   0x6   : > { %p265_p1 = scmp.eq.s32.totalorder %s264_s25, 0  ;;  %p278_p2 = scmp.eq.s32.totalorder %s15661_s21, 1 }
   0x7   : > { %p283_p3 = scmp.ne.s32.totalorder %s15567_s18, %s15563_s17  ;;  %p284_p4 = scmp.eq.s32.totalorder %s9282_s22, 1 }
   0x8   : > { %s15676_s26 = scalar_select %p265_p1, %s15571_s19, %s267_s24  }
   0x9   : > { %p15678_p5 = por %p278_p2, %p277_p0  ;;  %p15682_p6 = por %p284_p4, %p283_p3 }
   0xa   : > { %20563 = sst [smem:[#allocation5_spill]] %s15676_s26  ;;  %p9285_p7 = scmp.ge.s32.totalorder %s15575_s20, 1 }
   0xb   : > { %p340_p8 = scmp.lt.s32.totalorder %s15575_s20, 3 }
   0xd   : > { %p341_p9 = pnand %p9285_p7, %p340_p8 }
   0xf   : > { %344 = sbr.rel (%p341_p9) target bundleno = 5573 (0x15c5), region = 64 }
  0x16   : > { %v401_v0 = vld [vmem:[%s20284_s1] sm:$0xff]  ;;  %v402_v1 = vld [vmem:[%s20284_s1 + $0x8] sm:$0xff]  ;;  %v403_v2 = vld [vmem:[%s20284_s1 + $0x10] sm:$0xff]  ;;  %p380_p10 = scmp.lt.s32.totalorder %s15661_s21, 1  ;;  %vm412_vm0 = vcmask 261120   ;;  %s9782_s22 = sshll.u32 %s15661_s21, 11 }
  0x17   : > { %v13355_v3 = vpack.c.bf16 %v402_v1, %v401_v0  ;;  %v404_v4 = vld [vmem:[%s20284_s1 + $0x18] sm:$0xff]  ;;  %v622_v5 = vld [vmem:[%s20286_s3] sm:$0xff]  ;;  %v623_v6 = vld [vmem:[%s20286_s3 + $0x8] sm:$0xff]  ;;  %s20233_s30 = scalar_lea.hbm %s20294_s11, %s9782_s22 }
  0x18   : > { %v13359_v7 = vpack.c.bf16 %v404_v4, %v403_v2  ;;  %s381_s12 = scalar_select %p380_p10, %s15661_s21, 1  ;;  %v15708_v8 = vpack.c.bf16 %v623_v6, %v622_v5  ;;  %v624_v9 = vld [vmem:[%s20286_s3 + $0x10] sm:$0xff]  ;;  %v625_v10 = vld [vmem:[%s20286_s3 + $0x18] sm:$0xff]  ;;  %v626_v12 = vld [vmem:[%s20286_s3 + $0x20] sm:$0xff] }
  0x19   : > { %13356 = vmatprep.subr.bf16.mxu0 %v13355_v3  ;;  %v15716_v11 = vpack.c.bf16 %v625_v10, %v624_v9  ;;  %v627_v13 = vld [vmem:[%s20286_s3 + $0x28] sm:$0xff]  ;;  %v628_v16 = vld [vmem:[%s20286_s3 + $0x30] sm:$0xff]  ;;  %v629_v17 = vld [vmem:[%s20286_s3 + $0x38] sm:$0xff] }
  0x1a   : > { %13358 = vmatpush3.bf16.msra.mxu0 %v13355_v3  ;;  %s9781_s29 = sshll.u32 %s381_s12, 7  ;;  %13364 = vmatprep.subr.bf16.mxu1 %v15708_v8  ;;  %v15733_v15 = vpack.c.bf16 %v627_v13, %v626_v12  ;;  %v15746_v20 = vpack.c.bf16 %v629_v17, %v628_v16  ;;  %v630_v21 = vld [vmem:[%s20286_s3 + $0x40] sm:$0xff]  ;;  %v631_v22 = vld [vmem:[%s20286_s3 + $0x48] sm:$0xff]  ;;  %v632_v26 = vld [vmem:[%s20286_s3 + $0x50] sm:$0xff]  ;;  %s377_s12 = sand.u32 1, %s15567_s18  }
  0x1b   : > { %13360 = vmatprep.subr.bf16.mxu0 %v13359_v7  ;;  %s15728_s13 = scalar_lea.vmem %s20283_s0, %s9781_s29  ;;  %13366 = vmatpush3.bf16.msra.mxu1 %v15708_v8  ;;  %v15760_v25 = vpack.c.bf16 %v631_v22, %v630_v21  ;;  %v633_v27 = vld [vmem:[%s20286_s3 + $0x58] sm:$0xff]  ;;  %v634_v31 = vld [vmem:[%s20286_s3 + $0x60] sm:$0xff]  ;;  %v635_v32 = vld [vmem:[%s20286_s3 + $0x68] sm:$0xff]  ;;  %s9286_s14 = sshll.u32 %s377_s12, 7 }
  0x1c   : > { %v385_v14 = vld [vmem:[%s15728_s13] sm:$0xff]  ;;  %13368 = vmatprep.subr.bf16.mxu1 %v15716_v11  ;;  %v386_v18 = vld [vmem:[%s15728_s13 + $0x8] sm:$0xff]  ;;  %v387_v19 = vld [vmem:[%s15728_s13 + $0x10] sm:$0xff]  ;;  %v15774_v30 = vpack.c.bf16 %v633_v27, %v632_v26  ;;  %v15788_v35 = vpack.c.bf16 %v635_v32, %v634_v31  ;;  %s20211_s16 = scalar_lea.vmem [#allocation2], %s9286_s14  ;;  %s20242_s21 = scalar_lea.sflag [#allocation3], %s377_s12 }
  0x1d   : > { %11091 = vmatprep.mubr.msk.f32.mxu0 %vm412_vm0, %v385_v14  ;;  %v388_v23 = vld [vmem:[%s15728_s13 + $0x18] sm:$0xff]  ;;  %v389_v24 = vld [vmem:[%s15728_s13 + $0x20] sm:$0xff]  ;;  %v390_v28 = vld [vmem:[%s15728_s13 + $0x28] sm:$0xff]  ;;  %s9220_s24 = sshll.u32 %s20211_s16, 4  ;;  %s15577_s14 = smov [#allocation2]   ;;  %s20235_s24 = int_to_ptr.vmem [resolvable:$true] %s9220_s24 }
  0x1e   : > { %13362 = vmatpush3.bf16.msra.mxu0 %v13359_v7  ;;  %v391_v29 = vld [vmem:[%s15728_s13 + $0x30] sm:$0xff]  ;;  %v392_v33 = vld [vmem:[%s15728_s13 + $0x38] sm:$0xff]  ;;  %v393_v34 = vld [vmem:[%s15728_s13 + $0x40] sm:$0xff]  ;;  %s15513_s26 = scalar_lea.vmem %s20235_s24, 2048 }
  0x1f   : > { %13370 = vmatpush3.bf16.msra.mxu1 %v15716_v11  ;;  %v394_v36 = vld [vmem:[%s15728_s13 + $0x48] sm:$0xff]  ;;  %v395_v37 = vld [vmem:[%s15728_s13 + $0x50] sm:$0xff]  ;;  %v396_v38 = vld [vmem:[%s15728_s13 + $0x58] sm:$0xff]  ;;  %p15514_p11 = scmp.ne.s32.totalorder %s20235_s24, %s15513_s26 }
  0x20   : > { %13372 = vmatprep.subr.bf16.mxu1 %v15733_v15  ;;  %v397_v39 = vld [vmem:[%s15728_s13 + $0x60] sm:$0xff]  ;;  %v398_v40 = vld [vmem:[%s15728_s13 + $0x68] sm:$0xff]  ;;  %v399_v41 = vld [vmem:[%s15728_s13 + $0x70] sm:$0xff] }
  0x21   : > { %11092 = vmatmul.mubr.msk.f32.vlgmr.msra.gmra.mrb[0].mxu0 %vm412_vm0, %v386_v18  ;;  %v400_v42 = vld [vmem:[%s15728_s13 + $0x78] sm:$0xff]  ;;  %v636_v43 = vld [vmem:[%s20286_s3 + $0x70] sm:$0xff]  ;;  %v790_v46 = vld [vmem:[%s20288_s5] sm:$0xff]  ;;  %p15515_p12 = pnand %p15514_p11, %p15678_p5  ;;  %s15517_s13 = sshll.u32 %s15577_s14, 4  ;;  %s15518_s13 = int_to_ptr.vmem [resolvable:$false] %s15517_s13 }
  0x22   : > { %11094 = vmatprep.mubr.msk.f32.mxu0 %vm412_vm0, %v387_v19  ;;  %v637_v44 = vld [vmem:[%s20286_s3 + $0x78] sm:$0xff]  ;;  %v791_v47 = vld [vmem:[%s20288_s5 + $0x8] sm:$0xff]  ;;  %v15831_v49 = vld [vmem:[%s20285_s2] ss:$0 sm:$0xff]  ;;  %s15519_s15 = scalar_lea.vmem %s15518_s13, 4096  ;;  %p15520_p0 = scmp.lt.s32.totalorder %s20235_s24, %s15518_s13 }
  0x23   : > { %13374 = vmatpush3.bf16.msra.mxu1 %v15733_v15  ;;  %v15815_v45 = vpack.c.bf16 %v637_v44, %v636_v43  ;;  %v15825_v48 = vpack.c.bf16 %v791_v47, %v790_v46  ;;  %v792_v54 = vld [vmem:[%s20288_s5 + $0x10] sm:$0xff]  ;;  %v793_v55 = vld [vmem:[%s20288_s5 + $0x18] sm:$0xff]  ;;  %v794_v63 = vld [vmem:[%s20288_s5 + $0x20] sm:$0xff]  ;;  %p15516_p13 = pneg %p15515_p12  ;;  %p15521_p1 = scmp.lt.s32.totalorder %s15519_s15, %s15513_s26 }
  0x24   : > { %13376 = vmatprep.subr.bf16.mxu1 %v15746_v20  ;;  %v15846_v61 = vpack.c.bf16 %v793_v55, %v792_v54  ;;  %v795_v0 = vld [vmem:[%s20288_s5 + $0x28] sm:$0xff]  ;;  %v796_v9 = vld [vmem:[%s20288_s5 + $0x30] sm:$0xff]  ;;  %v797_v10 = vld [vmem:[%s20288_s5 + $0x38] sm:$0xff] }
  0x25   : > { %11095 = vmatmul.mubr.msk.f32.gmra.mrb[2].mxu0 %vm412_vm0, %v388_v23  ;;  %20566 = vst [vmem:[#allocation6_spill] sm:$0xff] %v15825_v48  ;;  %v15864_v6 = vpack.c.bf16 %v795_v0, %v794_v63  ;;  %v15882_v18 = vpack.c.bf16 %v797_v10, %v796_v9  ;;  %v798_v21 = vld [vmem:[%s20288_s5 + $0x40] sm:$0xff]  ;;  %v799_v22 = vld [vmem:[%s20288_s5 + $0x48] sm:$0xff]  ;;  %v800_v32 = vld [vmem:[%s20288_s5 + $0x50] sm:$0xff]  ;;  %p15522_p2 = por %p15521_p1, %p15520_p0 }
  0x26   : > { %11097 = vmatprep.mubr.msk.f32.mxu0 %vm412_vm0, %v389_v24  ;;  %20569 = vst [vmem:[#allocation9_spill] sm:$0xff] %v15846_v61  ;;  %v803_v43 = vld [vmem:[%s20288_s5 + $0x68] sm:$0xff]  ;;  %v804_v54 = vld [vmem:[%s20288_s5 + $0x70] sm:$0xff]  ;;  %v805_v55 = vld [vmem:[%s20288_s5 + $0x78] sm:$0xff] }
  0x27   : > { %13378 = vmatpush3.bf16.msra.mxu1 %v15746_v20  ;;  %20572 = vst [vmem:[#allocation12_spill] sm:$0xff] %v15864_v6  ;;  %20575 = vst [vmem:[#allocation15_spill] sm:$0xff] %v15882_v18  ;;  %v15954_v0 = vpack.c.bf16 %v805_v55, %v804_v54  ;;  %v960_v10 = vld [vmem:[%s20290_s7 + $0x10] sm:$0xff]  ;;  %p15523_p3 = pnand %p15522_p2, %p15516_p13 }
  0x28   : > { %13380 = vmatprep.subr.bf16.mxu1 %v15760_v25  ;;  %v9343_v55 = vld [vmem:[%s20286_s3 + $0x90] sm:$0xff]  ;;  %vm16314_vm1 = vmpackc.low %vm412_vm0, %vm412_vm0 }
  0x29   : > { %11098 = vmatmul.mubr.msk.f32.gmra.mrb[4].mxu0 %vm412_vm0, %v390_v28  ;;  %20587 = vst [vmem:[#allocation27_spill] sm:$0xff] %v15954_v0 }
  0x2a   : > { %11100 = vmatprep.mubr.msk.f32.mxu0 %vm412_vm0, %v391_v29  ;;  %v15900_v29 = vpack.c.bf16 %v799_v22, %v798_v21  ;;  %v964_v22 = vld [vmem:[%s20290_s7 + $0x30] sm:$0xff] }
  0x2b   : > { %13382 = vmatpush3.bf16.msra.mxu1 %v15760_v25 }
  0x2c   : > { %13384 = vmatprep.subr.bf16.mxu1 %v15774_v30  ;;  %20578 = vst [vmem:[#allocation18_spill] sm:$0xff] %v15900_v29 }
  0x2d   : > { %11101 = vmatmul.mubr.msk.f32.gmra.mrb[6].mxu0 %vm412_vm0, %v392_v33  ;;  %v801_v33 = vld [vmem:[%s20288_s5 + $0x58] sm:$0xff] }
  0x2e   : > { %11103 = vmatprep.mubr.msk.f32.mxu0 %vm412_vm0, %v393_v34 }
  0x2f   : > { %13386 = vmatpush3.bf16.msra.mxu1 %v15774_v30 }
  0x30   : > { %13388 = vmatprep.subr.bf16.mxu1 %v15788_v35 }
  0x31   : > { %11104 = vmatmul.mubr.msk.f32.gmra.mrb[8].mxu0 %vm412_vm0, %v394_v36 }
  0x32   : > { %11106 = vmatprep.mubr.msk.f32.mxu0 %vm412_vm0, %v395_v37 }
  0x33   : > { %13390 = vmatpush3.bf16.msra.mxu1 %v15788_v35 }
  0x34   : > { %13392 = vmatprep.subr.bf16.mxu1 %v15815_v45 }
  0x35   : > { %11107 = vmatmul.mubr.msk.f32.gmra.mrb[10].mxu0 %vm412_vm0, %v396_v38 }
  0x36   : > { %11109 = vmatprep.mubr.msk.f32.mxu0 %vm412_vm0, %v397_v39 }
  0x37   : > { %13394 = vmatpush3.bf16.msra.mxu1 %v15815_v45 }
  0x38   : > { %13396 = vmatprep.subr.bf16.mxu1 %v15825_v48 }
  0x39   : > { %11110 = vmatmul.mubr.msk.f32.gmra.mrb[12].mxu0 %vm412_vm0, %v398_v40  ;;  %v15918_v40 = vpack.c.bf16 %v801_v33, %v800_v32  ;;  %v968_v33 = vld [vmem:[%s20290_s7 + $0x50] sm:$0xff] }
  0x3a   : > { %11112 = vmatprep.mubr.msk.f32.mxu0 %vm412_vm0, %v399_v41 }
  0x3b   : > { %20581 = vst [vmem:[#allocation21_spill] sm:$0xff] %v15918_v40 }
  0x3d   : > { %11113 = vmatmul.mubr.msk.f32.gmra.mrb[14].mxu0 %vm412_vm0, %v400_v42  ;;  %v802_v42 = vld [vmem:[%s20288_s5 + $0x60] sm:$0xff] }
  0xf4   : > { %v11093_v50 = vpop.f32.mrb[0].mxu0 }
  0xf5   : > { %v533_v51 = vadd.f32 %v11093_v50, %v15831_v49  ;;  %v527_v52 = vpop.f32.mrb[1].mxu0 }
  0xf6   : > { %v528_v53 = vadd.f32 %v15831_v49, %v527_v52  ;;  %v15936_v52 = vpack.c.bf16 %v803_v43, %v802_v42  ;;  %v972_v43 = vld [vmem:[%s20290_s7 + $0x70] sm:$0xff] }
  0xf7   : > { %v15843_v58 = vmax.f32 %v533_v51, 0.0 }
  0xf8   : > { %v15841_v56 = vmax.f32 %v528_v53, 0.0  ;;  %v11096_v57 = vpop.f32.mrb[2].mxu0  ;;  %20584 = vst [vmem:[#allocation24_spill] sm:$0xff] %v15936_v52 }
  0xf9   : > { %20568 = vst [vmem:[#allocation8_spill] sm:$0xff] %v15843_v58  ;;  %v543_v59 = vadd.f32 %v11096_v57, %v15831_v49  ;;  %v537_v60 = vpop.f32.mrb[3].mxu0 }
  0xfa   : > { %20567 = vst [vmem:[#allocation7_spill] sm:$0xff] %v15841_v56  ;;  %v538_v62 = vadd.f32 %v15831_v49, %v537_v60  ;;  %11147 = vmatprep.mubr.f32.mxu1 %v15841_v56 }
  0xfb   : > { %11148 = vmatmul.mubr.f32.vlgmr.msra.gmra.mrb[0].mxu1 %v15843_v58  ;;  %v15860_v3 = vmax.f32 %v543_v59, 0.0 }
  0xfc   : > { %v15857_v1 = vmax.f32 %v538_v62, 0.0  ;;  %13398 = vmatpush3.bf16.msra.mxu1 %v15825_v48  ;;  %v11099_v2 = vpop.f32.mrb[4].mxu0 }
  0xfd   : > { %20571 = vst [vmem:[#allocation11_spill] sm:$0xff] %v15860_v3  ;;  %v553_v4 = vadd.f32 %v11099_v2, %v15831_v49  ;;  %v547_v5 = vpop.f32.mrb[5].mxu0  ;;  %13400 = vmatprep.subr.bf16.mxu1 %v15846_v61 }
  0xfe   : > { %20570 = vst [vmem:[#allocation10_spill] sm:$0xff] %v15857_v1  ;;  %v548_v7 = vadd.f32 %v15831_v49, %v547_v5  ;;  %11150 = vmatprep.mubr.f32.mxu1 %v15857_v1  ;;  %v959_v5 = vld [vmem:[%s20290_s7 + $0x8] sm:$0xff] }
  0xff   : > { %11151 = vmatmul.mubr.f32.gmra.mrb[2].mxu1 %v15860_v3  ;;  %v15878_v14 = vmax.f32 %v553_v4, 0.0  ;;  %v958_v4 = vld [vmem:[%s20290_s7] sm:$0xff] }
 0x100   : > { %v15875_v12 = vmax.f32 %v548_v7, 0.0  ;;  %13402 = vmatpush3.bf16.msra.mxu1 %v15846_v61  ;;  %v11102_v13 = vpop.f32.mrb[6].mxu0 }
 0x101   : > { %20574 = vst [vmem:[#allocation14_spill] sm:$0xff] %v15878_v14  ;;  %v563_v16 = vadd.f32 %v11102_v13, %v15831_v49  ;;  %v557_v17 = vpop.f32.mrb[7].mxu0  ;;  %13404 = vmatprep.subr.bf16.mxu1 %v15864_v6  ;;  %v961_v13 = vld [vmem:[%s20290_s7 + $0x18] sm:$0xff] }
 0x102   : > { %20573 = vst [vmem:[#allocation13_spill] sm:$0xff] %v15875_v12  ;;  %v558_v19 = vadd.f32 %v15831_v49, %v557_v17  ;;  %11153 = vmatprep.mubr.f32.mxu1 %v15875_v12  ;;  %v962_v17 = vld [vmem:[%s20290_s7 + $0x20] sm:$0xff] }
 0x103   : > { %11154 = vmatmul.mubr.f32.gmra.mrb[4].mxu1 %v15878_v14  ;;  %v15896_v26 = vmax.f32 %v563_v16, 0.0  ;;  %v15984_v16 = vpack.c.bf16 %v961_v13, %v960_v10  ;;  %v9348_v10 = vld [vmem:[%s20286_s3 + $0xb8] sm:$0xff] }
 0x104   : > { %v15893_v23 = vmax.f32 %v558_v19, 0.0  ;;  %13406 = vmatpush3.bf16.msra.mxu1 %v15864_v6  ;;  %v11105_v24 = vpop.f32.mrb[8].mxu0  ;;  %v963_v19 = vld [vmem:[%s20290_s7 + $0x28] sm:$0xff] }
 0x105   : > { %20577 = vst [vmem:[#allocation17_spill] sm:$0xff] %v15896_v26  ;;  %v573_v27 = vadd.f32 %v11105_v24, %v15831_v49  ;;  %v567_v28 = vpop.f32.mrb[9].mxu0  ;;  %13408 = vmatprep.subr.bf16.mxu1 %v15882_v18  ;;  %20591 = vst [vmem:[#allocation31_spill] sm:$0xff] %v15984_v16  ;;  %v15996_v21 = vpack.c.bf16 %v963_v19, %v962_v17  ;;  %v965_v24 = vld [vmem:[%s20290_s7 + $0x38] sm:$0xff]  ;;  %v9349_v17 = vld [vmem:[%s20286_s3 + $0xc0] sm:$0xff] }
 0x106   : > { %20576 = vst [vmem:[#allocation16_spill] sm:$0xff] %v15893_v23  ;;  %v568_v31 = vadd.f32 %v15831_v49, %v567_v28  ;;  %11156 = vmatprep.mubr.f32.mxu1 %v15893_v23  ;;  %v966_v28 = vld [vmem:[%s20290_s7 + $0x40] sm:$0xff]  ;;  %v9350_v19 = vld [vmem:[%s20286_s3 + $0xc8] sm:$0xff] }
 0x107   : > { %11157 = vmatmul.mubr.f32.gmra.mrb[6].mxu1 %v15896_v26  ;;  %v15914_v37 = vmax.f32 %v573_v27, 0.0  ;;  %20592 = vst [vmem:[#allocation32_spill] sm:$0xff] %v15996_v21  ;;  %v16008_v27 = vpack.c.bf16 %v965_v24, %v964_v22  ;;  %v16116_v22 = vpack.c.bf16 %v9350_v19, %v9349_v17  ;;  %v9351_v24 = vld [vmem:[%s20286_s3 + $0xd0] sm:$0xff] }
 0x108   : > { %v15911_v34 = vmax.f32 %v568_v31, 0.0  ;;  %13410 = vmatpush3.bf16.msra.mxu1 %v15882_v18  ;;  %v11108_v36 = vpop.f32.mrb[10].mxu0  ;;  %v967_v31 = vld [vmem:[%s20290_s7 + $0x48] sm:$0xff]  ;;  %v9365_v19 = vld [vmem:[%s20288_s5 + $0xb0] sm:$0xff] }
 0x109   : > { %20580 = vst [vmem:[#allocation20_spill] sm:$0xff] %v15914_v37  ;;  %v583_v38 = vadd.f32 %v11108_v36, %v15831_v49  ;;  %v577_v39 = vpop.f32.mrb[11].mxu0  ;;  %13412 = vmatprep.subr.bf16.mxu1 %v15900_v29  ;;  %20593 = vst [vmem:[#allocation33_spill] sm:$0xff] %v16008_v27  ;;  %v16020_v32 = vpack.c.bf16 %v967_v31, %v966_v28  ;;  %v969_v36 = vld [vmem:[%s20290_s7 + $0x58] sm:$0xff] }
 0x10a   : > { %20579 = vst [vmem:[#allocation19_spill] sm:$0xff] %v15911_v34  ;;  %v578_v41 = vadd.f32 %v15831_v49, %v577_v39  ;;  %11159 = vmatprep.mubr.f32.mxu1 %v15911_v34  ;;  %v970_v39 = vld [vmem:[%s20290_s7 + $0x60] sm:$0xff]  ;;  %20602 = vst [vmem:[#allocation42_spill] sm:$0xff] %v16116_v22  ;;  %v9352_v28 = vld [vmem:[%s20286_s3 + $0xd8] sm:$0xff] }
 0x10b   : > { %11160 = vmatmul.mubr.f32.gmra.mrb[8].mxu1 %v15914_v37  ;;  %v15932_v47 = vmax.f32 %v583_v38, 0.0  ;;  %20594 = vst [vmem:[#allocation34_spill] sm:$0xff] %v16020_v32  ;;  %v16032_v38 = vpack.c.bf16 %v969_v36, %v968_v33  ;;  %v16128_v31 = vpack.c.bf16 %v9352_v28, %v9351_v24  ;;  %v9353_v33 = vld [vmem:[%s20286_s3 + $0xe0] sm:$0xff]  ;;  %v9354_v36 = vld [vmem:[%s20286_s3 + $0xe8] sm:$0xff]  ;;  %v9366_v24 = vld [vmem:[%s20288_s5 + $0xb8] sm:$0xff] }
 0x10c   : > { %v15929_v44 = vmax.f32 %v578_v41, 0.0  ;;  %13414 = vmatpush3.bf16.msra.mxu1 %v15900_v29  ;;  %v11111_v46 = vpop.f32.mrb[12].mxu0  ;;  %v971_v41 = vld [vmem:[%s20290_s7 + $0x68] sm:$0xff]  ;;  %v16200_v28 = vpack.c.bf16 %v9366_v24, %v9365_v19  ;;  %v9374_v19 = vld [vmem:[%s20288_s5 + $0xf8] sm:$0xff] }
 0x10d   : > { %20583 = vst [vmem:[#allocation23_spill] sm:$0xff] %v15932_v47  ;;  %v593_v50 = vadd.f32 %v11111_v46, %v15831_v49  ;;  %v587_v51 = vpop.f32.mrb[13].mxu0  ;;  %13416 = vmatprep.subr.bf16.mxu1 %v15918_v40  ;;  %20595 = vst [vmem:[#allocation35_spill] sm:$0xff] %v16032_v38  ;;  %v16044_v42 = vpack.c.bf16 %v971_v41, %v970_v39  ;;  %v973_v46 = vld [vmem:[%s20290_s7 + $0x78] sm:$0xff]  ;;  %v16140_v39 = vpack.c.bf16 %v9354_v36, %v9353_v33  ;;  %v9355_v41 = vld [vmem:[%s20286_s3 + $0xf0] sm:$0xff] }
 0x10e   : > { %20582 = vst [vmem:[#allocation22_spill] sm:$0xff] %v15929_v44  ;;  %v588_v53 = vadd.f32 %v15831_v49, %v587_v51  ;;  %11162 = vmatprep.mubr.f32.mxu1 %v15929_v44  ;;  %v9341_v51 = vld [vmem:[%s20286_s3 + $0x80] sm:$0xff]  ;;  %20603 = vst [vmem:[#allocation43_spill] sm:$0xff] %v16128_v31  ;;  %v9368_v36 = vld [vmem:[%s20288_s5 + $0xc8] sm:$0xff] }
 0x10f   : > { %11163 = vmatmul.mubr.f32.gmra.mrb[10].mxu1 %v15932_v47  ;;  %v15950_v60 = vmax.f32 %v593_v50, 0.0  ;;  %20596 = vst [vmem:[#allocation36_spill] sm:$0xff] %v16044_v42  ;;  %v16056_v50 = vpack.c.bf16 %v973_v46, %v972_v43  ;;  %20604 = vst [vmem:[#allocation44_spill] sm:$0xff] %v16140_v39  ;;  %v9356_v43 = vld [vmem:[%s20286_s3 + $0xf8] sm:$0xff]  ;;  %v9367_v33 = vld [vmem:[%s20288_s5 + $0xc0] sm:$0xff] }
 0x110   : > { %v15947_v57 = vmax.f32 %v588_v53, 0.0  ;;  %13418 = vmatpush3.bf16.msra.mxu1 %v15918_v40  ;;  %v11114_v59 = vpop.f32.mrb[14].mxu0  ;;  %v9342_v53 = vld [vmem:[%s20286_s3 + $0x88] sm:$0xff]  ;;  %v16152_v46 = vpack.c.bf16 %v9356_v43, %v9355_v41  ;;  %20609 = vst [vmem:[#allocation49_spill] sm:$0xff] %v16200_v28  ;;  %v16212_v41 = vpack.c.bf16 %v9368_v36, %v9367_v33  ;;  %v9369_v43 = vld [vmem:[%s20288_s5 + $0xd0] sm:$0xff] }
 0x111   : > { %20586 = vst [vmem:[#allocation26_spill] sm:$0xff] %v15950_v60  ;;  %v603_v62 = vadd.f32 %v11114_v59, %v15831_v49  ;;  %v597_v63 = vpop.f32.mrb[15].mxu0  ;;  %13420 = vmatprep.subr.bf16.mxu1 %v15936_v52  ;;  %20597 = vst [vmem:[#allocation37_spill] sm:$0xff] %v16056_v50  ;;  %v16068_v54 = vpack.c.bf16 %v9342_v53, %v9341_v51  ;;  %v9344_v59 = vld [vmem:[%s20286_s3 + $0x98] sm:$0xff]  ;;  %v9359_v51 = vld [vmem:[%s20288_s5 + $0x80] sm:$0xff] }
 0x112   : > { %20585 = vst [vmem:[#allocation25_spill] sm:$0xff] %v15947_v57  ;;  %v598_v2 = vadd.f32 %v15831_v49, %v597_v63  ;;  %11165 = vmatprep.mubr.f32.mxu1 %v15947_v57  ;;  %v15971_v49 = vpack.c.bf16 %v959_v5, %v958_v4  ;;  %v9345_v63 = vld [vmem:[%s20286_s3 + $0xa0] sm:$0xff]  ;;  %v9347_v5 = vld [vmem:[%s20286_s3 + $0xb0] sm:$0xff]  ;;  %20605 = vst [vmem:[#allocation45_spill] sm:$0xff] %v16152_v46 }
 0x113   : > { %11166 = vmatmul.mubr.f32.gmra.mrb[12].mxu1 %v15950_v60  ;;  %v15968_v9 = vmax.f32 %v603_v62, 0.0  ;;  %20598 = vst [vmem:[#allocation38_spill] sm:$0xff] %v16068_v54  ;;  %v16080_v62 = vpack.c.bf16 %v9344_v59, %v9343_v55  ;;  %v16104_v13 = vpack.c.bf16 %v9348_v10, %v9347_v5  ;;  %v9360_v53 = vld [vmem:[%s20288_s5 + $0x88] sm:$0xff]  ;;  %v9361_v59 = vld [vmem:[%s20288_s5 + $0x90] sm:$0xff]  ;;  %v9363_v5 = vld [vmem:[%s20288_s5 + $0xa0] sm:$0xff] }
 0x114   : > { %v15965_v7 = vmax.f32 %v598_v2, 0.0  ;;  %13422 = vmatpush3.bf16.msra.mxu1 %v15936_v52  ;;  %20590 = vst [vmem:[#allocation30_spill] sm:$0xff] %v15971_v49  ;;  %v9346_v2 = vld [vmem:[%s20286_s3 + $0xa8] sm:$0xff]  ;;  %v16164_v55 = vpack.c.bf16 %v9360_v53, %v9359_v51  ;;  %20610 = vst [vmem:[#allocation50_spill] sm:$0xff] %v16212_v41  ;;  %v9370_v51 = vld [vmem:[%s20288_s5 + $0xd8] sm:$0xff] }
 0x115   : > { %20589 = vst [vmem:[#allocation29_spill] sm:$0xff] %v15968_v9  ;;  %13424 = vmatprep.subr.bf16.mxu1 %v15954_v0  ;;  %20599 = vst [vmem:[#allocation39_spill] sm:$0xff] %v16080_v62  ;;  %v16092_v4 = vpack.c.bf16 %v9346_v2, %v9345_v63  ;;  %v9362_v63 = vld [vmem:[%s20288_s5 + $0x98] sm:$0xff]  ;;  %v9364_v10 = vld [vmem:[%s20288_s5 + $0xa8] sm:$0xff]  ;;  %v16224_v53 = vpack.c.bf16 %v9370_v51, %v9369_v43 }
 0x116   : > { %20588 = vst [vmem:[#allocation28_spill] sm:$0xff] %v15965_v7  ;;  %11168 = vmatprep.mubr.f32.mxu1 %v15965_v7  ;;  %20601 = vst [vmem:[#allocation41_spill] sm:$0xff] %v16104_v13  ;;  %v16176_v2 = vpack.c.bf16 %v9362_v63, %v9361_v59  ;;  %v16188_v17 = vpack.c.bf16 %v9364_v10, %v9363_v5  ;;  %v9371_v59 = vld [vmem:[%s20288_s5 + $0xe0] sm:$0xff]  ;;  %v9372_v63 = vld [vmem:[%s20288_s5 + $0xe8] sm:$0xff] }
 0x117   : > { %11169 = vmatmul.mubr.f32.gmra.mrb[14].mxu1 %v15968_v9  ;;  %20600 = vst [vmem:[#allocation40_spill] sm:$0xff] %v16092_v4  ;;  %20606 = vst [vmem:[#allocation46_spill] sm:$0xff] %v16164_v55  ;;  %v16236_v5 = vpack.c.bf16 %v9372_v63, %v9371_v59  ;;  %v9373_v10 = vld [vmem:[%s20288_s5 + $0xf0] sm:$0xff]  ;;  %v16275_v33 = vld [vmem:[%s20287_s4] ss:$0 sm:$0xff] }
 0x118   : > { %13426 = vmatpush3.bf16.msra.mxu1 %v15954_v0  ;;  %11203 = vmatprep.mubr.f32.mxu1 %v15841_v56  ;;  %20607 = vst [vmem:[#allocation47_spill] sm:$0xff] %v16176_v2  ;;  %20608 = vst [vmem:[#allocation48_spill] sm:$0xff] %v16188_v17  ;;  %v16248_v24 = vpack.c.bf16 %v9374_v19, %v9373_v10 }
 0x119   : > { %13428 = vmatprep.subr.bf16.mxu1 %v15971_v49  ;;  %20611 = vst [vmem:[#allocation51_spill] sm:$0xff] %v16224_v53  ;;  %20612 = vst [vmem:[#allocation52_spill] sm:$0xff] %v16236_v5 }
 0x11a   : > { %20613 = vst [vmem:[#allocation53_spill] sm:$0xff] %v16248_v24 }
 0x11b   : > { %11204 = vmatmul.mubr.f32.vlgmr.msra.gmra.mrb[16].mxu1 %v15843_v58 }
 0x11c   : > { %13430 = vmatpush3.bf16.msra.mxu1 %v15971_v49  ;;  %11206 = vmatprep.mubr.f32.mxu1 %v15857_v1 }
 0x11d   : > { %13432 = vmatprep.subr.bf16.mxu1 %v15984_v16 }
 0x11f   : > { %11207 = vmatmul.mubr.f32.gmra.mrb[18].mxu1 %v15860_v3 }
 0x120   : > { %13434 = vmatpush3.bf16.msra.mxu1 %v15984_v16  ;;  %11209 = vmatprep.mubr.f32.mxu1 %v15875_v12 }
 0x121   : > { %13436 = vmatprep.subr.bf16.mxu1 %v15996_v21 }
 0x123   : > { %11210 = vmatmul.mubr.f32.gmra.mrb[20].mxu1 %v15878_v14 }
 0x124   : > { %13438 = vmatpush3.bf16.msra.mxu1 %v15996_v21  ;;  %11212 = vmatprep.mubr.f32.mxu1 %v15893_v23 }
 0x125   : > { %13440 = vmatprep.subr.bf16.mxu1 %v16008_v27 }
 0x127   : > { %11213 = vmatmul.mubr.f32.gmra.mrb[22].mxu1 %v15896_v26 }
 0x128   : > { %13442 = vmatpush3.bf16.msra.mxu1 %v16008_v27  ;;  %11215 = vmatprep.mubr.f32.mxu1 %v15911_v34 }
 0x129   : > { %13444 = vmatprep.subr.bf16.mxu1 %v16020_v32 }
 0x12b   : > { %11216 = vmatmul.mubr.f32.gmra.mrb[24].mxu1 %v15914_v37 }
 0x12c   : > { %13446 = vmatpush3.bf16.msra.mxu1 %v16020_v32  ;;  %11218 = vmatprep.mubr.f32.mxu1 %v15929_v44 }
 0x12d   : > { %13448 = vmatprep.subr.bf16.mxu1 %v16032_v38 }
 0x12f   : > { %11219 = vmatmul.mubr.f32.gmra.mrb[26].mxu1 %v15932_v47 }
 0x130   : > { %13450 = vmatpush3.bf16.msra.mxu1 %v16032_v38  ;;  %11221 = vmatprep.mubr.f32.mxu1 %v15947_v57 }
 0x131   : > { %13452 = vmatprep.subr.bf16.mxu1 %v16044_v42 }
 0x133   : > { %11222 = vmatmul.mubr.f32.gmra.mrb[28].mxu1 %v15950_v60 }
 0x134   : > { %13454 = vmatpush3.bf16.msra.mxu1 %v16044_v42  ;;  %11224 = vmatprep.mubr.f32.mxu1 %v15965_v7 }
 0x135   : > { %13456 = vmatprep.subr.bf16.mxu1 %v16056_v50 }
 0x137   : > { %11225 = vmatmul.mubr.f32.gmra.mrb[30].mxu1 %v15968_v9 }
 0x138   : > { %13458 = vmatpush3.bf16.msra.mxu1 %v16056_v50  ;;  %11259 = vmatprep.mubr.f32.mxu1 %v15841_v56 }
 0x139   : > { %13508 = vmatprep.subr.bf16.mxu1 %v16068_v54 }
 0x13b   : > { %11260 = vmatmul.mubr.f32.vlgmr.msra.gmra.mrb[32].mxu1 %v15843_v58 }
 0x13c   : > { %13510 = vmatpush3.bf16.msra.mxu1 %v16068_v54  ;;  %11262 = vmatprep.mubr.f32.mxu1 %v15857_v1 }
 0x13d   : > { %13512 = vmatprep.subr.bf16.mxu1 %v16080_v62 }
 0x13f   : > { %11263 = vmatmul.mubr.f32.gmra.mrb[34].mxu1 %v15860_v3 }
 0x140   : > { %13514 = vmatpush3.bf16.msra.mxu1 %v16080_v62  ;;  %11265 = vmatprep.mubr.f32.mxu1 %v15875_v12 }
 0x141   : > { %13516 = vmatprep.subr.bf16.mxu1 %v16092_v4 }
 0x143   : > { %11266 = vmatmul.mubr.f32.gmra.mrb[36].mxu1 %v15878_v14 }
 0x144   : > { %13518 = vmatpush3.bf16.msra.mxu1 %v16092_v4  ;;  %11268 = vmatprep.mubr.f32.mxu1 %v15893_v23  ;;  %v20614_v4 = vmov 0 }
 0x145   : > { %13520 = vmatprep.subr.bf16.mxu1 %v16104_v13  ;;  %v20615_v4 = vsel %vm16314_vm1, 4294967295, %v20614_v4 }
 0x146   : > { %20616 = vst [vmem:[#allocation54_spill] sm:$0xff] %v20615_v4 }
 0x147   : > { %11269 = vmatmul.mubr.f32.gmra.mrb[38].mxu1 %v15896_v26 }
 0x148   : > { %13522 = vmatpush3.bf16.msra.mxu1 %v16104_v13  ;;  %11271 = vmatprep.mubr.f32.mxu1 %v15911_v34 }
 0x149   : > { %13524 = vmatprep.subr.bf16.mxu1 %v16116_v22 }
 0x14b   : > { %11272 = vmatmul.mubr.f32.gmra.mrb[40].mxu1 %v15914_v37 }
 0x14c   : > { %13526 = vmatpush3.bf16.msra.mxu1 %v16116_v22  ;;  %11274 = vmatprep.mubr.f32.mxu1 %v15929_v44 }
 0x14d   : > { %13528 = vmatprep.subr.bf16.mxu1 %v16128_v31 }
 0x14f   : > { %11275 = vmatmul.mubr.f32.gmra.mrb[42].mxu1 %v15932_v47 }
 0x150   : > { %13530 = vmatpush3.bf16.msra.mxu1 %v16128_v31  ;;  %11277 = vmatprep.mubr.f32.mxu1 %v15947_v57 }
 0x151   : > { %13532 = vmatprep.subr.bf16.mxu1 %v16140_v39 }
 0x153   : > { %11278 = vmatmul.mubr.f32.gmra.mrb[44].mxu1 %v15950_v60 }
 0x154   : > { %13534 = vmatpush3.bf16.msra.mxu1 %v16140_v39  ;;  %11280 = vmatprep.mubr.f32.mxu1 %v15965_v7 }
 0x155   : > { %13536 = vmatprep.subr.bf16.mxu1 %v16152_v46 }
 0x157   : > { %11281 = vmatmul.mubr.f32.gmra.mrb[46].mxu1 %v15968_v9 }
 0x158   : > { %13538 = vmatpush3.bf16.msra.mxu1 %v16152_v46  ;;  %11371 = vmatprep.mubr.f32.mxu1 %v15841_v56  ;;  %v9307_v46 = vld [vmem:[%s20289_s6] ss:$0 sm:$0xff] }
 0x159   : > { %13540 = vmatprep.subr.bf16.mxu1 %v16164_v55 }
 0x15b   : > { %11372 = vmatmul.mubr.f32.vlgmr.msra.gmra.mrb[48].mxu1 %v15843_v58 }
 0x15c   : > { %13542 = vmatpush3.bf16.msra.mxu1 %v16164_v55  ;;  %11374 = vmatprep.mubr.f32.mxu1 %v15857_v1 }
 0x15d   : > { %13544 = vmatprep.subr.bf16.mxu1 %v16176_v2 }
 0x15f   : > { %11375 = vmatmul.mubr.f32.gmra.mrb[50].mxu1 %v15860_v3 }
 0x160   : > { %13546 = vmatpush3.bf16.msra.mxu1 %v16176_v2  ;;  %11377 = vmatprep.mubr.f32.mxu1 %v15875_v12 }
 0x161   : > { %13548 = vmatprep.subr.bf16.mxu1 %v16188_v17 }
 0x163   : > { %11378 = vmatmul.mubr.f32.gmra.mrb[52].mxu1 %v15878_v14 }
 0x164   : > { %13550 = vmatpush3.bf16.msra.mxu1 %v16188_v17  ;;  %11380 = vmatprep.mubr.f32.mxu1 %v15893_v23 }
 0x165   : > { %13552 = vmatprep.subr.bf16.mxu1 %v16200_v28 }
 0x167   : > { %11381 = vmatmul.mubr.f32.gmra.mrb[54].mxu1 %v15896_v26 }
 0x168   : > { %13554 = vmatpush3.bf16.msra.mxu1 %v16200_v28  ;;  %11383 = vmatprep.mubr.f32.mxu1 %v15911_v34 }
 0x169   : > { %13556 = vmatprep.subr.bf16.mxu1 %v16212_v41 }
 0x16b   : > { %11384 = vmatmul.mubr.f32.gmra.mrb[56].mxu1 %v15914_v37 }
 0x16c   : > { %13558 = vmatpush3.bf16.msra.mxu1 %v16212_v41  ;;  %11386 = vmatprep.mubr.f32.mxu1 %v15929_v44 }
 0x16d   : > { %13560 = vmatprep.subr.bf16.mxu1 %v16224_v53 }
 0x16f   : > { %11387 = vmatmul.mubr.f32.gmra.mrb[58].mxu1 %v15932_v47 }
 0x170   : > { %13562 = vmatpush3.bf16.msra.mxu1 %v16224_v53  ;;  %11389 = vmatprep.mubr.f32.mxu1 %v15947_v57 }
 0x171   : > { %13564 = vmatprep.subr.bf16.mxu1 %v16236_v5 }
 0x173   : > { %11390 = vmatmul.mubr.f32.gmra.mrb[60].mxu1 %v15950_v60 }
 0x174   : > { %13566 = vmatpush3.bf16.msra.mxu1 %v16236_v5  ;;  %11392 = vmatprep.mubr.f32.mxu1 %v15965_v7 }
 0x175   : > { %13568 = vmatprep.subr.bf16.mxu1 %v16248_v24 }
 0x177   : > { %11393 = vmatmul.mubr.f32.gmra.mrb[62].mxu1 %v15968_v9 }
 0x178   : > { %13570 = vmatpush3.bf16.msra.mxu1 %v16248_v24  ;;  %11427 = vmatprep.mubr.f32.mxu1 %v15841_v56 }
 0x17b   : > { %11428 = vmatmul.mubr.f32.vlgmr.msra.gmra.mrb[64].mxu1 %v15843_v58 }
 0x17c   : > { %11430 = vmatprep.mubr.f32.mxu1 %v15857_v1 }
 0x17f   : > { %11431 = vmatmul.mubr.f32.gmra.mrb[66].mxu1 %v15860_v3 }
 0x180   : > { %11433 = vmatprep.mubr.f32.mxu1 %v15875_v12 }
 0x183   : > { %11434 = vmatmul.mubr.f32.gmra.mrb[68].mxu1 %v15878_v14 }
 0x184   : > { %11436 = vmatprep.mubr.f32.mxu1 %v15893_v23 }
 0x187   : > { %11437 = vmatmul.mubr.f32.gmra.mrb[70].mxu1 %v15896_v26 }
 0x188   : > { %11439 = vmatprep.mubr.f32.mxu1 %v15911_v34 }
 0x18b   : > { %11440 = vmatmul.mubr.f32.gmra.mrb[72].mxu1 %v15914_v37 }
 0x18c   : > { %11442 = vmatprep.mubr.f32.mxu1 %v15929_v44 }
 0x18f   : > { %11443 = vmatmul.mubr.f32.gmra.mrb[74].mxu1 %v15932_v47 }
 0x190   : > { %11445 = vmatprep.mubr.f32.mxu1 %v15947_v57 }
 0x193   : > { %11446 = vmatmul.mubr.f32.gmra.mrb[76].mxu1 %v15950_v60 }
 0x194   : > { %11448 = vmatprep.mubr.f32.mxu1 %v15965_v7 }
 0x197   : > { %11449 = vmatmul.mubr.f32.gmra.mrb[78].mxu1 %v15968_v9 }
 0x1ce   : > { %v16277_v36 = vpop.f32.mrb[0].mxu1 }
 0x1cf   : > { %v711_v43 = vpop.f32.mrb[1].mxu1 }
 0x1d0   : > { %v712_v51 = vadd.f32 %v16275_v33, %v711_v43 }
 0x1d2   : > { %v16280_v59 = vpop.f32.mrb[2].mxu1  ;;  %11315 = vmatprep.mubr.msk.f32.mxu0 %vm412_vm0, %v712_v51 }
 0x1d3   : > { %v16283_v63 = vpop.f32.mrb[3].mxu1 }
 0x1d6   : > { %v16285_v10 = vpop.f32.mrb[4].mxu1 }
 0x1d7   : > { %v16287_v19 = vpop.f32.mrb[5].mxu1 }
 0x1da   : > { %v16289_v24 = vpop.f32.mrb[6].mxu1 }
 0x1db   : > { %v16291_v5 = vpop.f32.mrb[7].mxu1 }
 0x1de   : > { %v16293_v53 = vpop.f32.mrb[8].mxu1 }
 0x1df   : > { %v16295_v41 = vpop.f32.mrb[9].mxu1 }
 0x1e2   : > { %v16297_v28 = vpop.f32.mrb[10].mxu1 }
 0x1e3   : > { %v16299_v43 = vpop.f32.mrb[11].mxu1 }
 0x1e6   : > { %v16301_v17 = vpop.f32.mrb[12].mxu1 }
 0x1e7   : > { %v16303_v51 = vpop.f32.mrb[13].mxu1 }
 0x1ea   : > { %v16305_v2 = vpop.f32.mrb[14].mxu1 }
 0x1eb   : > { %v16307_v55 = vpop.f32.mrb[15].mxu1 }
 0x1ee   : > { %v11205_v39 = vpop.f32.mrb[16].mxu1 }
 0x1ef   : > { %v885_v31 = vadd.f32 %v11205_v39, %v9307_v46  ;;  %v879_v22 = vpop.f32.mrb[17].mxu1 }
 0x1f0   : > { %v880_v13 = vadd.f32 %v9307_v46, %v879_v22 }
 0x1f2   : > { %v13459_v62 = vpack.c.bf16 %v885_v31, %v880_v13  ;;  %v11208_v54 = vpop.f32.mrb[18].mxu1 }
 0x1f3   : > { %v895_v50 = vadd.f32 %v11208_v54, %v9307_v46  ;;  %v889_v42 = vpop.f32.mrb[19].mxu1 }
 0x1f4   : > { %v890_v38 = vadd.f32 %v9307_v46, %v889_v42  ;;  %13461 = vmatprep.subr.msk.bf16.mxu0 %vm16314_vm1, %v13459_v62 }
 0x1f5   : > { %13464 = vmatpush3.bf16.xpose.msk.msra.mxu0 %vm16314_vm1, %v13459_v62 }
 0x1f6   : > { %v13465_v39 = vpack.c.bf16 %v895_v50, %v890_v38  ;;  %v11211_v32 = vpop.f32.mrb[20].mxu1 }
 0x1f7   : > { %v905_v22 = vadd.f32 %v11211_v32, %v9307_v46  ;;  %v899_v27 = vpop.f32.mrb[21].mxu1 }
 0x1f8   : > { %v900_v21 = vadd.f32 %v9307_v46, %v899_v27  ;;  %13467 = vmatprep.subr.msk.bf16.mxu0 %vm16314_vm1, %v13465_v39 }
 0x1fa   : > { %v13471_v16 = vpack.c.bf16 %v905_v22, %v900_v21  ;;  %v11214_v13 = vpop.f32.mrb[22].mxu1 }
 0x1fb   : > { %v915_v31 = vadd.f32 %v11214_v13, %v9307_v46  ;;  %v909_v54 = vpop.f32.mrb[23].mxu1 }
 0x1fc   : > { %v910_v49 = vadd.f32 %v9307_v46, %v909_v54 }
 0x1fd   : > { %13470 = vmatpush3.bf16.xpose.msk.msra.mxu0 %vm16314_vm1, %v13465_v39 }
 0x1fe   : > { %v13477_v42 = vpack.c.bf16 %v915_v31, %v910_v49  ;;  %v11217_v0 = vpop.f32.mrb[24].mxu1  ;;  %13473 = vmatprep.subr.msk.bf16.mxu0 %vm16314_vm1, %v13471_v16 }
 0x1ff   : > { %v925_v38 = vadd.f32 %v11217_v0, %v9307_v46  ;;  %v919_v32 = vpop.f32.mrb[25].mxu1 }
 0x200   : > { %v920_v50 = vadd.f32 %v9307_v46, %v919_v32 }
 0x202   : > { %v13483_v27 = vpack.c.bf16 %v925_v38, %v920_v50  ;;  %v11220_v62 = vpop.f32.mrb[26].mxu1 }
 0x203   : > { %v935_v52 = vadd.f32 %v11220_v62, %v9307_v46  ;;  %v929_v40 = vpop.f32.mrb[27].mxu1 }
 0x204   : > { %v930_v21 = vadd.f32 %v9307_v46, %v929_v40  ;;  %v9308_v40 = vld [vmem:[%s20291_s8] ss:$0 sm:$0xff] }
 0x205   : > { %13476 = vmatpush3.bf16.xpose.msk.msra.mxu0 %vm16314_vm1, %v13471_v16 }
 0x206   : > { %v13489_v22 = vpack.c.bf16 %v935_v52, %v930_v21  ;;  %v11223_v13 = vpop.f32.mrb[28].mxu1  ;;  %13479 = vmatprep.subr.msk.bf16.mxu0 %vm16314_vm1, %v13477_v42 }
 0x207   : > { %v945_v49 = vadd.f32 %v11223_v13, %v9307_v46  ;;  %v939_v39 = vpop.f32.mrb[29].mxu1 }
 0x208   : > { %v940_v31 = vadd.f32 %v9307_v46, %v939_v39 }
 0x20a   : > { %v13495_v54 = vpack.c.bf16 %v945_v49, %v940_v31  ;;  %v11226_v0 = vpop.f32.mrb[30].mxu1 }
 0x20b   : > { %v955_v29 = vadd.f32 %v11226_v0, %v9307_v46  ;;  %v949_v32 = vpop.f32.mrb[31].mxu1 }
 0x20c   : > { %v950_v38 = vadd.f32 %v9307_v46, %v949_v32 }
 0x20d   : > { %13482 = vmatpush3.bf16.xpose.msk.msra.mxu0 %vm16314_vm1, %v13477_v42 }
 0x20e   : > { %v13501_v52 = vpack.c.bf16 %v955_v29, %v950_v38  ;;  %v11261_v16 = vpop.f32.mrb[32].mxu1  ;;  %13485 = vmatprep.subr.msk.bf16.mxu0 %vm16314_vm1, %v13483_v27 }
 0x20f   : > { %v1053_v50 = vadd.f32 %v11261_v16, %v9308_v40  ;;  %v1047_v62 = vpop.f32.mrb[33].mxu1 }
 0x210   : > { %v1048_v21 = vadd.f32 %v9308_v40, %v1047_v62 }
 0x212   : > { %v11264_v13 = vpop.f32.mrb[34].mxu1  ;;  %v16339_v49 = vpack.c.bf16 %v1053_v50, %v1048_v21 }
 0x213   : > { %v1063_v39 = vadd.f32 %v11264_v13, %v9308_v40  ;;  %v1057_v46 = vpop.f32.mrb[35].mxu1 }
 0x214   : > { %v1058_v31 = vadd.f32 %v9308_v40, %v1057_v46 }
 0x215   : > { %13488 = vmatpush3.bf16.xpose.msk.msra.mxu0 %vm16314_vm1, %v13483_v27 }
 0x216   : > { %v11267_v0 = vpop.f32.mrb[36].mxu1  ;;  %13491 = vmatprep.subr.msk.bf16.mxu0 %vm16314_vm1, %v13489_v22  ;;  %v16345_v29 = vpack.c.bf16 %v1063_v39, %v1058_v31 }
 0x217   : > { %v1073_v42 = vadd.f32 %v11267_v0, %v9308_v40  ;;  %v1067_v32 = vpop.f32.mrb[37].mxu1 }
 0x218   : > { %v1068_v38 = vadd.f32 %v9308_v40, %v1067_v32 }
 0x21a   : > { %v11270_v16 = vpop.f32.mrb[38].mxu1  ;;  %v16347_v62 = vpack.c.bf16 %v1073_v42, %v1068_v38 }
 0x21b   : > { %v1083_v50 = vadd.f32 %v11270_v16, %v9308_v40  ;;  %v1077_v21 = vpop.f32.mrb[39].mxu1 }
 0x21c   : > { %v1078_v13 = vadd.f32 %v9308_v40, %v1077_v21 }
 0x21d   : > { %13494 = vmatpush3.bf16.xpose.msk.msra.mxu0 %vm16314_vm1, %v13489_v22 }
 0x21e   : > { %v11273_v46 = vpop.f32.mrb[40].mxu1  ;;  %13497 = vmatprep.subr.msk.bf16.mxu0 %vm16314_vm1, %v13495_v54  ;;  %v16353_v27 = vpack.c.bf16 %v1083_v50, %v1078_v13 }
 0x21f   : > { %v1093_v39 = vadd.f32 %v11273_v46, %v9308_v40  ;;  %v1087_v31 = vpop.f32.mrb[41].mxu1  ;;  %v9377_v46 = vld [vmem:[%s20290_s7 + $0x80] sm:$0xff] }
 0x220   : > { %v1088_v0 = vadd.f32 %v9308_v40, %v1087_v31 }
 0x222   : > { %v11276_v18 = vpop.f32.mrb[42].mxu1  ;;  %v16355_v32 = vpack.c.bf16 %v1093_v39, %v1088_v0 }
 0x223   : > { %v1103_v42 = vadd.f32 %v11276_v18, %v9308_v40  ;;  %v1097_v38 = vpop.f32.mrb[43].mxu1  ;;  %v9378_v18 = vld [vmem:[%s20290_s7 + $0x88] sm:$0xff] }
 0x224   : > { %v1098_v16 = vadd.f32 %v9308_v40, %v1097_v38  ;;  %v16369_v0 = vpack.c.bf16 %v9378_v18, %v9377_v46 }
 0x225   : > { %13500 = vmatpush3.bf16.xpose.msk.msra.mxu0 %vm16314_vm1, %v13495_v54 }
 0x226   : > { %v11279_v21 = vpop.f32.mrb[44].mxu1  ;;  %13503 = vmatprep.subr.msk.bf16.mxu0 %vm16314_vm1, %v13501_v52  ;;  %v16361_v22 = vpack.c.bf16 %v1103_v42, %v1098_v16  ;;  %20617 = vst [vmem:[#allocation55_spill] sm:$0xff] %v16369_v0  ;;  %v16378_v16 = vld [vmem:[%s20287_s4 + $0x1] ss:$0 sm:$0xff] }
 0x227   : > { %v1113_v50 = vadd.f32 %v11279_v21, %v9308_v40  ;;  %v1107_v13 = vpop.f32.mrb[45].mxu1 }
 0x228   : > { %v1108_v39 = vadd.f32 %v9308_v40, %v1107_v13 }
 0x22a   : > { %v11282_v31 = vpop.f32.mrb[46].mxu1  ;;  %v16371_v54 = vpack.c.bf16 %v1113_v50, %v1108_v39  ;;  %v9379_v50 = vld [vmem:[%s20290_s7 + $0x90] sm:$0xff] }
 0x22b   : > { %v1123_v38 = vadd.f32 %v11282_v31, %v9308_v40  ;;  %v1117_v6 = vpop.f32.mrb[47].mxu1  ;;  %v722_v31 = vadd.f32 %v16275_v33, %v16283_v63 }
 0x22c   : > { %v1118_v42 = vadd.f32 %v9308_v40, %v1117_v6  ;;  %v9380_v6 = vld [vmem:[%s20290_s7 + $0x98] sm:$0xff] }
 0x22d   : > { %13506 = vmatpush3.bf16.xpose.msk.msra.mxu0 %vm16314_vm1, %v13501_v52  ;;  %v717_v52 = vadd.f32 %v16277_v36, %v16275_v33  ;;  %v16397_v39 = vpack.c.bf16 %v9380_v6, %v9379_v50  ;;  %v727_v36 = vadd.f32 %v16280_v59, %v16275_v33  ;;  %v732_v6 = vadd.f32 %v16275_v33, %v16287_v19 }
 0x22e   : > { %v16380_v21 = vpop.f32.mrb[48].mxu1  ;;  %13572 = vmatprep.subr.bf16.mxu0 %v16369_v0  ;;  %v16383_v13 = vpack.c.bf16 %v1123_v38, %v1118_v42  ;;  %v9381_v42 = vld [vmem:[%s20290_s7 + $0xa0] sm:$0xff]  ;;  %v737_v59 = vadd.f32 %v16285_v10, %v16275_v33  ;;  %v747_v10 = vadd.f32 %v16289_v24, %v16275_v33  ;;  %v757_v24 = vadd.f32 %v16293_v53, %v16275_v33 }
 0x22f   : > { %v1666_v46 = vpop.f32.mrb[49].mxu1  ;;  %20619 = vst [vmem:[#allocation57_spill] sm:$0xff] %v16397_v39  ;;  %v767_v53 = vadd.f32 %v16297_v28, %v16275_v33  ;;  %v777_v28 = vadd.f32 %v16301_v17, %v16275_v33  ;;  %v787_v17 = vadd.f32 %v16305_v2, %v16275_v33 }
 0x230   : > { %20618 = vst [vmem:[#allocation56_spill] sm:$0xff] %v16383_v13  ;;  %v1667_v40 = vadd.f32 %v16378_v16, %v1666_v46  ;;  %v9382_v46 = vld [vmem:[%s20290_s7 + $0xa8] sm:$0xff] }
 0x231   : > { %v16417_v50 = vpack.c.bf16 %v9382_v46, %v9381_v42  ;;  %v742_v46 = vadd.f32 %v16275_v33, %v16291_v5 }
 0x232   : > { %v16394_v18 = vpop.f32.mrb[50].mxu1  ;;  %11539 = vmatprep.mubr.msk.f32.mxu1 %vm412_vm0, %v1667_v40 }
 0x233   : > { %v16401_v38 = vpop.f32.mrb[51].mxu1  ;;  %20620 = vst [vmem:[#allocation58_spill] sm:$0xff] %v16417_v50 }
 0x234   : > { %11316 = vmatmul.mubr.msk.f32.vlgmr.msra.gmra.mrb[16].mxu0 %vm412_vm0, %v717_v52  ;;  %v9383_v52 = vld [vmem:[%s20290_s7 + $0xb0] sm:$0xff] }
 0x235   : > { %11318 = vmatprep.mubr.msk.f32.mxu0 %vm412_vm0, %v722_v31  ;;  %13574 = vmatpush3.bf16.msra.mxu0 %v16369_v0  ;;  %v9384_v31 = vld [vmem:[%s20290_s7 + $0xb8] sm:$0xff] }
 0x236   : > { %v16414_v63 = vpop.f32.mrb[52].mxu1  ;;  %13576 = vmatprep.subr.bf16.mxu0 %v16397_v39  ;;  %v16437_v42 = vpack.c.bf16 %v9384_v31, %v9383_v52  ;;  %v752_v31 = vadd.f32 %v16275_v33, %v16295_v41 }
 0x237   : > { %v16421_v40 = vpop.f32.mrb[53].mxu1 }
 0x238   : > { %11319 = vmatmul.mubr.msk.f32.gmra.mrb[18].mxu0 %vm412_vm0, %v727_v36  ;;  %20621 = vst [vmem:[#allocation59_spill] sm:$0xff] %v16437_v42  ;;  %v9385_v36 = vld [vmem:[%s20290_s7 + $0xc0] sm:$0xff] }
 0x239   : > { %11321 = vmatprep.mubr.msk.f32.mxu0 %vm412_vm0, %v732_v6  ;;  %13578 = vmatpush3.bf16.msra.mxu0 %v16397_v39  ;;  %v9386_v6 = vld [vmem:[%s20290_s7 + $0xc8] sm:$0xff] }
 0x23a   : > { %v16434_v19 = vpop.f32.mrb[54].mxu1  ;;  %13580 = vmatprep.subr.bf16.mxu0 %v16417_v50  ;;  %v16457_v52 = vpack.c.bf16 %v9386_v6, %v9385_v36  ;;  %v762_v6 = vadd.f32 %v16275_v33, %v16299_v43 }
 0x23b   : > { %v16441_v0 = vpop.f32.mrb[55].mxu1 }
 0x23c   : > { %11322 = vmatmul.mubr.msk.f32.gmra.mrb[20].mxu0 %vm412_vm0, %v737_v59  ;;  %20622 = vst [vmem:[#allocation60_spill] sm:$0xff] %v16457_v52  ;;  %v9387_v59 = vld [vmem:[%s20290_s7 + $0xd0] sm:$0xff] }
 0x23d   : > { %11324 = vmatprep.mubr.msk.f32.mxu0 %vm412_vm0, %v742_v46  ;;  %13582 = vmatpush3.bf16.msra.mxu0 %v16417_v50  ;;  %v9388_v46 = vld [vmem:[%s20290_s7 + $0xd8] sm:$0xff] }
 0x23e   : > { %v16454_v5 = vpop.f32.mrb[56].mxu1  ;;  %13584 = vmatprep.subr.bf16.mxu0 %v16437_v42  ;;  %v16477_v36 = vpack.c.bf16 %v9388_v46, %v9387_v59  ;;  %v772_v46 = vadd.f32 %v16275_v33, %v16303_v51 }
 0x23f   : > { %v16461_v39 = vpop.f32.mrb[57].mxu1 }
 0x240   : > { %11325 = vmatmul.mubr.msk.f32.gmra.mrb[22].mxu0 %vm412_vm0, %v747_v10  ;;  %20623 = vst [vmem:[#allocation61_spill] sm:$0xff] %v16477_v36  ;;  %v9389_v10 = vld [vmem:[%s20290_s7 + $0xe0] sm:$0xff] }
 0x241   : > { %11327 = vmatprep.mubr.msk.f32.mxu0 %vm412_vm0, %v752_v31  ;;  %13586 = vmatpush3.bf16.msra.mxu0 %v16437_v42  ;;  %v9390_v31 = vld [vmem:[%s20290_s7 + $0xe8] sm:$0xff] }
 0x242   : > { %v16474_v41 = vpop.f32.mrb[58].mxu1  ;;  %13588 = vmatprep.subr.bf16.mxu0 %v16457_v52  ;;  %v16497_v59 = vpack.c.bf16 %v9390_v31, %v9389_v10  ;;  %v782_v31 = vadd.f32 %v16275_v33, %v16307_v55 }
 0x243   : > { %v16481_v50 = vpop.f32.mrb[59].mxu1 }
 0x244   : > { %11328 = vmatmul.mubr.msk.f32.gmra.mrb[24].mxu0 %vm412_vm0, %v757_v24  ;;  %20624 = vst [vmem:[#allocation62_spill] sm:$0xff] %v16497_v59  ;;  %v9391_v24 = vld [vmem:[%s20290_s7 + $0xf0] sm:$0xff] }
 0x245   : > { %11330 = vmatprep.mubr.msk.f32.mxu0 %vm412_vm0, %v762_v6  ;;  %13590 = vmatpush3.bf16.msra.mxu0 %v16457_v52  ;;  %v9392_v6 = vld [vmem:[%s20290_s7 + $0xf8] sm:$0xff] }
 0x246   : > { %v16494_v43 = vpop.f32.mrb[60].mxu1  ;;  %13592 = vmatprep.subr.bf16.mxu0 %v16477_v36  ;;  %v16517_v10 = vpack.c.bf16 %v9392_v6, %v9391_v24 }
 0x247   : > { %v16501_v42 = vpop.f32.mrb[61].mxu1 }
 0x248   : > { %11331 = vmatmul.mubr.msk.f32.gmra.mrb[26].mxu0 %vm412_vm0, %v767_v53  ;;  %20625 = vst [vmem:[#allocation63_spill] sm:$0xff] %v16517_v10  ;;  %v16527_v53 = vld [vmem:[%s20289_s6 + $0x1] ss:$0 sm:$0xff] }
 0x249   : > { %11333 = vmatprep.mubr.msk.f32.mxu0 %vm412_vm0, %v772_v46  ;;  %13594 = vmatpush3.bf16.msra.mxu0 %v16477_v36 }
 0x24a   : > { %v16514_v51 = vpop.f32.mrb[62].mxu1  ;;  %13596 = vmatprep.subr.bf16.mxu0 %v16497_v59 }
 0x24b   : > { %v16521_v52 = vpop.f32.mrb[63].mxu1 }
 0x24c   : > { %11334 = vmatmul.mubr.msk.f32.gmra.mrb[28].mxu0 %vm412_vm0, %v777_v28 }
 0x24d   : > { %11336 = vmatprep.mubr.msk.f32.mxu0 %vm412_vm0, %v782_v31  ;;  %13598 = vmatpush3.bf16.msra.mxu0 %v16497_v59 }
 0x24e   : > { %v11429_v46 = vpop.f32.mrb[64].mxu1  ;;  %13600 = vmatprep.subr.bf16.mxu0 %v16517_v10 }
 0x24f   : > { %v1842_v55 = vadd.f32 %v11429_v46, %v16527_v53  ;;  %v1836_v24 = vpop.f32.mrb[65].mxu1 }
 0x250   : > { %v1837_v6 = vadd.f32 %v16527_v53, %v1836_v24  ;;  %11337 = vmatmul.mubr.msk.f32.gmra.mrb[30].mxu0 %vm412_vm0, %v787_v17 }
 0x251   : > { %13602 = vmatpush3.bf16.msra.mxu0 %v16517_v10  ;;  %11483 = vmatprep.mubr.f32.mxu0 %v15841_v56 }
 0x252   : > { %v13603_v28 = vpack.c.bf16 %v1842_v55, %v1837_v6  ;;  %v11432_v31 = vpop.f32.mrb[66].mxu1 }
 0x253   : > { %v1852_v59 = vadd.f32 %v11432_v31, %v16527_v53  ;;  %v1846_v36 = vpop.f32.mrb[67].mxu1 }
 0x254   : > { %v1847_v2 = vadd.f32 %v16527_v53, %v1846_v36  ;;  %11484 = vmatmul.mubr.f32.vlgmr.msra.gmra.mrb[32].mxu0 %v15843_v58  ;;  %13605 = vmatprep.subr.msk.bf16.mxu1 %vm16314_vm1, %v13603_v28 }
 0x255   : > { %11486 = vmatprep.mubr.f32.mxu0 %v15857_v1  ;;  %13608 = vmatpush3.bf16.xpose.msk.msra.mxu1 %vm16314_vm1, %v13603_v28 }
 0x256   : > { %v13609_v33 = vpack.c.bf16 %v1852_v59, %v1847_v2  ;;  %v11435_v17 = vpop.f32.mrb[68].mxu1 }
 0x257   : > { %v1862_v46 = vadd.f32 %v11435_v17, %v16527_v53  ;;  %v1856_v55 = vpop.f32.mrb[69].mxu1 }
 0x258   : > { %v1857_v24 = vadd.f32 %v16527_v53, %v1856_v55  ;;  %11487 = vmatmul.mubr.f32.gmra.mrb[34].mxu0 %v15860_v3  ;;  %13611 = vmatprep.subr.msk.bf16.mxu1 %vm16314_vm1, %v13609_v33 }
 0x259   : > { %11489 = vmatprep.mubr.f32.mxu0 %v15875_v12 }
 0x25a   : > { %v13615_v36 = vpack.c.bf16 %v1862_v46, %v1857_v24  ;;  %v11438_v6 = vpop.f32.mrb[70].mxu1 }
 0x25b   : > { %v1872_v31 = vadd.f32 %v11438_v6, %v16527_v53  ;;  %v1866_v10 = vpop.f32.mrb[71].mxu1 }
 0x25c   : > { %v1867_v59 = vadd.f32 %v16527_v53, %v1866_v10  ;;  %11490 = vmatmul.mubr.f32.gmra.mrb[36].mxu0 %v15878_v14 }
 0x25d   : > { %11492 = vmatprep.mubr.f32.mxu0 %v15893_v23  ;;  %13614 = vmatpush3.bf16.xpose.msk.msra.mxu1 %vm16314_vm1, %v13609_v33 }
 0x25e   : > { %v13621_v28 = vpack.c.bf16 %v1872_v31, %v1867_v59  ;;  %v11441_v2 = vpop.f32.mrb[72].mxu1  ;;  %13617 = vmatprep.subr.msk.bf16.mxu1 %vm16314_vm1, %v13615_v36 }
 0x25f   : > { %v1882_v17 = vadd.f32 %v11441_v2, %v16527_v53  ;;  %v1876_v46 = vpop.f32.mrb[73].mxu1 }
 0x260   : > { %v1877_v55 = vadd.f32 %v16527_v53, %v1876_v46  ;;  %11493 = vmatmul.mubr.f32.gmra.mrb[38].mxu0 %v15896_v26 }
 0x261   : > { %11495 = vmatprep.mubr.f32.mxu0 %v15911_v34 }
 0x262   : > { %v13627_v10 = vpack.c.bf16 %v1882_v17, %v1877_v55  ;;  %v11444_v24 = vpop.f32.mrb[74].mxu1 }
 0x263   : > { %v1892_v6 = vadd.f32 %v11444_v24, %v16527_v53  ;;  %v1886_v61 = vpop.f32.mrb[75].mxu1 }
 0x264   : > { %v1887_v33 = vadd.f32 %v16527_v53, %v1886_v61  ;;  %11496 = vmatmul.mubr.f32.gmra.mrb[40].mxu0 %v15914_v37 }
 0x265   : > { %11498 = vmatprep.mubr.f32.mxu0 %v15929_v44  ;;  %13620 = vmatpush3.bf16.xpose.msk.msra.mxu1 %vm16314_vm1, %v13615_v36 }
 0x266   : > { %v13633_v31 = vpack.c.bf16 %v1892_v6, %v1887_v33  ;;  %v11447_v59 = vpop.f32.mrb[76].mxu1  ;;  %13623 = vmatprep.subr.msk.bf16.mxu1 %vm16314_vm1, %v13621_v28  ;;  %v9446_v33 = vld [vmem:[%s20286_s3 + $0x118] sm:$0xff] }
 0x267   : > { %v1902_v2 = vadd.f32 %v11447_v59, %v16527_v53  ;;  %v1896_v17 = vpop.f32.mrb[77].mxu1 }
 0x268   : > { %v1897_v46 = vadd.f32 %v16527_v53, %v1896_v17  ;;  %11499 = vmatmul.mubr.f32.gmra.mrb[42].mxu0 %v15932_v47  ;;  %v9447_v17 = vld [vmem:[%s20286_s3 + $0x120] sm:$0xff] }
 0x269   : > { %11501 = vmatprep.mubr.f32.mxu0 %v15947_v57 }
 0x26a   : > { %v13639_v61 = vpack.c.bf16 %v1902_v2, %v1897_v46  ;;  %v11450_v55 = vpop.f32.mrb[78].mxu1  ;;  %v1677_v2 = vadd.f32 %v16378_v16, %v16401_v38  ;;  %v9448_v46 = vld [vmem:[%s20286_s3 + $0x128] sm:$0xff] }
 0x26b   : > { %v1912_v24 = vadd.f32 %v11450_v55, %v16527_v53  ;;  %v1906_v13 = vpop.f32.mrb[79].mxu1  ;;  %v16633_v38 = vpack.c.bf16 %v9448_v46, %v9447_v17  ;;  %v9449_v55 = vld [vmem:[%s20286_s3 + $0x130] sm:$0xff]  ;;  %v9456_v17 = vld [vmem:[%s20286_s3 + $0x168] sm:$0xff]  ;;  %v1727_v46 = vadd.f32 %v16378_v16, %v16501_v42 }
 0x26c   : > { %v1907_v36 = vadd.f32 %v16527_v53, %v1906_v13  ;;  %11502 = vmatmul.mubr.f32.gmra.mrb[44].mxu0 %v15950_v60  ;;  %v9443_v13 = vld [vmem:[%s20286_s3 + $0x100] sm:$0xff]  ;;  %v9444_v53 = vld [vmem:[%s20286_s3 + $0x108] sm:$0xff] }
 0x26d   : > { %11504 = vmatprep.mubr.f32.mxu0 %v15965_v7  ;;  %13626 = vmatpush3.bf16.xpose.msk.msra.mxu1 %vm16314_vm1, %v13621_v28  ;;  %v16604_v28 = vpack.c.bf16 %v9444_v53, %v9443_v13  ;;  %20628 = vst [vmem:[#allocation66_spill] sm:$0xff] %v16633_v38  ;;  %v9452_v13 = vld [vmem:[%s20286_s3 + $0x148] sm:$0xff]  ;;  %v1707_v53 = vadd.f32 %v16378_v16, %v16461_v39 }
 0x26e   : > { %v13645_v6 = vpack.c.bf16 %v1912_v24, %v1907_v36  ;;  %13629 = vmatprep.subr.msk.bf16.mxu1 %vm16314_vm1, %v13627_v10  ;;  %v9450_v24 = vld [vmem:[%s20286_s3 + $0x138] sm:$0xff]  ;;  %v1697_v36 = vadd.f32 %v16378_v16, %v16441_v0 }
 0x26f   : > { %20626 = vst [vmem:[#allocation64_spill] sm:$0xff] %v16604_v28 }
 0x270   : > { %11505 = vmatmul.mubr.f32.gmra.mrb[46].mxu0 %v15968_v9 }
 0x275   : > { %13632 = vmatpush3.bf16.xpose.msk.msra.mxu1 %vm16314_vm1, %v13627_v10  ;;  %v9445_v10 = vld [vmem:[%s20286_s3 + $0x110] sm:$0xff] }
 0x276   : > { %13635 = vmatprep.subr.msk.bf16.mxu1 %vm16314_vm1, %v13633_v31  ;;  %v16617_v59 = vpack.c.bf16 %v9446_v33, %v9445_v10  ;;  %v9453_v10 = vld [vmem:[%s20286_s3 + $0x150] sm:$0xff]  ;;  %v9454_v33 = vld [vmem:[%s20286_s3 + $0x158] sm:$0xff] }
 0x277   : > { %v16681_v39 = vpack.c.bf16 %v9454_v33, %v9453_v10  ;;  %v9486_v10 = vld [vmem:[%s20290_s7 + $0x138] sm:$0xff] }
 0x278   : > { %20627 = vst [vmem:[#allocation65_spill] sm:$0xff] %v16617_v59 }
 0x279   : > { %20631 = vst [vmem:[#allocation69_spill] sm:$0xff] %v16681_v39 }
 0x27d   : > { %13638 = vmatpush3.bf16.xpose.msk.msra.mxu1 %vm16314_vm1, %v13633_v31  ;;  %v1672_v31 = vadd.f32 %v16380_v21, %v16378_v16  ;;  %v1682_v21 = vadd.f32 %v16394_v18, %v16378_v16  ;;  %v1692_v18 = vadd.f32 %v16414_v63, %v16378_v16  ;;  %v1702_v63 = vadd.f32 %v16434_v19, %v16378_v16 }
 0x27e   : > { %13641 = vmatprep.subr.msk.bf16.mxu1 %vm16314_vm1, %v13639_v61  ;;  %v1712_v19 = vadd.f32 %v16454_v5, %v16378_v16  ;;  %v1722_v5 = vadd.f32 %v16474_v41, %v16378_v16  ;;  %v1732_v41 = vadd.f32 %v16494_v43, %v16378_v16  ;;  %v1742_v43 = vadd.f32 %v16514_v51, %v16378_v16  ;;  %v9483_v51 = vld [vmem:[%s20290_s7 + $0x120] sm:$0xff] }
 0x285   : > { %13644 = vmatpush3.bf16.xpose.msk.msra.mxu1 %vm16314_vm1, %v13639_v61  ;;  %v1687_v61 = vadd.f32 %v16378_v16, %v16421_v40  ;;  %v16649_v40 = vpack.c.bf16 %v9450_v24, %v9449_v55  ;;  %v1737_v55 = vadd.f32 %v16378_v16, %v16521_v52  ;;  %v9479_v24 = vld [vmem:[%s20290_s7 + $0x100] sm:$0xff] }
 0x286   : > { %13647 = vmatprep.subr.msk.bf16.mxu1 %vm16314_vm1, %v13645_v6 }
 0x287   : > { %20629 = vst [vmem:[#allocation67_spill] sm:$0xff] %v16649_v40 }
 0x28d   : > { %13650 = vmatpush3.bf16.xpose.msk.msra.mxu1 %vm16314_vm1, %v13645_v6  ;;  %v9451_v6 = vld [vmem:[%s20286_s3 + $0x140] sm:$0xff] }
 0x28e   : > { %13716 = vmatprep.subr.bf16.mxu1 %v16604_v28  ;;  %v16665_v0 = vpack.c.bf16 %v9452_v13, %v9451_v6  ;;  %v9482_v6 = vld [vmem:[%s20290_s7 + $0x118] sm:$0xff]  ;;  %v9484_v13 = vld [vmem:[%s20290_s7 + $0x128] sm:$0xff] }
 0x290   : > { %20630 = vst [vmem:[#allocation68_spill] sm:$0xff] %v16665_v0 }
 0x294   : > { %11540 = vmatmul.mubr.msk.f32.vlgmr.msra.gmra.mrb[80].mxu1 %vm412_vm0, %v1672_v31  ;;  %v1717_v31 = vadd.f32 %v16378_v16, %v16481_v50 }
 0x295   : > { %11542 = vmatprep.mubr.msk.f32.mxu1 %vm412_vm0, %v1677_v2  ;;  %13718 = vmatpush3.bf16.msra.mxu1 %v16604_v28  ;;  %v9455_v2 = vld [vmem:[%s20286_s3 + $0x160] sm:$0xff] }
 0x296   : > { %13720 = vmatprep.subr.bf16.mxu1 %v16617_v59  ;;  %v16697_v50 = vpack.c.bf16 %v9456_v17, %v9455_v2  ;;  %v9489_v17 = vld [vmem:[%s20290_s7 + $0x150] sm:$0xff] }
 0x298   : > { %11543 = vmatmul.mubr.msk.f32.gmra.mrb[82].mxu1 %vm412_vm0, %v1682_v21  ;;  %20632 = vst [vmem:[#allocation70_spill] sm:$0xff] %v16697_v50  ;;  %v9457_v21 = vld [vmem:[%s20286_s3 + $0x170] sm:$0xff] }
 0x299   : > { %11545 = vmatprep.mubr.msk.f32.mxu1 %vm412_vm0, %v1687_v61  ;;  %13722 = vmatpush3.bf16.msra.mxu1 %v16617_v59  ;;  %v9458_v61 = vld [vmem:[%s20286_s3 + $0x178] sm:$0xff] }
 0x29a   : > { %13724 = vmatprep.subr.bf16.mxu1 %v16633_v38  ;;  %v16713_v42 = vpack.c.bf16 %v9458_v61, %v9457_v21  ;;  %v9491_v21 = vld [vmem:[%s20290_s7 + $0x160] sm:$0xff]  ;;  %v9492_v61 = vld [vmem:[%s20290_s7 + $0x168] sm:$0xff] }
 0x29c   : > { %11546 = vmatmul.mubr.msk.f32.gmra.mrb[84].mxu1 %vm412_vm0, %v1692_v18  ;;  %20633 = vst [vmem:[#allocation71_spill] sm:$0xff] %v16713_v42  ;;  %v9480_v18 = vld [vmem:[%s20290_s7 + $0x108] sm:$0xff] }
 0x29d   : > { %11548 = vmatprep.mubr.msk.f32.mxu1 %vm412_vm0, %v1697_v36  ;;  %13726 = vmatpush3.bf16.msra.mxu1 %v16633_v38  ;;  %v16729_v52 = vpack.c.bf16 %v9480_v18, %v9479_v24  ;;  %v9481_v36 = vld [vmem:[%s20290_s7 + $0x110] sm:$0xff]  ;;  %v9494_v24 = vld [vmem:[%s20290_s7 + $0x178] sm:$0xff] }
 0x29e   : > { %13728 = vmatprep.subr.bf16.mxu1 %v16649_v40  ;;  %v16741_v16 = vpack.c.bf16 %v9482_v6, %v9481_v36  ;;  %v9546_v36 = vld [vmem:[%s20286_s3 + $0x188] sm:$0xff] }
 0x29f   : > { %20634 = vst [vmem:[#allocation72_spill] sm:$0xff] %v16729_v52 }
 0x2a0   : > { %11549 = vmatmul.mubr.msk.f32.gmra.mrb[86].mxu1 %vm412_vm0, %v1702_v63  ;;  %20635 = vst [vmem:[#allocation73_spill] sm:$0xff] %v16741_v16  ;;  %v16753_v63 = vpack.c.bf16 %v9484_v13, %v9483_v51  ;;  %v9547_v51 = vld [vmem:[%s20286_s3 + $0x190] sm:$0xff]  ;;  %v9548_v13 = vld [vmem:[%s20286_s3 + $0x198] sm:$0xff] }
 0x2a1   : > { %11551 = vmatprep.mubr.msk.f32.mxu1 %vm412_vm0, %v1707_v53  ;;  %13730 = vmatpush3.bf16.msra.mxu1 %v16649_v40  ;;  %v9485_v53 = vld [vmem:[%s20290_s7 + $0x130] sm:$0xff] }
 0x2a2   : > { %13732 = vmatprep.subr.bf16.mxu1 %v16665_v0  ;;  %20636 = vst [vmem:[#allocation74_spill] sm:$0xff] %v16753_v63  ;;  %v16765_v33 = vpack.c.bf16 %v9486_v10, %v9485_v53  ;;  %v16837_v53 = vpack.c.bf16 %v9548_v13, %v9547_v51  ;;  %v9549_v10 = vld [vmem:[%s20286_s3 + $0x1a0] sm:$0xff] }
 0x2a3   : > { %v9557_v13 = vld [vmem:[%s20286_s3 + $0x1e0] sm:$0xff] }
 0x2a4   : > { %11552 = vmatmul.mubr.msk.f32.gmra.mrb[88].mxu1 %vm412_vm0, %v1712_v19  ;;  %20637 = vst [vmem:[#allocation75_spill] sm:$0xff] %v16765_v33  ;;  %v9487_v19 = vld [vmem:[%s20290_s7 + $0x140] sm:$0xff]  ;;  %20643 = vst [vmem:[#allocation81_spill] sm:$0xff] %v16837_v53 }
 0x2a5   : > { %11554 = vmatprep.mubr.msk.f32.mxu1 %vm412_vm0, %v1717_v31  ;;  %13734 = vmatpush3.bf16.msra.mxu1 %v16665_v0  ;;  %v9488_v31 = vld [vmem:[%s20290_s7 + $0x148] sm:$0xff] }
 0x2a6   : > { %13736 = vmatprep.subr.bf16.mxu1 %v16681_v39  ;;  %v16777_v2 = vpack.c.bf16 %v9488_v31, %v9487_v19  ;;  %v9550_v19 = vld [vmem:[%s20286_s3 + $0x1a8] sm:$0xff] }
 0x2a7   : > { %v16849_v31 = vpack.c.bf16 %v9550_v19, %v9549_v10  ;;  %v9558_v10 = vld [vmem:[%s20286_s3 + $0x1e8] sm:$0xff] }
 0x2a8   : > { %11555 = vmatmul.mubr.msk.f32.gmra.mrb[90].mxu1 %vm412_vm0, %v1722_v5  ;;  %20638 = vst [vmem:[#allocation76_spill] sm:$0xff] %v16777_v2  ;;  %v9490_v5 = vld [vmem:[%s20290_s7 + $0x158] sm:$0xff]  ;;  %v16897_v19 = vpack.c.bf16 %v9558_v10, %v9557_v13  ;;  %v9565_v13 = vld [vmem:[%s20288_s5 + $0x190] sm:$0xff] }
 0x2a9   : > { %11557 = vmatprep.mubr.msk.f32.mxu1 %vm412_vm0, %v1727_v46  ;;  %13738 = vmatpush3.bf16.msra.mxu1 %v16681_v39  ;;  %v16789_v46 = vpack.c.bf16 %v9490_v5, %v9489_v17  ;;  %20644 = vst [vmem:[#allocation82_spill] sm:$0xff] %v16849_v31  ;;  %v9551_v17 = vld [vmem:[%s20286_s3 + $0x1b0] sm:$0xff]  ;;  %v9552_v5 = vld [vmem:[%s20286_s3 + $0x1b8] sm:$0xff] }
 0x2aa   : > { %13740 = vmatprep.subr.bf16.mxu1 %v16697_v50  ;;  %20648 = vst [vmem:[#allocation86_spill] sm:$0xff] %v16897_v19  ;;  %v9566_v10 = vld [vmem:[%s20288_s5 + $0x198] sm:$0xff]  ;;  %v9595_v39 = vld [vmem:[%s20290_s7 + $0x1f0] sm:$0xff] }
 0x2ab   : > { %20639 = vst [vmem:[#allocation77_spill] sm:$0xff] %v16789_v46 }
 0x2ac   : > { %11558 = vmatmul.mubr.msk.f32.gmra.mrb[92].mxu1 %vm412_vm0, %v1732_v41  ;;  %v16801_v41 = vpack.c.bf16 %v9492_v61, %v9491_v21  ;;  %v16861_v21 = vpack.c.bf16 %v9552_v5, %v9551_v17  ;;  %v9553_v61 = vld [vmem:[%s20286_s3 + $0x1c0] sm:$0xff]  ;;  %v9559_v17 = vld [vmem:[%s20286_s3 + $0x1f0] sm:$0xff]  ;;  %v9560_v5 = vld [vmem:[%s20286_s3 + $0x1f8] sm:$0xff] }
 0x2ad   : > { %11560 = vmatprep.mubr.msk.f32.mxu1 %vm412_vm0, %v1737_v55  ;;  %13742 = vmatpush3.bf16.msra.mxu1 %v16697_v50  ;;  %v9493_v55 = vld [vmem:[%s20290_s7 + $0x170] sm:$0xff] }
 0x2ae   : > { %13744 = vmatprep.subr.bf16.mxu1 %v16713_v42  ;;  %20640 = vst [vmem:[#allocation78_spill] sm:$0xff] %v16801_v41  ;;  %v16813_v18 = vpack.c.bf16 %v9494_v24, %v9493_v55  ;;  %20645 = vst [vmem:[#allocation83_spill] sm:$0xff] %v16861_v21  ;;  %v9554_v55 = vld [vmem:[%s20286_s3 + $0x1c8] sm:$0xff] }
 0x2af   : > { %v16873_v24 = vpack.c.bf16 %v9554_v55, %v9553_v61  ;;  %v16909_v61 = vpack.c.bf16 %v9560_v5, %v9559_v17  ;;  %v9563_v55 = vld [vmem:[%s20288_s5 + $0x180] sm:$0xff]  ;;  %v16933_v17 = vpack.c.bf16 %v9566_v10, %v9565_v13  ;;  %v9569_v13 = vld [vmem:[%s20288_s5 + $0x1b0] sm:$0xff]  ;;  %v9570_v10 = vld [vmem:[%s20288_s5 + $0x1b8] sm:$0xff] }
 0x2b0   : > { %11561 = vmatmul.mubr.msk.f32.gmra.mrb[94].mxu1 %vm412_vm0, %v1742_v43  ;;  %20641 = vst [vmem:[#allocation79_spill] sm:$0xff] %v16813_v18  ;;  %v9545_v43 = vld [vmem:[%s20286_s3 + $0x180] sm:$0xff] }
 0x2b1   : > { %13746 = vmatpush3.bf16.msra.mxu1 %v16713_v42  ;;  %11707 = vmatprep.mubr.f32.mxu1 %v15841_v56  ;;  %v16825_v6 = vpack.c.bf16 %v9546_v36, %v9545_v43  ;;  %20646 = vst [vmem:[#allocation84_spill] sm:$0xff] %v16873_v24  ;;  %v9555_v43 = vld [vmem:[%s20286_s3 + $0x1d0] sm:$0xff]  ;;  %v9556_v36 = vld [vmem:[%s20286_s3 + $0x1d8] sm:$0xff]  ;;  %20649 = vst [vmem:[#allocation87_spill] sm:$0xff] %v16909_v61 }
 0x2b2   : > { %13780 = vmatprep.subr.bf16.mxu1 %v16729_v52  ;;  %v16885_v51 = vpack.c.bf16 %v9556_v36, %v9555_v43  ;;  %v9564_v43 = vld [vmem:[%s20288_s5 + $0x188] sm:$0xff]  ;;  %20651 = vst [vmem:[#allocation89_spill] sm:$0xff] %v16933_v17  ;;  %v9567_v5 = vld [vmem:[%s20288_s5 + $0x1a0] sm:$0xff] }
 0x2b3   : > { %20642 = vst [vmem:[#allocation80_spill] sm:$0xff] %v16825_v6  ;;  %v16921_v36 = vpack.c.bf16 %v9564_v43, %v9563_v55  ;;  %v9568_v55 = vld [vmem:[%s20288_s5 + $0x1a8] sm:$0xff] }
 0x2b4   : > { %11708 = vmatmul.mubr.f32.vlgmr.msra.gmra.mrb[96].mxu1 %v15843_v58  ;;  %20647 = vst [vmem:[#allocation85_spill] sm:$0xff] %v16885_v51  ;;  %v16945_v43 = vpack.c.bf16 %v9568_v55, %v9567_v5  ;;  %v9571_v5 = vld [vmem:[%s20288_s5 + $0x1c0] sm:$0xff]  ;;  %v9572_v55 = vld [vmem:[%s20288_s5 + $0x1c8] sm:$0xff] }
 0x2b5   : > { %11710 = vmatprep.mubr.f32.mxu1 %v15857_v1  ;;  %13782 = vmatpush3.bf16.msra.mxu1 %v16729_v52  ;;  %20650 = vst [vmem:[#allocation88_spill] sm:$0xff] %v16921_v36 }
 0x2b6   : > { %13784 = vmatprep.subr.bf16.mxu1 %v16741_v16  ;;  %20652 = vst [vmem:[#allocation90_spill] sm:$0xff] %v16945_v43 }
 0x2b8   : > { %11711 = vmatmul.mubr.f32.gmra.mrb[98].mxu1 %v15860_v3 }
 0x2b9   : > { %11713 = vmatprep.mubr.f32.mxu1 %v15875_v12  ;;  %13786 = vmatpush3.bf16.msra.mxu1 %v16741_v16  ;;  %v9594_v16 = vld [vmem:[%s20290_s7 + $0x1e8] sm:$0xff] }
 0x2ba   : > { %13788 = vmatprep.subr.bf16.mxu1 %v16753_v63 }
 0x2bc   : > { %11714 = vmatmul.mubr.f32.gmra.mrb[100].mxu1 %v15878_v14 }
 0x2bd   : > { %11716 = vmatprep.mubr.f32.mxu1 %v15893_v23  ;;  %13790 = vmatpush3.bf16.msra.mxu1 %v16753_v63 }
 0x2be   : > { %13792 = vmatprep.subr.bf16.mxu1 %v16765_v33 }
 0x2c0   : > { %11717 = vmatmul.mubr.f32.gmra.mrb[102].mxu1 %v15896_v26 }
 0x2c1   : > { %11719 = vmatprep.mubr.f32.mxu1 %v15911_v34  ;;  %13794 = vmatpush3.bf16.msra.mxu1 %v16765_v33  ;;  %v9592_v33 = vld [vmem:[%s20290_s7 + $0x1d8] sm:$0xff] }
 0x2c2   : > { %13796 = vmatprep.subr.bf16.mxu1 %v16777_v2 }
 0x2c4   : > { %11720 = vmatmul.mubr.f32.gmra.mrb[104].mxu1 %v15914_v37 }
 0x2c5   : > { %11722 = vmatprep.mubr.f32.mxu1 %v15929_v44  ;;  %13798 = vmatpush3.bf16.msra.mxu1 %v16777_v2 }
 0x2c6   : > { %13800 = vmatprep.subr.bf16.mxu1 %v16789_v46 }
 0x2c8   : > { %11723 = vmatmul.mubr.f32.gmra.mrb[106].mxu1 %v15932_v47 }
 0x2c9   : > { %11725 = vmatprep.mubr.f32.mxu1 %v15947_v57  ;;  %13802 = vmatpush3.bf16.msra.mxu1 %v16789_v46  ;;  %v9590_v46 = vld [vmem:[%s20290_s7 + $0x1c8] sm:$0xff] }
 0x2ca   : > { %13804 = vmatprep.subr.bf16.mxu1 %v16801_v41 }
 0x2cc   : > { %11726 = vmatmul.mubr.f32.gmra.mrb[108].mxu1 %v15950_v60 }
 0x2cd   : > { %11728 = vmatprep.mubr.f32.mxu1 %v15965_v7  ;;  %13806 = vmatpush3.bf16.msra.mxu1 %v16801_v41 }
 0x2ce   : > { %13808 = vmatprep.subr.bf16.mxu1 %v16813_v18 }
 0x2d0   : > { %11729 = vmatmul.mubr.f32.gmra.mrb[110].mxu1 %v15968_v9 }
 0x2d1   : > { %13810 = vmatpush3.bf16.msra.mxu1 %v16813_v18  ;;  %11819 = vmatprep.mubr.f32.mxu1 %v15841_v56  ;;  %v9588_v18 = vld [vmem:[%s20290_s7 + $0x1b8] sm:$0xff] }
 0x2d2   : > { %13892 = vmatprep.subr.bf16.mxu1 %v16825_v6 }
 0x2d4   : > { %11820 = vmatmul.mubr.f32.vlgmr.msra.gmra.mrb[112].mxu1 %v15843_v58 }
 0x2d5   : > { %11822 = vmatprep.mubr.f32.mxu1 %v15857_v1  ;;  %13894 = vmatpush3.bf16.msra.mxu1 %v16825_v6 }
 0x2d6   : > { %13896 = vmatprep.subr.bf16.mxu1 %v16837_v53 }
 0x2d8   : > { %11823 = vmatmul.mubr.f32.gmra.mrb[114].mxu1 %v15860_v3 }
 0x2d9   : > { %11825 = vmatprep.mubr.f32.mxu1 %v15875_v12  ;;  %13898 = vmatpush3.bf16.msra.mxu1 %v16837_v53  ;;  %v9586_v53 = vld [vmem:[%s20290_s7 + $0x1a8] sm:$0xff] }
 0x2da   : > { %13900 = vmatprep.subr.bf16.mxu1 %v16849_v31 }
 0x2dc   : > { %11826 = vmatmul.mubr.f32.gmra.mrb[116].mxu1 %v15878_v14 }
 0x2dd   : > { %11828 = vmatprep.mubr.f32.mxu1 %v15893_v23  ;;  %13902 = vmatpush3.bf16.msra.mxu1 %v16849_v31 }
 0x2de   : > { %13904 = vmatprep.subr.bf16.mxu1 %v16861_v21 }
 0x2e0   : > { %11829 = vmatmul.mubr.f32.gmra.mrb[118].mxu1 %v15896_v26 }
 0x2e1   : > { %11831 = vmatprep.mubr.f32.mxu1 %v15911_v34  ;;  %13906 = vmatpush3.bf16.msra.mxu1 %v16861_v21  ;;  %v9584_v21 = vld [vmem:[%s20290_s7 + $0x198] sm:$0xff] }
 0x2e2   : > { %13908 = vmatprep.subr.bf16.mxu1 %v16873_v24 }
 0x2e4   : > { %11832 = vmatmul.mubr.f32.gmra.mrb[120].mxu1 %v15914_v37 }
 0x2e5   : > { %11834 = vmatprep.mubr.f32.mxu1 %v15929_v44  ;;  %13910 = vmatpush3.bf16.msra.mxu1 %v16873_v24 }
 0x2e6   : > { %13912 = vmatprep.subr.bf16.mxu1 %v16885_v51 }
 0x2e8   : > { %11835 = vmatmul.mubr.f32.gmra.mrb[122].mxu1 %v15932_v47 }
 0x2e9   : > { %11837 = vmatprep.mubr.f32.mxu1 %v15947_v57  ;;  %13914 = vmatpush3.bf16.msra.mxu1 %v16885_v51  ;;  %v9582_v51 = vld [vmem:[%s20290_s7 + $0x188] sm:$0xff] }
 0x2ea   : > { %13916 = vmatprep.subr.bf16.mxu1 %v16897_v19 }
 0x2ec   : > { %11838 = vmatmul.mubr.f32.gmra.mrb[124].mxu1 %v15950_v60 }
 0x2ed   : > { %11840 = vmatprep.mubr.f32.mxu1 %v15965_v7  ;;  %13918 = vmatpush3.bf16.msra.mxu1 %v16897_v19 }
 0x2ee   : > { %13920 = vmatprep.subr.bf16.mxu1 %v16909_v61 }
 0x2f0   : > { %11841 = vmatmul.mubr.f32.gmra.mrb[126].mxu1 %v15968_v9 }
 0x2f1   : > { %13922 = vmatpush3.bf16.msra.mxu1 %v16909_v61  ;;  %11987 = vmatprep.mubr.f32.mxu1 %v15841_v56  ;;  %v9578_v61 = vld [vmem:[%s20288_s5 + $0x1f8] sm:$0xff] }
 0x2f2   : > { %13924 = vmatprep.subr.bf16.mxu1 %v16921_v36 }
 0x2f4   : > { %11988 = vmatmul.mubr.f32.vlgmr.msra.gmra.mrb[128].mxu1 %v15843_v58 }
 0x2f5   : > { %11990 = vmatprep.mubr.f32.mxu1 %v15857_v1  ;;  %13926 = vmatpush3.bf16.msra.mxu1 %v16921_v36  ;;  %v16957_v36 = vpack.c.bf16 %v9570_v10, %v9569_v13  ;;  %v9573_v13 = vld [vmem:[%s20288_s5 + $0x1d0] sm:$0xff]  ;;  %v9574_v10 = vld [vmem:[%s20288_s5 + $0x1d8] sm:$0xff] }
 0x2f6   : > { %13928 = vmatprep.subr.bf16.mxu1 %v16933_v17 }
 0x2f7   : > { %20653 = vst [vmem:[#allocation91_spill] sm:$0xff] %v16957_v36 }
 0x2f8   : > { %11991 = vmatmul.mubr.f32.gmra.mrb[130].mxu1 %v15860_v3 }
 0x2f9   : > { %11993 = vmatprep.mubr.f32.mxu1 %v15875_v12  ;;  %13930 = vmatpush3.bf16.msra.mxu1 %v16933_v17  ;;  %v16969_v17 = vpack.c.bf16 %v9572_v55, %v9571_v5  ;;  %v9575_v5 = vld [vmem:[%s20288_s5 + $0x1e0] sm:$0xff]  ;;  %v9576_v55 = vld [vmem:[%s20288_s5 + $0x1e8] sm:$0xff] }
 0x2fa   : > { %13932 = vmatprep.subr.bf16.mxu1 %v16945_v43 }
 0x2fb   : > { %20654 = vst [vmem:[#allocation92_spill] sm:$0xff] %v16969_v17 }
 0x2fc   : > { %11994 = vmatmul.mubr.f32.gmra.mrb[132].mxu1 %v15878_v14 }
 0x2fd   : > { %11996 = vmatprep.mubr.f32.mxu1 %v15893_v23  ;;  %13934 = vmatpush3.bf16.msra.mxu1 %v16945_v43  ;;  %v16981_v43 = vpack.c.bf16 %v9574_v10, %v9573_v13  ;;  %v9577_v10 = vld [vmem:[%s20288_s5 + $0x1f0] sm:$0xff] }
 0x2fe   : > { %13936 = vmatprep.subr.bf16.mxu1 %v16957_v36 }
 0x2ff   : > { %20655 = vst [vmem:[#allocation93_spill] sm:$0xff] %v16981_v43 }
 0x300   : > { %11997 = vmatmul.mubr.f32.gmra.mrb[134].mxu1 %v15896_v26 }
 0x301   : > { %11999 = vmatprep.mubr.f32.mxu1 %v15911_v34  ;;  %13938 = vmatpush3.bf16.msra.mxu1 %v16957_v36  ;;  %v16993_v36 = vpack.c.bf16 %v9576_v55, %v9575_v5  ;;  %v17009_v5 = vpack.c.bf16 %v9578_v61, %v9577_v10 }
 0x302   : > { %13940 = vmatprep.subr.bf16.mxu1 %v16969_v17 }
 0x303   : > { %20656 = vst [vmem:[#allocation94_spill] sm:$0xff] %v16993_v36  ;;  %20657 = vst [vmem:[#allocation95_spill] sm:$0xff] %v17009_v5 }
 0x304   : > { %12000 = vmatmul.mubr.f32.gmra.mrb[136].mxu1 %v15914_v37 }
 0x305   : > { %12002 = vmatprep.mubr.f32.mxu1 %v15929_v44  ;;  %13942 = vmatpush3.bf16.msra.mxu1 %v16969_v17  ;;  %v9581_v17 = vld [vmem:[%s20290_s7 + $0x180] sm:$0xff] }
 0x306   : > { %13944 = vmatprep.subr.bf16.mxu1 %v16981_v43  ;;  %v17025_v61 = vpack.c.bf16 %v9582_v51, %v9581_v17 }
 0x307   : > { %v16995_v13 = vpop.f32.mrb[16].mxu0 }
 0x308   : > { %v17003_v19 = vpop.f32.mrb[17].mxu0  ;;  %12003 = vmatmul.mubr.f32.gmra.mrb[138].mxu1 %v15932_v47  ;;  %20658 = vst [vmem:[#allocation96_spill] sm:$0xff] %v17025_v61 }
 0x309   : > { %12005 = vmatprep.mubr.f32.mxu1 %v15947_v57  ;;  %13946 = vmatpush3.bf16.msra.mxu1 %v16981_v43  ;;  %v9583_v43 = vld [vmem:[%s20290_s7 + $0x190] sm:$0xff] }
 0x30a   : > { %13948 = vmatprep.subr.bf16.mxu1 %v16993_v36  ;;  %v17041_v51 = vpack.c.bf16 %v9584_v21, %v9583_v43 }
 0x30b   : > { %v17011_v55 = vpop.f32.mrb[18].mxu0 }
 0x30c   : > { %v17019_v24 = vpop.f32.mrb[19].mxu0  ;;  %12006 = vmatmul.mubr.f32.gmra.mrb[140].mxu1 %v15950_v60  ;;  %20659 = vst [vmem:[#allocation97_spill] sm:$0xff] %v17041_v51 }
 0x30d   : > { %12008 = vmatprep.mubr.f32.mxu1 %v15965_v7  ;;  %13950 = vmatpush3.bf16.msra.mxu1 %v16993_v36  ;;  %v9585_v36 = vld [vmem:[%s20290_s7 + $0x1a0] sm:$0xff] }
 0x30e   : > { %13952 = vmatprep.subr.bf16.mxu1 %v17009_v5  ;;  %v17057_v21 = vpack.c.bf16 %v9586_v53, %v9585_v36 }
 0x30f   : > { %v17027_v10 = vpop.f32.mrb[20].mxu0 }
 0x310   : > { %v17035_v31 = vpop.f32.mrb[21].mxu0  ;;  %12009 = vmatmul.mubr.f32.gmra.mrb[142].mxu1 %v15968_v9  ;;  %20660 = vst [vmem:[#allocation98_spill] sm:$0xff] %v17057_v21 }
 0x311   : > { %13954 = vmatpush3.bf16.msra.mxu1 %v17009_v5  ;;  %12043 = vmatprep.mubr.f32.mxu1 %v15841_v56  ;;  %v9587_v5 = vld [vmem:[%s20290_s7 + $0x1b0] sm:$0xff] }
 0x312   : > { %13956 = vmatprep.subr.bf16.mxu1 %v17025_v61  ;;  %v17073_v53 = vpack.c.bf16 %v9588_v18, %v9587_v5 }
 0x313   : > { %v17043_v17 = vpop.f32.mrb[22].mxu0 }
 0x314   : > { %v17051_v6 = vpop.f32.mrb[23].mxu0  ;;  %12044 = vmatmul.mubr.f32.vlgmr.msra.gmra.mrb[144].mxu1 %v15843_v58  ;;  %20661 = vst [vmem:[#allocation99_spill] sm:$0xff] %v17073_v53 }
 0x315   : > { %12046 = vmatprep.mubr.f32.mxu1 %v15857_v1  ;;  %13958 = vmatpush3.bf16.msra.mxu1 %v17025_v61  ;;  %v9589_v61 = vld [vmem:[%s20290_s7 + $0x1c0] sm:$0xff] }
 0x316   : > { %13960 = vmatprep.subr.bf16.mxu1 %v17041_v51  ;;  %v17089_v18 = vpack.c.bf16 %v9590_v46, %v9589_v61 }
 0x317   : > { %v17059_v43 = vpop.f32.mrb[24].mxu0 }
 0x318   : > { %v17067_v41 = vpop.f32.mrb[25].mxu0  ;;  %12047 = vmatmul.mubr.f32.gmra.mrb[146].mxu1 %v15860_v3  ;;  %20662 = vst [vmem:[#allocation100_spill] sm:$0xff] %v17089_v18 }
 0x319   : > { %12049 = vmatprep.mubr.f32.mxu1 %v15875_v12  ;;  %13962 = vmatpush3.bf16.msra.mxu1 %v17041_v51  ;;  %v9591_v51 = vld [vmem:[%s20290_s7 + $0x1d0] sm:$0xff] }
 0x31a   : > { %13964 = vmatprep.subr.bf16.mxu1 %v17057_v21  ;;  %v17105_v46 = vpack.c.bf16 %v9592_v33, %v9591_v51  ;;  %v17123_v33 = vld [vmem:[%s20291_s8 + $0x1] ss:$0 sm:$0xff] }
 0x31b   : > { %v17075_v36 = vpop.f32.mrb[26].mxu0 }
 0x31c   : > { %v17083_v2 = vpop.f32.mrb[27].mxu0  ;;  %12050 = vmatmul.mubr.f32.gmra.mrb[148].mxu1 %v15878_v14  ;;  %20663 = vst [vmem:[#allocation101_spill] sm:$0xff] %v17105_v46 }
 0x31d   : > { %12052 = vmatprep.mubr.f32.mxu1 %v15893_v23  ;;  %13966 = vmatpush3.bf16.msra.mxu1 %v17057_v21  ;;  %v9593_v21 = vld [vmem:[%s20290_s7 + $0x1e0] sm:$0xff] }
 0x31e   : > { %13968 = vmatprep.subr.bf16.mxu1 %v17073_v53  ;;  %v17126_v51 = vpack.c.bf16 %v9594_v16, %v9593_v21 }
 0x31f   : > { %v17091_v5 = vpop.f32.mrb[28].mxu0 }
 0x320   : > { %v17099_v63 = vpop.f32.mrb[29].mxu0  ;;  %12053 = vmatmul.mubr.f32.gmra.mrb[150].mxu1 %v15896_v26  ;;  %20664 = vst [vmem:[#allocation102_spill] sm:$0xff] %v17126_v51 }
 0x321   : > { %12055 = vmatprep.mubr.f32.mxu1 %v15911_v34  ;;  %13970 = vmatpush3.bf16.msra.mxu1 %v17073_v53 }
 0x322   : > { %13972 = vmatprep.subr.bf16.mxu1 %v17089_v18 }
 0x323   : > { %v17107_v61 = vpop.f32.mrb[30].mxu0 }
 0x324   : > { %v17115_v52 = vpop.f32.mrb[31].mxu0  ;;  %12056 = vmatmul.mubr.f32.gmra.mrb[152].mxu1 %v15914_v37 }
 0x325   : > { %12058 = vmatprep.mubr.f32.mxu1 %v15929_v44  ;;  %13974 = vmatpush3.bf16.msra.mxu1 %v17089_v18  ;;  %v9596_v18 = vld [vmem:[%s20290_s7 + $0x1f8] sm:$0xff] }
 0x326   : > { %13976 = vmatprep.subr.bf16.mxu1 %v17105_v46 }
 0x327   : > { %v11485_v53 = vpop.f32.mrb[32].mxu0 }
 0x328   : > { %v2012_v42 = vadd.f32 %v11485_v53, %v17123_v33  ;;  %v2006_v50 = vpop.f32.mrb[33].mxu0  ;;  %12059 = vmatmul.mubr.f32.gmra.mrb[154].mxu1 %v15932_v47  ;;  %v17140_v53 = vpack.c.bf16 %v9596_v18, %v9595_v39 }
 0x329   : > { %v2007_v0 = vadd.f32 %v17123_v33, %v2006_v50  ;;  %12061 = vmatprep.mubr.f32.mxu1 %v15947_v57  ;;  %13978 = vmatpush3.bf16.msra.mxu1 %v17105_v46 }
 0x32a   : > { %13980 = vmatprep.subr.bf16.mxu1 %v17126_v51  ;;  %20665 = vst [vmem:[#allocation103_spill] sm:$0xff] %v17140_v53 }
 0x32b   : > { %v13651_v16 = vpack.c.bf16 %v2012_v42, %v2007_v0  ;;  %v11488_v21 = vpop.f32.mrb[34].mxu0 }
 0x32c   : > { %v2022_v40 = vadd.f32 %v11488_v21, %v17123_v33  ;;  %v2016_v38 = vpop.f32.mrb[35].mxu0  ;;  %12062 = vmatmul.mubr.f32.gmra.mrb[156].mxu1 %v15950_v60 }
 0x32d   : > { %v2017_v59 = vadd.f32 %v17123_v33, %v2016_v38  ;;  %13652 = vmatprep.subr.bf16.mxu0 %v13651_v16  ;;  %12064 = vmatprep.mubr.f32.mxu1 %v15965_v7 }
 0x32e   : > { %13982 = vmatpush3.bf16.msra.mxu1 %v17126_v51  ;;  %13654 = vmatpush3.bf16.msra.mxu0 %v13651_v16 }
 0x32f   : > { %v13655_v50 = vpack.c.bf16 %v2022_v40, %v2017_v59  ;;  %v11491_v46 = vpop.f32.mrb[36].mxu0  ;;  %13984 = vmatprep.subr.bf16.mxu1 %v17140_v53 }
 0x330   : > { %v2032_v0 = vadd.f32 %v11491_v46, %v17123_v33  ;;  %v2026_v39 = vpop.f32.mrb[37].mxu0  ;;  %12065 = vmatmul.mubr.f32.gmra.mrb[158].mxu1 %v15968_v9 }
 0x331   : > { %v2027_v42 = vadd.f32 %v17123_v33, %v2026_v39  ;;  %13656 = vmatprep.subr.bf16.mxu0 %v13655_v50  ;;  %12099 = vmatprep.mubr.f32.mxu1 %v15841_v56 }
 0x332   : > { %13986 = vmatpush3.bf16.msra.mxu1 %v17140_v53  ;;  %13658 = vmatpush3.bf16.msra.mxu0 %v13655_v50 }
 0x333   : > { %v13659_v38 = vpack.c.bf16 %v2032_v0, %v2027_v42  ;;  %v11494_v18 = vpop.f32.mrb[38].mxu0  ;;  %14068 = vmatprep.subr.bf16.mxu1 %v15708_v8 }
 0x334   : > { %v2042_v59 = vadd.f32 %v11494_v18, %v17123_v33  ;;  %v2036_v40 = vpop.f32.mrb[39].mxu0 }
 0x335   : > { %v2037_v46 = vadd.f32 %v17123_v33, %v2036_v40  ;;  %12100 = vmatmul.mubr.f32.vlgmr.msra.gmra.mrb[160].mxu1 %v15843_v58  ;;  %13660 = vmatprep.subr.bf16.mxu0 %v13659_v38 }
 0x336   : > { %12102 = vmatprep.mubr.f32.mxu1 %v15857_v1  ;;  %13662 = vmatpush3.bf16.msra.mxu0 %v13659_v38 }
 0x337   : > { %v13663_v16 = vpack.c.bf16 %v2042_v59, %v2037_v46  ;;  %v11497_v21 = vpop.f32.mrb[40].mxu0  ;;  %14070 = vmatpush3.bf16.msra.mxu1 %v15708_v8 }
 0x338   : > { %v2052_v50 = vadd.f32 %v11497_v21, %v17123_v33  ;;  %v2046_v0 = vpop.f32.mrb[41].mxu0  ;;  %14072 = vmatprep.subr.bf16.mxu1 %v15716_v11 }
 0x339   : > { %v2047_v39 = vadd.f32 %v17123_v33, %v2046_v0  ;;  %12103 = vmatmul.mubr.f32.gmra.mrb[162].mxu1 %v15860_v3  ;;  %13664 = vmatprep.subr.bf16.mxu0 %v13663_v16 }
 0x33a   : > { %12105 = vmatprep.mubr.f32.mxu1 %v15875_v12  ;;  %13666 = vmatpush3.bf16.msra.mxu0 %v13663_v16 }
 0x33b   : > { %v13667_v42 = vpack.c.bf16 %v2052_v50, %v2047_v39  ;;  %v11500_v18 = vpop.f32.mrb[42].mxu0  ;;  %14074 = vmatpush3.bf16.msra.mxu1 %v15716_v11 }
 0x33c   : > { %v2062_v38 = vadd.f32 %v11500_v18, %v17123_v33  ;;  %v2056_v8 = vpop.f32.mrb[43].mxu0  ;;  %14076 = vmatprep.subr.bf16.mxu1 %v15733_v15 }
 0x33d   : > { %v2057_v59 = vadd.f32 %v17123_v33, %v2056_v8  ;;  %12106 = vmatmul.mubr.f32.gmra.mrb[164].mxu1 %v15878_v14  ;;  %13668 = vmatprep.subr.bf16.mxu0 %v13667_v42 }
 0x33e   : > { %12108 = vmatprep.mubr.f32.mxu1 %v15893_v23  ;;  %13670 = vmatpush3.bf16.msra.mxu0 %v13667_v42 }
 0x33f   : > { %v13671_v40 = vpack.c.bf16 %v2062_v38, %v2057_v59  ;;  %v11503_v46 = vpop.f32.mrb[44].mxu0  ;;  %14078 = vmatpush3.bf16.msra.mxu1 %v15733_v15  ;;  %v9396_v38 = vld [vmem:[%s20292_s9 + $0x88] sm:$0xff] }
 0x340   : > { %v2072_v16 = vadd.f32 %v11503_v46, %v17123_v33  ;;  %v2066_v11 = vpop.f32.mrb[45].mxu0  ;;  %14080 = vmatprep.subr.bf16.mxu1 %v15746_v20  ;;  %v9398_v46 = vld [vmem:[%s20292_s9 + $0x98] sm:$0xff] }
 0x341   : > { %v2067_v21 = vadd.f32 %v17123_v33, %v2066_v11  ;;  %12109 = vmatmul.mubr.f32.gmra.mrb[166].mxu1 %v15896_v26  ;;  %13672 = vmatprep.subr.bf16.mxu0 %v13671_v40 }
 0x342   : > { %12111 = vmatprep.mubr.f32.mxu1 %v15911_v34  ;;  %13674 = vmatpush3.bf16.msra.mxu0 %v13671_v40 }
 0x343   : > { %v13675_v50 = vpack.c.bf16 %v2072_v16, %v2067_v21  ;;  %v11506_v0 = vpop.f32.mrb[46].mxu0  ;;  %14082 = vmatpush3.bf16.msra.mxu1 %v15746_v20  ;;  %v9395_v20 = vld [vmem:[%s20292_s9 + $0x80] sm:$0xff] }
 0x344   : > { %v2082_v39 = vadd.f32 %v11506_v0, %v17123_v33  ;;  %v2076_v15 = vpop.f32.mrb[47].mxu0  ;;  %14084 = vmatprep.subr.bf16.mxu1 %v15760_v25  ;;  %v9399_v16 = vld [vmem:[%s20292_s9 + $0xa0] sm:$0xff] }
 0x345   : > { %v2077_v42 = vadd.f32 %v17123_v33, %v2076_v15  ;;  %12112 = vmatmul.mubr.f32.gmra.mrb[168].mxu1 %v15914_v37  ;;  %13676 = vmatprep.subr.bf16.mxu0 %v13675_v50  ;;  %v9401_v15 = vld [vmem:[%s20292_s9 + $0xb0] sm:$0xff] }
 0x346   : > { %12114 = vmatprep.mubr.f32.mxu1 %v15929_v44  ;;  %13678 = vmatpush3.bf16.msra.mxu0 %v13675_v50 }
 0x347   : > { %v13679_v18 = vpack.c.bf16 %v2082_v39, %v2077_v42  ;;  %14086 = vmatpush3.bf16.msra.mxu1 %v15760_v25  ;;  %v9400_v39 = vld [vmem:[%s20292_s9 + $0xa8] sm:$0xff] }
 0x348   : > { %14088 = vmatprep.subr.bf16.mxu1 %v15774_v30 }
 0x349   : > { %12115 = vmatmul.mubr.f32.gmra.mrb[170].mxu1 %v15932_v47  ;;  %13680 = vmatprep.subr.bf16.mxu0 %v13679_v18 }
 0x34a   : > { %12117 = vmatprep.mubr.f32.mxu1 %v15947_v57  ;;  %13682 = vmatpush3.bf16.msra.mxu0 %v13679_v18 }
 0x34b   : > { %13684 = vmatprep.subr.bf16.mxu0 %v16339_v49  ;;  %14090 = vmatpush3.bf16.msra.mxu1 %v15774_v30 }
 0x34c   : > { %14092 = vmatprep.subr.bf16.mxu1 %v15788_v35 }
 0x34d   : > { %12118 = vmatmul.mubr.f32.gmra.mrb[172].mxu1 %v15950_v60 }
 0x34e   : > { %12120 = vmatprep.mubr.f32.mxu1 %v15965_v7 }
 0x34f   : > { %14094 = vmatpush3.bf16.msra.mxu1 %v15788_v35  ;;  %v9397_v35 = vld [vmem:[%s20292_s9 + $0x90] sm:$0xff] }
 0x350   : > { %14096 = vmatprep.subr.bf16.mxu1 %v15815_v45 }
 0x351   : > { %12121 = vmatmul.mubr.f32.gmra.mrb[174].mxu1 %v15968_v9 }
 0x353   : > { %14098 = vmatpush3.bf16.msra.mxu1 %v15815_v45 }
 0x354   : > { %14100 = vmatprep.subr.bf16.mxu1 %v15825_v48 }
 0x367   : > { %v11541_v25 = vpop.f32.mrb[80].mxu1 }
 0x368   : > { %v2264_v30 = vpop.f32.mrb[81].mxu1  ;;  %v17210_v40 = vadd.f32 %v11541_v25, %v9396_v38 }
 0x369   : > { %v17199_v33 = vadd.f32 %v9395_v20, %v2264_v30  ;;  %v9402_v30 = vld [vmem:[%s20292_s9 + $0xb8] sm:$0xff] }
 0x36b   : > { %v11544_v8 = vpop.f32.mrb[82].mxu1  ;;  %2343 = vmax.xlane.f32.xlu0 %v17199_v33 }
 0x36c   : > { %v2274_v45 = vpop.f32.mrb[83].mxu1  ;;  %v17220_v50 = vadd.f32 %v11544_v8, %v9398_v46 }
 0x36d   : > { %v17208_v59 = vadd.f32 %v9397_v35, %v2274_v45  ;;  %v9403_v35 = vld [vmem:[%s20292_s9 + $0xc0] sm:$0xff] }
 0x36f   : > { %v11547_v11 = vpop.f32.mrb[84].mxu1  ;;  %2347 = vmax.xlane.f32.xlu1 %v17208_v59  ;;  %2345 = vmax.xlane.f32.xlu0 %v17210_v40 }
 0x370   : > { %v2284_v21 = vpop.f32.mrb[85].mxu1  ;;  %v17232_v20 = vadd.f32 %v11547_v11, %v9400_v39  ;;  %v9405_v11 = vld [vmem:[%s20292_s9 + $0xd0] sm:$0xff] }
 0x371   : > { %v17222_v0 = vadd.f32 %v9399_v16, %v2284_v21  ;;  %v9404_v16 = vld [vmem:[%s20292_s9 + $0xc8] sm:$0xff] }
 0x373   : > { %v11550_v42 = vpop.f32.mrb[86].mxu1  ;;  %2349 = vmax.xlane.f32.xlu1 %v17220_v50  ;;  %2351 = vmax.xlane.f32.xlu0 %v17222_v0 }
 0x374   : > { %v2294_v18 = vpop.f32.mrb[87].mxu1  ;;  %v17244_v45 = vadd.f32 %v11550_v42, %v9402_v30  ;;  %v9407_v30 = vld [vmem:[%s20292_s9 + $0xe0] sm:$0xff] }
 0x375   : > { %v17234_v25 = vadd.f32 %v9401_v15, %v2294_v18  ;;  %v9406_v18 = vld [vmem:[%s20292_s9 + $0xd8] sm:$0xff] }
 0x377   : > { %v11553_v38 = vpop.f32.mrb[88].mxu1  ;;  %2353 = vmax.xlane.f32.xlu1 %v17232_v20  ;;  %2355 = vmax.xlane.f32.xlu0 %v17234_v25 }
 0x378   : > { %v2304_v8 = vpop.f32.mrb[89].mxu1  ;;  %v17256_v15 = vadd.f32 %v11553_v38, %v9404_v16  ;;  %v9408_v16 = vld [vmem:[%s20292_s9 + $0xe8] sm:$0xff] }
 0x379   : > { %v17246_v46 = vadd.f32 %v9403_v35, %v2304_v8 }
 0x37b   : > { %v11556_v21 = vpop.f32.mrb[90].mxu1  ;;  %2357 = vmax.xlane.f32.xlu1 %v17244_v45  ;;  %2359 = vmax.xlane.f32.xlu0 %v17246_v46 }
 0x37c   : > { %v2314_v39 = vpop.f32.mrb[91].mxu1  ;;  %v17268_v53 = vadd.f32 %v11556_v21, %v9406_v18  ;;  %v1126_v18 = vld [vmem:[%s20292_s9] sm:$0xff] }
 0x37d   : > { %v17258_v42 = vadd.f32 %v9405_v11, %v2314_v39  ;;  %v9409_v11 = vld [vmem:[%s20292_s9 + $0xf0] sm:$0xff] }
 0x37f   : > { %v11559_v35 = vpop.f32.mrb[92].mxu1  ;;  %2361 = vmax.xlane.f32.xlu1 %v17256_v15  ;;  %2363 = vmax.xlane.f32.xlu0 %v17258_v42 }
 0x380   : > { %v2324_v8 = vpop.f32.mrb[93].mxu1  ;;  %v17280_v28 = vadd.f32 %v11559_v35, %v9408_v16  ;;  %v17297_v35 = vadd.f32 %v17003_v19, %v1126_v18  ;;  %v1127_v16 = vld [vmem:[%s20292_s9 + $0x8] sm:$0xff]  ;;  %v1129_v18 = vld [vmem:[%s20292_s9 + $0x18] sm:$0xff] }
 0x381   : > { %v17270_v38 = vadd.f32 %v9407_v30, %v2324_v8  ;;  %v9410_v30 = vld [vmem:[%s20292_s9 + $0xf8] sm:$0xff]  ;;  %v17314_v19 = vadd.f32 %v16995_v13, %v1127_v16  ;;  %v17332_v13 = vadd.f32 %v17011_v55, %v1129_v18  ;;  %v1131_v16 = vld [vmem:[%s20292_s9 + $0x28] sm:$0xff] }
 0x382   : > { %v17350_v55 = vadd.f32 %v17027_v10, %v1131_v16  ;;  %v1133_v18 = vld [vmem:[%s20292_s9 + $0x38] sm:$0xff]  ;;  %v1135_v16 = vld [vmem:[%s20292_s9 + $0x48] sm:$0xff] }
 0x383   : > { %v11562_v39 = vpop.f32.mrb[94].mxu1  ;;  %2365 = vmax.xlane.f32.xlu1 %v17268_v53  ;;  %2367 = vmax.xlane.f32.xlu0 %v17270_v38  ;;  %v17368_v10 = vadd.f32 %v17043_v17, %v1133_v18  ;;  %v17386_v17 = vadd.f32 %v17059_v43, %v1135_v16  ;;  %v1137_v18 = vld [vmem:[%s20292_s9 + $0x58] sm:$0xff]  ;;  %v1139_v16 = vld [vmem:[%s20292_s9 + $0x68] sm:$0xff] }
 0x384   : > { %v2334_v51 = vpop.f32.mrb[95].mxu1  ;;  %v17404_v43 = vadd.f32 %v17075_v36, %v1137_v18  ;;  %v17422_v36 = vadd.f32 %v17091_v5, %v1139_v16  ;;  %v9496_v18 = vld [vmem:[%s20291_s8 + $0x2] ss:$0 sm:$0xff] }
 0x385   : > { %v17282_v21 = vadd.f32 %v9409_v11, %v2334_v51  ;;  %v17299_v51 = vadd.f32 %v11562_v39, %v9410_v30  ;;  %v1128_v11 = vld [vmem:[%s20292_s9 + $0x10] sm:$0xff]  ;;  %v1130_v30 = vld [vmem:[%s20292_s9 + $0x20] sm:$0xff] }
 0x386   : > { %v17317_v39 = vadd.f32 %v17019_v24, %v1128_v11  ;;  %v17335_v24 = vadd.f32 %v17035_v31, %v1130_v30  ;;  %v1132_v11 = vld [vmem:[%s20292_s9 + $0x30] sm:$0xff]  ;;  %v1134_v30 = vld [vmem:[%s20292_s9 + $0x40] sm:$0xff] }
 0x387   : > { %v17290_v8 = vpop.f32.mrb[96].mxu1  ;;  %2369 = vmax.xlane.f32.xlu1 %v17280_v28  ;;  %2371 = vmax.xlane.f32.xlu0 %v17282_v21  ;;  %v17353_v31 = vadd.f32 %v17051_v6, %v1132_v11  ;;  %v17371_v6 = vadd.f32 %v17067_v41, %v1134_v30  ;;  %v1136_v11 = vld [vmem:[%s20292_s9 + $0x50] sm:$0xff]  ;;  %v1138_v30 = vld [vmem:[%s20292_s9 + $0x60] sm:$0xff] }
 0x388   : > { %20666 = vst [vmem:[#allocation104_spill] sm:$0xff] %v17290_v8  ;;  %v17294_v48 = vpop.f32.mrb[97].mxu1  ;;  %v17389_v41 = vadd.f32 %v17083_v2, %v1136_v11  ;;  %v17407_v2 = vadd.f32 %v17099_v63, %v1138_v30  ;;  %v1140_v11 = vld [vmem:[%s20292_s9 + $0x70] sm:$0xff]  ;;  %v1141_v30 = vld [vmem:[%s20292_s9 + $0x78] sm:$0xff] }
 0x389   : > { %20667 = vst [vmem:[#allocation105_spill] sm:$0xff] %v17294_v48  ;;  %v17425_v63 = vadd.f32 %v17115_v52, %v1140_v11  ;;  %v17436_v5 = vadd.f32 %v17107_v61, %v1141_v30 }
 0x38b   : > { %v17307_v8 = vpop.f32.mrb[98].mxu1  ;;  %2373 = vmax.xlane.f32.xlu1 %v17299_v51  ;;  %1383 = vmax.xlane.f32.xlu0 %v17297_v35 }
 0x38c   : > { %20668 = vst [vmem:[#allocation106_spill] sm:$0xff] %v17307_v8  ;;  %v17311_v4 = vpop.f32.mrb[99].mxu1 }
 0x38d   : > { %20669 = vst [vmem:[#allocation107_spill] sm:$0xff] %v17311_v4 }
 0x38f   : > { %v17325_v8 = vpop.f32.mrb[100].mxu1  ;;  %1385 = vmax.xlane.f32.xlu1 %v17314_v19  ;;  %1387 = vmax.xlane.f32.xlu0 %v17317_v39 }
 0x390   : > { %20670 = vst [vmem:[#allocation108_spill] sm:$0xff] %v17325_v8  ;;  %v17329_v4 = vpop.f32.mrb[101].mxu1 }
 0x391   : > { %20671 = vst [vmem:[#allocation109_spill] sm:$0xff] %v17329_v4 }
 0x393   : > { %v17343_v8 = vpop.f32.mrb[102].mxu1  ;;  %1389 = vmax.xlane.f32.xlu1 %v17332_v13  ;;  %1391 = vmax.xlane.f32.xlu0 %v17335_v24 }
 0x394   : > { %20672 = vst [vmem:[#allocation110_spill] sm:$0xff] %v17343_v8  ;;  %v17347_v4 = vpop.f32.mrb[103].mxu1 }
 0x395   : > { %20673 = vst [vmem:[#allocation111_spill] sm:$0xff] %v17347_v4 }
 0x397   : > { %v17361_v8 = vpop.f32.mrb[104].mxu1  ;;  %1393 = vmax.xlane.f32.xlu1 %v17350_v55  ;;  %1395 = vmax.xlane.f32.xlu0 %v17353_v31 }
 0x398   : > { %20674 = vst [vmem:[#allocation112_spill] sm:$0xff] %v17361_v8  ;;  %v17365_v4 = vpop.f32.mrb[105].mxu1 }
 0x399   : > { %20675 = vst [vmem:[#allocation113_spill] sm:$0xff] %v17365_v4 }
 0x39b   : > { %v17379_v8 = vpop.f32.mrb[106].mxu1  ;;  %1397 = vmax.xlane.f32.xlu1 %v17368_v10  ;;  %1399 = vmax.xlane.f32.xlu0 %v17371_v6 }
 0x39c   : > { %20676 = vst [vmem:[#allocation114_spill] sm:$0xff] %v17379_v8  ;;  %v17383_v4 = vpop.f32.mrb[107].mxu1 }
 0x39d   : > { %20677 = vst [vmem:[#allocation115_spill] sm:$0xff] %v17383_v4 }
 0x39f   : > { %v17397_v8 = vpop.f32.mrb[108].mxu1  ;;  %1401 = vmax.xlane.f32.xlu1 %v17386_v17  ;;  %1403 = vmax.xlane.f32.xlu0 %v17389_v41 }
 0x3a0   : > { %20678 = vst [vmem:[#allocation116_spill] sm:$0xff] %v17397_v8  ;;  %v17401_v4 = vpop.f32.mrb[109].mxu1 }
 0x3a1   : > { %20679 = vst [vmem:[#allocation117_spill] sm:$0xff] %v17401_v4 }
 0x3a3   : > { %v17415_v8 = vpop.f32.mrb[110].mxu1  ;;  %1405 = vmax.xlane.f32.xlu1 %v17404_v43  ;;  %1407 = vmax.xlane.f32.xlu0 %v17407_v2 }
 0x3a4   : > { %20680 = vst [vmem:[#allocation118_spill] sm:$0xff] %v17415_v8  ;;  %v17419_v4 = vpop.f32.mrb[111].mxu1 }
 0x3a5   : > { %20681 = vst [vmem:[#allocation119_spill] sm:$0xff] %v17419_v4 }
 0x3a7   : > { %v11821_v8 = vpop.f32.mrb[112].mxu1  ;;  %1409 = vmax.xlane.f32.xlu1 %v17422_v36  ;;  %1411 = vmax.xlane.f32.xlu0 %v17425_v63 }
 0x3a8   : > { %v3262_v4 = vadd.f32 %v11821_v8, %v9496_v18  ;;  %v3256_v9 = vpop.f32.mrb[113].mxu1 }
 0x3a9   : > { %v3257_v52 = vadd.f32 %v9496_v18, %v3256_v9 }
 0x3ab   : > { %v17438_v16 = vpack.c.bf16 %v3262_v4, %v3257_v52  ;;  %v11824_v11 = vpop.f32.mrb[114].mxu1  ;;  %1413 = vmax.xlane.f32.xlu1 %v17436_v5 }
 0x3ac   : > { %v3272_v48 = vadd.f32 %v11824_v11, %v9496_v18  ;;  %v3266_v7 = vpop.f32.mrb[115].mxu1 }
 0x3ad   : > { %20682 = vst [vmem:[#allocation120_spill] sm:$0xff] %v17438_v16  ;;  %v3267_v60 = vadd.f32 %v9496_v18, %v3266_v7 }
 0x3af   : > { %v17441_v57 = vpack.c.bf16 %v3272_v48, %v3267_v60  ;;  %v11827_v47 = vpop.f32.mrb[116].mxu1 }
 0x3b0   : > { %v3282_v44 = vadd.f32 %v11827_v47, %v9496_v18  ;;  %v3276_v37 = vpop.f32.mrb[117].mxu1 }
 0x3b1   : > { %20683 = vst [vmem:[#allocation121_spill] sm:$0xff] %v17441_v57  ;;  %v3277_v34 = vadd.f32 %v9496_v18, %v3276_v37 }
 0x3b3   : > { %v17443_v8 = vpack.c.bf16 %v3282_v44, %v3277_v34  ;;  %v11830_v26 = vpop.f32.mrb[118].mxu1 }
 0x3b4   : > { %v3292_v61 = vadd.f32 %v11830_v26, %v9496_v18  ;;  %v3286_v30 = vpop.f32.mrb[119].mxu1 }
 0x3b5   : > { %20684 = vst [vmem:[#allocation122_spill] sm:$0xff] %v17443_v8  ;;  %v3287_v9 = vadd.f32 %v9496_v18, %v3286_v30 }
 0x3b7   : > { %v17445_v4 = vpack.c.bf16 %v3292_v61, %v3287_v9  ;;  %v11833_v52 = vpop.f32.mrb[120].mxu1 }
 0x3b8   : > { %v3302_v16 = vadd.f32 %v11833_v52, %v9496_v18  ;;  %v3296_v23 = vpop.f32.mrb[121].mxu1 }
 0x3b9   : > { %20685 = vst [vmem:[#allocation123_spill] sm:$0xff] %v17445_v4  ;;  %v3297_v11 = vadd.f32 %v9496_v18, %v3296_v23 }
 0x3bb   : > { %v17447_v14 = vpack.c.bf16 %v3302_v16, %v3297_v11  ;;  %v11836_v48 = vpop.f32.mrb[122].mxu1 }
 0x3bc   : > { %v3312_v60 = vadd.f32 %v11836_v48, %v9496_v18  ;;  %v3306_v7 = vpop.f32.mrb[123].mxu1 }
 0x3bd   : > { %20686 = vst [vmem:[#allocation124_spill] sm:$0xff] %v17447_v14  ;;  %v3307_v47 = vadd.f32 %v9496_v18, %v3306_v7 }
 0x3bf   : > { %v17449_v57 = vpack.c.bf16 %v3312_v60, %v3307_v47  ;;  %v11839_v34 = vpop.f32.mrb[124].mxu1 }
 0x3c0   : > { %v3322_v37 = vadd.f32 %v11839_v34, %v9496_v18  ;;  %v3316_v44 = vpop.f32.mrb[125].mxu1 }
 0x3c1   : > { %20687 = vst [vmem:[#allocation125_spill] sm:$0xff] %v17449_v57  ;;  %v3317_v26 = vadd.f32 %v9496_v18, %v3316_v44 }
 0x3c3   : > { %v17451_v8 = vpack.c.bf16 %v3322_v37, %v3317_v26  ;;  %v11842_v61 = vpop.f32.mrb[126].mxu1 }
 0x3c4   : > { %v3332_v30 = vadd.f32 %v11842_v61, %v9496_v18  ;;  %v3326_v9 = vpop.f32.mrb[127].mxu1 }
 0x3c5   : > { %20688 = vst [vmem:[#allocation126_spill] sm:$0xff] %v17451_v8  ;;  %v3327_v52 = vadd.f32 %v9496_v18, %v3326_v9 }
 0x3c7   : > { %v17453_v4 = vpack.c.bf16 %v3332_v30, %v3327_v52  ;;  %v17455_v23 = vpop.f32.mrb[128].mxu1 }
 0x3c8   : > { %20690 = vst [vmem:[#allocation128_spill] sm:$0xff] %v17455_v23  ;;  %v17457_v16 = vpop.f32.mrb[129].mxu1 }
 0x3c9   : > { %20689 = vst [vmem:[#allocation127_spill] sm:$0xff] %v17453_v4  ;;  %20691 = vst [vmem:[#allocation129_spill] sm:$0xff] %v17457_v16 }
 0x3cb   : > { %v17459_v11 = vpop.f32.mrb[130].mxu1 }
 0x3cc   : > { %20692 = vst [vmem:[#allocation130_spill] sm:$0xff] %v17459_v11  ;;  %v17461_v48 = vpop.f32.mrb[131].mxu1 }
 0x3cd   : > { %20693 = vst [vmem:[#allocation131_spill] sm:$0xff] %v17461_v48 }
 0x3cf   : > { %v17463_v60 = vpop.f32.mrb[132].mxu1 }
 0x3d0   : > { %20694 = vst [vmem:[#allocation132_spill] sm:$0xff] %v17463_v60  ;;  %v17465_v7 = vpop.f32.mrb[133].mxu1 }
 0x3d1   : > { %20695 = vst [vmem:[#allocation133_spill] sm:$0xff] %v17465_v7 }
 0x3d3   : > { %v17467_v47 = vpop.f32.mrb[134].mxu1 }
 0x3d4   : > { %20696 = vst [vmem:[#allocation134_spill] sm:$0xff] %v17467_v47  ;;  %v17469_v34 = vpop.f32.mrb[135].mxu1  ;;  %v9580_v47 = vld [vmem:[%s20289_s6 + $0x3] ss:$0 sm:$0xff] }
 0x3d5   : > { %20697 = vst [vmem:[#allocation135_spill] sm:$0xff] %v17469_v34 }
 0x3d7   : > { %v17471_v37 = vpop.f32.mrb[136].mxu1 }
 0x3d8   : > { %20698 = vst [vmem:[#allocation136_spill] sm:$0xff] %v17471_v37  ;;  %v17473_v18 = vpop.f32.mrb[137].mxu1 }
 0x3d9   : > { %20699 = vst [vmem:[#allocation137_spill] sm:$0xff] %v17473_v18 }
 0x3db   : > { %v17475_v44 = vpop.f32.mrb[138].mxu1 }
 0x3dc   : > { %20700 = vst [vmem:[#allocation138_spill] sm:$0xff] %v17475_v44  ;;  %v17477_v26 = vpop.f32.mrb[139].mxu1 }
 0x3dd   : > { %20701 = vst [vmem:[#allocation139_spill] sm:$0xff] %v17477_v26 }
 0x3df   : > { %v17479_v61 = vpop.f32.mrb[140].mxu1 }
 0x3e0   : > { %20702 = vst [vmem:[#allocation140_spill] sm:$0xff] %v17479_v61  ;;  %v17481_v30 = vpop.f32.mrb[141].mxu1 }
 0x3e1   : > { %20703 = vst [vmem:[#allocation141_spill] sm:$0xff] %v17481_v30 }
 0x3e3   : > { %v17483_v9 = vpop.f32.mrb[142].mxu1 }
 0x3e4   : > { %20704 = vst [vmem:[#allocation142_spill] sm:$0xff] %v17483_v9  ;;  %v17485_v52 = vpop.f32.mrb[143].mxu1 }
 0x3e5   : > { %20705 = vst [vmem:[#allocation143_spill] sm:$0xff] %v17485_v52 }
 0x3e7   : > { %v12045_v34 = vpop.f32.mrb[144].mxu1 }
 0x3e8   : > { %v4213_v37 = vadd.f32 %v12045_v34, %v9580_v47  ;;  %v4207_v60 = vpop.f32.mrb[145].mxu1 }
 0x3e9   : > { %v4208_v18 = vadd.f32 %v9580_v47, %v4207_v60 }
 0x3eb   : > { %v17490_v7 = vpack.c.bf16 %v4213_v37, %v4208_v18  ;;  %v12048_v44 = vpop.f32.mrb[146].mxu1 }
 0x3ec   : > { %v4223_v26 = vadd.f32 %v12048_v44, %v9580_v47  ;;  %v4217_v11 = vpop.f32.mrb[147].mxu1 }
 0x3ed   : > { %20706 = vst [vmem:[#allocation144_spill] sm:$0xff] %v17490_v7  ;;  %v4218_v61 = vadd.f32 %v9580_v47, %v4217_v11 }
 0x3ef   : > { %v17492_v48 = vpack.c.bf16 %v4223_v26, %v4218_v61  ;;  %v12051_v30 = vpop.f32.mrb[148].mxu1 }
 0x3f0   : > { %v4233_v9 = vadd.f32 %v12051_v30, %v9580_v47  ;;  %v4227_v23 = vpop.f32.mrb[149].mxu1 }
 0x3f1   : > { %20707 = vst [vmem:[#allocation145_spill] sm:$0xff] %v17492_v48  ;;  %v4228_v52 = vadd.f32 %v9580_v47, %v4227_v23 }
 0x3f3   : > { %v17494_v16 = vpack.c.bf16 %v4233_v9, %v4228_v52  ;;  %v12054_v4 = vpop.f32.mrb[150].mxu1 }
 0x3f4   : > { %v4243_v8 = vadd.f32 %v12054_v4, %v9580_v47  ;;  %v4237_v57 = vpop.f32.mrb[151].mxu1 }
 0x3f5   : > { %20708 = vst [vmem:[#allocation146_spill] sm:$0xff] %v17494_v16  ;;  %v4238_v34 = vadd.f32 %v9580_v47, %v4237_v57 }
 0x3f7   : > { %v17496_v14 = vpack.c.bf16 %v4243_v8, %v4238_v34  ;;  %v12057_v60 = vpop.f32.mrb[152].mxu1 }
 0x3f8   : > { %v4253_v37 = vadd.f32 %v12057_v60, %v9580_v47  ;;  %v4247_v18 = vpop.f32.mrb[153].mxu1  ;;  %v2344_v44 = vpop.xlane.xlu0 %2343 }
 0x3f9   : > { %20709 = vst [vmem:[#allocation147_spill] sm:$0xff] %v17496_v14  ;;  %v4248_v7 = vadd.f32 %v9580_v47, %v4247_v18  ;;  %v2375_v11 = vsub.f32 %v17199_v33, %v2344_v44 }
 0x3fb   : > { %v17499_v26 = vpack.c.bf16 %v4253_v37, %v4248_v7  ;;  %v2391_v61 = vmul.f32 1.442695, %v2375_v11  ;;  %v12060_v30 = vpop.f32.mrb[154].mxu1 }
 0x3fc   : > { %v4263_v23 = vadd.f32 %v12060_v30, %v9580_v47  ;;  %v4257_v9 = vpop.f32.mrb[155].mxu1  ;;  %v2348_v52 = vpop.xlane.xlu1 %2347 }
 0x3fd   : > { %20710 = vst [vmem:[#allocation148_spill] sm:$0xff] %v17499_v26  ;;  %14924 = vpow2.f32 %v2391_v61  ;;  %v4258_v4 = vadd.f32 %v9580_v47, %v4257_v9  ;;  %v2377_v57 = vsub.f32 %v17208_v59, %v2348_v52  ;;  %v2346_v8 = vpop.xlane.xlu0 %2345 }
 0x3fe   : > { %v2376_v34 = vsub.f32 %v17210_v40, %v2346_v8 }
 0x3ff   : > { %v17503_v60 = vpack.c.bf16 %v4263_v23, %v4258_v4  ;;  %v2395_v14 = vmul.f32 1.442695, %v2377_v57  ;;  %v12063_v18 = vpop.f32.mrb[156].mxu1 }
 0x400   : > { %v2393_v16 = vmul.f32 1.442695, %v2376_v34  ;;  %v4273_v33 = vadd.f32 %v12063_v18, %v9580_v47  ;;  %v4267_v7 = vpop.f32.mrb[157].mxu1  ;;  %v2350_v37 = vpop.xlane.xlu1 %2349 }
 0x401   : > { %20711 = vst [vmem:[#allocation149_spill] sm:$0xff] %v17503_v60  ;;  %14926 = vpow2.f32 %v2395_v14  ;;  %v4268_v44 = vadd.f32 %v9580_v47, %v4267_v7  ;;  %v2378_v11 = vsub.f32 %v17220_v50, %v2350_v37  ;;  %v2352_v30 = vpop.xlane.xlu0 %2351 }
 0x402   : > { %14928 = vpow2.f32 %v2393_v16  ;;  %v2379_v61 = vsub.f32 %v17222_v0, %v2352_v30  ;;  %v17514_v0 = vld [vmem:[%s20291_s8 + $0x3] ss:$0 sm:$0xff] }
 0x403   : > { %v17507_v59 = vpack.c.bf16 %v4273_v33, %v4268_v44  ;;  %v2397_v9 = vmul.f32 1.442695, %v2378_v11  ;;  %v12066_v40 = vpop.f32.mrb[158].mxu1 }
 0x404   : > { %v2399_v23 = vmul.f32 1.442695, %v2379_v61  ;;  %v4283_v52 = vadd.f32 %v12066_v40, %v9580_v47  ;;  %v4277_v4 = vpop.f32.mrb[159].mxu1  ;;  %v2354_v57 = vpop.xlane.xlu1 %2353 }
 0x405   : > { %20712 = vst [vmem:[#allocation150_spill] sm:$0xff] %v17507_v59  ;;  %14930 = vpow2.f32 %v2397_v9  ;;  %v4278_v8 = vadd.f32 %v9580_v47, %v4277_v4  ;;  %v2380_v34 = vsub.f32 %v17232_v20, %v2354_v57  ;;  %v2356_v14 = vpop.xlane.xlu0 %2355 }
 0x406   : > { %14932 = vpow2.f32 %v2399_v23  ;;  %v2381_v50 = vsub.f32 %v17234_v25, %v2356_v14 }
 0x407   : > { %v17516_v16 = vpop.eup %14924  ;;  %v17518_v18 = vpack.c.bf16 %v4283_v52, %v4278_v8  ;;  %v2401_v33 = vmul.f32 1.442695, %v2380_v34 }
 0x408   : > { %v2403_v7 = vmul.f32 1.442695, %v2381_v50  ;;  %v12101_v37 = vpop.f32.mrb[160].mxu1  ;;  %v2358_v44 = vpop.xlane.xlu1 %2357  ;;  %2423 = vadd.xlane.f32.xlu0 %v17516_v16 }
 0x409   : > { %20713 = vst [vmem:[#allocation151_spill] sm:$0xff] %v17518_v18  ;;  %14934 = vpow2.f32 %v2401_v33  ;;  %v4383_v20 = vadd.f32 %v12101_v37, %v17514_v0  ;;  %v4377_v47 = vpop.f32.mrb[161].mxu1  ;;  %v2382_v25 = vsub.f32 %v17244_v45, %v2358_v44  ;;  %v2360_v11 = vpop.xlane.xlu0 %2359 }
 0x40a   : > { %14936 = vpow2.f32 %v2403_v7  ;;  %v4378_v30 = vadd.f32 %v17514_v0, %v4377_v47  ;;  %v2383_v61 = vsub.f32 %v17246_v46, %v2360_v11 }
 0x40b   : > { %v17525_v9 = vpop.eup %14926  ;;  %v2405_v40 = vmul.f32 1.442695, %v2382_v25 }
 0x40c   : > { %v17527_v23 = vpop.eup %14928  ;;  %v17529_v52 = vpack.c.bf16 %v4383_v20, %v4378_v30  ;;  %v2407_v4 = vmul.f32 1.442695, %v2383_v61  ;;  %v12104_v57 = vpop.f32.mrb[162].mxu1  ;;  %2427 = vadd.xlane.f32.xlu0 %v17525_v9 }
 0x40d   : > { %v2362_v8 = vpop.xlane.xlu1 %2361  ;;  %14938 = vpow2.f32 %v2405_v40  ;;  %v4393_v45 = vadd.f32 %v12104_v57, %v17514_v0  ;;  %v4387_v34 = vpop.f32.mrb[163].mxu1  ;;  %2425 = vadd.xlane.f32.xlu1 %v17527_v23 }
 0x40e   : > { %20714 = vst [vmem:[#allocation152_spill] sm:$0xff] %v17529_v52  ;;  %v2384_v14 = vsub.f32 %v17256_v15, %v2362_v8  ;;  %v2364_v50 = vpop.xlane.xlu0 %2363  ;;  %14940 = vpow2.f32 %v2407_v4  ;;  %v4388_v46 = vadd.f32 %v17514_v0, %v4387_v34 }
 0x40f   : > { %v2385_v33 = vsub.f32 %v17258_v42, %v2364_v50  ;;  %v17537_v7 = vpop.eup %14930 }
 0x410   : > { %v2409_v37 = vmul.f32 1.442695, %v2384_v14  ;;  %v17539_v44 = vpop.eup %14932  ;;  %v17541_v20 = vpack.c.bf16 %v4393_v45, %v4388_v46  ;;  %v12107_v25 = vpop.f32.mrb[164].mxu1 }
 0x411   : > { %v2411_v47 = vmul.f32 1.442695, %v2385_v33  ;;  %v2366_v11 = vpop.xlane.xlu1 %2365  ;;  %v4403_v15 = vadd.f32 %v12107_v25, %v17514_v0  ;;  %v4397_v30 = vpop.f32.mrb[165].mxu1  ;;  %2429 = vadd.xlane.f32.xlu1 %v17537_v7  ;;  %2431 = vadd.xlane.f32.xlu0 %v17539_v44 }
 0x412   : > { %20715 = vst [vmem:[#allocation153_spill] sm:$0xff] %v17541_v20  ;;  %14942 = vpow2.f32 %v2409_v37  ;;  %v2386_v61 = vsub.f32 %v17268_v53, %v2366_v11  ;;  %v2368_v40 = vpop.xlane.xlu0 %2367  ;;  %v4398_v42 = vadd.f32 %v17514_v0, %v4397_v30 }
 0x413   : > { %14944 = vpow2.f32 %v2411_v47  ;;  %v2387_v4 = vsub.f32 %v17270_v38, %v2368_v40  ;;  %v17549_v57 = vpop.eup %14934 }
 0x414   : > { %v2413_v8 = vmul.f32 1.442695, %v2386_v61  ;;  %v17551_v45 = vpop.eup %14936  ;;  %v17553_v34 = vpack.c.bf16 %v4403_v15, %v4398_v42  ;;  %v12110_v50 = vpop.f32.mrb[166].mxu1 }
 0x415   : > { %v2415_v14 = vmul.f32 1.442695, %v2387_v4  ;;  %v2370_v53 = vpop.xlane.xlu1 %2369  ;;  %v4413_v46 = vadd.f32 %v12110_v50, %v17514_v0  ;;  %v4407_v33 = vpop.f32.mrb[167].mxu1  ;;  %2433 = vadd.xlane.f32.xlu1 %v17549_v57  ;;  %2435 = vadd.xlane.f32.xlu0 %v17551_v45 }
 0x416   : > { %20716 = vst [vmem:[#allocation154_spill] sm:$0xff] %v17553_v34  ;;  %14946 = vpow2.f32 %v2413_v8  ;;  %v2388_v37 = vsub.f32 %v17280_v28, %v2370_v53  ;;  %v2372_v47 = vpop.xlane.xlu0 %2371  ;;  %v4408_v38 = vadd.f32 %v17514_v0, %v4407_v33 }
 0x417   : > { %14948 = vpow2.f32 %v2415_v14  ;;  %v2389_v25 = vsub.f32 %v17282_v21, %v2372_v47  ;;  %v17561_v11 = vpop.eup %14938 }
 0x418   : > { %v2417_v15 = vmul.f32 1.442695, %v2388_v37  ;;  %v17563_v30 = vpop.eup %14940  ;;  %v17565_v61 = vpack.c.bf16 %v4413_v46, %v4408_v38  ;;  %v12113_v42 = vpop.f32.mrb[168].mxu1 }
 0x419   : > { %v2419_v40 = vmul.f32 1.442695, %v2389_v25  ;;  %v2374_v28 = vpop.xlane.xlu1 %2373  ;;  %v4423_v4 = vadd.f32 %v12113_v42, %v17514_v0  ;;  %v4417_v8 = vpop.f32.mrb[169].mxu1  ;;  %2437 = vadd.xlane.f32.xlu1 %v17561_v11  ;;  %2439 = vadd.xlane.f32.xlu0 %v17563_v30 }
 0x41a   : > { %20717 = vst [vmem:[#allocation155_spill] sm:$0xff] %v17565_v61  ;;  %14950 = vpow2.f32 %v2417_v15  ;;  %v2390_v14 = vsub.f32 %v17299_v51, %v2374_v28  ;;  %v1384_v21 = vpop.xlane.xlu0 %1383  ;;  %v4418_v50 = vadd.f32 %v17514_v0, %v4417_v8 }
 0x41b   : > { %14952 = vpow2.f32 %v2419_v40  ;;  %v1415_v53 = vsub.f32 %v17297_v35, %v1384_v21 }
 0x41c   : > { %v17573_v46 = vpop.eup %14942  ;;  %v2421_v33 = vmul.f32 1.442695, %v2390_v14  ;;  %v17577_v47 = vpack.c.bf16 %v4423_v4, %v4418_v50  ;;  %v12116_v25 = vpop.f32.mrb[170].mxu1 }
 0x41d   : > { %v17575_v37 = vpop.eup %14944  ;;  %v1431_v38 = vmul.f32 1.442695, %v1415_v53  ;;  %v1386_v51 = vpop.xlane.xlu1 %1385  ;;  %v4433_v15 = vadd.f32 %v12116_v25, %v17514_v0  ;;  %2441 = vadd.xlane.f32.xlu1 %v17573_v46 }
 0x41e   : > { %20718 = vst [vmem:[#allocation156_spill] sm:$0xff] %v17577_v47  ;;  %14954 = vpow2.f32 %v2421_v33  ;;  %v4427_v42 = vpop.f32.mrb[171].mxu1  ;;  %v1416_v40 = vsub.f32 %v17314_v19, %v1386_v51  ;;  %2443 = vadd.xlane.f32.xlu0 %v17575_v37  ;;  %v1388_v35 = vpop.xlane.xlu0 %1387 }
 0x41f   : > { %14956 = vpow2.f32 %v1431_v38  ;;  %v4428_v28 = vadd.f32 %v17514_v0, %v4427_v42  ;;  %v1417_v4 = vsub.f32 %v17317_v39, %v1388_v35 }
 0x420   : > { %v17585_v8 = vpop.eup %14946  ;;  %v1433_v14 = vmul.f32 1.442695, %v1416_v40  ;;  %v12119_v33 = vpop.f32.mrb[172].mxu1 }
 0x421   : > { %v17587_v21 = vpop.eup %14948  ;;  %v17589_v50 = vpack.c.bf16 %v4433_v15, %v4428_v28  ;;  %v1435_v53 = vmul.f32 1.442695, %v1417_v4  ;;  %v1390_v19 = vpop.xlane.xlu1 %1389  ;;  %v4443_v25 = vadd.f32 %v12119_v33, %v17514_v0  ;;  %2445 = vadd.xlane.f32.xlu1 %v17585_v8 }
 0x422   : > { %14958 = vpow2.f32 %v1433_v14  ;;  %v4437_v51 = vpop.f32.mrb[173].mxu1  ;;  %v1418_v38 = vsub.f32 %v17332_v13, %v1390_v19  ;;  %2447 = vadd.xlane.f32.xlu0 %v17587_v21  ;;  %v1392_v39 = vpop.xlane.xlu0 %1391 }
 0x423   : > { %20719 = vst [vmem:[#allocation157_spill] sm:$0xff] %v17589_v50  ;;  %14960 = vpow2.f32 %v1435_v53  ;;  %v4438_v42 = vadd.f32 %v17514_v0, %v4437_v51  ;;  %v1419_v15 = vsub.f32 %v17335_v24, %v1392_v39 }
 0x424   : > { %v17597_v40 = vpop.eup %14950  ;;  %v1437_v35 = vmul.f32 1.442695, %v1418_v38  ;;  %v12122_v33 = vpop.f32.mrb[174].mxu1 }
 0x425   : > { %v17599_v28 = vpop.eup %14952  ;;  %v17601_v4 = vpack.c.bf16 %v4443_v25, %v4438_v42  ;;  %v1439_v14 = vmul.f32 1.442695, %v1419_v15  ;;  %v1394_v13 = vpop.xlane.xlu1 %1393  ;;  %v4453_v19 = vadd.f32 %v12122_v33, %v17514_v0  ;;  %2449 = vadd.xlane.f32.xlu1 %v17597_v40 }
 0x426   : > { %14962 = vpow2.f32 %v1437_v35  ;;  %v4447_v50 = vpop.f32.mrb[175].mxu1  ;;  %v1420_v53 = vsub.f32 %v17350_v55, %v1394_v13  ;;  %2451 = vadd.xlane.f32.xlu0 %v17599_v28  ;;  %v1396_v24 = vpop.xlane.xlu0 %1395 }
 0x427   : > { %20720 = vst [vmem:[#allocation158_spill] sm:$0xff] %v17601_v4  ;;  %14964 = vpow2.f32 %v1439_v14  ;;  %v4448_v51 = vadd.f32 %v17514_v0, %v4447_v50  ;;  %v1421_v25 = vsub.f32 %v17353_v31, %v1396_v24 }
 0x428   : > { %v17609_v38 = vpop.eup %14954  ;;  %v1441_v39 = vmul.f32 1.442695, %v1420_v53 }
 0x429   : > { %v17611_v42 = vpop.eup %14956  ;;  %v17613_v15 = vpack.c.bf16 %v4453_v19, %v4448_v51  ;;  %v1443_v35 = vmul.f32 1.442695, %v1421_v25  ;;  %v1398_v33 = vpop.xlane.xlu1 %1397  ;;  %2453 = vadd.xlane.f32.xlu1 %v17609_v38 }
 0x42a   : > { %14966 = vpow2.f32 %v1441_v39  ;;  %v1422_v55 = vsub.f32 %v17368_v10, %v1398_v33  ;;  %1463 = vadd.xlane.f32.xlu0 %v17611_v42  ;;  %v1400_v14 = vpop.xlane.xlu0 %1399 }
 0x42b   : > { %20721 = vst [vmem:[#allocation159_spill] sm:$0xff] %v17613_v15  ;;  %14968 = vpow2.f32 %v1443_v35  ;;  %v1423_v31 = vsub.f32 %v17371_v6, %v1400_v14 }
 0x42c   : > { %v17619_v0 = vpop.eup %14958  ;;  %v1445_v50 = vmul.f32 1.442695, %v1422_v55 }
 0x42d   : > { %v17621_v13 = vpop.eup %14960  ;;  %v1447_v19 = vmul.f32 1.442695, %v1423_v31  ;;  %v1402_v53 = vpop.xlane.xlu1 %1401  ;;  %1465 = vadd.xlane.f32.xlu1 %v17619_v0 }
 0x42e   : > { %14970 = vpow2.f32 %v1445_v50  ;;  %v1424_v24 = vsub.f32 %v17386_v17, %v1402_v53  ;;  %1467 = vadd.xlane.f32.xlu0 %v17621_v13  ;;  %v1404_v10 = vpop.xlane.xlu0 %1403 }
 0x42f   : > { %14972 = vpow2.f32 %v1447_v19  ;;  %v1425_v51 = vsub.f32 %v17389_v41, %v1404_v10 }
 0x430   : > { %v17627_v25 = vpop.eup %14962  ;;  %v1449_v6 = vmul.f32 1.442695, %v1424_v24 }
 0x431   : > { %v17629_v39 = vpop.eup %14964  ;;  %v1451_v35 = vmul.f32 1.442695, %v1425_v51  ;;  %v1406_v33 = vpop.xlane.xlu1 %1405  ;;  %1469 = vadd.xlane.f32.xlu1 %v17627_v25 }
 0x432   : > { %14974 = vpow2.f32 %v1449_v6  ;;  %v1426_v55 = vsub.f32 %v17404_v43, %v1406_v33  ;;  %1471 = vadd.xlane.f32.xlu0 %v17629_v39  ;;  %v1408_v17 = vpop.xlane.xlu0 %1407 }
 0x433   : > { %14976 = vpow2.f32 %v1451_v35  ;;  %v1427_v14 = vsub.f32 %v17407_v2, %v1408_v17 }
 0x434   : > { %v17635_v31 = vpop.eup %14966  ;;  %v1453_v41 = vmul.f32 1.442695, %v1426_v55 }
 0x435   : > { %v17637_v50 = vpop.eup %14968  ;;  %v1455_v19 = vmul.f32 1.442695, %v1427_v14  ;;  %v1410_v53 = vpop.xlane.xlu1 %1409  ;;  %1473 = vadd.xlane.f32.xlu1 %v17635_v31 }
 0x436   : > { %14978 = vpow2.f32 %v1453_v41  ;;  %v1428_v24 = vsub.f32 %v17422_v36, %v1410_v53  ;;  %1475 = vadd.xlane.f32.xlu0 %v17637_v50  ;;  %v1412_v43 = vpop.xlane.xlu0 %1411 }
 0x437   : > { %14980 = vpow2.f32 %v1455_v19  ;;  %v1429_v10 = vsub.f32 %v17425_v63, %v1412_v43 }
 0x438   : > { %v17643_v51 = vpop.eup %14970  ;;  %v1457_v2 = vmul.f32 1.442695, %v1428_v24 }
 0x439   : > { %v17645_v6 = vpop.eup %14972  ;;  %v1459_v35 = vmul.f32 1.442695, %v1429_v10  ;;  %v1414_v33 = vpop.xlane.xlu1 %1413  ;;  %1477 = vadd.xlane.f32.xlu1 %v17643_v51 }
 0x43a   : > { %14982 = vpow2.f32 %v1457_v2  ;;  %v1430_v36 = vsub.f32 %v17436_v5, %v1414_v33  ;;  %1479 = vadd.xlane.f32.xlu0 %v17645_v6 }
 0x43b   : > { %14984 = vpow2.f32 %v1459_v35 }
 0x43c   : > { %v17650_v55 = vpop.eup %14974  ;;  %v1461_v17 = vmul.f32 1.442695, %v1430_v36 }
 0x43d   : > { %v17652_v14 = vpop.eup %14976  ;;  %1481 = vadd.xlane.f32.xlu1 %v17650_v55 }
 0x43e   : > { %14986 = vpow2.f32 %v1461_v17  ;;  %1483 = vadd.xlane.f32.xlu0 %v17652_v14 }
 0x440   : > { %v17656_v63 = vpop.eup %14978 }
 0x441   : > { %v17658_v41 = vpop.eup %14980  ;;  %1485 = vadd.xlane.f32.xlu1 %v17656_v63 }
 0x442   : > { %1487 = vadd.xlane.f32.xlu0 %v17658_v41 }
 0x444   : > { %v17662_v5 = vpop.eup %14982 }
 0x445   : > { %v17664_v19 = vpop.eup %14984  ;;  %1489 = vadd.xlane.f32.xlu1 %v17662_v5 }
 0x446   : > { %1491 = vadd.xlane.f32.xlu0 %v17664_v19 }
 0x448   : > { %v17668_v53 = vpop.eup %14986 }
 0x449   : > { %20722 = vst [vmem:[#allocation160_spill] sm:$0xff] %v17668_v53  ;;  %1493 = vadd.xlane.f32.xlu1 %v17668_v53 }
 0x495   : > { %v2424_v24 = vpop.xlane.xlu0 %2423 }
 0x496   : > { %14988 = vrcp.f32 %v2424_v24 }
 0x499   : > { %v2428_v43 = vpop.xlane.xlu0 %2427 }
 0x49a   : > { %v2426_v10 = vpop.xlane.xlu1 %2425  ;;  %14990 = vrcp.f32 %v2428_v43 }
 0x49b   : > { %14992 = vrcp.f32 %v2426_v10 }
 0x49e   : > { %v2430_v2 = vpop.xlane.xlu1 %2429  ;;  %v2432_v35 = vpop.xlane.xlu0 %2431 }
 0x49f   : > { %14994 = vrcp.f32 %v2430_v2 }
 0x4a0   : > { %v14989_v33 = vpop.eup %14988  ;;  %14996 = vrcp.f32 %v2432_v35 }
 0x4a1   : > { %v2471_v36 = vmul.f32 %v14989_v33, %v2424_v24 }
 0x4a2   : > { %v2434_v17 = vpop.xlane.xlu1 %2433  ;;  %v2436_v15 = vpop.xlane.xlu0 %2435 }
 0x4a3   : > { %v2487_v4 = vsub.f32 2.0, %v2471_v36  ;;  %14998 = vrcp.f32 %v2434_v17 }
 0x4a4   : > { %v14991_v47 = vpop.eup %14990  ;;  %15000 = vrcp.f32 %v2436_v15 }
 0x4a5   : > { %v14993_v61 = vpop.eup %14992  ;;  %v2473_v34 = vmul.f32 %v14991_v47, %v2428_v43  ;;  %v2503_v20 = vmul.f32 %v14989_v33, %v2487_v4 }
 0x4a6   : > { %v2472_v52 = vmul.f32 %v14993_v61, %v2426_v10  ;;  %v2438_v18 = vpop.xlane.xlu1 %2437  ;;  %v2440_v59 = vpop.xlane.xlu0 %2439 }
 0x4a7   : > { %v2489_v60 = vsub.f32 2.0, %v2473_v34  ;;  %15002 = vrcp.f32 %v2438_v18  ;;  %v2519_v26 = vmul.f32 %v17516_v16, %v2503_v20 }
 0x4a8   : > { %v2488_v48 = vsub.f32 2.0, %v2472_v52  ;;  %15004 = vrcp.f32 %v2440_v59 }
 0x4a9   : > { %v14995_v12 = vpop.eup %14994  ;;  %11595 = vmatprep.mubr.f32.mxu0 %v2519_v26  ;;  %v2505_v24 = vmul.f32 %v14991_v47, %v2489_v60 }
 0x4aa   : > { %v14997_v3 = vpop.eup %14996  ;;  %v2504_v36 = vmul.f32 %v14993_v61, %v2488_v48  ;;  %v2474_v1 = vmul.f32 %v14995_v12, %v2430_v2  ;;  %v2442_v58 = vpop.xlane.xlu1 %2441 }
 0x4ab   : > { %v2444_v56 = vpop.xlane.xlu0 %2443  ;;  %v2475_v53 = vmul.f32 %v14997_v3, %v2432_v35  ;;  %15006 = vrcp.f32 %v2442_v58  ;;  %v2521_v4 = vmul.f32 %v17525_v9, %v2505_v24 }
 0x4ac   : > { %v2520_v43 = vmul.f32 %v17527_v23, %v2504_v36  ;;  %v2490_v34 = vsub.f32 2.0, %v2474_v1  ;;  %15008 = vrcp.f32 %v2444_v56 }
 0x4ad   : > { %v14999_v10 = vpop.eup %14998  ;;  %v2491_v16 = vsub.f32 2.0, %v2475_v53 }
 0x4ae   : > { %v15001_v52 = vpop.eup %15000  ;;  %v2476_v20 = vmul.f32 %v14999_v10, %v2434_v17  ;;  %v2446_v33 = vpop.xlane.xlu1 %2445  ;;  %11596 = vmatmul.mubr.f32.vlgmr.msra.gmra.mrb[48].mxu0 %v2520_v43  ;;  %v2506_v60 = vmul.f32 %v14995_v12, %v2490_v34 }
 0x4af   : > { %v2448_v26 = vpop.xlane.xlu0 %2447  ;;  %v2477_v48 = vmul.f32 %v15001_v52, %v2436_v15  ;;  %15010 = vrcp.f32 %v2446_v33  ;;  %13686 = vmatpush3.bf16.msra.mxu0 %v16339_v49  ;;  %11598 = vmatprep.mubr.f32.mxu0 %v2521_v4  ;;  %v2507_v61 = vmul.f32 %v14997_v3, %v2491_v16 }
 0x4b0   : > { %v2492_v47 = vsub.f32 2.0, %v2476_v20  ;;  %15012 = vrcp.f32 %v2448_v26  ;;  %13688 = vmatprep.subr.bf16.mxu0 %v16345_v29  ;;  %v2522_v1 = vmul.f32 %v17537_v7, %v2506_v60 }
 0x4b1   : > { %v15003_v9 = vpop.eup %15002  ;;  %v2493_v23 = vsub.f32 2.0, %v2477_v48  ;;  %v2523_v53 = vmul.f32 %v17539_v44, %v2507_v61 }
 0x4b2   : > { %v15005_v2 = vpop.eup %15004  ;;  %v2478_v35 = vmul.f32 %v15003_v9, %v2438_v18  ;;  %v2450_v17 = vpop.xlane.xlu1 %2449  ;;  %11599 = vmatmul.mubr.f32.gmra.mrb[50].mxu0 %v2522_v1  ;;  %v2508_v15 = vmul.f32 %v14999_v10, %v2492_v47 }
 0x4b3   : > { %v2452_v12 = vpop.xlane.xlu0 %2451  ;;  %v2479_v24 = vmul.f32 %v15005_v2, %v2440_v59  ;;  %15014 = vrcp.f32 %v2450_v17  ;;  %13690 = vmatpush3.bf16.msra.mxu0 %v16345_v29  ;;  %11601 = vmatprep.mubr.f32.mxu0 %v2523_v53  ;;  %v2509_v3 = vmul.f32 %v15001_v52, %v2493_v23 }
 0x4b4   : > { %v2494_v49 = vsub.f32 2.0, %v2478_v35  ;;  %15016 = vrcp.f32 %v2452_v12  ;;  %13692 = vmatprep.subr.bf16.mxu0 %v16347_v62  ;;  %v2524_v7 = vmul.f32 %v17549_v57, %v2508_v15 }
 0x4b5   : > { %v15007_v36 = vpop.eup %15006  ;;  %v2495_v44 = vsub.f32 2.0, %v2479_v24  ;;  %v2525_v18 = vmul.f32 %v17551_v45, %v2509_v3 }
 0x4b6   : > { %v15009_v4 = vpop.eup %15008  ;;  %v2480_v43 = vmul.f32 %v15007_v36, %v2442_v58  ;;  %v2454_v34 = vpop.xlane.xlu1 %2453  ;;  %11602 = vmatmul.mubr.f32.gmra.mrb[52].mxu0 %v2524_v7  ;;  %v2510_v10 = vmul.f32 %v15003_v9, %v2494_v49 }
 0x4b7   : > { %v1464_v59 = vpop.xlane.xlu0 %1463  ;;  %v2481_v16 = vmul.f32 %v15009_v4, %v2444_v56  ;;  %15018 = vrcp.f32 %v2454_v34  ;;  %13694 = vmatpush3.bf16.msra.mxu0 %v16347_v62  ;;  %11604 = vmatprep.mubr.f32.mxu0 %v2525_v18  ;;  %v2511_v29 = vmul.f32 %v15005_v2, %v2495_v44 }
 0x4b8   : > { %v2496_v52 = vsub.f32 2.0, %v2480_v43  ;;  %15020 = vrcp.f32 %v1464_v59  ;;  %13696 = vmatprep.subr.bf16.mxu0 %v16353_v27  ;;  %v2526_v57 = vmul.f32 %v17561_v11, %v2510_v10 }
 0x4b9   : > { %v15011_v20 = vpop.eup %15010  ;;  %v2497_v45 = vsub.f32 2.0, %v2481_v16  ;;  %v2527_v58 = vmul.f32 %v17563_v30, %v2511_v29 }
 0x4ba   : > { %v15013_v60 = vpop.eup %15012  ;;  %v2482_v48 = vmul.f32 %v15011_v20, %v2446_v33  ;;  %v1466_v61 = vpop.xlane.xlu1 %1465  ;;  %11605 = vmatmul.mubr.f32.gmra.mrb[54].mxu0 %v2526_v57  ;;  %v2512_v47 = vmul.f32 %v15007_v36, %v2496_v52 }
 0x4bb   : > { %v1468_v56 = vpop.xlane.xlu0 %1467  ;;  %v2483_v1 = vmul.f32 %v15013_v60, %v2448_v26  ;;  %15022 = vrcp.f32 %v1466_v61  ;;  %13698 = vmatpush3.bf16.msra.mxu0 %v16353_v27  ;;  %11607 = vmatprep.mubr.f32.mxu0 %v2527_v58  ;;  %v2513_v62 = vmul.f32 %v15009_v4, %v2497_v45  ;;  %v20723_v58 = vld [vmem:[#allocation56_spill] sm:$0xff] }
 0x4bc   : > { %v2498_v9 = vsub.f32 2.0, %v2482_v48  ;;  %15024 = vrcp.f32 %v1468_v56  ;;  %13700 = vmatprep.subr.bf16.mxu0 %v16355_v32  ;;  %v2528_v11 = vmul.f32 %v17573_v46, %v2512_v47 }
 0x4bd   : > { %v15015_v23 = vpop.eup %15014  ;;  %v2499_v30 = vsub.f32 2.0, %v2483_v1  ;;  %v2529_v33 = vmul.f32 %v17575_v37, %v2513_v62 }
 0x4be   : > { %v15017_v53 = vpop.eup %15016  ;;  %v2484_v2 = vmul.f32 %v15015_v23, %v2450_v17  ;;  %v1470_v35 = vpop.xlane.xlu1 %1469  ;;  %11608 = vmatmul.mubr.f32.gmra.mrb[56].mxu0 %v2528_v11  ;;  %v2514_v15 = vmul.f32 %v15011_v20, %v2498_v9 }
 0x4bf   : > { %v1472_v26 = vpop.xlane.xlu0 %1471  ;;  %v2485_v24 = vmul.f32 %v15017_v53, %v2452_v12  ;;  %15026 = vrcp.f32 %v1470_v35  ;;  %13702 = vmatpush3.bf16.msra.mxu0 %v16355_v32  ;;  %11610 = vmatprep.mubr.f32.mxu0 %v2529_v33  ;;  %v2515_v27 = vmul.f32 %v15013_v60, %v2499_v30 }
 0x4c0   : > { %v2500_v3 = vsub.f32 2.0, %v2484_v2  ;;  %15028 = vrcp.f32 %v1472_v26  ;;  %13704 = vmatprep.subr.bf16.mxu0 %v16361_v22  ;;  %v2530_v46 = vmul.f32 %v17585_v8, %v2514_v15 }
 0x4c1   : > { %v15019_v49 = vpop.eup %15018  ;;  %v2501_v37 = vsub.f32 2.0, %v2485_v24  ;;  %v2531_v17 = vmul.f32 %v17587_v21, %v2515_v27  ;;  %v9466_v27 = vld [vmem:[%s20288_s5 + $0x128] sm:$0xff] }
 0x4c2   : > { %v15021_v7 = vpop.eup %15020  ;;  %v2486_v36 = vmul.f32 %v15019_v49, %v2454_v34  ;;  %v1474_v44 = vpop.xlane.xlu1 %1473  ;;  %11611 = vmatmul.mubr.f32.gmra.mrb[58].mxu0 %v2530_v46  ;;  %v2516_v18 = vmul.f32 %v15015_v23, %v2500_v3 }
 0x4c3   : > { %v17694_v12 = vpop.xlane.xlu0 %1475  ;;  %v1511_v32 = vmul.f32 %v15021_v7, %v1464_v59  ;;  %15030 = vrcp.f32 %v1474_v44  ;;  %13706 = vmatpush3.bf16.msra.mxu0 %v16361_v22  ;;  %11613 = vmatprep.mubr.f32.mxu0 %v2531_v17  ;;  %v2517_v4 = vmul.f32 %v15017_v53, %v2501_v37  ;;  %v9461_v59 = vld [vmem:[%s20288_s5 + $0x100] sm:$0xff]  ;;  %v9462_v22 = vld [vmem:[%s20288_s5 + $0x108] sm:$0xff] }
 0x4c4   : > { %v2502_v43 = vsub.f32 2.0, %v2486_v36  ;;  %15032 = vrcp.f32 %v17694_v12  ;;  %13708 = vmatprep.subr.bf16.mxu0 %v16371_v54  ;;  %v2532_v8 = vmul.f32 %v17597_v40, %v2516_v18  ;;  %v17713_v48 = vpack.c.bf16 %v9462_v22, %v9461_v59 }
 0x4c5   : > { %v15023_v21 = vpop.eup %15022  ;;  %v1527_v34 = vsub.f32 2.0, %v1511_v32  ;;  %v2533_v10 = vmul.f32 %v17599_v28, %v2517_v4 }
 0x4c6   : > { %v15025_v16 = vpop.eup %15024  ;;  %v1512_v29 = vmul.f32 %v15023_v21, %v1466_v61  ;;  %v1478_v52 = vpop.xlane.xlu1 %1477  ;;  %11614 = vmatmul.mubr.f32.gmra.mrb[60].mxu0 %v2532_v8  ;;  %v2518_v20 = vmul.f32 %v15019_v49, %v2502_v43  ;;  %v9468_v43 = vld [vmem:[%s20288_s5 + $0x138] sm:$0xff] }
 0x4c7   : > { %v17707_v57 = vpop.xlane.xlu0 %1479  ;;  %v1513_v40 = vmul.f32 %v15025_v16, %v1468_v56  ;;  %15034 = vrcp.f32 %v1478_v52  ;;  %13710 = vmatpush3.bf16.msra.mxu0 %v16371_v54  ;;  %11616 = vmatprep.mubr.f32.mxu0 %v2533_v10  ;;  %v1543_v28 = vmul.f32 %v15021_v7, %v1527_v34  ;;  %v9463_v56 = vld [vmem:[%s20288_s5 + $0x110] sm:$0xff]  ;;  %v9464_v54 = vld [vmem:[%s20288_s5 + $0x118] sm:$0xff] }
 0x4c8   : > { %v1528_v45 = vsub.f32 2.0, %v1512_v29  ;;  %15036 = vrcp.f32 %v17707_v57  ;;  %13712 = vmatprep.subr.bf16.mxu0 %v20723_v58  ;;  %v2534_v60 = vmul.f32 %v17609_v38, %v2518_v20  ;;  %v17728_v2 = vpack.c.bf16 %v9464_v54, %v9463_v56 }
 0x4c9   : > { %v15027_v61 = vpop.eup %15026  ;;  %v1529_v47 = vsub.f32 2.0, %v1513_v40  ;;  %v1559_v1 = vmul.f32 %v17611_v42, %v1543_v28  ;;  %v9470_v28 = vld [vmem:[%s20288_s5 + $0x148] sm:$0xff] }
 0x4ca   : > { %v15029_v62 = vpop.eup %15028  ;;  %v1544_v9 = vmul.f32 %v15023_v21, %v1528_v45  ;;  %v1514_v11 = vmul.f32 %v15027_v61, %v1470_v35  ;;  %v1482_v23 = vpop.xlane.xlu1 %1481  ;;  %11617 = vmatmul.mubr.f32.gmra.mrb[62].mxu0 %v2534_v60 }
 0x4cb   : > { %v17722_v38 = vpop.xlane.xlu0 %1483  ;;  %v1515_v30 = vmul.f32 %v15029_v62, %v1472_v26  ;;  %15038 = vrcp.f32 %v1482_v23  ;;  %13714 = vmatpush3.bf16.msra.mxu0 %v20723_v58  ;;  %11651 = vmatprep.mubr.f32.mxu0 %v1559_v1  ;;  %v1545_v42 = vmul.f32 %v15025_v16, %v1529_v47  ;;  %v9465_v26 = vld [vmem:[%s20288_s5 + $0x120] sm:$0xff] }
 0x4cc   : > { %v1560_v33 = vmul.f32 %v17619_v0, %v1544_v9  ;;  %v1530_v53 = vsub.f32 2.0, %v1514_v11  ;;  %15040 = vrcp.f32 %v17722_v38  ;;  %13748 = vmatprep.subr.bf16.mxu0 %v17713_v48  ;;  %v17741_v18 = vpack.c.bf16 %v9466_v27, %v9465_v26  ;;  %v9471_v11 = vld [vmem:[%s20288_s5 + $0x150] sm:$0xff]  ;;  %v9473_v27 = vld [vmem:[%s20288_s5 + $0x160] sm:$0xff] }
 0x4cd   : > { %v15031_v35 = vpop.eup %15030  ;;  %v1531_v15 = vsub.f32 2.0, %v1515_v30  ;;  %v1561_v24 = vmul.f32 %v17621_v13, %v1545_v42 }
 0x4ce   : > { %v15033_v0 = vpop.eup %15032  ;;  %v1516_v3 = vmul.f32 %v15031_v35, %v1474_v44  ;;  %v1486_v46 = vpop.xlane.xlu1 %1485  ;;  %11652 = vmatmul.mubr.f32.vlgmr.msra.gmra.mrb[48].mxu0 %v1560_v33  ;;  %v1546_v37 = vmul.f32 %v15027_v61, %v1530_v53 }
 0x4cf   : > { %v1488_v49 = vpop.xlane.xlu0 %1487  ;;  %v1517_v17 = vmul.f32 %v15033_v0, %v17694_v12  ;;  %15042 = vrcp.f32 %v1486_v46  ;;  %13750 = vmatpush3.bf16.msra.mxu0 %v17713_v48  ;;  %11654 = vmatprep.mubr.f32.mxu0 %v1561_v24  ;;  %v1547_v13 = vmul.f32 %v15029_v62, %v1531_v15  ;;  %v9467_v12 = vld [vmem:[%s20288_s5 + $0x130] sm:$0xff] }
 0x4d0   : > { %v1532_v7 = vsub.f32 2.0, %v1516_v3  ;;  %15044 = vrcp.f32 %v1488_v49  ;;  %13752 = vmatprep.subr.bf16.mxu0 %v17728_v2  ;;  %v1562_v36 = vmul.f32 %v17627_v25, %v1546_v37  ;;  %v17754_v29 = vpack.c.bf16 %v9468_v43, %v9467_v12 }
 0x4d1   : > { %v15035_v44 = vpop.eup %15034  ;;  %v1533_v32 = vsub.f32 2.0, %v1517_v17  ;;  %v1563_v4 = vmul.f32 %v17629_v39, %v1547_v13 }
 0x4d2   : > { %v15037_v8 = vpop.eup %15036  ;;  %v1518_v21 = vmul.f32 %v15035_v44, %v1478_v52  ;;  %v1490_v34 = vpop.xlane.xlu1 %1489  ;;  %11655 = vmatmul.mubr.f32.gmra.mrb[50].mxu0 %v1562_v36  ;;  %v1548_v25 = vmul.f32 %v15031_v35, %v1532_v7 }
 0x4d3   : > { %v1492_v10 = vpop.xlane.xlu0 %1491  ;;  %v1519_v59 = vmul.f32 %v15037_v8, %v17707_v57  ;;  %15046 = vrcp.f32 %v1490_v34  ;;  %13754 = vmatpush3.bf16.msra.mxu0 %v17728_v2  ;;  %11657 = vmatprep.mubr.f32.mxu0 %v1563_v4  ;;  %v1549_v39 = vmul.f32 %v15033_v0, %v1533_v32  ;;  %v9469_v57 = vld [vmem:[%s20288_s5 + $0x140] sm:$0xff]  ;;  %v9474_v0 = vld [vmem:[%s20288_s5 + $0x168] sm:$0xff]  ;;  %v9475_v32 = vld [vmem:[%s20288_s5 + $0x170] sm:$0xff] }
 0x4d4   : > { %v1534_v22 = vsub.f32 2.0, %v1518_v21  ;;  %15048 = vrcp.f32 %v1492_v10  ;;  %13756 = vmatprep.subr.bf16.mxu0 %v17741_v18  ;;  %v1564_v16 = vmul.f32 %v17635_v31, %v1548_v25  ;;  %v17767_v56 = vpack.c.bf16 %v9470_v28, %v9469_v57  ;;  %v9476_v4 = vld [vmem:[%s20288_s5 + $0x178] sm:$0xff]  ;;  %v20728_v25 = vld [vmem:[#allocation160_spill] sm:$0xff]  ;;  %v20737_v57 = vld [vmem:[#allocation19_spill] sm:$0xff] }
 0x4d5   : > { %v15039_v52 = vpop.eup %15038  ;;  %v1535_v20 = vsub.f32 2.0, %v1519_v59  ;;  %v1565_v40 = vmul.f32 %v17637_v50, %v1549_v39  ;;  %v17791_v13 = vpack.c.bf16 %v9474_v0, %v9473_v27  ;;  %v17803_v21 = vpack.c.bf16 %v9476_v4, %v9475_v32  ;;  %v20729_v39 = vld [vmem:[#allocation7_spill] sm:$0xff]  ;;  %v20738_v28 = vld [vmem:[#allocation20_spill] sm:$0xff] }
 0x4d6   : > { %v15041_v45 = vpop.eup %15040  ;;  %v1520_v58 = vmul.f32 %v15039_v52, %v1482_v23  ;;  %v1494_v60 = vpop.xlane.xlu1 %1493  ;;  %11658 = vmatmul.mubr.f32.gmra.mrb[52].mxu0 %v1564_v16  ;;  %v1550_v61 = vmul.f32 %v15035_v44, %v1534_v22  ;;  %20724 = vst [vmem:[#allocation56_spill] sm:$0xff] %v17767_v56  ;;  %v9472_v23 = vld [vmem:[%s20288_s5 + $0x158] sm:$0xff]  ;;  %v20730_v22 = vld [vmem:[#allocation8_spill] sm:$0xff]  ;;  %v20732_v16 = vld [vmem:[#allocation11_spill] sm:$0xff] }
 0x4d7   : > { %v1521_v31 = vmul.f32 %v15041_v45, %v17722_v38  ;;  %15050 = vrcp.f32 %v1494_v60  ;;  %13758 = vmatpush3.bf16.msra.mxu0 %v17741_v18  ;;  %11660 = vmatprep.mubr.f32.mxu0 %v1565_v40  ;;  %v1551_v50 = vmul.f32 %v15037_v8, %v1535_v20  ;;  %v17779_v35 = vpack.c.bf16 %v9472_v23, %v9471_v11  ;;  %v20735_v20 = vld [vmem:[#allocation16_spill] sm:$0xff]  ;;  %v20736_v40 = vld [vmem:[#allocation17_spill] sm:$0xff] }
 0x4d8   : > { %v1536_v47 = vsub.f32 2.0, %v1520_v58  ;;  %13760 = vmatprep.subr.bf16.mxu0 %v17754_v29  ;;  %v1566_v1 = vmul.f32 %v17643_v51, %v1550_v61  ;;  %20726 = vst [vmem:[#allocation162_spill] sm:$0xff] %v17791_v13  ;;  %20727 = vst [vmem:[#allocation163_spill] sm:$0xff] %v17803_v21  ;;  %v20740_v58 = vld [vmem:[#allocation23_spill] sm:$0xff]  ;;  %v17826_v61 = vld [vmem:[%s20287_s4 + $0x2] ss:$0 sm:$0xff] }
 0x4d9   : > { %v15043_v54 = vpop.eup %15042  ;;  %v1537_v62 = vsub.f32 2.0, %v1521_v31  ;;  %v1567_v9 = vmul.f32 %v17645_v6, %v1551_v50  ;;  %20725 = vst [vmem:[#allocation161_spill] sm:$0xff] %v17779_v35  ;;  %v20742_v31 = vld [vmem:[#allocation26_spill] sm:$0xff]  ;;  %v20743_v50 = vld [vmem:[#allocation28_spill] sm:$0xff] }
 0x4da   : > { %v15045_v38 = vpop.eup %15044  ;;  %v1522_v30 = vmul.f32 %v15043_v54, %v1486_v46  ;;  %11661 = vmatmul.mubr.f32.gmra.mrb[54].mxu0 %v1566_v1  ;;  %v1552_v42 = vmul.f32 %v15039_v52, %v1536_v47  ;;  %v20734_v52 = vld [vmem:[#allocation14_spill] sm:$0xff]  ;;  %v20744_v47 = vld [vmem:[#allocation105_spill] sm:$0xff] }
 0x4db   : > { %v1523_v33 = vmul.f32 %v15045_v38, %v1488_v49  ;;  %13762 = vmatpush3.bf16.msra.mxu0 %v17754_v29  ;;  %11663 = vmatprep.mubr.f32.mxu0 %v1567_v9  ;;  %v1553_v51 = vmul.f32 %v15041_v45, %v1537_v62  ;;  %v20739_v45 = vld [vmem:[#allocation22_spill] sm:$0xff]  ;;  %v2917_v1 = vadd.f32 %v17826_v61, %v20744_v47  ;;  %v20753_v47 = vld [vmem:[#allocation108_spill] sm:$0xff] }
 0x4dc   : > { %v1538_v53 = vsub.f32 2.0, %v1522_v30  ;;  %13764 = vmatprep.subr.bf16.mxu0 %v17767_v56  ;;  %v1568_v6 = vmul.f32 %v17650_v55, %v1552_v42  ;;  %v9478_v62 = vld [vmem:[%s20289_s6 + $0x2] ss:$0 sm:$0xff] }
 0x4dd   : > { %v15047_v15 = vpop.eup %15046  ;;  %v1539_v24 = vsub.f32 2.0, %v1523_v33  ;;  %v1569_v26 = vmul.f32 %v17652_v14, %v1553_v51 }
 0x4de   : > { %v15049_v3 = vpop.eup %15048  ;;  %v1524_v46 = vmul.f32 %v15047_v15, %v1490_v34  ;;  %11664 = vmatmul.mubr.f32.gmra.mrb[56].mxu0 %v1568_v6  ;;  %v1554_v49 = vmul.f32 %v15043_v54, %v1538_v53  ;;  %v20745_v54 = vld [vmem:[#allocation29_spill] sm:$0xff] }
 0x4df   : > { %v1525_v37 = vmul.f32 %v15049_v3, %v1492_v10  ;;  %13766 = vmatpush3.bf16.msra.mxu0 %v17767_v56  ;;  %11666 = vmatprep.mubr.f32.mxu0 %v1569_v26  ;;  %v1555_v55 = vmul.f32 %v15045_v38, %v1539_v24 }
 0x4e0   : > { %v1540_v17 = vsub.f32 2.0, %v1524_v46  ;;  %13768 = vmatprep.subr.bf16.mxu0 %v17779_v35  ;;  %v1570_v14 = vmul.f32 %v17656_v63, %v1554_v49 }
 0x4e1   : > { %v15051_v7 = vpop.eup %15050  ;;  %v1541_v36 = vsub.f32 2.0, %v1525_v37  ;;  %v1571_v44 = vmul.f32 %v17658_v41, %v1555_v55 }
 0x4e2   : > { %v1526_v12 = vmul.f32 %v15051_v7, %v1494_v60  ;;  %11667 = vmatmul.mubr.f32.gmra.mrb[58].mxu0 %v1570_v14  ;;  %v1556_v43 = vmul.f32 %v15047_v15, %v1540_v17  ;;  %v20741_v60 = vld [vmem:[#allocation25_spill] sm:$0xff] }
 0x4e3   : > { %13770 = vmatpush3.bf16.msra.mxu0 %v17779_v35  ;;  %11669 = vmatprep.mubr.f32.mxu0 %v1571_v44  ;;  %v1557_v63 = vmul.f32 %v15049_v3, %v1541_v36 }
 0x4e4   : > { %v1542_v8 = vsub.f32 2.0, %v1526_v12  ;;  %13772 = vmatprep.subr.bf16.mxu0 %v17791_v13  ;;  %v1572_v41 = vmul.f32 %v17662_v5, %v1556_v43  ;;  %v20731_v5 = vld [vmem:[#allocation10_spill] sm:$0xff] }
 0x4e5   : > { %v1573_v34 = vmul.f32 %v17664_v19, %v1557_v63  ;;  %v20733_v19 = vld [vmem:[#allocation13_spill] sm:$0xff] }
 0x4e6   : > { %11670 = vmatmul.mubr.f32.gmra.mrb[60].mxu0 %v1572_v41  ;;  %v1558_v10 = vmul.f32 %v15051_v7, %v1542_v8 }
 0x4e7   : > { %13774 = vmatpush3.bf16.msra.mxu0 %v17791_v13  ;;  %11672 = vmatprep.mubr.f32.mxu0 %v1573_v34 }
 0x4e8   : > { %13776 = vmatprep.subr.bf16.mxu0 %v17803_v21  ;;  %v1574_v59 = vmul.f32 %v20728_v25, %v1558_v10 }
 0x4ea   : > { %11673 = vmatmul.mubr.f32.gmra.mrb[62].mxu0 %v1574_v59 }
 0x4eb   : > { %13778 = vmatpush3.bf16.msra.mxu0 %v17803_v21  ;;  %11763 = vmatprep.mubr.f32.mxu0 %v20729_v39 }
 0x4ee   : > { %11764 = vmatmul.mubr.f32.vlgmr.msra.gmra.mrb[64].mxu0 %v20730_v22 }
 0x4ef   : > { %11766 = vmatprep.mubr.f32.mxu0 %v20731_v5 }
 0x4f2   : > { %11767 = vmatmul.mubr.f32.gmra.mrb[66].mxu0 %v20732_v16 }
 0x4f3   : > { %11769 = vmatprep.mubr.f32.mxu0 %v20733_v19 }
 0x4f6   : > { %11770 = vmatmul.mubr.f32.gmra.mrb[68].mxu0 %v20734_v52  ;;  %v20747_v52 = vld [vmem:[#allocation120_spill] sm:$0xff] }
 0x4f7   : > { %11772 = vmatprep.mubr.f32.mxu0 %v20735_v20  ;;  %v20748_v20 = vld [vmem:[#allocation104_spill] sm:$0xff] }
 0x4fa   : > { %11773 = vmatmul.mubr.f32.gmra.mrb[70].mxu0 %v20736_v40  ;;  %v2922_v40 = vadd.f32 %v20748_v20, %v17826_v61 }
 0x4fb   : > { %11775 = vmatprep.mubr.f32.mxu0 %v20737_v57  ;;  %v20749_v57 = vld [vmem:[#allocation107_spill] sm:$0xff] }
 0x4fe   : > { %11776 = vmatmul.mubr.f32.gmra.mrb[72].mxu0 %v20738_v28  ;;  %v2927_v28 = vadd.f32 %v17826_v61, %v20749_v57  ;;  %v9503_v57 = vld [vmem:[%s20292_s9 + $0x130] sm:$0xff] }
 0x4ff   : > { %11778 = vmatprep.mubr.f32.mxu0 %v20739_v45  ;;  %v20750_v45 = vld [vmem:[#allocation106_spill] sm:$0xff] }
 0x502   : > { %11779 = vmatmul.mubr.f32.gmra.mrb[74].mxu0 %v20740_v58  ;;  %v2932_v58 = vadd.f32 %v20750_v45, %v17826_v61 }
 0x503   : > { %11781 = vmatprep.mubr.f32.mxu0 %v20741_v60  ;;  %v20751_v60 = vld [vmem:[#allocation121_spill] sm:$0xff] }
 0x506   : > { %11782 = vmatmul.mubr.f32.gmra.mrb[76].mxu0 %v20742_v31  ;;  %v20752_v31 = vld [vmem:[#allocation109_spill] sm:$0xff] }
 0x507   : > { %11784 = vmatprep.mubr.f32.mxu0 %v20743_v50  ;;  %v2937_v50 = vadd.f32 %v17826_v61, %v20752_v31  ;;  %v9506_v31 = vld [vmem:[%s20292_s9 + $0x148] sm:$0xff] }
 0x50a   : > { %11785 = vmatmul.mubr.f32.gmra.mrb[78].mxu0 %v20745_v54  ;;  %v20754_v54 = vld [vmem:[#allocation122_spill] sm:$0xff] }
 0x50b   : > { %11875 = vmatprep.mubr.msk.f32.mxu0 %vm412_vm0, %v2917_v1  ;;  %v2942_v1 = vadd.f32 %v20753_v47, %v17826_v61 }
 0x5c1   : > { %v11765_v9 = vpop.f32.mrb[64].mxu0 }
 0x5c2   : > { %v3092_v11 = vadd.f32 %v11765_v9, %v9478_v62  ;;  %v3086_v23 = vpop.f32.mrb[65].mxu0 }
 0x5c3   : > { %v3087_v38 = vadd.f32 %v9478_v62, %v3086_v23 }
 0x5c5   : > { %v13811_v30 = vpack.c.bf16 %v3092_v11, %v3087_v38  ;;  %v11768_v42 = vpop.f32.mrb[66].mxu0  ;;  %v20756_v11 = vld [vmem:[#allocation110_spill] sm:$0xff]  ;;  %v20757_v38 = vld [vmem:[#allocation123_spill] sm:$0xff] }
 0x5c6   : > { %v3102_v33 = vadd.f32 %v11768_v42, %v9478_v62  ;;  %v3096_v51 = vpop.f32.mrb[67].mxu0  ;;  %v2952_v23 = vadd.f32 %v20756_v11, %v17826_v61  ;;  %v9507_v11 = vld [vmem:[%s20292_s9 + $0x150] sm:$0xff] }
 0x5c7   : > { %v3097_v53 = vadd.f32 %v9478_v62, %v3096_v51  ;;  %13813 = vmatprep.subr.msk.bf16.mxu0 %vm16314_vm1, %v13811_v30 }
 0x5c8   : > { %13816 = vmatpush3.bf16.xpose.msk.msra.mxu0 %vm16314_vm1, %v13811_v30  ;;  %v20758_v30 = vld [vmem:[#allocation113_spill] sm:$0xff] }
 0x5c9   : > { %v13817_v15 = vpack.c.bf16 %v3102_v33, %v3097_v53  ;;  %v11771_v24 = vpop.f32.mrb[68].mxu0  ;;  %v2957_v42 = vadd.f32 %v17826_v61, %v20758_v30  ;;  %v20759_v33 = vld [vmem:[#allocation112_spill] sm:$0xff] }
 0x5ca   : > { %v3112_v26 = vadd.f32 %v11771_v24, %v9478_v62  ;;  %v3106_v27 = vpop.f32.mrb[69].mxu0  ;;  %v2962_v51 = vadd.f32 %v20759_v33, %v17826_v61  ;;  %v20760_v53 = vld [vmem:[#allocation124_spill] sm:$0xff]  ;;  %v9510_v33 = vld [vmem:[%s20292_s9 + $0x168] sm:$0xff] }
 0x5cb   : > { %v3107_v0 = vadd.f32 %v9478_v62, %v3106_v27  ;;  %13819 = vmatprep.subr.msk.bf16.mxu0 %vm16314_vm1, %v13817_v15 }
 0x5cd   : > { %v13823_v3 = vpack.c.bf16 %v3112_v26, %v3107_v0  ;;  %v11774_v46 = vpop.f32.mrb[70].mxu0  ;;  %v20762_v26 = vld [vmem:[#allocation114_spill] sm:$0xff]  ;;  %v20763_v0 = vld [vmem:[#allocation125_spill] sm:$0xff] }
 0x5ce   : > { %v3122_v49 = vadd.f32 %v11774_v46, %v9478_v62  ;;  %v3116_v37 = vpop.f32.mrb[71].mxu0  ;;  %v2972_v27 = vadd.f32 %v20762_v26, %v17826_v61 }
 0x5cf   : > { %v3117_v55 = vadd.f32 %v9478_v62, %v3116_v37 }
 0x5d0   : > { %13822 = vmatpush3.bf16.xpose.msk.msra.mxu0 %vm16314_vm1, %v13817_v15  ;;  %v20761_v15 = vld [vmem:[#allocation115_spill] sm:$0xff] }
 0x5d1   : > { %v13829_v17 = vpack.c.bf16 %v3122_v49, %v3117_v55  ;;  %v11777_v14 = vpop.f32.mrb[72].mxu0  ;;  %13825 = vmatprep.subr.msk.bf16.mxu0 %vm16314_vm1, %v13823_v3  ;;  %v2967_v24 = vadd.f32 %v17826_v61, %v20761_v15  ;;  %v20765_v49 = vld [vmem:[#allocation116_spill] sm:$0xff]  ;;  %v20766_v55 = vld [vmem:[#allocation126_spill] sm:$0xff] }
 0x5d2   : > { %v3132_v7 = vadd.f32 %v11777_v14, %v9478_v62  ;;  %v3126_v36 = vpop.f32.mrb[73].mxu0  ;;  %v2982_v37 = vadd.f32 %v20765_v49, %v17826_v61 }
 0x5d3   : > { %v3127_v44 = vadd.f32 %v9478_v62, %v3126_v36 }
 0x5d5   : > { %v13835_v32 = vpack.c.bf16 %v3132_v7, %v3127_v44  ;;  %v11780_v4 = vpop.f32.mrb[74].mxu0  ;;  %v20768_v7 = vld [vmem:[#allocation118_spill] sm:$0xff]  ;;  %v20769_v44 = vld [vmem:[#allocation127_spill] sm:$0xff] }
 0x5d6   : > { %v3142_v12 = vadd.f32 %v11780_v4, %v9478_v62  ;;  %v3136_v43 = vpop.f32.mrb[75].mxu0  ;;  %v2992_v36 = vadd.f32 %v20768_v7, %v17826_v61  ;;  %v9498_v4 = vld [vmem:[%s20292_s9 + $0x108] sm:$0xff] }
 0x5d7   : > { %v3137_v63 = vadd.f32 %v9478_v62, %v3136_v43 }
 0x5d8   : > { %13828 = vmatpush3.bf16.xpose.msk.msra.mxu0 %vm16314_vm1, %v13823_v3  ;;  %v20764_v3 = vld [vmem:[#allocation117_spill] sm:$0xff] }
 0x5d9   : > { %v13841_v8 = vpack.c.bf16 %v3142_v12, %v3137_v63  ;;  %v11783_v41 = vpop.f32.mrb[76].mxu0  ;;  %13831 = vmatprep.subr.msk.bf16.mxu0 %vm16314_vm1, %v13829_v17  ;;  %v2977_v46 = vadd.f32 %v17826_v61, %v20764_v3  ;;  %v9497_v12 = vld [vmem:[%s20292_s9 + $0x100] sm:$0xff] }
 0x5da   : > { %v3152_v34 = vadd.f32 %v11783_v41, %v9478_v62  ;;  %v3146_v10 = vpop.f32.mrb[77].mxu0  ;;  %v9500_v41 = vld [vmem:[%s20292_s9 + $0x118] sm:$0xff] }
 0x5db   : > { %v3147_v25 = vadd.f32 %v9478_v62, %v3146_v10 }
 0x5dd   : > { %v13847_v59 = vpack.c.bf16 %v3152_v34, %v3147_v25  ;;  %v11786_v39 = vpop.f32.mrb[78].mxu0  ;;  %v9499_v34 = vld [vmem:[%s20292_s9 + $0x110] sm:$0xff] }
 0x5de   : > { %v3162_v22 = vadd.f32 %v11786_v39, %v9478_v62  ;;  %v3156_v5 = vpop.f32.mrb[79].mxu0 }
 0x5df   : > { %v3157_v16 = vadd.f32 %v9478_v62, %v3156_v5  ;;  %v20755_v62 = vld [vmem:[#allocation111_spill] sm:$0xff]  ;;  %v9501_v5 = vld [vmem:[%s20292_s9 + $0x120] sm:$0xff] }
 0x5e0   : > { %13834 = vmatpush3.bf16.xpose.msk.msra.mxu0 %vm16314_vm1, %v13829_v17  ;;  %v2947_v9 = vadd.f32 %v17826_v61, %v20755_v62  ;;  %v20767_v17 = vld [vmem:[#allocation119_spill] sm:$0xff] }
 0x5e1   : > { %v13853_v19 = vpack.c.bf16 %v3162_v22, %v3157_v16  ;;  %13837 = vmatprep.subr.msk.bf16.mxu0 %vm16314_vm1, %v13835_v32  ;;  %v2987_v14 = vadd.f32 %v17826_v61, %v20767_v17  ;;  %v9502_v22 = vld [vmem:[%s20292_s9 + $0x128] sm:$0xff] }
 0x5e8   : > { %13840 = vmatpush3.bf16.xpose.msk.msra.mxu0 %vm16314_vm1, %v13835_v32  ;;  %v20770_v32 = vld [vmem:[#allocation144_spill] sm:$0xff] }
 0x5e9   : > { %13843 = vmatprep.subr.msk.bf16.mxu0 %vm16314_vm1, %v13841_v8 }
 0x5f0   : > { %13846 = vmatpush3.bf16.xpose.msk.msra.mxu0 %vm16314_vm1, %v13841_v8 }
 0x5f1   : > { %13849 = vmatprep.subr.msk.bf16.mxu0 %vm16314_vm1, %v13847_v59 }
 0x5f8   : > { %13852 = vmatpush3.bf16.xpose.msk.msra.mxu0 %vm16314_vm1, %v13847_v59 }
 0x5f9   : > { %13855 = vmatprep.subr.msk.bf16.mxu0 %vm16314_vm1, %v13853_v19 }
 0x600   : > { %13858 = vmatpush3.bf16.xpose.msk.msra.mxu0 %vm16314_vm1, %v13853_v19 }
 0x601   : > { %13860 = vmatprep.subr.bf16.mxu0 %v20747_v52 }
 0x607   : > { %11876 = vmatmul.mubr.msk.f32.vlgmr.msra.gmra.mrb[80].mxu0 %vm412_vm0, %v2922_v40  ;;  %v9504_v40 = vld [vmem:[%s20292_s9 + $0x138] sm:$0xff] }
 0x608   : > { %11878 = vmatprep.mubr.msk.f32.mxu0 %vm412_vm0, %v2927_v28  ;;  %13862 = vmatpush3.bf16.msra.mxu0 %v20747_v52 }
 0x609   : > { %13864 = vmatprep.subr.bf16.mxu0 %v20751_v60 }
 0x60b   : > { %11879 = vmatmul.mubr.msk.f32.gmra.mrb[82].mxu0 %vm412_vm0, %v2932_v58 }
 0x60c   : > { %11881 = vmatprep.mubr.msk.f32.mxu0 %vm412_vm0, %v2937_v50  ;;  %13866 = vmatpush3.bf16.msra.mxu0 %v20751_v60  ;;  %v9505_v50 = vld [vmem:[%s20292_s9 + $0x140] sm:$0xff] }
 0x60d   : > { %13868 = vmatprep.subr.bf16.mxu0 %v20754_v54 }
 0x60f   : > { %11882 = vmatmul.mubr.msk.f32.gmra.mrb[84].mxu0 %vm412_vm0, %v2942_v1 }
 0x610   : > { %11884 = vmatprep.mubr.msk.f32.mxu0 %vm412_vm0, %v2947_v9  ;;  %13870 = vmatpush3.bf16.msra.mxu0 %v20754_v54  ;;  %v9508_v9 = vld [vmem:[%s20292_s9 + $0x158] sm:$0xff] }
 0x611   : > { %13872 = vmatprep.subr.bf16.mxu0 %v20757_v38 }
 0x613   : > { %11885 = vmatmul.mubr.msk.f32.gmra.mrb[86].mxu0 %vm412_vm0, %v2952_v23 }
 0x614   : > { %11887 = vmatprep.mubr.msk.f32.mxu0 %vm412_vm0, %v2957_v42  ;;  %13874 = vmatpush3.bf16.msra.mxu0 %v20757_v38 }
 0x615   : > { %13876 = vmatprep.subr.bf16.mxu0 %v20760_v53 }
 0x617   : > { %11888 = vmatmul.mubr.msk.f32.gmra.mrb[88].mxu0 %vm412_vm0, %v2962_v51  ;;  %v9509_v51 = vld [vmem:[%s20292_s9 + $0x160] sm:$0xff] }
 0x618   : > { %11890 = vmatprep.mubr.msk.f32.mxu0 %vm412_vm0, %v2967_v24  ;;  %13878 = vmatpush3.bf16.msra.mxu0 %v20760_v53 }
 0x619   : > { %13880 = vmatprep.subr.bf16.mxu0 %v20763_v0 }
 0x61b   : > { %11891 = vmatmul.mubr.msk.f32.gmra.mrb[90].mxu0 %vm412_vm0, %v2972_v27  ;;  %v9512_v27 = vld [vmem:[%s20292_s9 + $0x178] sm:$0xff] }
 0x61c   : > { %11893 = vmatprep.mubr.msk.f32.mxu0 %vm412_vm0, %v2977_v46  ;;  %13882 = vmatpush3.bf16.msra.mxu0 %v20763_v0  ;;  %v9511_v0 = vld [vmem:[%s20292_s9 + $0x170] sm:$0xff] }
 0x61d   : > { %13884 = vmatprep.subr.bf16.mxu0 %v20766_v55 }
 0x61f   : > { %11894 = vmatmul.mubr.msk.f32.gmra.mrb[92].mxu0 %vm412_vm0, %v2982_v37 }
 0x620   : > { %11896 = vmatprep.mubr.msk.f32.mxu0 %vm412_vm0, %v2987_v14  ;;  %13886 = vmatpush3.bf16.msra.mxu0 %v20766_v55 }
 0x621   : > { %13888 = vmatprep.subr.bf16.mxu0 %v20769_v44 }
 0x623   : > { %11897 = vmatmul.mubr.msk.f32.gmra.mrb[94].mxu0 %vm412_vm0, %v2992_v36 }
 0x624   : > { %13890 = vmatpush3.bf16.msra.mxu0 %v20769_v44 }
 0x625   : > { %13989 = vmatprep.subr.msk.bf16.mxu0 %vm16314_vm1, %v20770_v32 }
 0x6da   : > { %v11877_v43 = vpop.f32.mrb[80].mxu0 }
 0x6db   : > { %v17939_v61 = vadd.f32 %v11877_v43, %v9498_v4  ;;  %v3514_v63 = vpop.f32.mrb[81].mxu0 }
 0x6dc   : > { %v17941_v8 = vadd.f32 %v9497_v12, %v3514_v63 }
 0x6dd   : > { %3595 = vmax.xlane.f32.xlu1 %v17939_v61 }
 0x6de   : > { %v11880_v10 = vpop.f32.mrb[82].mxu0  ;;  %3593 = vmax.xlane.f32.xlu0 %v17941_v8 }
 0x6df   : > { %v17951_v25 = vadd.f32 %v11880_v10, %v9500_v41  ;;  %v3524_v59 = vpop.f32.mrb[83].mxu0 }
 0x6e0   : > { %v17953_v39 = vadd.f32 %v9499_v34, %v3524_v59 }
 0x6e1   : > { %3599 = vmax.xlane.f32.xlu1 %v17951_v25 }
 0x6e2   : > { %v11883_v16 = vpop.f32.mrb[84].mxu0  ;;  %3597 = vmax.xlane.f32.xlu0 %v17953_v39 }
 0x6e3   : > { %v17963_v19 = vadd.f32 %v11883_v16, %v9502_v22  ;;  %v3534_v52 = vpop.f32.mrb[85].mxu0 }
 0x6e4   : > { %v17965_v20 = vadd.f32 %v9501_v5, %v3534_v52 }
 0x6e5   : > { %3603 = vmax.xlane.f32.xlu1 %v17963_v19 }
 0x6e6   : > { %v11886_v28 = vpop.f32.mrb[86].mxu0  ;;  %3601 = vmax.xlane.f32.xlu0 %v17965_v20 }
 0x6e7   : > { %v17975_v45 = vadd.f32 %v11886_v28, %v9504_v40  ;;  %v3544_v58 = vpop.f32.mrb[87].mxu0 }
 0x6e8   : > { %v17977_v60 = vadd.f32 %v9503_v57, %v3544_v58 }
 0x6e9   : > { %3607 = vmax.xlane.f32.xlu1 %v17975_v45 }
 0x6ea   : > { %v11889_v47 = vpop.f32.mrb[88].mxu0  ;;  %3605 = vmax.xlane.f32.xlu0 %v17977_v60 }
 0x6eb   : > { %v17987_v1 = vadd.f32 %v11889_v47, %v9506_v31  ;;  %v3554_v54 = vpop.f32.mrb[89].mxu0 }
 0x6ec   : > { %v17989_v62 = vadd.f32 %v9505_v50, %v3554_v54 }
 0x6ed   : > { %3611 = vmax.xlane.f32.xlu1 %v17987_v1 }
 0x6ee   : > { %v11892_v23 = vpop.f32.mrb[90].mxu0  ;;  %3609 = vmax.xlane.f32.xlu0 %v17989_v62 }
 0x6ef   : > { %v17999_v38 = vadd.f32 %v11892_v23, %v9508_v9  ;;  %v3564_v30 = vpop.f32.mrb[91].mxu0 }
 0x6f0   : > { %v18001_v42 = vadd.f32 %v9507_v11, %v3564_v30 }
 0x6f1   : > { %3615 = vmax.xlane.f32.xlu1 %v17999_v38 }
 0x6f2   : > { %v11895_v53 = vpop.f32.mrb[92].mxu0  ;;  %3613 = vmax.xlane.f32.xlu0 %v18001_v42 }
 0x6f3   : > { %v18011_v15 = vadd.f32 %v11895_v53, %v9510_v33  ;;  %v3574_v24 = vpop.f32.mrb[93].mxu0 }
 0x6f4   : > { %v18013_v26 = vadd.f32 %v9509_v51, %v3574_v24 }
 0x6f5   : > { %3619 = vmax.xlane.f32.xlu1 %v18011_v15 }
 0x6f6   : > { %v11898_v3 = vpop.f32.mrb[94].mxu0  ;;  %3617 = vmax.xlane.f32.xlu0 %v18013_v26 }
 0x6f7   : > { %v18023_v46 = vadd.f32 %v11898_v3, %v9512_v27  ;;  %v3584_v49 = vpop.f32.mrb[95].mxu0 }
 0x6f8   : > { %v18025_v37 = vadd.f32 %v9511_v0, %v3584_v49 }
 0x6f9   : > { %3623 = vmax.xlane.f32.xlu1 %v18023_v46 }
 0x6fa   : > { %3621 = vmax.xlane.f32.xlu0 %v18025_v37 }
 0x76a   : > { %v3596_v55 = vpop.xlane.xlu1 %3595 }
 0x76b   : > { %v3626_v17 = vsub.f32 %v17939_v61, %v3596_v55  ;;  %v3594_v14 = vpop.xlane.xlu0 %3593 }
 0x76c   : > { %v3625_v7 = vsub.f32 %v17941_v8, %v3594_v14 }
 0x76d   : > { %v3643_v36 = vmul.f32 1.442695, %v3626_v17 }
 0x76e   : > { %v3641_v44 = vmul.f32 1.442695, %v3625_v7  ;;  %v3600_v4 = vpop.xlane.xlu1 %3599 }
 0x76f   : > { %15052 = vpow2.f32 %v3643_v36  ;;  %v3628_v12 = vsub.f32 %v17951_v25, %v3600_v4  ;;  %v3598_v43 = vpop.xlane.xlu0 %3597 }
 0x770   : > { %15054 = vpow2.f32 %v3641_v44  ;;  %v3627_v63 = vsub.f32 %v17953_v39, %v3598_v43 }
 0x771   : > { %v3647_v41 = vmul.f32 1.442695, %v3628_v12 }
 0x772   : > { %v3645_v34 = vmul.f32 1.442695, %v3627_v63  ;;  %v3604_v10 = vpop.xlane.xlu1 %3603 }
 0x773   : > { %15056 = vpow2.f32 %v3647_v41  ;;  %v3630_v59 = vsub.f32 %v17963_v19, %v3604_v10  ;;  %v3602_v61 = vpop.xlane.xlu0 %3601 }
 0x774   : > { %15058 = vpow2.f32 %v3645_v34  ;;  %v3629_v8 = vsub.f32 %v17965_v20, %v3602_v61 }
 0x775   : > { %v3651_v22 = vmul.f32 1.442695, %v3630_v59 }
 0x776   : > { %v3649_v5 = vmul.f32 1.442695, %v3629_v8  ;;  %v3608_v16 = vpop.xlane.xlu1 %3607 }
 0x777   : > { %15060 = vpow2.f32 %v3651_v22  ;;  %v3632_v25 = vsub.f32 %v17975_v45, %v3608_v16  ;;  %v3606_v52 = vpop.xlane.xlu0 %3605 }
 0x778   : > { %15062 = vpow2.f32 %v3649_v5  ;;  %v3631_v39 = vsub.f32 %v17977_v60, %v3606_v52 }
 0x779   : > { %v18037_v40 = vpop.eup %15052  ;;  %v3655_v57 = vmul.f32 1.442695, %v3632_v25 }
 0x77a   : > { %v18039_v28 = vpop.eup %15054  ;;  %v3653_v19 = vmul.f32 1.442695, %v3631_v39  ;;  %v3612_v58 = vpop.xlane.xlu1 %3611  ;;  %3675 = vadd.xlane.f32.xlu1 %v18037_v40 }
 0x77b   : > { %15064 = vpow2.f32 %v3655_v57  ;;  %v3634_v20 = vsub.f32 %v17987_v1, %v3612_v58  ;;  %3673 = vadd.xlane.f32.xlu0 %v18039_v28  ;;  %v3610_v31 = vpop.xlane.xlu0 %3609 }
 0x77c   : > { %15066 = vpow2.f32 %v3653_v19  ;;  %v3633_v45 = vsub.f32 %v17989_v62, %v3610_v31 }
 0x77d   : > { %v18045_v50 = vpop.eup %15056  ;;  %v3659_v60 = vmul.f32 1.442695, %v3634_v20 }
 0x77e   : > { %v18047_v47 = vpop.eup %15058  ;;  %v3657_v54 = vmul.f32 1.442695, %v3633_v45  ;;  %v3616_v9 = vpop.xlane.xlu1 %3615  ;;  %3679 = vadd.xlane.f32.xlu1 %v18045_v50 }
 0x77f   : > { %15068 = vpow2.f32 %v3659_v60  ;;  %v3636_v11 = vsub.f32 %v17999_v38, %v3616_v9  ;;  %3677 = vadd.xlane.f32.xlu0 %v18047_v47  ;;  %v3614_v1 = vpop.xlane.xlu0 %3613 }
 0x780   : > { %15070 = vpow2.f32 %v3657_v54  ;;  %v3635_v23 = vsub.f32 %v18001_v42, %v3614_v1 }
 0x781   : > { %v18053_v30 = vpop.eup %15060  ;;  %v3663_v62 = vmul.f32 1.442695, %v3636_v11 }
 0x782   : > { %v18055_v33 = vpop.eup %15062  ;;  %v3661_v51 = vmul.f32 1.442695, %v3635_v23  ;;  %v3620_v53 = vpop.xlane.xlu1 %3619  ;;  %3683 = vadd.xlane.f32.xlu1 %v18053_v30 }
 0x783   : > { %15072 = vpow2.f32 %v3663_v62  ;;  %v3638_v24 = vsub.f32 %v18011_v15, %v3620_v53  ;;  %3681 = vadd.xlane.f32.xlu0 %v18055_v33  ;;  %v3618_v38 = vpop.xlane.xlu0 %3617 }
 0x784   : > { %15074 = vpow2.f32 %v3661_v51  ;;  %v3637_v27 = vsub.f32 %v18013_v26, %v3618_v38 }
 0x785   : > { %v18061_v0 = vpop.eup %15064  ;;  %v3667_v42 = vmul.f32 1.442695, %v3638_v24 }
 0x786   : > { %v18063_v3 = vpop.eup %15066  ;;  %v3665_v49 = vmul.f32 1.442695, %v3637_v27  ;;  %3687 = vadd.xlane.f32.xlu1 %v18061_v0  ;;  %v3624_v55 = vpop.xlane.xlu1 %3623 }
 0x787   : > { %15076 = vpow2.f32 %v3667_v42  ;;  %v3640_v17 = vsub.f32 %v18023_v46, %v3624_v55  ;;  %3685 = vadd.xlane.f32.xlu0 %v18063_v3  ;;  %v3622_v15 = vpop.xlane.xlu0 %3621 }
 0x788   : > { %15078 = vpow2.f32 %v3665_v49  ;;  %v3639_v14 = vsub.f32 %v18025_v37, %v3622_v15 }
 0x789   : > { %v18069_v7 = vpop.eup %15068  ;;  %v3671_v26 = vmul.f32 1.442695, %v3640_v17 }
 0x78a   : > { %v18071_v36 = vpop.eup %15070  ;;  %v3669_v44 = vmul.f32 1.442695, %v3639_v14  ;;  %3691 = vadd.xlane.f32.xlu1 %v18069_v7 }
 0x78b   : > { %15080 = vpow2.f32 %v3671_v26  ;;  %3689 = vadd.xlane.f32.xlu0 %v18071_v36 }
 0x78c   : > { %15082 = vpow2.f32 %v3669_v44 }
 0x78d   : > { %v18075_v4 = vpop.eup %15072 }
 0x78e   : > { %v18077_v46 = vpop.eup %15074  ;;  %3695 = vadd.xlane.f32.xlu1 %v18075_v4 }
 0x78f   : > { %3693 = vadd.xlane.f32.xlu0 %v18077_v46 }
 0x791   : > { %v18081_v37 = vpop.eup %15076 }
 0x792   : > { %v18083_v12 = vpop.eup %15078  ;;  %3699 = vadd.xlane.f32.xlu1 %v18081_v37 }
 0x793   : > { %3697 = vadd.xlane.f32.xlu0 %v18083_v12 }
 0x795   : > { %v18087_v43 = vpop.eup %15080 }
 0x796   : > { %v18089_v63 = vpop.eup %15082  ;;  %3703 = vadd.xlane.f32.xlu1 %v18087_v43 }
 0x797   : > { %3701 = vadd.xlane.f32.xlu0 %v18089_v63 }
 0x807   : > { %v3676_v41 = vpop.xlane.xlu1 %3675 }
 0x808   : > { %15084 = vrcp.f32 %v3676_v41  ;;  %v3674_v34 = vpop.xlane.xlu0 %3673 }
 0x809   : > { %15086 = vrcp.f32 %v3674_v34 }
 0x80b   : > { %v3680_v10 = vpop.xlane.xlu1 %3679 }
 0x80c   : > { %15088 = vrcp.f32 %v3680_v10  ;;  %v3678_v59 = vpop.xlane.xlu0 %3677 }
 0x80d   : > { %15090 = vrcp.f32 %v3678_v59 }
 0x80f   : > { %v3684_v61 = vpop.xlane.xlu1 %3683 }
 0x810   : > { %15092 = vrcp.f32 %v3684_v61  ;;  %v3682_v8 = vpop.xlane.xlu0 %3681 }
 0x811   : > { %15094 = vrcp.f32 %v3682_v8 }
 0x812   : > { %v15085_v22 = vpop.eup %15084 }
 0x813   : > { %v15087_v5 = vpop.eup %15086  ;;  %v3722_v16 = vmul.f32 %v15085_v22, %v3676_v41  ;;  %v3688_v25 = vpop.xlane.xlu1 %3687  ;;  %v20771_v41 = vld [vmem:[#allocation145_spill] sm:$0xff] }
 0x814   : > { %v3721_v52 = vmul.f32 %v15087_v5, %v3674_v34  ;;  %15096 = vrcp.f32 %v3688_v25  ;;  %v3686_v39 = vpop.xlane.xlu0 %3685 }
 0x815   : > { %v3738_v57 = vsub.f32 2.0, %v3722_v16  ;;  %15098 = vrcp.f32 %v3686_v39 }
 0x816   : > { %v15089_v19 = vpop.eup %15088  ;;  %v3737_v58 = vsub.f32 2.0, %v3721_v52 }
 0x817   : > { %v15091_v20 = vpop.eup %15090  ;;  %v3754_v31 = vmul.f32 %v15085_v22, %v3738_v57  ;;  %v3724_v45 = vmul.f32 %v15089_v19, %v3680_v10  ;;  %v3692_v60 = vpop.xlane.xlu1 %3691 }
 0x818   : > { %v3723_v54 = vmul.f32 %v15091_v20, %v3678_v59  ;;  %15100 = vrcp.f32 %v3692_v60  ;;  %v3690_v9 = vpop.xlane.xlu0 %3689  ;;  %v3753_v11 = vmul.f32 %v15087_v5, %v3737_v58 }
 0x819   : > { %v3740_v1 = vsub.f32 2.0, %v3724_v45  ;;  %15102 = vrcp.f32 %v3690_v9  ;;  %v3770_v24 = vmul.f32 %v18037_v40, %v3754_v31 }
 0x81a   : > { %v15093_v23 = vpop.eup %15092  ;;  %v3739_v62 = vsub.f32 2.0, %v3723_v54  ;;  %v3769_v51 = vmul.f32 %v18039_v28, %v3753_v11 }
 0x81b   : > { %v15095_v53 = vpop.eup %15094  ;;  %v3726_v38 = vmul.f32 %v15093_v23, %v3684_v61  ;;  %v3696_v27 = vpop.xlane.xlu1 %3695  ;;  %v3756_v42 = vmul.f32 %v15089_v19, %v3740_v1 }
 0x81c   : > { %v3725_v49 = vmul.f32 %v15095_v53, %v3682_v8  ;;  %15104 = vrcp.f32 %v3696_v27  ;;  %11931 = vmatprep.mubr.f32.mxu0 %v3769_v51  ;;  %v3694_v55 = vpop.xlane.xlu0 %3693  ;;  %v3755_v17 = vmul.f32 %v15091_v20, %v3739_v62 }
 0x81d   : > { %v3742_v15 = vsub.f32 2.0, %v3726_v38  ;;  %15106 = vrcp.f32 %v3694_v55  ;;  %11932 = vmatmul.mubr.f32.vlgmr.msra.gmra.mrb[48].mxu0 %v3770_v24  ;;  %v3772_v10 = vmul.f32 %v18045_v50, %v3756_v42 }
 0x81e   : > { %v15097_v14 = vpop.eup %15096  ;;  %v3741_v26 = vsub.f32 2.0, %v3725_v49  ;;  %13992 = vmatpush3.bf16.xpose.msk.msra.mxu0 %vm16314_vm1, %v20770_v32  ;;  %v3771_v28 = vmul.f32 %v18047_v47, %v3755_v17 }
 0x81f   : > { %v15099_v40 = vpop.eup %15098  ;;  %v3728_v44 = vmul.f32 %v15097_v14, %v3688_v25  ;;  %13995 = vmatprep.subr.msk.bf16.mxu0 %vm16314_vm1, %v20771_v41  ;;  %v3700_v34 = vpop.xlane.xlu1 %3699  ;;  %v3758_v59 = vmul.f32 %v15093_v23, %v3742_v15 }
 0x820   : > { %v3727_v61 = vmul.f32 %v15099_v40, %v3686_v39  ;;  %15108 = vrcp.f32 %v3700_v34  ;;  %11934 = vmatprep.mubr.f32.mxu0 %v3771_v28  ;;  %v3698_v8 = vpop.xlane.xlu0 %3697  ;;  %v3757_v22 = vmul.f32 %v15095_v53, %v3741_v26 }
 0x821   : > { %v3744_v5 = vsub.f32 2.0, %v3728_v44  ;;  %15110 = vrcp.f32 %v3698_v8  ;;  %11935 = vmatmul.mubr.f32.gmra.mrb[50].mxu0 %v3772_v10  ;;  %v3774_v19 = vmul.f32 %v18053_v30, %v3758_v59  ;;  %v20772_v30 = vld [vmem:[#allocation146_spill] sm:$0xff] }
 0x822   : > { %v15101_v32 = vpop.eup %15100  ;;  %v3743_v47 = vsub.f32 2.0, %v3727_v61  ;;  %v3773_v16 = vmul.f32 %v18055_v33, %v3757_v22 }
 0x823   : > { %v15103_v25 = vpop.eup %15102  ;;  %v3730_v52 = vmul.f32 %v15101_v32, %v3692_v60  ;;  %v3704_v57 = vpop.xlane.xlu1 %3703  ;;  %v3760_v58 = vmul.f32 %v15097_v14, %v3744_v5  ;;  %v9562_v5 = vld [vmem:[%s20287_s4 + $0x3] ss:$0 sm:$0xff] }
 0x824   : > { %v3729_v50 = vmul.f32 %v15103_v25, %v3690_v9  ;;  %15112 = vrcp.f32 %v3704_v57  ;;  %11937 = vmatprep.mubr.f32.mxu0 %v3773_v16  ;;  %v3702_v39 = vpop.xlane.xlu0 %3701  ;;  %v3759_v20 = vmul.f32 %v15099_v40, %v3743_v47  ;;  %v20773_v40 = vld [vmem:[#allocation147_spill] sm:$0xff]  ;;  %v20776_v16 = vld [vmem:[#allocation149_spill] sm:$0xff] }
 0x825   : > { %v3746_v31 = vsub.f32 2.0, %v3730_v52  ;;  %15114 = vrcp.f32 %v3702_v39  ;;  %11938 = vmatmul.mubr.f32.gmra.mrb[52].mxu0 %v3774_v19  ;;  %v3776_v9 = vmul.f32 %v18061_v0, %v3760_v58  ;;  %v20780_v52 = vld [vmem:[#allocation128_spill] sm:$0xff]  ;;  %v20781_v19 = vld [vmem:[#allocation131_spill] sm:$0xff] }
 0x826   : > { %v15105_v45 = vpop.eup %15104  ;;  %v3745_v54 = vsub.f32 2.0, %v3729_v50  ;;  %13998 = vmatpush3.bf16.xpose.msk.msra.mxu0 %vm16314_vm1, %v20771_v41  ;;  %v3775_v33 = vmul.f32 %v18063_v3, %v3759_v20  ;;  %v4048_v58 = vadd.f32 %v9562_v5, %v20781_v19  ;;  %v20782_v50 = vld [vmem:[#allocation130_spill] sm:$0xff]  ;;  %v20783_v20 = vld [vmem:[#allocation153_spill] sm:$0xff] }
 0x827   : > { %v15107_v60 = vpop.eup %15106  ;;  %v3732_v11 = vmul.f32 %v15105_v45, %v3696_v27  ;;  %14001 = vmatprep.subr.msk.bf16.mxu0 %vm16314_vm1, %v20772_v30  ;;  %v3762_v1 = vmul.f32 %v15101_v32, %v3746_v31  ;;  %v20774_v32 = vld [vmem:[#allocation148_spill] sm:$0xff]  ;;  %v20784_v31 = vld [vmem:[#allocation133_spill] sm:$0xff] }
 0x828   : > { %v3731_v23 = vmul.f32 %v15107_v60, %v3694_v55  ;;  %11940 = vmatprep.mubr.f32.mxu0 %v3775_v33  ;;  %v3761_v62 = vmul.f32 %v15103_v25, %v3745_v54  ;;  %v20779_v25 = vld [vmem:[#allocation152_spill] sm:$0xff] }
 0x829   : > { %v3748_v51 = vsub.f32 2.0, %v3732_v11  ;;  %11941 = vmatmul.mubr.f32.gmra.mrb[54].mxu0 %v3776_v9  ;;  %v3778_v27 = vmul.f32 %v18069_v7, %v3762_v1  ;;  %v20785_v54 = vld [vmem:[#allocation132_spill] sm:$0xff]  ;;  %v20787_v11 = vld [vmem:[#allocation135_spill] sm:$0xff]  ;;  %v20788_v9 = vld [vmem:[#allocation134_spill] sm:$0xff] }
 0x82a   : > { %v15109_v53 = vpop.eup %15108  ;;  %v3747_v24 = vsub.f32 2.0, %v3731_v23  ;;  %v3777_v38 = vmul.f32 %v18071_v36, %v3761_v62  ;;  %v4063_v33 = vadd.f32 %v20785_v54, %v9562_v5  ;;  %v4073_v1 = vadd.f32 %v20788_v9, %v9562_v5  ;;  %v20789_v23 = vld [vmem:[#allocation155_spill] sm:$0xff]  ;;  %v20790_v62 = vld [vmem:[#allocation137_spill] sm:$0xff] }
 0x82b   : > { %v15111_v42 = vpop.eup %15110  ;;  %v3734_v3 = vmul.f32 %v15109_v53, %v3700_v34  ;;  %v3764_v49 = vmul.f32 %v15105_v45, %v3748_v51  ;;  %v4058_v45 = vadd.f32 %v9562_v5, %v20784_v31  ;;  %v4078_v51 = vadd.f32 %v9562_v5, %v20790_v62  ;;  %v9607_v31 = vld [vmem:[%s20292_s9 + $0x1c0] sm:$0xff] }
 0x82c   : > { %v3733_v17 = vmul.f32 %v15111_v42, %v3698_v8  ;;  %11943 = vmatprep.mubr.f32.mxu0 %v3777_v38  ;;  %v3763_v15 = vmul.f32 %v15107_v60, %v3747_v24  ;;  %v20786_v60 = vld [vmem:[#allocation154_spill] sm:$0xff]  ;;  %v20792_v38 = vld [vmem:[#allocation156_spill] sm:$0xff] }
 0x82d   : > { %v3750_v14 = vsub.f32 2.0, %v3734_v3  ;;  %11944 = vmatmul.mubr.f32.gmra.mrb[56].mxu0 %v3778_v27  ;;  %v3780_v7 = vmul.f32 %v18075_v4, %v3764_v49  ;;  %v20794_v27 = vld [vmem:[#allocation138_spill] sm:$0xff] }
 0x82e   : > { %v15113_v0 = vpop.eup %15112  ;;  %v3749_v55 = vsub.f32 2.0, %v3733_v17  ;;  %14004 = vmatpush3.bf16.xpose.msk.msra.mxu0 %vm16314_vm1, %v20772_v30  ;;  %v3779_v26 = vmul.f32 %v18077_v46, %v3763_v15  ;;  %v4068_v30 = vadd.f32 %v9562_v5, %v20787_v11  ;;  %v4093_v49 = vadd.f32 %v20794_v27, %v9562_v5  ;;  %v20795_v17 = vld [vmem:[#allocation157_spill] sm:$0xff] }
 0x82f   : > { %v15115_v28 = vpop.eup %15114  ;;  %v3736_v36 = vmul.f32 %v15113_v0, %v3704_v57  ;;  %14007 = vmatprep.subr.msk.bf16.mxu0 %vm16314_vm1, %v20773_v40  ;;  %v3766_v44 = vmul.f32 %v15109_v53, %v3750_v14  ;;  %v4043_v57 = vadd.f32 %v20780_v52, %v9562_v5  ;;  %v20791_v53 = vld [vmem:[#allocation136_spill] sm:$0xff]  ;;  %v20796_v15 = vld [vmem:[#allocation141_spill] sm:$0xff] }
 0x830   : > { %v3735_v41 = vmul.f32 %v15115_v28, %v3702_v39  ;;  %11946 = vmatprep.mubr.f32.mxu0 %v3779_v26  ;;  %v3765_v34 = vmul.f32 %v15111_v42, %v3749_v55  ;;  %v4053_v39 = vadd.f32 %v20782_v50, %v9562_v5  ;;  %v4083_v24 = vadd.f32 %v20791_v53, %v9562_v5  ;;  %v20793_v42 = vld [vmem:[#allocation139_spill] sm:$0xff]  ;;  %v20798_v26 = vld [vmem:[#allocation158_spill] sm:$0xff]  ;;  %v9606_v52 = vld [vmem:[%s20292_s9 + $0x1b8] sm:$0xff] }
 0x831   : > { %v3752_v10 = vsub.f32 2.0, %v3736_v36  ;;  %11947 = vmatmul.mubr.f32.gmra.mrb[58].mxu0 %v3780_v7  ;;  %v3782_v8 = vmul.f32 %v18081_v37, %v3766_v44  ;;  %v4088_v3 = vadd.f32 %v9562_v5, %v20793_v42  ;;  %v4098_v14 = vadd.f32 %v9562_v5, %v20796_v15  ;;  %v20801_v44 = vld [vmem:[#allocation159_spill] sm:$0xff]  ;;  %v9610_v11 = vld [vmem:[%s20292_s9 + $0x1d8] sm:$0xff]  ;;  %v9611_v53 = vld [vmem:[%s20292_s9 + $0x1e0] sm:$0xff] }
 0x832   : > { %v3751_v59 = vsub.f32 2.0, %v3735_v41  ;;  %v3781_v61 = vmul.f32 %v18083_v12, %v3765_v34  ;;  %v20775_v12 = vld [vmem:[#allocation129_spill] sm:$0xff]  ;;  %v9600_v41 = vld [vmem:[%s20292_s9 + $0x188] sm:$0xff]  ;;  %v9599_v34 = vld [vmem:[%s20292_s9 + $0x180] sm:$0xff] }
 0x833   : > { %v3768_v46 = vmul.f32 %v15113_v0, %v3752_v10  ;;  %v4038_v47 = vadd.f32 %v9562_v5, %v20775_v12  ;;  %v20797_v0 = vld [vmem:[#allocation140_spill] sm:$0xff]  ;;  %v9604_v12 = vld [vmem:[%s20292_s9 + $0x1a8] sm:$0xff]  ;;  %v9614_v27 = vld [vmem:[%s20292_s9 + $0x1f8] sm:$0xff] }
 0x834   : > { %11949 = vmatprep.mubr.f32.mxu0 %v3781_v61  ;;  %v3767_v22 = vmul.f32 %v15115_v28, %v3751_v59  ;;  %v4103_v55 = vadd.f32 %v20797_v0, %v9562_v5  ;;  %v20799_v28 = vld [vmem:[#allocation143_spill] sm:$0xff] }
 0x835   : > { %11950 = vmatmul.mubr.f32.gmra.mrb[60].mxu0 %v3782_v8  ;;  %v3784_v37 = vmul.f32 %v18087_v43, %v3768_v46  ;;  %v20778_v43 = vld [vmem:[#allocation151_spill] sm:$0xff]  ;;  %v4108_v36 = vadd.f32 %v9562_v5, %v20799_v28  ;;  %v9602_v46 = vld [vmem:[%s20292_s9 + $0x198] sm:$0xff] }
 0x836   : > { %14010 = vmatpush3.bf16.xpose.msk.msra.mxu0 %vm16314_vm1, %v20773_v40  ;;  %v3783_v4 = vmul.f32 %v18089_v63, %v3767_v22  ;;  %v20777_v63 = vld [vmem:[#allocation150_spill] sm:$0xff]  ;;  %v9601_v22 = vld [vmem:[%s20292_s9 + $0x190] sm:$0xff] }
 0x837   : > { %14013 = vmatprep.subr.msk.bf16.mxu0 %vm16314_vm1, %v20774_v32  ;;  %v20800_v40 = vld [vmem:[#allocation142_spill] sm:$0xff] }
 0x838   : > { %11952 = vmatprep.mubr.f32.mxu0 %v3783_v4  ;;  %v4113_v7 = vadd.f32 %v20800_v40, %v9562_v5 }
 0x839   : > { %11953 = vmatmul.mubr.f32.gmra.mrb[62].mxu0 %v3784_v37 }
 0x83a   : > { %12155 = vmatprep.mubr.msk.f32.mxu0 %vm412_vm0, %v4038_v47  ;;  %v9603_v47 = vld [vmem:[%s20292_s9 + $0x1a0] sm:$0xff] }
 0x83e   : > { %14016 = vmatpush3.bf16.xpose.msk.msra.mxu0 %vm16314_vm1, %v20774_v32 }
 0x83f   : > { %14019 = vmatprep.subr.msk.bf16.mxu0 %vm16314_vm1, %v20776_v16 }
 0x846   : > { %14022 = vmatpush3.bf16.xpose.msk.msra.mxu0 %vm16314_vm1, %v20776_v16 }
 0x847   : > { %14025 = vmatprep.subr.msk.bf16.mxu0 %vm16314_vm1, %v20777_v63 }
 0x84e   : > { %14028 = vmatpush3.bf16.xpose.msk.msra.mxu0 %vm16314_vm1, %v20777_v63 }
 0x84f   : > { %14031 = vmatprep.subr.msk.bf16.mxu0 %vm16314_vm1, %v20778_v43 }
 0x856   : > { %14034 = vmatpush3.bf16.xpose.msk.msra.mxu0 %vm16314_vm1, %v20778_v43 }
 0x857   : > { %14036 = vmatprep.subr.bf16.mxu0 %v20779_v25 }
 0x85d   : > { %12156 = vmatmul.mubr.msk.f32.vlgmr.msra.gmra.mrb[96].mxu0 %vm412_vm0, %v4043_v57  ;;  %v9605_v57 = vld [vmem:[%s20292_s9 + $0x1b0] sm:$0xff] }
 0x85e   : > { %12158 = vmatprep.mubr.msk.f32.mxu0 %vm412_vm0, %v4048_v58  ;;  %14038 = vmatpush3.bf16.msra.mxu0 %v20779_v25 }
 0x85f   : > { %14040 = vmatprep.subr.bf16.mxu0 %v20783_v20 }
 0x861   : > { %12159 = vmatmul.mubr.msk.f32.gmra.mrb[98].mxu0 %vm412_vm0, %v4053_v39 }
 0x862   : > { %12161 = vmatprep.mubr.msk.f32.mxu0 %vm412_vm0, %v4058_v45  ;;  %14042 = vmatpush3.bf16.msra.mxu0 %v20783_v20  ;;  %v9608_v20 = vld [vmem:[%s20292_s9 + $0x1c8] sm:$0xff] }
 0x863   : > { %14044 = vmatprep.subr.bf16.mxu0 %v20786_v60 }
 0x865   : > { %12162 = vmatmul.mubr.msk.f32.gmra.mrb[100].mxu0 %vm412_vm0, %v4063_v33 }
 0x866   : > { %12164 = vmatprep.mubr.msk.f32.mxu0 %vm412_vm0, %v4068_v30  ;;  %14046 = vmatpush3.bf16.msra.mxu0 %v20786_v60  ;;  %v9609_v30 = vld [vmem:[%s20292_s9 + $0x1d0] sm:$0xff] }
 0x867   : > { %14048 = vmatprep.subr.bf16.mxu0 %v20789_v23 }
 0x869   : > { %12165 = vmatmul.mubr.msk.f32.gmra.mrb[102].mxu0 %vm412_vm0, %v4073_v1 }
 0x86a   : > { %12167 = vmatprep.mubr.msk.f32.mxu0 %vm412_vm0, %v4078_v51  ;;  %14050 = vmatpush3.bf16.msra.mxu0 %v20789_v23  ;;  %v9612_v51 = vld [vmem:[%s20292_s9 + $0x1e8] sm:$0xff] }
 0x86b   : > { %14052 = vmatprep.subr.bf16.mxu0 %v20792_v38 }
 0x86d   : > { %12168 = vmatmul.mubr.msk.f32.gmra.mrb[104].mxu0 %vm412_vm0, %v4083_v24 }
 0x86e   : > { %12170 = vmatprep.mubr.msk.f32.mxu0 %vm412_vm0, %v4088_v3  ;;  %14054 = vmatpush3.bf16.msra.mxu0 %v20792_v38 }
 0x86f   : > { %14056 = vmatprep.subr.bf16.mxu0 %v20795_v17 }
 0x871   : > { %12171 = vmatmul.mubr.msk.f32.gmra.mrb[106].mxu0 %vm412_vm0, %v4093_v49  ;;  %v9613_v49 = vld [vmem:[%s20292_s9 + $0x1f0] sm:$0xff] }
 0x872   : > { %12173 = vmatprep.mubr.msk.f32.mxu0 %vm412_vm0, %v4098_v14  ;;  %14058 = vmatpush3.bf16.msra.mxu0 %v20795_v17 }
 0x873   : > { %14060 = vmatprep.subr.bf16.mxu0 %v20798_v26 }
 0x875   : > { %12174 = vmatmul.mubr.msk.f32.gmra.mrb[108].mxu0 %vm412_vm0, %v4103_v55 }
 0x876   : > { %12176 = vmatprep.mubr.msk.f32.mxu0 %vm412_vm0, %v4108_v36  ;;  %14062 = vmatpush3.bf16.msra.mxu0 %v20798_v26 }
 0x877   : > { %14064 = vmatprep.subr.bf16.mxu0 %v20801_v44 }
 0x879   : > { %12177 = vmatmul.mubr.msk.f32.gmra.mrb[110].mxu0 %vm412_vm0, %v4113_v7 }
 0x87a   : > { %14066 = vmatpush3.bf16.msra.mxu0 %v20801_v44 }
 0x930   : > { %v12157_v10 = vpop.f32.mrb[96].mxu0 }
 0x931   : > { %v18211_v59 = vadd.f32 %v12157_v10, %v9600_v41  ;;  %v4635_v61 = vpop.f32.mrb[97].mxu0 }
 0x932   : > { %v18213_v8 = vadd.f32 %v9599_v34, %v4635_v61 }
 0x933   : > { %4716 = vmax.xlane.f32.xlu1 %v18211_v59 }
 0x934   : > { %v12160_v5 = vpop.f32.mrb[98].mxu0  ;;  %4714 = vmax.xlane.f32.xlu0 %v18213_v8 }
 0x935   : > { %v18223_v4 = vadd.f32 %v12160_v5, %v9602_v46  ;;  %v4645_v32 = vpop.f32.mrb[99].mxu0 }
 0x936   : > { %v18225_v37 = vadd.f32 %v9601_v22, %v4645_v32 }
 0x937   : > { %4720 = vmax.xlane.f32.xlu1 %v18223_v4 }
 0x938   : > { %v12163_v16 = vpop.f32.mrb[100].mxu0  ;;  %4718 = vmax.xlane.f32.xlu0 %v18225_v37 }
 0x939   : > { %v18235_v63 = vadd.f32 %v12163_v16, %v9604_v12  ;;  %v4655_v43 = vpop.f32.mrb[101].mxu0 }
 0x93a   : > { %v18237_v25 = vadd.f32 %v9603_v47, %v4655_v43 }
 0x93b   : > { %4724 = vmax.xlane.f32.xlu1 %v18235_v63 }
 0x93c   : > { %v12166_v19 = vpop.f32.mrb[102].mxu0  ;;  %4722 = vmax.xlane.f32.xlu0 %v18237_v25 }
 0x93d   : > { %v18247_v58 = vadd.f32 %v12166_v19, %v9606_v52  ;;  %v4665_v50 = vpop.f32.mrb[103].mxu0 }
 0x93e   : > { %v18249_v39 = vadd.f32 %v9605_v57, %v4665_v50 }
 0x93f   : > { %4728 = vmax.xlane.f32.xlu1 %v18247_v58 }
 0x940   : > { %v12169_v45 = vpop.f32.mrb[104].mxu0  ;;  %4726 = vmax.xlane.f32.xlu0 %v18249_v39 }
 0x941   : > { %v18259_v54 = vadd.f32 %v12169_v45, %v9608_v20  ;;  %v4675_v33 = vpop.f32.mrb[105].mxu0 }
 0x942   : > { %v18261_v60 = vadd.f32 %v9607_v31, %v4675_v33 }
 0x943   : > { %4732 = vmax.xlane.f32.xlu1 %v18259_v54 }
 0x944   : > { %v12172_v9 = vpop.f32.mrb[106].mxu0  ;;  %4730 = vmax.xlane.f32.xlu0 %v18261_v60 }
 0x945   : > { %v18271_v1 = vadd.f32 %v12172_v9, %v9610_v11  ;;  %v4685_v23 = vpop.f32.mrb[107].mxu0 }
 0x946   : > { %v18273_v62 = vadd.f32 %v9609_v30, %v4685_v23 }
 0x947   : > { %4736 = vmax.xlane.f32.xlu1 %v18271_v1 }
 0x948   : > { %v12175_v24 = vpop.f32.mrb[108].mxu0  ;;  %4734 = vmax.xlane.f32.xlu0 %v18273_v62 }
 0x949   : > { %v18283_v38 = vadd.f32 %v12175_v24, %v9612_v51  ;;  %v4695_v42 = vpop.f32.mrb[109].mxu0 }
 0x94a   : > { %v18285_v3 = vadd.f32 %v9611_v53, %v4695_v42 }
 0x94b   : > { %4740 = vmax.xlane.f32.xlu1 %v18283_v38 }
 0x94c   : > { %v12178_v17 = vpop.f32.mrb[110].mxu0  ;;  %4738 = vmax.xlane.f32.xlu0 %v18285_v3 }
 0x94d   : > { %v18295_v15 = vadd.f32 %v12178_v17, %v9614_v27  ;;  %v4705_v14 = vpop.f32.mrb[111].mxu0 }
 0x94e   : > { %v18297_v0 = vadd.f32 %v9613_v49, %v4705_v14 }
 0x94f   : > { %4744 = vmax.xlane.f32.xlu1 %v18295_v15 }
 0x950   : > { %4742 = vmax.xlane.f32.xlu0 %v18297_v0 }
 0x9c0   : > { %v4717_v55 = vpop.xlane.xlu1 %4716 }
 0x9c1   : > { %v4747_v26 = vsub.f32 %v18211_v59, %v4717_v55  ;;  %v4715_v28 = vpop.xlane.xlu0 %4714 }
 0x9c2   : > { %v4746_v36 = vsub.f32 %v18213_v8, %v4715_v28 }
 0x9c3   : > { %v4764_v40 = vmul.f32 1.442695, %v4747_v26 }
 0x9c4   : > { %v4762_v7 = vmul.f32 1.442695, %v4746_v36  ;;  %v4721_v44 = vpop.xlane.xlu1 %4720 }
 0x9c5   : > { %15116 = vpow2.f32 %v4764_v40  ;;  %v4749_v41 = vsub.f32 %v18223_v4, %v4721_v44  ;;  %v4719_v34 = vpop.xlane.xlu0 %4718 }
 0x9c6   : > { %15118 = vpow2.f32 %v4762_v7  ;;  %v4748_v10 = vsub.f32 %v18225_v37, %v4719_v34 }
 0x9c7   : > { %v4768_v61 = vmul.f32 1.442695, %v4749_v41 }
 0x9c8   : > { %v4766_v46 = vmul.f32 1.442695, %v4748_v10  ;;  %v4725_v22 = vpop.xlane.xlu1 %4724 }
 0x9c9   : > { %15120 = vpow2.f32 %v4768_v61  ;;  %v4751_v5 = vsub.f32 %v18235_v63, %v4725_v22  ;;  %v4723_v59 = vpop.xlane.xlu0 %4722 }
 0x9ca   : > { %15122 = vpow2.f32 %v4766_v46  ;;  %v4750_v8 = vsub.f32 %v18237_v25, %v4723_v59 }
 0x9cb   : > { %v4772_v32 = vmul.f32 1.442695, %v4751_v5 }
 0x9cc   : > { %v4770_v12 = vmul.f32 1.442695, %v4750_v8  ;;  %v4729_v47 = vpop.xlane.xlu1 %4728 }
 0x9cd   : > { %15124 = vpow2.f32 %v4772_v32  ;;  %v4753_v4 = vsub.f32 %v18247_v58, %v4729_v47  ;;  %v4727_v16 = vpop.xlane.xlu0 %4726 }
 0x9ce   : > { %15126 = vpow2.f32 %v4770_v12  ;;  %v4752_v37 = vsub.f32 %v18249_v39, %v4727_v16 }
 0x9cf   : > { %v18309_v43 = vpop.eup %15116  ;;  %v4776_v52 = vmul.f32 1.442695, %v4753_v4 }
 0x9d0   : > { %v18311_v57 = vpop.eup %15118  ;;  %v4774_v63 = vmul.f32 1.442695, %v4752_v37  ;;  %v4733_v19 = vpop.xlane.xlu1 %4732  ;;  %4796 = vadd.xlane.f32.xlu1 %v18309_v43 }
 0x9d1   : > { %15128 = vpow2.f32 %v4776_v52  ;;  %v4755_v25 = vsub.f32 %v18259_v54, %v4733_v19  ;;  %4794 = vadd.xlane.f32.xlu0 %v18311_v57  ;;  %v4731_v50 = vpop.xlane.xlu0 %4730 }
 0x9d2   : > { %15130 = vpow2.f32 %v4774_v63  ;;  %v4754_v58 = vsub.f32 %v18261_v60, %v4731_v50 }
 0x9d3   : > { %v18317_v20 = vpop.eup %15120  ;;  %v4780_v39 = vmul.f32 1.442695, %v4755_v25 }
 0x9d4   : > { %v18319_v31 = vpop.eup %15122  ;;  %v4778_v45 = vmul.f32 1.442695, %v4754_v58  ;;  %v4737_v33 = vpop.xlane.xlu1 %4736  ;;  %4800 = vadd.xlane.f32.xlu1 %v18317_v20 }
 0x9d5   : > { %15132 = vpow2.f32 %v4780_v39  ;;  %v4757_v11 = vsub.f32 %v18271_v1, %v4737_v33  ;;  %4798 = vadd.xlane.f32.xlu0 %v18319_v31  ;;  %v4735_v54 = vpop.xlane.xlu0 %4734 }
 0x9d6   : > { %15134 = vpow2.f32 %v4778_v45  ;;  %v4756_v30 = vsub.f32 %v18273_v62, %v4735_v54 }
 0x9d7   : > { %v18325_v9 = vpop.eup %15124  ;;  %v4784_v60 = vmul.f32 1.442695, %v4757_v11 }
 0x9d8   : > { %v18327_v23 = vpop.eup %15126  ;;  %v4782_v51 = vmul.f32 1.442695, %v4756_v30  ;;  %v4741_v53 = vpop.xlane.xlu1 %4740  ;;  %4804 = vadd.xlane.f32.xlu1 %v18325_v9 }
 0x9d9   : > { %15136 = vpow2.f32 %v4784_v60  ;;  %v4759_v24 = vsub.f32 %v18283_v38, %v4741_v53  ;;  %4802 = vadd.xlane.f32.xlu0 %v18327_v23  ;;  %v4739_v1 = vpop.xlane.xlu0 %4738 }
 0x9da   : > { %15138 = vpow2.f32 %v4782_v51  ;;  %v4758_v42 = vsub.f32 %v18285_v3, %v4739_v1 }
 0x9db   : > { %v18333_v27 = vpop.eup %15128  ;;  %v4788_v62 = vmul.f32 1.442695, %v4759_v24 }
 0x9dc   : > { %v18335_v49 = vpop.eup %15130  ;;  %v4786_v17 = vmul.f32 1.442695, %v4758_v42  ;;  %4808 = vadd.xlane.f32.xlu1 %v18333_v27  ;;  %v4745_v14 = vpop.xlane.xlu1 %4744 }
 0x9dd   : > { %15140 = vpow2.f32 %v4788_v62  ;;  %v4761_v55 = vsub.f32 %v18295_v15, %v4745_v14  ;;  %4806 = vadd.xlane.f32.xlu0 %v18335_v49  ;;  %v4743_v38 = vpop.xlane.xlu0 %4742 }
 0x9de   : > { %15142 = vpow2.f32 %v4786_v17  ;;  %v4760_v26 = vsub.f32 %v18297_v0, %v4743_v38 }
 0x9df   : > { %v18341_v28 = vpop.eup %15132  ;;  %v4792_v3 = vmul.f32 1.442695, %v4761_v55 }
 0x9e0   : > { %v18343_v36 = vpop.eup %15134  ;;  %v4790_v40 = vmul.f32 1.442695, %v4760_v26  ;;  %4812 = vadd.xlane.f32.xlu1 %v18341_v28 }
 0x9e1   : > { %15144 = vpow2.f32 %v4792_v3  ;;  %4810 = vadd.xlane.f32.xlu0 %v18343_v36 }
 0x9e2   : > { %15146 = vpow2.f32 %v4790_v40 }
 0x9e3   : > { %v18347_v7 = vpop.eup %15136 }
 0x9e4   : > { %v18349_v15 = vpop.eup %15138  ;;  %4816 = vadd.xlane.f32.xlu1 %v18347_v7 }
 0x9e5   : > { %4814 = vadd.xlane.f32.xlu0 %v18349_v15 }
 0x9e7   : > { %v18353_v0 = vpop.eup %15140 }
 0x9e8   : > { %v18355_v44 = vpop.eup %15142  ;;  %4820 = vadd.xlane.f32.xlu1 %v18353_v0 }
 0x9e9   : > { %4818 = vadd.xlane.f32.xlu0 %v18355_v44 }
 0x9eb   : > { %v18359_v41 = vpop.eup %15144 }
 0x9ec   : > { %v18361_v34 = vpop.eup %15146  ;;  %4824 = vadd.xlane.f32.xlu1 %v18359_v41 }
 0x9ed   : > { %4822 = vadd.xlane.f32.xlu0 %v18361_v34 }
 0xa5d   : > { %v4797_v10 = vpop.xlane.xlu1 %4796 }
 0xa5e   : > { %15148 = vrcp.f32 %v4797_v10  ;;  %v4795_v61 = vpop.xlane.xlu0 %4794 }
 0xa5f   : > { %15150 = vrcp.f32 %v4795_v61 }
 0xa61   : > { %v4801_v46 = vpop.xlane.xlu1 %4800 }
 0xa62   : > { %15152 = vrcp.f32 %v4801_v46  ;;  %v4799_v22 = vpop.xlane.xlu0 %4798 }
 0xa63   : > { %15154 = vrcp.f32 %v4799_v22 }
 0xa65   : > { %v4805_v5 = vpop.xlane.xlu1 %4804 }
 0xa66   : > { %15156 = vrcp.f32 %v4805_v5  ;;  %v4803_v59 = vpop.xlane.xlu0 %4802 }
 0xa67   : > { %15158 = vrcp.f32 %v4803_v59 }
 0xa68   : > { %v15149_v8 = vpop.eup %15148 }
 0xa69   : > { %v15151_v32 = vpop.eup %15150  ;;  %v4843_v12 = vmul.f32 %v15149_v8, %v4797_v10  ;;  %v4809_v47 = vpop.xlane.xlu1 %4808 }
 0xa6a   : > { %v4842_v4 = vmul.f32 %v15151_v32, %v4795_v61  ;;  %15160 = vrcp.f32 %v4809_v47  ;;  %v4807_v16 = vpop.xlane.xlu0 %4806 }
 0xa6b   : > { %v4859_v37 = vsub.f32 2.0, %v4843_v12  ;;  %15162 = vrcp.f32 %v4807_v16 }
 0xa6c   : > { %v15153_v52 = vpop.eup %15152  ;;  %v4858_v63 = vsub.f32 2.0, %v4842_v4 }
 0xa6d   : > { %v15155_v19 = vpop.eup %15154  ;;  %v4875_v25 = vmul.f32 %v15149_v8, %v4859_v37  ;;  %v4845_v50 = vmul.f32 %v15153_v52, %v4801_v46  ;;  %v4813_v58 = vpop.xlane.xlu1 %4812 }
 0xa6e   : > { %v4844_v39 = vmul.f32 %v15155_v19, %v4799_v22  ;;  %15164 = vrcp.f32 %v4813_v58  ;;  %v4811_v45 = vpop.xlane.xlu0 %4810  ;;  %v4874_v33 = vmul.f32 %v15151_v32, %v4858_v63 }
 0xa6f   : > { %v4861_v11 = vsub.f32 2.0, %v4845_v50  ;;  %15166 = vrcp.f32 %v4811_v45  ;;  %v4891_v53 = vmul.f32 %v18309_v43, %v4875_v25 }
 0xa70   : > { %v15157_v54 = vpop.eup %15156  ;;  %v4860_v30 = vsub.f32 2.0, %v4844_v39  ;;  %v4890_v60 = vmul.f32 %v18311_v57, %v4874_v33 }
 0xa71   : > { %v15159_v51 = vpop.eup %15158  ;;  %v4847_v24 = vmul.f32 %v15157_v54, %v4805_v5  ;;  %v4817_v1 = vpop.xlane.xlu1 %4816  ;;  %v4877_v42 = vmul.f32 %v15153_v52, %v4861_v11 }
 0xa72   : > { %v4846_v62 = vmul.f32 %v15159_v51, %v4803_v59  ;;  %15168 = vrcp.f32 %v4817_v1  ;;  %12211 = vmatprep.mubr.f32.mxu0 %v4890_v60  ;;  %v4815_v17 = vpop.xlane.xlu0 %4814  ;;  %v4876_v14 = vmul.f32 %v15155_v19, %v4860_v30 }
 0xa73   : > { %v4863_v55 = vsub.f32 2.0, %v4847_v24  ;;  %15170 = vrcp.f32 %v4815_v17  ;;  %12212 = vmatmul.mubr.f32.vlgmr.msra.gmra.mrb[48].mxu0 %v4891_v53  ;;  %v4893_v43 = vmul.f32 %v18317_v20, %v4877_v42 }
 0xa74   : > { %v15161_v38 = vpop.eup %15160  ;;  %v4862_v26 = vsub.f32 2.0, %v4846_v62  ;;  %v4892_v3 = vmul.f32 %v18319_v31, %v4876_v14 }
 0xa75   : > { %v15163_v40 = vpop.eup %15162  ;;  %v4849_v57 = vmul.f32 %v15161_v38, %v4809_v47  ;;  %v4821_v10 = vpop.xlane.xlu1 %4820  ;;  %v4879_v61 = vmul.f32 %v15157_v54, %v4863_v55 }
 0xa76   : > { %v4848_v46 = vmul.f32 %v15163_v40, %v4807_v16  ;;  %15172 = vrcp.f32 %v4821_v10  ;;  %12214 = vmatprep.mubr.f32.mxu0 %v4892_v3  ;;  %v4819_v22 = vpop.xlane.xlu0 %4818  ;;  %v4878_v5 = vmul.f32 %v15159_v51, %v4862_v26 }
 0xa77   : > { %v4865_v59 = vsub.f32 2.0, %v4849_v57  ;;  %15174 = vrcp.f32 %v4819_v22  ;;  %12215 = vmatmul.mubr.f32.gmra.mrb[50].mxu0 %v4893_v43  ;;  %v4895_v47 = vmul.f32 %v18325_v9, %v4879_v61 }
 0xa78   : > { %v15165_v8 = vpop.eup %15164  ;;  %v4864_v32 = vsub.f32 2.0, %v4848_v46  ;;  %v4894_v12 = vmul.f32 %v18327_v23, %v4878_v5 }
 0xa79   : > { %v15167_v4 = vpop.eup %15166  ;;  %v4851_v31 = vmul.f32 %v15165_v8, %v4813_v58  ;;  %v4825_v37 = vpop.xlane.xlu1 %4824  ;;  %v4881_v52 = vmul.f32 %v15161_v38, %v4865_v59 }
 0xa7a   : > { %v4850_v20 = vmul.f32 %v15167_v4, %v4811_v45  ;;  %15176 = vrcp.f32 %v4825_v37  ;;  %12217 = vmatprep.mubr.f32.mxu0 %v4894_v12  ;;  %v4823_v16 = vpop.xlane.xlu0 %4822  ;;  %v4880_v63 = vmul.f32 %v15163_v40, %v4864_v32 }
 0xa7b   : > { %v4867_v19 = vsub.f32 2.0, %v4851_v31  ;;  %15178 = vrcp.f32 %v4823_v16  ;;  %12218 = vmatmul.mubr.f32.gmra.mrb[52].mxu0 %v4895_v47  ;;  %v4897_v58 = vmul.f32 %v18333_v27, %v4881_v52  ;;  %v20807_v31 = vld [vmem:[#allocation9_spill] sm:$0xff] }
 0xa7c   : > { %v15169_v25 = vpop.eup %15168  ;;  %v4866_v50 = vsub.f32 2.0, %v4850_v20  ;;  %v4896_v39 = vmul.f32 %v18335_v49, %v4880_v63 }
 0xa7d   : > { %v15171_v33 = vpop.eup %15170  ;;  %v4853_v23 = vmul.f32 %v15169_v25, %v4817_v1  ;;  %v4883_v11 = vmul.f32 %v15165_v8, %v4867_v19 }
 0xa7e   : > { %v4852_v54 = vmul.f32 %v15171_v33, %v4815_v17  ;;  %12220 = vmatprep.mubr.f32.mxu0 %v4896_v39  ;;  %v4882_v9 = vmul.f32 %v15167_v4, %v4866_v50  ;;  %v20813_v39 = vld [vmem:[#allocation15_spill] sm:$0xff] }
 0xa7f   : > { %v4869_v45 = vsub.f32 2.0, %v4853_v23  ;;  %12221 = vmatmul.mubr.f32.gmra.mrb[54].mxu0 %v4897_v58  ;;  %v4899_v42 = vmul.f32 %v18341_v28, %v4883_v11 }
 0xa80   : > { %v15173_v30 = vpop.eup %15172  ;;  %v4868_v60 = vsub.f32 2.0, %v4852_v54  ;;  %v4898_v51 = vmul.f32 %v18343_v36, %v4882_v9  ;;  %v20816_v54 = vld [vmem:[#allocation18_spill] sm:$0xff] }
 0xa81   : > { %v15175_v53 = vpop.eup %15174  ;;  %v4855_v24 = vmul.f32 %v15173_v30, %v4821_v10  ;;  %v4885_v62 = vmul.f32 %v15169_v25, %v4869_v45 }
 0xa82   : > { %v4854_v49 = vmul.f32 %v15175_v53, %v4819_v22  ;;  %12223 = vmatprep.mubr.f32.mxu0 %v4898_v51  ;;  %v4884_v1 = vmul.f32 %v15171_v33, %v4868_v60  ;;  %v20819_v51 = vld [vmem:[#allocation21_spill] sm:$0xff] }
 0xa83   : > { %v4871_v14 = vsub.f32 2.0, %v4855_v24  ;;  %12224 = vmatmul.mubr.f32.gmra.mrb[56].mxu0 %v4899_v42  ;;  %v4901_v3 = vmul.f32 %v18347_v7, %v4885_v62  ;;  %v9647_v7 = vld [vmem:[%s20293_s10] ss:$0 sm:$0xff] }
 0xa84   : > { %v15177_v27 = vpop.eup %15176  ;;  %v4870_v17 = vsub.f32 2.0, %v4854_v49  ;;  %v4900_v55 = vmul.f32 %v18349_v15, %v4884_v1  ;;  %v20822_v49 = vld [vmem:[#allocation24_spill] sm:$0xff] }
 0xa85   : > { %v15179_v38 = vpop.eup %15178  ;;  %v4857_v26 = vmul.f32 %v15177_v27, %v4825_v37  ;;  %v4887_v40 = vmul.f32 %v15173_v30, %v4871_v14 }
 0xa86   : > { %v4856_v36 = vmul.f32 %v15179_v38, %v4823_v16  ;;  %12226 = vmatprep.mubr.f32.mxu0 %v4900_v55  ;;  %v4886_v57 = vmul.f32 %v15175_v53, %v4870_v17  ;;  %v20810_v16 = vld [vmem:[#allocation12_spill] sm:$0xff]  ;;  %v20825_v55 = vld [vmem:[#allocation27_spill] sm:$0xff] }
 0xa87   : > { %v4873_v10 = vsub.f32 2.0, %v4857_v26  ;;  %12227 = vmatmul.mubr.f32.gmra.mrb[58].mxu0 %v4901_v3  ;;  %v4903_v61 = vmul.f32 %v18353_v0, %v4887_v40  ;;  %v20827_v26 = vld [vmem:[#allocation31_spill] sm:$0xff]  ;;  %v20828_v3 = vld [vmem:[#allocation32_spill] sm:$0xff]  ;;  %v20829_v40 = vld [vmem:[#allocation33_spill] sm:$0xff] }
 0xa88   : > { %v4872_v28 = vsub.f32 2.0, %v4856_v36  ;;  %v4902_v43 = vmul.f32 %v18355_v44, %v4886_v57  ;;  %v20830_v36 = vld [vmem:[#allocation34_spill] sm:$0xff]  ;;  %v20831_v57 = vld [vmem:[#allocation35_spill] sm:$0xff] }
 0xa89   : > { %v4889_v46 = vmul.f32 %v15177_v27, %v4873_v10  ;;  %v20832_v10 = vld [vmem:[#allocation36_spill] sm:$0xff] }
 0xa8a   : > { %12229 = vmatprep.mubr.f32.mxu0 %v4902_v43  ;;  %v4888_v22 = vmul.f32 %v15179_v38, %v4872_v28  ;;  %v20826_v38 = vld [vmem:[#allocation30_spill] sm:$0xff]  ;;  %v20833_v28 = vld [vmem:[#allocation37_spill] sm:$0xff] }
 0xa8b   : > { %12230 = vmatmul.mubr.f32.gmra.mrb[60].mxu0 %v4903_v61  ;;  %v4905_v5 = vmul.f32 %v18359_v41, %v4889_v46  ;;  %v20805_v41 = vld [vmem:[#allocation6_spill] sm:$0xff]  ;;  %v20835_v61 = vld [vmem:[#allocation39_spill] sm:$0xff]  ;;  %v20836_v46 = vld [vmem:[#allocation40_spill] sm:$0xff] }
 0xa8c   : > { %v4904_v15 = vmul.f32 %v18361_v34, %v4888_v22  ;;  %v20834_v43 = vld [vmem:[#allocation38_spill] sm:$0xff]  ;;  %v20837_v22 = vld [vmem:[#allocation41_spill] sm:$0xff] }
 0xa8e   : > { %12232 = vmatprep.mubr.f32.mxu0 %v4904_v15  ;;  %v20838_v15 = vld [vmem:[#allocation42_spill] sm:$0xff] }
 0xa8f   : > { %12233 = vmatmul.mubr.f32.gmra.mrb[62].mxu0 %v4905_v5  ;;  %v20839_v5 = vld [vmem:[#allocation43_spill] sm:$0xff] }
 0xb46   : > { %v12213_v59 = vpop.f32.mrb[48].mxu0 }
 0xb47   : > { %v4972_v8 = vpop.f32.mrb[49].mxu0  ;;  %v18386_v44 = vadd.f32 %v12213_v59, %v9647_v7  ;;  %v20841_v59 = vld [vmem:[#allocation45_spill] sm:$0xff] }
 0xb48   : > { %v18384_v32 = vadd.f32 %v9647_v7, %v4972_v8  ;;  %v20842_v8 = vld [vmem:[#allocation46_spill] sm:$0xff] }
 0xb49   : > { %20803 = vst [vmem:[#allocation7_spill] sm:$0xff] %v18386_v44 }
 0xb4a   : > { %20802 = vst [vmem:[#allocation160_spill] sm:$0xff] %v18384_v32  ;;  %v12216_v0 = vpop.f32.mrb[50].mxu0  ;;  %12267 = vmatprep.mubr.f32.mxu1 %v18384_v32 }
 0xb4b   : > { %v4982_v12 = vpop.f32.mrb[51].mxu0  ;;  %12268 = vmatmul.mubr.f32.vlgmr.msra.gmra.mrb[176].mxu1 %v18386_v44  ;;  %v18393_v4 = vadd.f32 %v12216_v0, %v9647_v7  ;;  %v20843_v0 = vld [vmem:[#allocation47_spill] sm:$0xff] }
 0xb4c   : > { %v18390_v34 = vadd.f32 %v9647_v7, %v4982_v12  ;;  %14102 = vmatpush3.bf16.msra.mxu1 %v20805_v41  ;;  %v20844_v12 = vld [vmem:[#allocation48_spill] sm:$0xff]  ;;  %v20845_v41 = vld [vmem:[#allocation49_spill] sm:$0xff] }
 0xb4d   : > { %20806 = vst [vmem:[#allocation10_spill] sm:$0xff] %v18393_v4  ;;  %14104 = vmatprep.subr.bf16.mxu1 %v20807_v31 }
 0xb4e   : > { %20804 = vst [vmem:[#allocation8_spill] sm:$0xff] %v18390_v34  ;;  %v12219_v37 = vpop.f32.mrb[52].mxu0  ;;  %12270 = vmatprep.mubr.f32.mxu1 %v18390_v34 }
 0xb4f   : > { %v4992_v47 = vpop.f32.mrb[53].mxu0  ;;  %12271 = vmatmul.mubr.f32.gmra.mrb[178].mxu1 %v18393_v4  ;;  %v18401_v20 = vadd.f32 %v12219_v37, %v9647_v7  ;;  %v20847_v37 = vld [vmem:[#allocation51_spill] sm:$0xff] }
 0xb50   : > { %v18398_v52 = vadd.f32 %v9647_v7, %v4992_v47  ;;  %14106 = vmatpush3.bf16.msra.mxu1 %v20807_v31  ;;  %v20846_v31 = vld [vmem:[#allocation50_spill] sm:$0xff]  ;;  %v20848_v47 = vld [vmem:[#allocation52_spill] sm:$0xff] }
 0xb51   : > { %20809 = vst [vmem:[#allocation13_spill] sm:$0xff] %v18401_v20  ;;  %14108 = vmatprep.subr.bf16.mxu1 %v20810_v16 }
 0xb52   : > { %20808 = vst [vmem:[#allocation11_spill] sm:$0xff] %v18398_v52  ;;  %v12222_v63 = vpop.f32.mrb[54].mxu0  ;;  %12273 = vmatprep.mubr.f32.mxu1 %v18398_v52 }
 0xb53   : > { %v5002_v19 = vpop.f32.mrb[55].mxu0  ;;  %12274 = vmatmul.mubr.f32.gmra.mrb[180].mxu1 %v18401_v20  ;;  %v18409_v50 = vadd.f32 %v12222_v63, %v9647_v7 }
 0xb54   : > { %v18406_v25 = vadd.f32 %v9647_v7, %v5002_v19  ;;  %14110 = vmatpush3.bf16.msra.mxu1 %v20810_v16  ;;  %v20849_v16 = vld [vmem:[#allocation53_spill] sm:$0xff] }
 0xb55   : > { %20812 = vst [vmem:[#allocation16_spill] sm:$0xff] %v18409_v50  ;;  %14112 = vmatprep.subr.bf16.mxu1 %v20813_v39 }
 0xb56   : > { %20811 = vst [vmem:[#allocation14_spill] sm:$0xff] %v18406_v25  ;;  %v12225_v33 = vpop.f32.mrb[56].mxu0  ;;  %12276 = vmatprep.mubr.f32.mxu1 %v18406_v25 }
 0xb57   : > { %v5012_v23 = vpop.f32.mrb[57].mxu0  ;;  %12277 = vmatmul.mubr.f32.gmra.mrb[182].mxu1 %v18409_v50  ;;  %v18417_v11 = vadd.f32 %v12225_v33, %v9647_v7 }
 0xb58   : > { %v18414_v58 = vadd.f32 %v9647_v7, %v5012_v23  ;;  %14114 = vmatpush3.bf16.msra.mxu1 %v20813_v39  ;;  %v18564_v39 = vld [vmem:[%s20287_s4] ss:$0 sm:$0xff] }
 0xb59   : > { %20815 = vst [vmem:[#allocation19_spill] sm:$0xff] %v18417_v11  ;;  %14116 = vmatprep.subr.bf16.mxu1 %v20816_v54 }
 0xb5a   : > { %20814 = vst [vmem:[#allocation17_spill] sm:$0xff] %v18414_v58  ;;  %v12228_v9 = vpop.f32.mrb[58].mxu0  ;;  %12279 = vmatprep.mubr.f32.mxu1 %v18414_v58 }
 0xb5b   : > { %v5022_v45 = vpop.f32.mrb[59].mxu0  ;;  %12280 = vmatmul.mubr.f32.gmra.mrb[184].mxu1 %v18417_v11  ;;  %v18425_v60 = vadd.f32 %v12228_v9, %v9647_v7 }
 0xb5c   : > { %v18422_v30 = vadd.f32 %v9647_v7, %v5022_v45  ;;  %14118 = vmatpush3.bf16.msra.mxu1 %v20816_v54 }
 0xb5d   : > { %20818 = vst [vmem:[#allocation22_spill] sm:$0xff] %v18425_v60  ;;  %14120 = vmatprep.subr.bf16.mxu1 %v20819_v51 }
 0xb5e   : > { %20817 = vst [vmem:[#allocation20_spill] sm:$0xff] %v18422_v30  ;;  %v12231_v53 = vpop.f32.mrb[60].mxu0  ;;  %12282 = vmatprep.mubr.f32.mxu1 %v18422_v30 }
 0xb5f   : > { %v5032_v24 = vpop.f32.mrb[61].mxu0  ;;  %12283 = vmatmul.mubr.f32.gmra.mrb[186].mxu1 %v18425_v60  ;;  %v18433_v62 = vadd.f32 %v12231_v53, %v9647_v7 }
 0xb60   : > { %v18430_v42 = vadd.f32 %v9647_v7, %v5032_v24  ;;  %14122 = vmatpush3.bf16.msra.mxu1 %v20819_v51 }
 0xb61   : > { %20821 = vst [vmem:[#allocation25_spill] sm:$0xff] %v18433_v62  ;;  %14124 = vmatprep.subr.bf16.mxu1 %v20822_v49 }
 0xb62   : > { %20820 = vst [vmem:[#allocation23_spill] sm:$0xff] %v18430_v42  ;;  %v12234_v1 = vpop.f32.mrb[62].mxu0  ;;  %12285 = vmatprep.mubr.f32.mxu1 %v18430_v42 }
 0xb63   : > { %v5042_v14 = vpop.f32.mrb[63].mxu0  ;;  %12286 = vmatmul.mubr.f32.gmra.mrb[188].mxu1 %v18433_v62  ;;  %v18441_v17 = vadd.f32 %v12234_v1, %v9647_v7 }
 0xb64   : > { %v18438_v27 = vadd.f32 %v9647_v7, %v5042_v14  ;;  %14126 = vmatpush3.bf16.msra.mxu1 %v20822_v49  ;;  %v20840_v7 = vld [vmem:[#allocation44_spill] sm:$0xff] }
 0xb65   : > { %20824 = vst [vmem:[#allocation28_spill] sm:$0xff] %v18441_v17  ;;  %14128 = vmatprep.subr.bf16.mxu1 %v20825_v55 }
 0xb66   : > { %20823 = vst [vmem:[#allocation26_spill] sm:$0xff] %v18438_v27  ;;  %12288 = vmatprep.mubr.f32.mxu1 %v18438_v27 }
 0xb67   : > { %12289 = vmatmul.mubr.f32.gmra.mrb[190].mxu1 %v18441_v17 }
 0xb68   : > { %14130 = vmatpush3.bf16.msra.mxu1 %v20825_v55  ;;  %12323 = vmatprep.mubr.f32.mxu1 %v18384_v32 }
 0xb69   : > { %14132 = vmatprep.subr.bf16.mxu1 %v20826_v38 }
 0xb6b   : > { %12324 = vmatmul.mubr.f32.vlgmr.msra.gmra.mrb[192].mxu1 %v18386_v44 }
 0xb6c   : > { %14134 = vmatpush3.bf16.msra.mxu1 %v20826_v38  ;;  %12326 = vmatprep.mubr.f32.mxu1 %v18390_v34 }
 0xb6d   : > { %14136 = vmatprep.subr.bf16.mxu1 %v20827_v26 }
 0xb6f   : > { %12327 = vmatmul.mubr.f32.gmra.mrb[194].mxu1 %v18393_v4 }
 0xb70   : > { %14138 = vmatpush3.bf16.msra.mxu1 %v20827_v26  ;;  %12329 = vmatprep.mubr.f32.mxu1 %v18398_v52 }
 0xb71   : > { %14140 = vmatprep.subr.bf16.mxu1 %v20828_v3 }
 0xb73   : > { %12330 = vmatmul.mubr.f32.gmra.mrb[196].mxu1 %v18401_v20 }
 0xb74   : > { %14142 = vmatpush3.bf16.msra.mxu1 %v20828_v3  ;;  %12332 = vmatprep.mubr.f32.mxu1 %v18406_v25 }
 0xb75   : > { %14144 = vmatprep.subr.bf16.mxu1 %v20829_v40 }
 0xb77   : > { %12333 = vmatmul.mubr.f32.gmra.mrb[198].mxu1 %v18409_v50 }
 0xb78   : > { %14146 = vmatpush3.bf16.msra.mxu1 %v20829_v40  ;;  %12335 = vmatprep.mubr.f32.mxu1 %v18414_v58 }
 0xb79   : > { %14148 = vmatprep.subr.bf16.mxu1 %v20830_v36 }
 0xb7b   : > { %12336 = vmatmul.mubr.f32.gmra.mrb[200].mxu1 %v18417_v11 }
 0xb7c   : > { %14150 = vmatpush3.bf16.msra.mxu1 %v20830_v36  ;;  %12338 = vmatprep.mubr.f32.mxu1 %v18422_v30  ;;  %v15437_v36 = vld [vmem:[%s20289_s6] ss:$0 sm:$0xff] }
 0xb7d   : > { %14152 = vmatprep.subr.bf16.mxu1 %v20831_v57 }
 0xb7f   : > { %12339 = vmatmul.mubr.f32.gmra.mrb[202].mxu1 %v18425_v60 }
 0xb80   : > { %14154 = vmatpush3.bf16.msra.mxu1 %v20831_v57  ;;  %12341 = vmatprep.mubr.f32.mxu1 %v18430_v42 }
 0xb81   : > { %14156 = vmatprep.subr.bf16.mxu1 %v20832_v10 }
 0xb83   : > { %12342 = vmatmul.mubr.f32.gmra.mrb[204].mxu1 %v18433_v62 }
 0xb84   : > { %14158 = vmatpush3.bf16.msra.mxu1 %v20832_v10  ;;  %12344 = vmatprep.mubr.f32.mxu1 %v18438_v27 }
 0xb85   : > { %14160 = vmatprep.subr.bf16.mxu1 %v20833_v28 }
 0xb87   : > { %12345 = vmatmul.mubr.f32.gmra.mrb[206].mxu1 %v18441_v17 }
 0xb88   : > { %14162 = vmatpush3.bf16.msra.mxu1 %v20833_v28  ;;  %12379 = vmatprep.mubr.f32.mxu1 %v18384_v32 }
 0xb89   : > { %14212 = vmatprep.subr.bf16.mxu1 %v20834_v43 }
 0xb8b   : > { %12380 = vmatmul.mubr.f32.vlgmr.msra.gmra.mrb[208].mxu1 %v18386_v44 }
 0xb8c   : > { %14214 = vmatpush3.bf16.msra.mxu1 %v20834_v43  ;;  %12382 = vmatprep.mubr.f32.mxu1 %v18390_v34 }
 0xb8d   : > { %14216 = vmatprep.subr.bf16.mxu1 %v20835_v61 }
 0xb8f   : > { %12383 = vmatmul.mubr.f32.gmra.mrb[210].mxu1 %v18393_v4 }
 0xb90   : > { %14218 = vmatpush3.bf16.msra.mxu1 %v20835_v61  ;;  %12385 = vmatprep.mubr.f32.mxu1 %v18398_v52 }
 0xb91   : > { %14220 = vmatprep.subr.bf16.mxu1 %v20836_v46 }
 0xb93   : > { %12386 = vmatmul.mubr.f32.gmra.mrb[212].mxu1 %v18401_v20 }
 0xb94   : > { %14222 = vmatpush3.bf16.msra.mxu1 %v20836_v46  ;;  %12388 = vmatprep.mubr.f32.mxu1 %v18406_v25 }
 0xb95   : > { %14224 = vmatprep.subr.bf16.mxu1 %v20837_v22 }
 0xb97   : > { %12389 = vmatmul.mubr.f32.gmra.mrb[214].mxu1 %v18409_v50 }
 0xb98   : > { %14226 = vmatpush3.bf16.msra.mxu1 %v20837_v22  ;;  %12391 = vmatprep.mubr.f32.mxu1 %v18414_v58 }
 0xb99   : > { %14228 = vmatprep.subr.bf16.mxu1 %v20838_v15 }
 0xb9b   : > { %12392 = vmatmul.mubr.f32.gmra.mrb[216].mxu1 %v18417_v11 }
 0xb9c   : > { %14230 = vmatpush3.bf16.msra.mxu1 %v20838_v15  ;;  %12394 = vmatprep.mubr.f32.mxu1 %v18422_v30 }
 0xb9d   : > { %14232 = vmatprep.subr.bf16.mxu1 %v20839_v5 }
 0xb9f   : > { %12395 = vmatmul.mubr.f32.gmra.mrb[218].mxu1 %v18425_v60 }
 0xba0   : > { %14234 = vmatpush3.bf16.msra.mxu1 %v20839_v5  ;;  %12397 = vmatprep.mubr.f32.mxu1 %v18430_v42 }
 0xba1   : > { %14236 = vmatprep.subr.bf16.mxu1 %v20840_v7 }
 0xba3   : > { %12398 = vmatmul.mubr.f32.gmra.mrb[220].mxu1 %v18433_v62 }
 0xba4   : > { %14238 = vmatpush3.bf16.msra.mxu1 %v20840_v7  ;;  %12400 = vmatprep.mubr.f32.mxu1 %v18438_v27 }
 0xba5   : > { %14240 = vmatprep.subr.bf16.mxu1 %v20841_v59 }
 0xba7   : > { %12401 = vmatmul.mubr.f32.gmra.mrb[222].mxu1 %v18441_v17 }
 0xba8   : > { %14242 = vmatpush3.bf16.msra.mxu1 %v20841_v59  ;;  %12491 = vmatprep.mubr.f32.mxu1 %v18384_v32 }
 0xba9   : > { %14244 = vmatprep.subr.bf16.mxu1 %v20842_v8 }
 0xbab   : > { %12492 = vmatmul.mubr.f32.vlgmr.msra.gmra.mrb[224].mxu1 %v18386_v44 }
 0xbac   : > { %14246 = vmatpush3.bf16.msra.mxu1 %v20842_v8  ;;  %12494 = vmatprep.mubr.f32.mxu1 %v18390_v34 }
 0xbad   : > { %14248 = vmatprep.subr.bf16.mxu1 %v20843_v0 }
 0xbaf   : > { %12495 = vmatmul.mubr.f32.gmra.mrb[226].mxu1 %v18393_v4 }
 0xbb0   : > { %14250 = vmatpush3.bf16.msra.mxu1 %v20843_v0  ;;  %12497 = vmatprep.mubr.f32.mxu1 %v18398_v52 }
 0xbb1   : > { %14252 = vmatprep.subr.bf16.mxu1 %v20844_v12 }
 0xbb3   : > { %12498 = vmatmul.mubr.f32.gmra.mrb[228].mxu1 %v18401_v20 }
 0xbb4   : > { %14254 = vmatpush3.bf16.msra.mxu1 %v20844_v12  ;;  %12500 = vmatprep.mubr.f32.mxu1 %v18406_v25 }
 0xbb5   : > { %14256 = vmatprep.subr.bf16.mxu1 %v20845_v41 }
 0xbb7   : > { %12501 = vmatmul.mubr.f32.gmra.mrb[230].mxu1 %v18409_v50 }
 0xbb8   : > { %14258 = vmatpush3.bf16.msra.mxu1 %v20845_v41  ;;  %12503 = vmatprep.mubr.f32.mxu1 %v18414_v58 }
 0xbb9   : > { %14260 = vmatprep.subr.bf16.mxu1 %v20846_v31 }
 0xbbb   : > { %12504 = vmatmul.mubr.f32.gmra.mrb[232].mxu1 %v18417_v11 }
 0xbbc   : > { %14262 = vmatpush3.bf16.msra.mxu1 %v20846_v31  ;;  %12506 = vmatprep.mubr.f32.mxu1 %v18422_v30 }
 0xbbd   : > { %14264 = vmatprep.subr.bf16.mxu1 %v20847_v37 }
 0xbbf   : > { %12507 = vmatmul.mubr.f32.gmra.mrb[234].mxu1 %v18425_v60 }
 0xbc0   : > { %14266 = vmatpush3.bf16.msra.mxu1 %v20847_v37  ;;  %12509 = vmatprep.mubr.f32.mxu1 %v18430_v42 }
 0xbc1   : > { %14268 = vmatprep.subr.bf16.mxu1 %v20848_v47 }
 0xbc3   : > { %12510 = vmatmul.mubr.f32.gmra.mrb[236].mxu1 %v18433_v62 }
 0xbc4   : > { %14270 = vmatpush3.bf16.msra.mxu1 %v20848_v47  ;;  %12512 = vmatprep.mubr.f32.mxu1 %v18438_v27 }
 0xbc5   : > { %14272 = vmatprep.subr.bf16.mxu1 %v20849_v16 }
 0xbc7   : > { %12513 = vmatmul.mubr.f32.gmra.mrb[238].mxu1 %v18441_v17 }
 0xbc8   : > { %14274 = vmatpush3.bf16.msra.mxu1 %v20849_v16  ;;  %12547 = vmatprep.mubr.f32.mxu1 %v18384_v32 }
 0xbcb   : > { %12548 = vmatmul.mubr.f32.vlgmr.msra.gmra.mrb[240].mxu1 %v18386_v44 }
 0xbcc   : > { %12550 = vmatprep.mubr.f32.mxu1 %v18390_v34 }
 0xbcf   : > { %12551 = vmatmul.mubr.f32.gmra.mrb[242].mxu1 %v18393_v4 }
 0xbd0   : > { %12553 = vmatprep.mubr.f32.mxu1 %v18398_v52 }
 0xbd3   : > { %12554 = vmatmul.mubr.f32.gmra.mrb[244].mxu1 %v18401_v20 }
 0xbd4   : > { %12556 = vmatprep.mubr.f32.mxu1 %v18406_v25 }
 0xbd7   : > { %12557 = vmatmul.mubr.f32.gmra.mrb[246].mxu1 %v18409_v50 }
 0xbd8   : > { %12559 = vmatprep.mubr.f32.mxu1 %v18414_v58 }
 0xbdb   : > { %12560 = vmatmul.mubr.f32.gmra.mrb[248].mxu1 %v18417_v11 }
 0xbdc   : > { %12562 = vmatprep.mubr.f32.mxu1 %v18422_v30 }
 0xbdf   : > { %12563 = vmatmul.mubr.f32.gmra.mrb[250].mxu1 %v18425_v60 }
 0xbe0   : > { %12565 = vmatprep.mubr.f32.mxu1 %v18430_v42 }
 0xbe3   : > { %12566 = vmatmul.mubr.f32.gmra.mrb[252].mxu1 %v18433_v62 }
 0xbe4   : > { %12568 = vmatprep.mubr.f32.mxu1 %v18438_v27 }
 0xbe7   : > { %12569 = vmatmul.mubr.f32.gmra.mrb[254].mxu1 %v18441_v17 }
 0xc1e   : > { %v18559_v63 = vpop.f32.mrb[176].mxu1 }
 0xc1f   : > { %v5156_v19 = vpop.f32.mrb[177].mxu1 }
 0xc20   : > { %v5157_v33 = vadd.f32 %v18564_v39, %v5156_v19 }
 0xc22   : > { %v18567_v23 = vpop.f32.mrb[178].mxu1  ;;  %12435 = vmatprep.mubr.msk.f32.mxu0 %vm412_vm0, %v5157_v33 }
 0xc23   : > { %v18570_v54 = vpop.f32.mrb[179].mxu1 }
 0xc26   : > { %v18572_v9 = vpop.f32.mrb[180].mxu1 }
 0xc27   : > { %v18574_v45 = vpop.f32.mrb[181].mxu1 }
 0xc2a   : > { %v18576_v51 = vpop.f32.mrb[182].mxu1 }
 0xc2b   : > { %v18578_v53 = vpop.f32.mrb[183].mxu1 }
 0xc2e   : > { %v18580_v24 = vpop.f32.mrb[184].mxu1 }
 0xc2f   : > { %v18582_v49 = vpop.f32.mrb[185].mxu1 }
 0xc32   : > { %v18584_v1 = vpop.f32.mrb[186].mxu1 }
 0xc33   : > { %v18586_v14 = vpop.f32.mrb[187].mxu1 }
 0xc36   : > { %v18588_v55 = vpop.f32.mrb[188].mxu1 }
 0xc37   : > { %v18590_v38 = vpop.f32.mrb[189].mxu1 }
 0xc3a   : > { %v18592_v26 = vpop.f32.mrb[190].mxu1 }
 0xc3b   : > { %v18594_v3 = vpop.f32.mrb[191].mxu1 }
 0xc3e   : > { %v12325_v40 = vpop.f32.mrb[192].mxu1 }
 0xc3f   : > { %v5307_v57 = vadd.f32 %v15437_v36, %v12325_v40  ;;  %v5301_v10 = vpop.f32.mrb[193].mxu1 }
 0xc40   : > { %v5302_v28 = vadd.f32 %v15437_v36, %v5301_v10 }
 0xc42   : > { %v14163_v43 = vpack.c.bf16 %v5307_v57, %v5302_v28  ;;  %v12328_v61 = vpop.f32.mrb[194].mxu1 }
 0xc43   : > { %v5317_v46 = vadd.f32 %v15437_v36, %v12328_v61  ;;  %v5311_v22 = vpop.f32.mrb[195].mxu1 }
 0xc44   : > { %v5312_v15 = vadd.f32 %v15437_v36, %v5311_v22  ;;  %14165 = vmatprep.subr.msk.bf16.mxu0 %vm16314_vm1, %v14163_v43 }
 0xc45   : > { %14168 = vmatpush3.bf16.xpose.msk.msra.mxu0 %vm16314_vm1, %v14163_v43 }
 0xc46   : > { %v14169_v5 = vpack.c.bf16 %v5317_v46, %v5312_v15  ;;  %v12331_v7 = vpop.f32.mrb[196].mxu1 }
 0xc47   : > { %v5327_v59 = vadd.f32 %v15437_v36, %v12331_v7  ;;  %v5321_v8 = vpop.f32.mrb[197].mxu1 }
 0xc48   : > { %v5322_v0 = vadd.f32 %v15437_v36, %v5321_v8  ;;  %14171 = vmatprep.subr.msk.bf16.mxu0 %vm16314_vm1, %v14169_v5 }
 0xc4a   : > { %v14175_v12 = vpack.c.bf16 %v5327_v59, %v5322_v0  ;;  %v12334_v41 = vpop.f32.mrb[198].mxu1 }
 0xc4b   : > { %v5337_v31 = vadd.f32 %v15437_v36, %v12334_v41  ;;  %v5331_v37 = vpop.f32.mrb[199].mxu1 }
 0xc4c   : > { %v5332_v47 = vadd.f32 %v15437_v36, %v5331_v37 }
 0xc4d   : > { %14174 = vmatpush3.bf16.xpose.msk.msra.mxu0 %vm16314_vm1, %v14169_v5 }
 0xc4e   : > { %v14181_v16 = vpack.c.bf16 %v5337_v31, %v5332_v47  ;;  %v12337_v19 = vpop.f32.mrb[200].mxu1  ;;  %14177 = vmatprep.subr.msk.bf16.mxu0 %vm16314_vm1, %v14175_v12 }
 0xc4f   : > { %v5347_v33 = vadd.f32 %v15437_v36, %v12337_v19  ;;  %v5341_v40 = vpop.f32.mrb[201].mxu1 }
 0xc50   : > { %v5342_v57 = vadd.f32 %v15437_v36, %v5341_v40 }
 0xc52   : > { %v14187_v10 = vpack.c.bf16 %v5347_v33, %v5342_v57  ;;  %v12340_v28 = vpop.f32.mrb[202].mxu1 }
 0xc53   : > { %v5357_v43 = vadd.f32 %v15437_v36, %v12340_v28  ;;  %v5351_v61 = vpop.f32.mrb[203].mxu1 }
 0xc54   : > { %v5352_v46 = vadd.f32 %v15437_v36, %v5351_v61 }
 0xc55   : > { %14180 = vmatpush3.bf16.xpose.msk.msra.mxu0 %vm16314_vm1, %v14175_v12  ;;  %v15438_v12 = vld [vmem:[%s20291_s8] ss:$0 sm:$0xff] }
 0xc56   : > { %v14193_v22 = vpack.c.bf16 %v5357_v43, %v5352_v46  ;;  %v12343_v15 = vpop.f32.mrb[204].mxu1  ;;  %14183 = vmatprep.subr.msk.bf16.mxu0 %vm16314_vm1, %v14181_v16 }
 0xc57   : > { %v5367_v5 = vadd.f32 %v15437_v36, %v12343_v15  ;;  %v5361_v7 = vpop.f32.mrb[205].mxu1 }
 0xc58   : > { %v5362_v59 = vadd.f32 %v15437_v36, %v5361_v7 }
 0xc5a   : > { %v14199_v8 = vpack.c.bf16 %v5367_v5, %v5362_v59  ;;  %v12346_v0 = vpop.f32.mrb[206].mxu1 }
 0xc5b   : > { %v5377_v41 = vadd.f32 %v15437_v36, %v12346_v0  ;;  %v5371_v31 = vpop.f32.mrb[207].mxu1 }
 0xc5c   : > { %v5372_v37 = vadd.f32 %v15437_v36, %v5371_v31 }
 0xc5d   : > { %14186 = vmatpush3.bf16.xpose.msk.msra.mxu0 %vm16314_vm1, %v14181_v16 }
 0xc5e   : > { %v14205_v47 = vpack.c.bf16 %v5377_v41, %v5372_v37  ;;  %v12381_v19 = vpop.f32.mrb[208].mxu1  ;;  %14189 = vmatprep.subr.msk.bf16.mxu0 %vm16314_vm1, %v14187_v10 }
 0xc5f   : > { %v5452_v33 = vadd.f32 %v15438_v12, %v12381_v19  ;;  %v5446_v40 = vpop.f32.mrb[209].mxu1 }
 0xc60   : > { %v5447_v57 = vadd.f32 %v15438_v12, %v5446_v40 }
 0xc62   : > { %v18620_v28 = vpack.c.bf16 %v5452_v33, %v5447_v57  ;;  %v12384_v43 = vpop.f32.mrb[210].mxu1 }
 0xc63   : > { %v5462_v61 = vadd.f32 %v15438_v12, %v12384_v43  ;;  %v5456_v36 = vpop.f32.mrb[211].mxu1 }
 0xc64   : > { %v5457_v46 = vadd.f32 %v15438_v12, %v5456_v36 }
 0xc65   : > { %14192 = vmatpush3.bf16.xpose.msk.msra.mxu0 %vm16314_vm1, %v14187_v10 }
 0xc66   : > { %v18624_v16 = vpack.c.bf16 %v5462_v61, %v5457_v46  ;;  %v12387_v15 = vpop.f32.mrb[212].mxu1  ;;  %14195 = vmatprep.subr.msk.bf16.mxu0 %vm16314_vm1, %v14193_v22 }
 0xc67   : > { %v5472_v5 = vadd.f32 %v15438_v12, %v12387_v15  ;;  %v5466_v7 = vpop.f32.mrb[213].mxu1 }
 0xc68   : > { %v5467_v59 = vadd.f32 %v15438_v12, %v5466_v7 }
 0xc6a   : > { %v18628_v0 = vpack.c.bf16 %v5472_v5, %v5467_v59  ;;  %v12390_v41 = vpop.f32.mrb[214].mxu1 }
 0xc6b   : > { %v5482_v31 = vadd.f32 %v15438_v12, %v12390_v41  ;;  %v5476_v37 = vpop.f32.mrb[215].mxu1 }
 0xc6c   : > { %v5477_v19 = vadd.f32 %v15438_v12, %v5476_v37 }
 0xc6d   : > { %14198 = vmatpush3.bf16.xpose.msk.msra.mxu0 %vm16314_vm1, %v14193_v22 }
 0xc6e   : > { %v18632_v33 = vpack.c.bf16 %v5482_v31, %v5477_v19  ;;  %v12393_v10 = vpop.f32.mrb[216].mxu1  ;;  %14201 = vmatprep.subr.msk.bf16.mxu0 %vm16314_vm1, %v14199_v8 }
 0xc6f   : > { %v5492_v40 = vadd.f32 %v15438_v12, %v12393_v10  ;;  %v5486_v57 = vpop.f32.mrb[217].mxu1 }
 0xc70   : > { %v5487_v43 = vadd.f32 %v15438_v12, %v5486_v57 }
 0xc72   : > { %v18636_v61 = vpack.c.bf16 %v5492_v40, %v5487_v43  ;;  %v12396_v36 = vpop.f32.mrb[218].mxu1 }
 0xc73   : > { %v5502_v46 = vadd.f32 %v15438_v12, %v12396_v36  ;;  %v5496_v15 = vpop.f32.mrb[219].mxu1  ;;  %v20850_v36 = vld [vmem:[#allocation55_spill] sm:$0xff] }
 0xc74   : > { %v5497_v5 = vadd.f32 %v15438_v12, %v5496_v15  ;;  %v18656_v15 = vld [vmem:[%s20287_s4 + $0x1] ss:$0 sm:$0xff] }
 0xc75   : > { %14204 = vmatpush3.bf16.xpose.msk.msra.mxu0 %vm16314_vm1, %v14199_v8 }
 0xc76   : > { %v18640_v7 = vpack.c.bf16 %v5502_v46, %v5497_v5  ;;  %v12399_v22 = vpop.f32.mrb[220].mxu1  ;;  %14207 = vmatprep.subr.msk.bf16.mxu0 %vm16314_vm1, %v14205_v47 }
 0xc77   : > { %v5512_v59 = vadd.f32 %v15438_v12, %v12399_v22  ;;  %v5506_v41 = vpop.f32.mrb[221].mxu1 }
 0xc78   : > { %v5507_v31 = vadd.f32 %v15438_v12, %v5506_v41  ;;  %v5172_v41 = vadd.f32 %v18564_v39, %v18567_v23  ;;  %v20852_v23 = vld [vmem:[#allocation58_spill] sm:$0xff] }
 0xc7a   : > { %v18644_v37 = vpack.c.bf16 %v5512_v59, %v5507_v31  ;;  %v12402_v19 = vpop.f32.mrb[222].mxu1 }
 0xc7b   : > { %v5522_v10 = vadd.f32 %v15438_v12, %v12402_v19  ;;  %v5516_v40 = vpop.f32.mrb[223].mxu1  ;;  %v5177_v19 = vadd.f32 %v18564_v39, %v18574_v45  ;;  %v5192_v45 = vadd.f32 %v18564_v39, %v18576_v51  ;;  %v20854_v51 = vld [vmem:[#allocation60_spill] sm:$0xff] }
 0xc7c   : > { %v5517_v57 = vadd.f32 %v15438_v12, %v5516_v40  ;;  %v5162_v12 = vadd.f32 %v18564_v39, %v18559_v63  ;;  %v20851_v63 = vld [vmem:[#allocation57_spill] sm:$0xff] }
 0xc7d   : > { %14210 = vmatpush3.bf16.xpose.msk.msra.mxu0 %vm16314_vm1, %v14205_v47  ;;  %v5167_v47 = vadd.f32 %v18564_v39, %v18570_v54  ;;  %v5182_v54 = vadd.f32 %v18564_v39, %v18572_v9  ;;  %v20853_v9 = vld [vmem:[#allocation59_spill] sm:$0xff] }
 0xc7e   : > { %v18648_v43 = vpack.c.bf16 %v5522_v10, %v5517_v57  ;;  %v18650_v8 = vpop.f32.mrb[224].mxu1  ;;  %14276 = vmatprep.subr.bf16.mxu0 %v20850_v36  ;;  %v5187_v57 = vadd.f32 %v18564_v39, %v18578_v53  ;;  %v5202_v53 = vadd.f32 %v18564_v39, %v18580_v24  ;;  %v20855_v24 = vld [vmem:[#allocation61_spill] sm:$0xff] }
 0xc7f   : > { %v6024_v46 = vpop.f32.mrb[225].mxu1 }
 0xc80   : > { %v6025_v5 = vadd.f32 %v18656_v15, %v6024_v46 }
 0xc82   : > { %v18661_v22 = vpop.f32.mrb[226].mxu1  ;;  %12659 = vmatprep.mubr.msk.f32.mxu1 %vm412_vm0, %v6025_v5  ;;  %v5197_v5 = vadd.f32 %v18564_v39, %v18582_v49  ;;  %v5212_v49 = vadd.f32 %v18564_v39, %v18584_v1  ;;  %v20856_v1 = vld [vmem:[#allocation62_spill] sm:$0xff] }
 0xc83   : > { %v18666_v59 = vpop.f32.mrb[227].mxu1 }
 0xc84   : > { %12436 = vmatmul.mubr.msk.f32.vlgmr.msra.gmra.mrb[112].mxu0 %vm412_vm0, %v5162_v12 }
 0xc85   : > { %12438 = vmatprep.mubr.msk.f32.mxu0 %vm412_vm0, %v5167_v47  ;;  %14278 = vmatpush3.bf16.msra.mxu0 %v20850_v36 }
 0xc86   : > { %v18673_v31 = vpop.f32.mrb[228].mxu1  ;;  %14280 = vmatprep.subr.bf16.mxu0 %v20851_v63 }
 0xc87   : > { %v18678_v10 = vpop.f32.mrb[229].mxu1 }
 0xc88   : > { %12439 = vmatmul.mubr.msk.f32.gmra.mrb[114].mxu0 %vm412_vm0, %v5172_v41  ;;  %v5207_v41 = vadd.f32 %v18564_v39, %v18586_v14  ;;  %v5222_v14 = vadd.f32 %v18564_v39, %v18588_v55  ;;  %v20857_v55 = vld [vmem:[#allocation63_spill] sm:$0xff] }
 0xc89   : > { %12441 = vmatprep.mubr.msk.f32.mxu0 %vm412_vm0, %v5177_v19  ;;  %14282 = vmatpush3.bf16.msra.mxu0 %v20851_v63 }
 0xc8a   : > { %v18685_v40 = vpop.f32.mrb[230].mxu1  ;;  %14284 = vmatprep.subr.bf16.mxu0 %v20852_v23 }
 0xc8b   : > { %v18690_v36 = vpop.f32.mrb[231].mxu1 }
 0xc8c   : > { %12442 = vmatmul.mubr.msk.f32.gmra.mrb[116].mxu0 %vm412_vm0, %v5182_v54  ;;  %v5217_v54 = vadd.f32 %v18564_v39, %v18590_v38  ;;  %v5232_v38 = vadd.f32 %v18564_v39, %v18592_v26 }
 0xc8d   : > { %12444 = vmatprep.mubr.msk.f32.mxu0 %vm412_vm0, %v5187_v57  ;;  %14286 = vmatpush3.bf16.msra.mxu0 %v20852_v23 }
 0xc8e   : > { %v18697_v46 = vpop.f32.mrb[232].mxu1  ;;  %14288 = vmatprep.subr.bf16.mxu0 %v20853_v9 }
 0xc8f   : > { %v18702_v12 = vpop.f32.mrb[233].mxu1 }
 0xc90   : > { %12445 = vmatmul.mubr.msk.f32.gmra.mrb[118].mxu0 %vm412_vm0, %v5192_v45  ;;  %v5227_v45 = vadd.f32 %v18564_v39, %v18594_v3 }
 0xc91   : > { %12447 = vmatprep.mubr.msk.f32.mxu0 %vm412_vm0, %v5197_v5  ;;  %14290 = vmatpush3.bf16.msra.mxu0 %v20853_v9 }
 0xc92   : > { %v18709_v47 = vpop.f32.mrb[234].mxu1  ;;  %14292 = vmatprep.subr.bf16.mxu0 %v20854_v51 }
 0xc93   : > { %v18714_v63 = vpop.f32.mrb[235].mxu1 }
 0xc94   : > { %12448 = vmatmul.mubr.msk.f32.gmra.mrb[120].mxu0 %vm412_vm0, %v5202_v53  ;;  %v15440_v53 = vld [vmem:[%s20289_s6 + $0x1] ss:$0 sm:$0xff] }
 0xc95   : > { %12450 = vmatprep.mubr.msk.f32.mxu0 %vm412_vm0, %v5207_v41  ;;  %14294 = vmatpush3.bf16.msra.mxu0 %v20854_v51 }
 0xc96   : > { %v18721_v19 = vpop.f32.mrb[236].mxu1  ;;  %14296 = vmatprep.subr.bf16.mxu0 %v20855_v24 }
 0xc97   : > { %v18726_v23 = vpop.f32.mrb[237].mxu1 }
 0xc98   : > { %12451 = vmatmul.mubr.msk.f32.gmra.mrb[122].mxu0 %vm412_vm0, %v5212_v49 }
 0xc99   : > { %12453 = vmatprep.mubr.msk.f32.mxu0 %vm412_vm0, %v5217_v54  ;;  %14298 = vmatpush3.bf16.msra.mxu0 %v20855_v24 }
 0xc9a   : > { %v18733_v57 = vpop.f32.mrb[238].mxu1  ;;  %14300 = vmatprep.subr.bf16.mxu0 %v20856_v1 }
 0xc9b   : > { %v18738_v9 = vpop.f32.mrb[239].mxu1 }
 0xc9c   : > { %12454 = vmatmul.mubr.msk.f32.gmra.mrb[124].mxu0 %vm412_vm0, %v5222_v14 }
 0xc9d   : > { %12456 = vmatprep.mubr.msk.f32.mxu0 %vm412_vm0, %v5227_v45  ;;  %14302 = vmatpush3.bf16.msra.mxu0 %v20856_v1 }
 0xc9e   : > { %v12549_v5 = vpop.f32.mrb[240].mxu1  ;;  %14304 = vmatprep.subr.bf16.mxu0 %v20857_v55 }
 0xc9f   : > { %v6175_v51 = vadd.f32 %v15440_v53, %v12549_v5  ;;  %v6169_v3 = vpop.f32.mrb[241].mxu1 }
 0xca0   : > { %v6170_v41 = vadd.f32 %v15440_v53, %v6169_v3  ;;  %12457 = vmatmul.mubr.msk.f32.gmra.mrb[126].mxu0 %vm412_vm0, %v5232_v38 }
 0xca1   : > { %14306 = vmatpush3.bf16.msra.mxu0 %v20857_v55  ;;  %12603 = vmatprep.mubr.f32.mxu0 %v18384_v32 }
 0xca2   : > { %v14307_v49 = vpack.c.bf16 %v6175_v51, %v6170_v41  ;;  %v12552_v24 = vpop.f32.mrb[242].mxu1 }
 0xca3   : > { %v6185_v54 = vadd.f32 %v15440_v53, %v12552_v24  ;;  %v6179_v39 = vpop.f32.mrb[243].mxu1 }
 0xca4   : > { %v6180_v26 = vadd.f32 %v15440_v53, %v6179_v39  ;;  %12604 = vmatmul.mubr.f32.vlgmr.msra.gmra.mrb[128].mxu0 %v18386_v44  ;;  %14309 = vmatprep.subr.msk.bf16.mxu1 %vm16314_vm1, %v14307_v49 }
 0xca5   : > { %12606 = vmatprep.mubr.f32.mxu0 %v18390_v34  ;;  %14312 = vmatpush3.bf16.xpose.msk.msra.mxu1 %vm16314_vm1, %v14307_v49 }
 0xca6   : > { %v14313_v14 = vpack.c.bf16 %v6185_v54, %v6180_v26  ;;  %v12555_v1 = vpop.f32.mrb[244].mxu1 }
 0xca7   : > { %v6195_v45 = vadd.f32 %v15440_v53, %v12555_v1  ;;  %v6189_v38 = vpop.f32.mrb[245].mxu1 }
 0xca8   : > { %v6190_v5 = vadd.f32 %v15440_v53, %v6189_v38  ;;  %12607 = vmatmul.mubr.f32.gmra.mrb[130].mxu0 %v18393_v4  ;;  %14315 = vmatprep.subr.msk.bf16.mxu1 %vm16314_vm1, %v14313_v14 }
 0xca9   : > { %12609 = vmatprep.mubr.f32.mxu0 %v18398_v52 }
 0xcaa   : > { %v14319_v55 = vpack.c.bf16 %v6195_v45, %v6190_v5  ;;  %v12558_v51 = vpop.f32.mrb[246].mxu1 }
 0xcab   : > { %v6205_v3 = vadd.f32 %v15440_v53, %v12558_v51  ;;  %v6199_v41 = vpop.f32.mrb[247].mxu1 }
 0xcac   : > { %v6200_v24 = vadd.f32 %v15440_v53, %v6199_v41  ;;  %12610 = vmatmul.mubr.f32.gmra.mrb[132].mxu0 %v18401_v20 }
 0xcad   : > { %12612 = vmatprep.mubr.f32.mxu0 %v18406_v25  ;;  %14318 = vmatpush3.bf16.xpose.msk.msra.mxu1 %vm16314_vm1, %v14313_v14 }
 0xcae   : > { %v14325_v49 = vpack.c.bf16 %v6205_v3, %v6200_v24  ;;  %v12561_v54 = vpop.f32.mrb[248].mxu1  ;;  %14321 = vmatprep.subr.msk.bf16.mxu1 %vm16314_vm1, %v14319_v55 }
 0xcaf   : > { %v6215_v39 = vadd.f32 %v15440_v53, %v12561_v54  ;;  %v6209_v26 = vpop.f32.mrb[249].mxu1 }
 0xcb0   : > { %v6210_v1 = vadd.f32 %v15440_v53, %v6209_v26  ;;  %12613 = vmatmul.mubr.f32.gmra.mrb[134].mxu0 %v18409_v50 }
 0xcb1   : > { %12615 = vmatprep.mubr.f32.mxu0 %v18414_v58 }
 0xcb2   : > { %v14331_v45 = vpack.c.bf16 %v6215_v39, %v6210_v1  ;;  %v12564_v38 = vpop.f32.mrb[250].mxu1 }
 0xcb3   : > { %v6225_v5 = vadd.f32 %v15440_v53, %v12564_v38  ;;  %v6219_v51 = vpop.f32.mrb[251].mxu1 }
 0xcb4   : > { %v6220_v41 = vadd.f32 %v15440_v53, %v6219_v51  ;;  %12616 = vmatmul.mubr.f32.gmra.mrb[136].mxu0 %v18417_v11 }
 0xcb5   : > { %12618 = vmatprep.mubr.f32.mxu0 %v18422_v30  ;;  %14324 = vmatpush3.bf16.xpose.msk.msra.mxu1 %vm16314_vm1, %v14319_v55 }
 0xcb6   : > { %v14337_v14 = vpack.c.bf16 %v6225_v5, %v6220_v41  ;;  %v12567_v3 = vpop.f32.mrb[252].mxu1  ;;  %14327 = vmatprep.subr.msk.bf16.mxu1 %vm16314_vm1, %v14325_v49  ;;  %v20859_v5 = vld [vmem:[#allocation65_spill] sm:$0xff]  ;;  %v6045_v41 = vadd.f32 %v18656_v15, %v18678_v10  ;;  %v20861_v10 = vld [vmem:[#allocation67_spill] sm:$0xff] }
 0xcb7   : > { %v6235_v24 = vadd.f32 %v15440_v53, %v12567_v3  ;;  %v6229_v54 = vpop.f32.mrb[253].mxu1  ;;  %v6065_v3 = vadd.f32 %v18656_v15, %v18702_v12  ;;  %v20863_v12 = vld [vmem:[#allocation69_spill] sm:$0xff] }
 0xcb8   : > { %v6230_v26 = vadd.f32 %v15440_v53, %v6229_v54  ;;  %12619 = vmatmul.mubr.f32.gmra.mrb[138].mxu0 %v18425_v60  ;;  %v6085_v54 = vadd.f32 %v18656_v15, %v18726_v23  ;;  %v20865_v23 = vld [vmem:[#allocation71_spill] sm:$0xff] }
 0xcb9   : > { %12621 = vmatprep.mubr.f32.mxu0 %v18430_v42 }
 0xcba   : > { %v14343_v39 = vpack.c.bf16 %v6235_v24, %v6230_v26  ;;  %v12570_v1 = vpop.f32.mrb[254].mxu1  ;;  %v6075_v24 = vadd.f32 %v18656_v15, %v18714_v63  ;;  %v20864_v63 = vld [vmem:[#allocation70_spill] sm:$0xff]  ;;  %v6095_v26 = vadd.f32 %v18656_v15, %v18738_v9  ;;  %v20867_v9 = vld [vmem:[#allocation73_spill] sm:$0xff] }
 0xcbb   : > { %v6245_v38 = vadd.f32 %v15440_v53, %v12570_v1  ;;  %v6239_v51 = vpop.f32.mrb[255].mxu1  ;;  %v20871_v1 = vld [vmem:[#allocation77_spill] sm:$0xff] }
 0xcbc   : > { %v6240_v21 = vadd.f32 %v15440_v53, %v6239_v51  ;;  %12622 = vmatmul.mubr.f32.gmra.mrb[140].mxu0 %v18433_v62  ;;  %v6030_v53 = vadd.f32 %v18656_v15, %v18650_v8  ;;  %v6050_v8 = vadd.f32 %v18656_v15, %v18673_v31  ;;  %v6070_v31 = vadd.f32 %v18656_v15, %v18697_v46  ;;  %v20873_v51 = vld [vmem:[#allocation79_spill] sm:$0xff] }
 0xcbd   : > { %12624 = vmatprep.mubr.f32.mxu0 %v18438_v27  ;;  %14330 = vmatpush3.bf16.xpose.msk.msra.mxu1 %vm16314_vm1, %v14325_v49  ;;  %v6035_v49 = vadd.f32 %v18656_v15, %v18666_v59  ;;  %v20860_v59 = vld [vmem:[#allocation66_spill] sm:$0xff]  ;;  %v6090_v46 = vadd.f32 %v18656_v15, %v18721_v19  ;;  %v20866_v19 = vld [vmem:[#allocation72_spill] sm:$0xff] }
 0xcbe   : > { %v14349_v55 = vpack.c.bf16 %v6245_v38, %v6240_v21  ;;  %14333 = vmatprep.subr.msk.bf16.mxu1 %vm16314_vm1, %v14331_v45  ;;  %v20858_v21 = vld [vmem:[#allocation64_spill] sm:$0xff]  ;;  %v20872_v38 = vld [vmem:[#allocation78_spill] sm:$0xff] }
 0xcc0   : > { %12625 = vmatmul.mubr.f32.gmra.mrb[142].mxu0 %v18441_v17 }
 0xcc5   : > { %14336 = vmatpush3.bf16.xpose.msk.msra.mxu1 %vm16314_vm1, %v14331_v45  ;;  %v6040_v45 = vadd.f32 %v18656_v15, %v18661_v22  ;;  %v6060_v22 = vadd.f32 %v18656_v15, %v18685_v40  ;;  %v6080_v40 = vadd.f32 %v18656_v15, %v18709_v47  ;;  %v6100_v47 = vadd.f32 %v18656_v15, %v18733_v57  ;;  %v20869_v57 = vld [vmem:[#allocation75_spill] sm:$0xff] }
 0xcc6   : > { %14339 = vmatprep.subr.msk.bf16.mxu1 %vm16314_vm1, %v14337_v14 }
 0xccd   : > { %14342 = vmatpush3.bf16.xpose.msk.msra.mxu1 %vm16314_vm1, %v14337_v14  ;;  %v6055_v14 = vadd.f32 %v18656_v15, %v18690_v36  ;;  %v20862_v36 = vld [vmem:[#allocation68_spill] sm:$0xff]  ;;  %v20868_v15 = vld [vmem:[#allocation74_spill] sm:$0xff] }
 0xcce   : > { %14345 = vmatprep.subr.msk.bf16.mxu1 %vm16314_vm1, %v14343_v39 }
 0xcd5   : > { %14348 = vmatpush3.bf16.xpose.msk.msra.mxu1 %vm16314_vm1, %v14343_v39  ;;  %v20870_v39 = vld [vmem:[#allocation76_spill] sm:$0xff] }
 0xcd6   : > { %14351 = vmatprep.subr.msk.bf16.mxu1 %vm16314_vm1, %v14349_v55 }
 0xcdd   : > { %14354 = vmatpush3.bf16.xpose.msk.msra.mxu1 %vm16314_vm1, %v14349_v55  ;;  %v20874_v55 = vld [vmem:[#allocation80_spill] sm:$0xff] }
 0xcde   : > { %14420 = vmatprep.subr.bf16.mxu1 %v20858_v21 }
 0xce4   : > { %12660 = vmatmul.mubr.msk.f32.vlgmr.msra.gmra.mrb[0].mxu1 %vm412_vm0, %v6030_v53  ;;  %v20876_v53 = vld [vmem:[#allocation82_spill] sm:$0xff] }
 0xce5   : > { %12662 = vmatprep.mubr.msk.f32.mxu1 %vm412_vm0, %v6035_v49  ;;  %14422 = vmatpush3.bf16.msra.mxu1 %v20858_v21  ;;  %v20875_v21 = vld [vmem:[#allocation81_spill] sm:$0xff]  ;;  %v20877_v49 = vld [vmem:[#allocation83_spill] sm:$0xff] }
 0xce6   : > { %14424 = vmatprep.subr.bf16.mxu1 %v20859_v5 }
 0xce8   : > { %12663 = vmatmul.mubr.msk.f32.gmra.mrb[2].mxu1 %vm412_vm0, %v6040_v45  ;;  %v20878_v45 = vld [vmem:[#allocation84_spill] sm:$0xff] }
 0xce9   : > { %12665 = vmatprep.mubr.msk.f32.mxu1 %vm412_vm0, %v6045_v41  ;;  %14426 = vmatpush3.bf16.msra.mxu1 %v20859_v5  ;;  %v20879_v5 = vld [vmem:[#allocation85_spill] sm:$0xff]  ;;  %v20880_v41 = vld [vmem:[#allocation86_spill] sm:$0xff] }
 0xcea   : > { %14428 = vmatprep.subr.bf16.mxu1 %v20860_v59 }
 0xcec   : > { %12666 = vmatmul.mubr.msk.f32.gmra.mrb[4].mxu1 %vm412_vm0, %v6050_v8  ;;  %v20881_v8 = vld [vmem:[#allocation87_spill] sm:$0xff] }
 0xced   : > { %12668 = vmatprep.mubr.msk.f32.mxu1 %vm412_vm0, %v6055_v14  ;;  %14430 = vmatpush3.bf16.msra.mxu1 %v20860_v59  ;;  %v20882_v59 = vld [vmem:[#allocation88_spill] sm:$0xff]  ;;  %v20883_v14 = vld [vmem:[#allocation89_spill] sm:$0xff] }
 0xcee   : > { %14432 = vmatprep.subr.bf16.mxu1 %v20861_v10 }
 0xcf0   : > { %12669 = vmatmul.mubr.msk.f32.gmra.mrb[6].mxu1 %vm412_vm0, %v6060_v22  ;;  %v20884_v22 = vld [vmem:[#allocation90_spill] sm:$0xff] }
 0xcf1   : > { %12671 = vmatprep.mubr.msk.f32.mxu1 %vm412_vm0, %v6065_v3  ;;  %14434 = vmatpush3.bf16.msra.mxu1 %v20861_v10  ;;  %v20885_v10 = vld [vmem:[#allocation91_spill] sm:$0xff]  ;;  %v20886_v3 = vld [vmem:[#allocation92_spill] sm:$0xff] }
 0xcf2   : > { %14436 = vmatprep.subr.bf16.mxu1 %v20862_v36 }
 0xcf4   : > { %12672 = vmatmul.mubr.msk.f32.gmra.mrb[8].mxu1 %vm412_vm0, %v6070_v31  ;;  %v20887_v31 = vld [vmem:[#allocation93_spill] sm:$0xff] }
 0xcf5   : > { %12674 = vmatprep.mubr.msk.f32.mxu1 %vm412_vm0, %v6075_v24  ;;  %14438 = vmatpush3.bf16.msra.mxu1 %v20862_v36 }
 0xcf6   : > { %14440 = vmatprep.subr.bf16.mxu1 %v20863_v12 }
 0xcf8   : > { %12675 = vmatmul.mubr.msk.f32.gmra.mrb[10].mxu1 %vm412_vm0, %v6080_v40  ;;  %v20888_v40 = vld [vmem:[#allocation94_spill] sm:$0xff] }
 0xcf9   : > { %12677 = vmatprep.mubr.msk.f32.mxu1 %vm412_vm0, %v6085_v54  ;;  %14442 = vmatpush3.bf16.msra.mxu1 %v20863_v12 }
 0xcfa   : > { %14444 = vmatprep.subr.bf16.mxu1 %v20864_v63 }
 0xcfc   : > { %12678 = vmatmul.mubr.msk.f32.gmra.mrb[12].mxu1 %vm412_vm0, %v6090_v46  ;;  %v20889_v46 = vld [vmem:[#allocation95_spill] sm:$0xff] }
 0xcfd   : > { %12680 = vmatprep.mubr.msk.f32.mxu1 %vm412_vm0, %v6095_v26  ;;  %14446 = vmatpush3.bf16.msra.mxu1 %v20864_v63 }
 0xcfe   : > { %14448 = vmatprep.subr.bf16.mxu1 %v20865_v23 }
 0xd00   : > { %12681 = vmatmul.mubr.msk.f32.gmra.mrb[14].mxu1 %vm412_vm0, %v6100_v47  ;;  %v20890_v47 = vld [vmem:[#allocation96_spill] sm:$0xff] }
 0xd01   : > { %14450 = vmatpush3.bf16.msra.mxu1 %v20865_v23  ;;  %12827 = vmatprep.mubr.f32.mxu1 %v18384_v32 }
 0xd02   : > { %14484 = vmatprep.subr.bf16.mxu1 %v20866_v19 }
 0xd04   : > { %12828 = vmatmul.mubr.f32.vlgmr.msra.gmra.mrb[16].mxu1 %v18386_v44 }
 0xd05   : > { %12830 = vmatprep.mubr.f32.mxu1 %v18390_v34  ;;  %14486 = vmatpush3.bf16.msra.mxu1 %v20866_v19 }
 0xd06   : > { %14488 = vmatprep.subr.bf16.mxu1 %v20867_v9 }
 0xd08   : > { %12831 = vmatmul.mubr.f32.gmra.mrb[18].mxu1 %v18393_v4 }
 0xd09   : > { %12833 = vmatprep.mubr.f32.mxu1 %v18398_v52  ;;  %14490 = vmatpush3.bf16.msra.mxu1 %v20867_v9  ;;  %v20891_v9 = vld [vmem:[#allocation97_spill] sm:$0xff] }
 0xd0a   : > { %14492 = vmatprep.subr.bf16.mxu1 %v20868_v15 }
 0xd0c   : > { %12834 = vmatmul.mubr.f32.gmra.mrb[20].mxu1 %v18401_v20 }
 0xd0d   : > { %12836 = vmatprep.mubr.f32.mxu1 %v18406_v25  ;;  %14494 = vmatpush3.bf16.msra.mxu1 %v20868_v15 }
 0xd0e   : > { %14496 = vmatprep.subr.bf16.mxu1 %v20869_v57 }
 0xd10   : > { %12837 = vmatmul.mubr.f32.gmra.mrb[22].mxu1 %v18409_v50 }
 0xd11   : > { %12839 = vmatprep.mubr.f32.mxu1 %v18414_v58  ;;  %14498 = vmatpush3.bf16.msra.mxu1 %v20869_v57 }
 0xd12   : > { %14500 = vmatprep.subr.bf16.mxu1 %v20870_v39 }
 0xd14   : > { %12840 = vmatmul.mubr.f32.gmra.mrb[24].mxu1 %v18417_v11 }
 0xd15   : > { %12842 = vmatprep.mubr.f32.mxu1 %v18422_v30  ;;  %14502 = vmatpush3.bf16.msra.mxu1 %v20870_v39  ;;  %v20892_v39 = vld [vmem:[#allocation98_spill] sm:$0xff] }
 0xd16   : > { %14504 = vmatprep.subr.bf16.mxu1 %v20871_v1 }
 0xd18   : > { %12843 = vmatmul.mubr.f32.gmra.mrb[26].mxu1 %v18425_v60 }
 0xd19   : > { %12845 = vmatprep.mubr.f32.mxu1 %v18430_v42  ;;  %14506 = vmatpush3.bf16.msra.mxu1 %v20871_v1 }
 0xd1a   : > { %14508 = vmatprep.subr.bf16.mxu1 %v20872_v38 }
 0xd1c   : > { %12846 = vmatmul.mubr.f32.gmra.mrb[28].mxu1 %v18433_v62 }
 0xd1d   : > { %12848 = vmatprep.mubr.f32.mxu1 %v18438_v27  ;;  %14510 = vmatpush3.bf16.msra.mxu1 %v20872_v38 }
 0xd1e   : > { %14512 = vmatprep.subr.bf16.mxu1 %v20873_v51 }
 0xd20   : > { %12849 = vmatmul.mubr.f32.gmra.mrb[30].mxu1 %v18441_v17 }
 0xd21   : > { %14514 = vmatpush3.bf16.msra.mxu1 %v20873_v51  ;;  %12939 = vmatprep.mubr.f32.mxu1 %v18384_v32  ;;  %v20893_v51 = vld [vmem:[#allocation99_spill] sm:$0xff] }
 0xd22   : > { %14596 = vmatprep.subr.bf16.mxu1 %v20874_v55 }
 0xd24   : > { %12940 = vmatmul.mubr.f32.vlgmr.msra.gmra.mrb[32].mxu1 %v18386_v44 }
 0xd25   : > { %12942 = vmatprep.mubr.f32.mxu1 %v18390_v34  ;;  %14598 = vmatpush3.bf16.msra.mxu1 %v20874_v55 }
 0xd26   : > { %14600 = vmatprep.subr.bf16.mxu1 %v20875_v21 }
 0xd28   : > { %12943 = vmatmul.mubr.f32.gmra.mrb[34].mxu1 %v18393_v4 }
 0xd29   : > { %12945 = vmatprep.mubr.f32.mxu1 %v18398_v52  ;;  %14602 = vmatpush3.bf16.msra.mxu1 %v20875_v21 }
 0xd2a   : > { %14604 = vmatprep.subr.bf16.mxu1 %v20876_v53 }
 0xd2c   : > { %12946 = vmatmul.mubr.f32.gmra.mrb[36].mxu1 %v18401_v20 }
 0xd2d   : > { %12948 = vmatprep.mubr.f32.mxu1 %v18406_v25  ;;  %14606 = vmatpush3.bf16.msra.mxu1 %v20876_v53  ;;  %v20894_v53 = vld [vmem:[#allocation100_spill] sm:$0xff] }
 0xd2e   : > { %14608 = vmatprep.subr.bf16.mxu1 %v20877_v49 }
 0xd30   : > { %12949 = vmatmul.mubr.f32.gmra.mrb[38].mxu1 %v18409_v50 }
 0xd31   : > { %12951 = vmatprep.mubr.f32.mxu1 %v18414_v58  ;;  %14610 = vmatpush3.bf16.msra.mxu1 %v20877_v49 }
 0xd32   : > { %14612 = vmatprep.subr.bf16.mxu1 %v20878_v45 }
 0xd34   : > { %12952 = vmatmul.mubr.f32.gmra.mrb[40].mxu1 %v18417_v11 }
 0xd35   : > { %12954 = vmatprep.mubr.f32.mxu1 %v18422_v30  ;;  %14614 = vmatpush3.bf16.msra.mxu1 %v20878_v45 }
 0xd36   : > { %14616 = vmatprep.subr.bf16.mxu1 %v20879_v5 }
 0xd38   : > { %12955 = vmatmul.mubr.f32.gmra.mrb[42].mxu1 %v18425_v60 }
 0xd39   : > { %12957 = vmatprep.mubr.f32.mxu1 %v18430_v42  ;;  %14618 = vmatpush3.bf16.msra.mxu1 %v20879_v5  ;;  %v20895_v5 = vld [vmem:[#allocation101_spill] sm:$0xff] }
 0xd3a   : > { %14620 = vmatprep.subr.bf16.mxu1 %v20880_v41 }
 0xd3c   : > { %12958 = vmatmul.mubr.f32.gmra.mrb[44].mxu1 %v18433_v62 }
 0xd3d   : > { %12960 = vmatprep.mubr.f32.mxu1 %v18438_v27  ;;  %14622 = vmatpush3.bf16.msra.mxu1 %v20880_v41 }
 0xd3e   : > { %14624 = vmatprep.subr.bf16.mxu1 %v20881_v8 }
 0xd40   : > { %12961 = vmatmul.mubr.f32.gmra.mrb[46].mxu1 %v18441_v17 }
 0xd41   : > { %14626 = vmatpush3.bf16.msra.mxu1 %v20881_v8  ;;  %13107 = vmatprep.mubr.f32.mxu1 %v18384_v32  ;;  %v19013_v8 = vld [vmem:[%s20291_s8 + $0x1] ss:$0 sm:$0xff] }
 0xd42   : > { %14628 = vmatprep.subr.bf16.mxu1 %v20882_v59 }
 0xd44   : > { %13108 = vmatmul.mubr.f32.vlgmr.msra.gmra.mrb[48].mxu1 %v18386_v44 }
 0xd45   : > { %13110 = vmatprep.mubr.f32.mxu1 %v18390_v34  ;;  %14630 = vmatpush3.bf16.msra.mxu1 %v20882_v59 }
 0xd46   : > { %14632 = vmatprep.subr.bf16.mxu1 %v20883_v14 }
 0xd48   : > { %13111 = vmatmul.mubr.f32.gmra.mrb[50].mxu1 %v18393_v4 }
 0xd49   : > { %13113 = vmatprep.mubr.f32.mxu1 %v18398_v52  ;;  %14634 = vmatpush3.bf16.msra.mxu1 %v20883_v14 }
 0xd4a   : > { %14636 = vmatprep.subr.bf16.mxu1 %v20884_v22 }
 0xd4c   : > { %13114 = vmatmul.mubr.f32.gmra.mrb[52].mxu1 %v18401_v20 }
 0xd4d   : > { %13116 = vmatprep.mubr.f32.mxu1 %v18406_v25  ;;  %14638 = vmatpush3.bf16.msra.mxu1 %v20884_v22 }
 0xd4e   : > { %14640 = vmatprep.subr.bf16.mxu1 %v20885_v10 }
 0xd50   : > { %13117 = vmatmul.mubr.f32.gmra.mrb[54].mxu1 %v18409_v50 }
 0xd51   : > { %13119 = vmatprep.mubr.f32.mxu1 %v18414_v58  ;;  %14642 = vmatpush3.bf16.msra.mxu1 %v20885_v10  ;;  %v20896_v10 = vld [vmem:[#allocation102_spill] sm:$0xff] }
 0xd52   : > { %14644 = vmatprep.subr.bf16.mxu1 %v20886_v3 }
 0xd54   : > { %13120 = vmatmul.mubr.f32.gmra.mrb[56].mxu1 %v18417_v11 }
 0xd55   : > { %13122 = vmatprep.mubr.f32.mxu1 %v18422_v30  ;;  %14646 = vmatpush3.bf16.msra.mxu1 %v20886_v3 }
 0xd56   : > { %14648 = vmatprep.subr.bf16.mxu1 %v20887_v31 }
 0xd57   : > { %v18946_v36 = vpop.f32.mrb[112].mxu0 }
 0xd58   : > { %v18948_v24 = vpop.f32.mrb[113].mxu0  ;;  %13123 = vmatmul.mubr.f32.gmra.mrb[58].mxu1 %v18425_v60 }
 0xd59   : > { %13125 = vmatprep.mubr.f32.mxu1 %v18430_v42  ;;  %14650 = vmatpush3.bf16.msra.mxu1 %v20887_v31 }
 0xd5a   : > { %14652 = vmatprep.subr.bf16.mxu1 %v20888_v40 }
 0xd5b   : > { %v18954_v12 = vpop.f32.mrb[114].mxu0 }
 0xd5c   : > { %v18956_v54 = vpop.f32.mrb[115].mxu0  ;;  %13126 = vmatmul.mubr.f32.gmra.mrb[60].mxu1 %v18433_v62 }
 0xd5d   : > { %13128 = vmatprep.mubr.f32.mxu1 %v18438_v27  ;;  %14654 = vmatpush3.bf16.msra.mxu1 %v20888_v40 }
 0xd5e   : > { %14656 = vmatprep.subr.bf16.mxu1 %v20889_v46 }
 0xd5f   : > { %v18962_v63 = vpop.f32.mrb[116].mxu0 }
 0xd60   : > { %v18964_v26 = vpop.f32.mrb[117].mxu0  ;;  %13129 = vmatmul.mubr.f32.gmra.mrb[62].mxu1 %v18441_v17 }
 0xd61   : > { %14658 = vmatpush3.bf16.msra.mxu1 %v20889_v46  ;;  %13163 = vmatprep.mubr.f32.mxu1 %v18384_v32 }
 0xd62   : > { %14660 = vmatprep.subr.bf16.mxu1 %v20890_v47 }
 0xd63   : > { %v18970_v23 = vpop.f32.mrb[118].mxu0 }
 0xd64   : > { %v18972_v19 = vpop.f32.mrb[119].mxu0  ;;  %13164 = vmatmul.mubr.f32.vlgmr.msra.gmra.mrb[64].mxu1 %v18386_v44 }
 0xd65   : > { %13166 = vmatprep.mubr.f32.mxu1 %v18390_v34  ;;  %14662 = vmatpush3.bf16.msra.mxu1 %v20890_v47 }
 0xd66   : > { %14664 = vmatprep.subr.bf16.mxu1 %v20891_v9 }
 0xd67   : > { %v18978_v15 = vpop.f32.mrb[120].mxu0 }
 0xd68   : > { %v18980_v57 = vpop.f32.mrb[121].mxu0  ;;  %13167 = vmatmul.mubr.f32.gmra.mrb[66].mxu1 %v18393_v4 }
 0xd69   : > { %13169 = vmatprep.mubr.f32.mxu1 %v18398_v52  ;;  %14666 = vmatpush3.bf16.msra.mxu1 %v20891_v9 }
 0xd6a   : > { %14668 = vmatprep.subr.bf16.mxu1 %v20892_v39 }
 0xd6b   : > { %v18986_v1 = vpop.f32.mrb[122].mxu0 }
 0xd6c   : > { %v18988_v38 = vpop.f32.mrb[123].mxu0  ;;  %13170 = vmatmul.mubr.f32.gmra.mrb[68].mxu1 %v18401_v20 }
 0xd6d   : > { %13172 = vmatprep.mubr.f32.mxu1 %v18406_v25  ;;  %14670 = vmatpush3.bf16.msra.mxu1 %v20892_v39 }
 0xd6e   : > { %14672 = vmatprep.subr.bf16.mxu1 %v20893_v51 }
 0xd6f   : > { %v18994_v55 = vpop.f32.mrb[124].mxu0 }
 0xd70   : > { %v18996_v21 = vpop.f32.mrb[125].mxu0  ;;  %13173 = vmatmul.mubr.f32.gmra.mrb[70].mxu1 %v18409_v50 }
 0xd71   : > { %13175 = vmatprep.mubr.f32.mxu1 %v18414_v58  ;;  %14674 = vmatpush3.bf16.msra.mxu1 %v20893_v51  ;;  %v20897_v51 = vld [vmem:[#allocation103_spill] sm:$0xff] }
 0xd72   : > { %14676 = vmatprep.subr.bf16.mxu1 %v20894_v53 }
 0xd73   : > { %v19002_v49 = vpop.f32.mrb[126].mxu0 }
 0xd74   : > { %v19004_v45 = vpop.f32.mrb[127].mxu0  ;;  %13176 = vmatmul.mubr.f32.gmra.mrb[72].mxu1 %v18417_v11 }
 0xd75   : > { %13178 = vmatprep.mubr.f32.mxu1 %v18422_v30  ;;  %14678 = vmatpush3.bf16.msra.mxu1 %v20894_v53 }
 0xd76   : > { %14680 = vmatprep.subr.bf16.mxu1 %v20895_v5 }
 0xd77   : > { %v12605_v41 = vpop.f32.mrb[128].mxu0 }
 0xd78   : > { %v6320_v59 = vadd.f32 %v19013_v8, %v12605_v41  ;;  %v6314_v14 = vpop.f32.mrb[129].mxu0  ;;  %13179 = vmatmul.mubr.f32.gmra.mrb[74].mxu1 %v18425_v60 }
 0xd79   : > { %v6315_v22 = vadd.f32 %v19013_v8, %v6314_v14  ;;  %13181 = vmatprep.mubr.f32.mxu1 %v18430_v42  ;;  %14682 = vmatpush3.bf16.msra.mxu1 %v20895_v5 }
 0xd7a   : > { %14684 = vmatprep.subr.bf16.mxu1 %v20896_v10 }
 0xd7b   : > { %v14355_v3 = vpack.c.bf16 %v6320_v59, %v6315_v22  ;;  %v12608_v31 = vpop.f32.mrb[130].mxu0 }
 0xd7c   : > { %v6330_v40 = vadd.f32 %v19013_v8, %v12608_v31  ;;  %v6324_v46 = vpop.f32.mrb[131].mxu0  ;;  %13182 = vmatmul.mubr.f32.gmra.mrb[76].mxu1 %v18433_v62 }
 0xd7d   : > { %v6325_v47 = vadd.f32 %v19013_v8, %v6324_v46  ;;  %14356 = vmatprep.subr.bf16.mxu0 %v14355_v3  ;;  %13184 = vmatprep.mubr.f32.mxu1 %v18438_v27 }
 0xd7e   : > { %14686 = vmatpush3.bf16.msra.mxu1 %v20896_v10  ;;  %14358 = vmatpush3.bf16.msra.mxu0 %v14355_v3 }
 0xd7f   : > { %v14359_v9 = vpack.c.bf16 %v6330_v40, %v6325_v47  ;;  %v12611_v39 = vpop.f32.mrb[132].mxu0  ;;  %14688 = vmatprep.subr.bf16.mxu1 %v20897_v51 }
 0xd80   : > { %v6340_v53 = vadd.f32 %v19013_v8, %v12611_v39  ;;  %v6334_v5 = vpop.f32.mrb[133].mxu0  ;;  %13185 = vmatmul.mubr.f32.gmra.mrb[78].mxu1 %v18441_v17 }
 0xd81   : > { %v6335_v41 = vadd.f32 %v19013_v8, %v6334_v5  ;;  %14360 = vmatprep.subr.bf16.mxu0 %v14359_v9  ;;  %13219 = vmatprep.mubr.f32.mxu1 %v18384_v32 }
 0xd82   : > { %14690 = vmatpush3.bf16.msra.mxu1 %v20897_v51  ;;  %14362 = vmatpush3.bf16.msra.mxu0 %v14359_v9 }
 0xd83   : > { %v14363_v59 = vpack.c.bf16 %v6340_v53, %v6335_v41  ;;  %v12614_v14 = vpop.f32.mrb[134].mxu0 }
 0xd84   : > { %v6350_v22 = vadd.f32 %v19013_v8, %v12614_v14  ;;  %v6344_v10 = vpop.f32.mrb[135].mxu0 }
 0xd85   : > { %v6345_v3 = vadd.f32 %v19013_v8, %v6344_v10  ;;  %13220 = vmatmul.mubr.f32.vlgmr.msra.gmra.mrb[80].mxu1 %v18386_v44  ;;  %14364 = vmatprep.subr.bf16.mxu0 %v14363_v59 }
 0xd86   : > { %13222 = vmatprep.mubr.f32.mxu1 %v18390_v34  ;;  %14366 = vmatpush3.bf16.msra.mxu0 %v14363_v59 }
 0xd87   : > { %v14367_v31 = vpack.c.bf16 %v6350_v22, %v6345_v3  ;;  %v12617_v40 = vpop.f32.mrb[136].mxu0 }
 0xd88   : > { %v6360_v46 = vadd.f32 %v19013_v8, %v12617_v40  ;;  %v6354_v47 = vpop.f32.mrb[137].mxu0 }
 0xd89   : > { %v6355_v9 = vadd.f32 %v19013_v8, %v6354_v47  ;;  %13223 = vmatmul.mubr.f32.gmra.mrb[82].mxu1 %v18393_v4  ;;  %14368 = vmatprep.subr.bf16.mxu0 %v14367_v31 }
 0xd8a   : > { %13225 = vmatprep.mubr.f32.mxu1 %v18398_v52  ;;  %14370 = vmatpush3.bf16.msra.mxu0 %v14367_v31 }
 0xd8b   : > { %v14371_v39 = vpack.c.bf16 %v6360_v46, %v6355_v9  ;;  %v12620_v51 = vpop.f32.mrb[138].mxu0 }
 0xd8c   : > { %v6370_v53 = vadd.f32 %v19013_v8, %v12620_v51  ;;  %v6364_v5 = vpop.f32.mrb[139].mxu0  ;;  %v15442_v51 = vld [vmem:[%s20292_s9 + $0x88] sm:$0xff] }
 0xd8d   : > { %v6365_v41 = vadd.f32 %v19013_v8, %v6364_v5  ;;  %13226 = vmatmul.mubr.f32.gmra.mrb[84].mxu1 %v18401_v20  ;;  %14372 = vmatprep.subr.bf16.mxu0 %v14371_v39 }
 0xd8e   : > { %13228 = vmatprep.mubr.f32.mxu1 %v18406_v25  ;;  %14374 = vmatpush3.bf16.msra.mxu0 %v14371_v39 }
 0xd8f   : > { %v14375_v59 = vpack.c.bf16 %v6370_v53, %v6365_v41  ;;  %v12623_v14 = vpop.f32.mrb[140].mxu0  ;;  %v15443_v41 = vld [vmem:[%s20292_s9 + $0x80] sm:$0xff] }
 0xd90   : > { %v6380_v22 = vadd.f32 %v19013_v8, %v12623_v14  ;;  %v6374_v10 = vpop.f32.mrb[141].mxu0 }
 0xd91   : > { %v6375_v3 = vadd.f32 %v19013_v8, %v6374_v10  ;;  %13229 = vmatmul.mubr.f32.gmra.mrb[86].mxu1 %v18409_v50  ;;  %14376 = vmatprep.subr.bf16.mxu0 %v14375_v59 }
 0xd92   : > { %13231 = vmatprep.mubr.f32.mxu1 %v18414_v58  ;;  %14378 = vmatpush3.bf16.msra.mxu0 %v14375_v59 }
 0xd93   : > { %v14379_v31 = vpack.c.bf16 %v6380_v22, %v6375_v3  ;;  %v12626_v40 = vpop.f32.mrb[142].mxu0  ;;  %v15444_v22 = vld [vmem:[%s20292_s9 + $0x98] sm:$0xff] }
 0xd94   : > { %v6390_v46 = vadd.f32 %v19013_v8, %v12626_v40  ;;  %v6384_v47 = vpop.f32.mrb[143].mxu0 }
 0xd95   : > { %v6385_v9 = vadd.f32 %v19013_v8, %v6384_v47  ;;  %13232 = vmatmul.mubr.f32.gmra.mrb[88].mxu1 %v18417_v11  ;;  %14380 = vmatprep.subr.bf16.mxu0 %v14379_v31  ;;  %v15446_v47 = vld [vmem:[%s20292_s9 + $0xa8] sm:$0xff] }
 0xd96   : > { %13234 = vmatprep.mubr.f32.mxu1 %v18422_v30  ;;  %14382 = vmatpush3.bf16.msra.mxu0 %v14379_v31  ;;  %v15445_v31 = vld [vmem:[%s20292_s9 + $0x90] sm:$0xff]  ;;  %v15474_v30 = vld [vmem:[%s20291_s8 + $0x2] ss:$0 sm:$0xff] }
 0xd97   : > { %v14383_v39 = vpack.c.bf16 %v6390_v46, %v6385_v9 }
 0xd99   : > { %13235 = vmatmul.mubr.f32.gmra.mrb[90].mxu1 %v18425_v60  ;;  %14384 = vmatprep.subr.bf16.mxu0 %v14383_v39 }
 0xd9a   : > { %13237 = vmatprep.mubr.f32.mxu1 %v18430_v42  ;;  %14386 = vmatpush3.bf16.msra.mxu0 %v14383_v39 }
 0xd9b   : > { %14388 = vmatprep.subr.bf16.mxu0 %v18620_v28 }
 0xd9d   : > { %13238 = vmatmul.mubr.f32.gmra.mrb[92].mxu1 %v18433_v62 }
 0xd9e   : > { %13240 = vmatprep.mubr.f32.mxu1 %v18438_v27 }
 0xda1   : > { %13241 = vmatmul.mubr.f32.gmra.mrb[94].mxu1 %v18441_v17 }
 0xdb7   : > { %v12661_v8 = vpop.f32.mrb[0].mxu1 }
 0xdb8   : > { %v19061_v53 = vadd.f32 %v15442_v51, %v12661_v8  ;;  %v6555_v5 = vpop.f32.mrb[1].mxu1  ;;  %v15447_v8 = vld [vmem:[%s20292_s9 + $0xa0] sm:$0xff] }
 0xdb9   : > { %v19066_v59 = vadd.f32 %v15443_v41, %v6555_v5  ;;  %v15448_v41 = vld [vmem:[%s20292_s9 + $0xb8] sm:$0xff] }
 0xdba   : > { %6636 = vmax.xlane.f32.xlu1 %v19061_v53 }
 0xdbb   : > { %v12664_v14 = vpop.f32.mrb[2].mxu1  ;;  %6634 = vmax.xlane.f32.xlu0 %v19066_v59 }
 0xdbc   : > { %v19073_v10 = vadd.f32 %v15444_v22, %v12664_v14  ;;  %v6565_v3 = vpop.f32.mrb[3].mxu1 }
 0xdbd   : > { %v19078_v40 = vadd.f32 %v15445_v31, %v6565_v3  ;;  %v15449_v3 = vld [vmem:[%s20292_s9 + $0xb0] sm:$0xff] }
 0xdbe   : > { %6640 = vmax.xlane.f32.xlu1 %v19073_v10 }
 0xdbf   : > { %v12667_v46 = vpop.f32.mrb[4].mxu1  ;;  %6638 = vmax.xlane.f32.xlu0 %v19078_v40 }
 0xdc0   : > { %v19085_v9 = vadd.f32 %v15446_v47, %v12667_v46  ;;  %v6575_v39 = vpop.f32.mrb[5].mxu1  ;;  %v15450_v47 = vld [vmem:[%s20292_s9 + $0xc8] sm:$0xff] }
 0xdc1   : > { %v19090_v51 = vadd.f32 %v15447_v8, %v6575_v39 }
 0xdc2   : > { %6644 = vmax.xlane.f32.xlu1 %v19085_v9 }
 0xdc3   : > { %v12670_v5 = vpop.f32.mrb[6].mxu1  ;;  %6642 = vmax.xlane.f32.xlu0 %v19090_v51 }
 0xdc4   : > { %v19097_v14 = vadd.f32 %v15448_v41, %v12670_v5  ;;  %v6585_v22 = vpop.f32.mrb[7].mxu1  ;;  %v15451_v5 = vld [vmem:[%s20292_s9 + $0xc0] sm:$0xff] }
 0xdc5   : > { %v19102_v31 = vadd.f32 %v15449_v3, %v6585_v22  ;;  %v15452_v3 = vld [vmem:[%s20292_s9 + $0xd8] sm:$0xff] }
 0xdc6   : > { %6648 = vmax.xlane.f32.xlu1 %v19097_v14 }
 0xdc7   : > { %v12673_v46 = vpop.f32.mrb[8].mxu1  ;;  %6646 = vmax.xlane.f32.xlu0 %v19102_v31 }
 0xdc8   : > { %v19109_v39 = vadd.f32 %v15450_v47, %v12673_v46  ;;  %v6595_v8 = vpop.f32.mrb[9].mxu1  ;;  %v15453_v47 = vld [vmem:[%s20292_s9 + $0xd0] sm:$0xff] }
 0xdc9   : > { %v19114_v41 = vadd.f32 %v15451_v5, %v6595_v8  ;;  %v15454_v5 = vld [vmem:[%s20292_s9 + $0xe8] sm:$0xff] }
 0xdca   : > { %6652 = vmax.xlane.f32.xlu1 %v19109_v39 }
 0xdcb   : > { %v12676_v22 = vpop.f32.mrb[10].mxu1  ;;  %6650 = vmax.xlane.f32.xlu0 %v19114_v41 }
 0xdcc   : > { %v19121_v6 = vadd.f32 %v15452_v3, %v12676_v22  ;;  %v6605_v46 = vpop.f32.mrb[11].mxu1  ;;  %v15455_v3 = vld [vmem:[%s20292_s9 + $0xe0] sm:$0xff] }
 0xdcd   : > { %v19126_v17 = vadd.f32 %v15453_v47, %v6605_v46  ;;  %v15456_v47 = vld [vmem:[%s20292_s9 + $0xf8] sm:$0xff] }
 0xdce   : > { %6656 = vmax.xlane.f32.xlu1 %v19121_v6 }
 0xdcf   : > { %v12679_v8 = vpop.f32.mrb[12].mxu1  ;;  %6654 = vmax.xlane.f32.xlu0 %v19126_v17 }
 0xdd0   : > { %v19133_v27 = vadd.f32 %v15454_v5, %v12679_v8  ;;  %v6615_v22 = vpop.f32.mrb[13].mxu1  ;;  %v15457_v5 = vld [vmem:[%s20292_s9 + $0xf0] sm:$0xff] }
 0xdd1   : > { %v19138_v62 = vadd.f32 %v15455_v3, %v6615_v22  ;;  %v15458_v3 = vld [vmem:[%s20292_s9 + $0x8] sm:$0xff] }
 0xdd2   : > { %6660 = vmax.xlane.f32.xlu1 %v19133_v27 }
 0xdd3   : > { %v12682_v46 = vpop.f32.mrb[14].mxu1  ;;  %6658 = vmax.xlane.f32.xlu0 %v19138_v62 }
 0xdd4   : > { %v19145_v42 = vadd.f32 %v15456_v47, %v12682_v46  ;;  %v6625_v8 = vpop.f32.mrb[15].mxu1  ;;  %v19160_v46 = vadd.f32 %v15458_v3, %v18946_v36  ;;  %v15460_v36 = vld [vmem:[%s20292_s9 + $0x18] sm:$0xff] }
 0xdd5   : > { %v19150_v60 = vadd.f32 %v15457_v5, %v6625_v8  ;;  %v15459_v8 = vld [vmem:[%s20292_s9] sm:$0xff]  ;;  %v19178_v3 = vadd.f32 %v15460_v36, %v18954_v12  ;;  %v15462_v12 = vld [vmem:[%s20292_s9 + $0x28] sm:$0xff] }
 0xdd6   : > { %6664 = vmax.xlane.f32.xlu1 %v19145_v42  ;;  %v19168_v5 = vadd.f32 %v15459_v8, %v18948_v24  ;;  %v15461_v24 = vld [vmem:[%s20292_s9 + $0x10] sm:$0xff]  ;;  %v19196_v36 = vadd.f32 %v15462_v12, %v18962_v63  ;;  %v15464_v63 = vld [vmem:[%s20292_s9 + $0x38] sm:$0xff] }
 0xdd7   : > { %v19153_v22 = vpop.f32.mrb[16].mxu1  ;;  %6662 = vmax.xlane.f32.xlu0 %v19150_v60  ;;  %v19186_v8 = vadd.f32 %v15461_v24, %v18956_v54  ;;  %v15463_v54 = vld [vmem:[%s20292_s9 + $0x20] sm:$0xff]  ;;  %v19214_v12 = vadd.f32 %v15464_v63, %v18970_v23  ;;  %v15466_v23 = vld [vmem:[%s20292_s9 + $0x48] sm:$0xff] }
 0xdd8   : > { %20898 = vst [vmem:[#allocation105_spill] sm:$0xff] %v19153_v22  ;;  %v19162_v47 = vpop.f32.mrb[17].mxu1  ;;  %v19204_v24 = vadd.f32 %v15463_v54, %v18964_v26  ;;  %v15465_v26 = vld [vmem:[%s20292_s9 + $0x30] sm:$0xff]  ;;  %v19232_v63 = vadd.f32 %v15466_v23, %v18978_v15  ;;  %v15468_v15 = vld [vmem:[%s20292_s9 + $0x58] sm:$0xff] }
 0xdd9   : > { %20899 = vst [vmem:[#allocation29_spill] sm:$0xff] %v19162_v47  ;;  %v19222_v54 = vadd.f32 %v15465_v26, %v18972_v19  ;;  %v15467_v19 = vld [vmem:[%s20292_s9 + $0x40] sm:$0xff]  ;;  %v19250_v23 = vadd.f32 %v15468_v15, %v18986_v1  ;;  %v15470_v1 = vld [vmem:[%s20292_s9 + $0x68] sm:$0xff] }
 0xdda   : > { %5768 = vmax.xlane.f32.xlu1 %v19160_v46  ;;  %v19240_v26 = vadd.f32 %v15467_v19, %v18980_v57  ;;  %v15469_v57 = vld [vmem:[%s20292_s9 + $0x50] sm:$0xff]  ;;  %v19268_v15 = vadd.f32 %v15470_v1, %v18994_v55  ;;  %v15472_v55 = vld [vmem:[%s20292_s9 + $0x78] sm:$0xff] }
 0xddb   : > { %v19171_v22 = vpop.f32.mrb[18].mxu1  ;;  %5766 = vmax.xlane.f32.xlu0 %v19168_v5  ;;  %v19258_v19 = vadd.f32 %v15469_v57, %v18988_v38  ;;  %v15471_v38 = vld [vmem:[%s20292_s9 + $0x60] sm:$0xff]  ;;  %v19286_v1 = vadd.f32 %v15472_v55, %v19002_v49 }
 0xddc   : > { %20900 = vst [vmem:[#allocation120_spill] sm:$0xff] %v19171_v22  ;;  %v19180_v47 = vpop.f32.mrb[19].mxu1  ;;  %v19276_v57 = vadd.f32 %v15471_v38, %v18996_v21  ;;  %v15473_v21 = vld [vmem:[%s20292_s9 + $0x70] sm:$0xff] }
 0xddd   : > { %20901 = vst [vmem:[#allocation104_spill] sm:$0xff] %v19180_v47  ;;  %v19294_v38 = vadd.f32 %v15473_v21, %v19004_v45 }
 0xdde   : > { %5772 = vmax.xlane.f32.xlu1 %v19178_v3 }
 0xddf   : > { %v19189_v22 = vpop.f32.mrb[20].mxu1  ;;  %5770 = vmax.xlane.f32.xlu0 %v19186_v8 }
 0xde0   : > { %20902 = vst [vmem:[#allocation107_spill] sm:$0xff] %v19189_v22  ;;  %v19198_v47 = vpop.f32.mrb[21].mxu1 }
 0xde1   : > { %20903 = vst [vmem:[#allocation106_spill] sm:$0xff] %v19198_v47 }
 0xde2   : > { %5776 = vmax.xlane.f32.xlu1 %v19196_v36 }
 0xde3   : > { %v19207_v22 = vpop.f32.mrb[22].mxu1  ;;  %5774 = vmax.xlane.f32.xlu0 %v19204_v24 }
 0xde4   : > { %20904 = vst [vmem:[#allocation121_spill] sm:$0xff] %v19207_v22  ;;  %v19216_v47 = vpop.f32.mrb[23].mxu1 }
 0xde5   : > { %20905 = vst [vmem:[#allocation109_spill] sm:$0xff] %v19216_v47 }
 0xde6   : > { %5780 = vmax.xlane.f32.xlu1 %v19214_v12 }
 0xde7   : > { %v19225_v22 = vpop.f32.mrb[24].mxu1  ;;  %5778 = vmax.xlane.f32.xlu0 %v19222_v54 }
 0xde8   : > { %20906 = vst [vmem:[#allocation108_spill] sm:$0xff] %v19225_v22  ;;  %v19234_v47 = vpop.f32.mrb[25].mxu1 }
 0xde9   : > { %20907 = vst [vmem:[#allocation122_spill] sm:$0xff] %v19234_v47 }
 0xdea   : > { %5784 = vmax.xlane.f32.xlu1 %v19232_v63 }
 0xdeb   : > { %v19243_v22 = vpop.f32.mrb[26].mxu1  ;;  %5782 = vmax.xlane.f32.xlu0 %v19240_v26 }
 0xdec   : > { %20908 = vst [vmem:[#allocation111_spill] sm:$0xff] %v19243_v22  ;;  %v19252_v47 = vpop.f32.mrb[27].mxu1 }
 0xded   : > { %20909 = vst [vmem:[#allocation110_spill] sm:$0xff] %v19252_v47 }
 0xdee   : > { %5788 = vmax.xlane.f32.xlu1 %v19250_v23 }
 0xdef   : > { %v19261_v22 = vpop.f32.mrb[28].mxu1  ;;  %5786 = vmax.xlane.f32.xlu0 %v19258_v19 }
 0xdf0   : > { %20910 = vst [vmem:[#allocation123_spill] sm:$0xff] %v19261_v22  ;;  %v19270_v47 = vpop.f32.mrb[29].mxu1 }
 0xdf1   : > { %20911 = vst [vmem:[#allocation113_spill] sm:$0xff] %v19270_v47 }
 0xdf2   : > { %5792 = vmax.xlane.f32.xlu1 %v19268_v15 }
 0xdf3   : > { %v19279_v22 = vpop.f32.mrb[30].mxu1  ;;  %5790 = vmax.xlane.f32.xlu0 %v19276_v57 }
 0xdf4   : > { %20912 = vst [vmem:[#allocation112_spill] sm:$0xff] %v19279_v22  ;;  %v19288_v47 = vpop.f32.mrb[31].mxu1 }
 0xdf5   : > { %20913 = vst [vmem:[#allocation124_spill] sm:$0xff] %v19288_v47 }
 0xdf6   : > { %5796 = vmax.xlane.f32.xlu1 %v19286_v1 }
 0xdf7   : > { %v12941_v22 = vpop.f32.mrb[32].mxu1  ;;  %5794 = vmax.xlane.f32.xlu0 %v19294_v38 }
 0xdf8   : > { %v7478_v49 = vadd.f32 %v15474_v30, %v12941_v22  ;;  %v7472_v55 = vpop.f32.mrb[33].mxu1 }
 0xdf9   : > { %v7473_v11 = vadd.f32 %v15474_v30, %v7472_v55 }
 0xdfb   : > { %v19301_v47 = vpack.c.bf16 %v7478_v49, %v7473_v11  ;;  %v12944_v58 = vpop.f32.mrb[34].mxu1 }
 0xdfc   : > { %v7488_v50 = vadd.f32 %v15474_v30, %v12944_v58  ;;  %v7482_v25 = vpop.f32.mrb[35].mxu1 }
 0xdfd   : > { %20914 = vst [vmem:[#allocation115_spill] sm:$0xff] %v19301_v47  ;;  %v7483_v20 = vadd.f32 %v15474_v30, %v7482_v25 }
 0xdff   : > { %v19303_v45 = vpack.c.bf16 %v7488_v50, %v7483_v20  ;;  %v12947_v21 = vpop.f32.mrb[36].mxu1 }
 0xe00   : > { %v7498_v52 = vadd.f32 %v15474_v30, %v12947_v21  ;;  %v7492_v4 = vpop.f32.mrb[37].mxu1 }
 0xe01   : > { %20915 = vst [vmem:[#allocation114_spill] sm:$0xff] %v19303_v45  ;;  %v7493_v34 = vadd.f32 %v15474_v30, %v7492_v4 }
 0xe03   : > { %v19305_v44 = vpack.c.bf16 %v7498_v52, %v7493_v34  ;;  %v12950_v32 = vpop.f32.mrb[38].mxu1 }
 0xe04   : > { %v7508_v13 = vadd.f32 %v15474_v30, %v12950_v32  ;;  %v7502_v35 = vpop.f32.mrb[39].mxu1 }
 0xe05   : > { %20916 = vst [vmem:[#allocation125_spill] sm:$0xff] %v19305_v44  ;;  %v7503_v22 = vadd.f32 %v15474_v30, %v7502_v35 }
 0xe07   : > { %v19307_v56 = vpack.c.bf16 %v7508_v13, %v7503_v22  ;;  %v12953_v11 = vpop.f32.mrb[40].mxu1 }
 0xe08   : > { %v7518_v49 = vadd.f32 %v15474_v30, %v12953_v11  ;;  %v7512_v55 = vpop.f32.mrb[41].mxu1 }
 0xe09   : > { %20917 = vst [vmem:[#allocation117_spill] sm:$0xff] %v19307_v56  ;;  %v7513_v58 = vadd.f32 %v15474_v30, %v7512_v55 }
 0xe0b   : > { %v19309_v47 = vpack.c.bf16 %v7518_v49, %v7513_v58  ;;  %v12956_v20 = vpop.f32.mrb[42].mxu1 }
 0xe0c   : > { %v7528_v25 = vadd.f32 %v15474_v30, %v12956_v20  ;;  %v7522_v50 = vpop.f32.mrb[43].mxu1 }
 0xe0d   : > { %20918 = vst [vmem:[#allocation116_spill] sm:$0xff] %v19309_v47  ;;  %v7523_v21 = vadd.f32 %v15474_v30, %v7522_v50 }
 0xe0f   : > { %v19311_v45 = vpack.c.bf16 %v7528_v25, %v7523_v21  ;;  %v12959_v34 = vpop.f32.mrb[44].mxu1 }
 0xe10   : > { %v7538_v4 = vadd.f32 %v15474_v30, %v12959_v34  ;;  %v7532_v52 = vpop.f32.mrb[45].mxu1 }
 0xe11   : > { %20919 = vst [vmem:[#allocation126_spill] sm:$0xff] %v19311_v45  ;;  %v7533_v32 = vadd.f32 %v15474_v30, %v7532_v52 }
 0xe13   : > { %v19313_v44 = vpack.c.bf16 %v7538_v4, %v7533_v32  ;;  %v12962_v35 = vpop.f32.mrb[46].mxu1 }
 0xe14   : > { %v7548_v13 = vadd.f32 %v15474_v30, %v12962_v35  ;;  %v7542_v22 = vpop.f32.mrb[47].mxu1 }
 0xe15   : > { %20920 = vst [vmem:[#allocation119_spill] sm:$0xff] %v19313_v44  ;;  %v7543_v11 = vadd.f32 %v15474_v30, %v7542_v22 }
 0xe17   : > { %v19315_v56 = vpack.c.bf16 %v7548_v13, %v7543_v11  ;;  %v19317_v49 = vpop.f32.mrb[48].mxu1 }
 0xe18   : > { %20922 = vst [vmem:[#allocation127_spill] sm:$0xff] %v19317_v49  ;;  %v19319_v55 = vpop.f32.mrb[49].mxu1 }
 0xe19   : > { %20921 = vst [vmem:[#allocation118_spill] sm:$0xff] %v19315_v56  ;;  %20923 = vst [vmem:[#allocation144_spill] sm:$0xff] %v19319_v55 }
 0xe1b   : > { %v19321_v58 = vpop.f32.mrb[50].mxu1 }
 0xe1c   : > { %20924 = vst [vmem:[#allocation145_spill] sm:$0xff] %v19321_v58  ;;  %v19323_v20 = vpop.f32.mrb[51].mxu1 }
 0xe1d   : > { %20925 = vst [vmem:[#allocation146_spill] sm:$0xff] %v19323_v20 }
 0xe1f   : > { %v19325_v25 = vpop.f32.mrb[52].mxu1 }
 0xe20   : > { %20926 = vst [vmem:[#allocation147_spill] sm:$0xff] %v19325_v25  ;;  %v19327_v50 = vpop.f32.mrb[53].mxu1 }
 0xe21   : > { %20927 = vst [vmem:[#allocation148_spill] sm:$0xff] %v19327_v50 }
 0xe23   : > { %v19329_v21 = vpop.f32.mrb[54].mxu1 }
 0xe24   : > { %20928 = vst [vmem:[#allocation129_spill] sm:$0xff] %v19329_v21  ;;  %v19331_v34 = vpop.f32.mrb[55].mxu1  ;;  %v19352_v21 = vld [vmem:[%s20289_s6 + $0x3] ss:$0 sm:$0xff] }
 0xe25   : > { %20929 = vst [vmem:[#allocation149_spill] sm:$0xff] %v19331_v34 }
 0xe27   : > { %v19333_v4 = vpop.f32.mrb[56].mxu1 }
 0xe28   : > { %20930 = vst [vmem:[#allocation150_spill] sm:$0xff] %v19333_v4  ;;  %v19335_v30 = vpop.f32.mrb[57].mxu1 }
 0xe29   : > { %20931 = vst [vmem:[#allocation151_spill] sm:$0xff] %v19335_v30 }
 0xe2b   : > { %v19337_v52 = vpop.f32.mrb[58].mxu1 }
 0xe2c   : > { %20932 = vst [vmem:[#allocation152_spill] sm:$0xff] %v19337_v52  ;;  %v19339_v32 = vpop.f32.mrb[59].mxu1 }
 0xe2d   : > { %20933 = vst [vmem:[#allocation128_spill] sm:$0xff] %v19339_v32 }
 0xe2f   : > { %v19341_v35 = vpop.f32.mrb[60].mxu1 }
 0xe30   : > { %20934 = vst [vmem:[#allocation131_spill] sm:$0xff] %v19341_v35  ;;  %v19343_v13 = vpop.f32.mrb[61].mxu1 }
 0xe31   : > { %20935 = vst [vmem:[#allocation130_spill] sm:$0xff] %v19343_v13 }
 0xe33   : > { %v19345_v22 = vpop.f32.mrb[62].mxu1 }
 0xe34   : > { %20936 = vst [vmem:[#allocation153_spill] sm:$0xff] %v19345_v22  ;;  %v19347_v11 = vpop.f32.mrb[63].mxu1 }
 0xe35   : > { %20937 = vst [vmem:[#allocation133_spill] sm:$0xff] %v19347_v11 }
 0xe37   : > { %v13165_v25 = vpop.f32.mrb[64].mxu1 }
 0xe38   : > { %v8362_v4 = vadd.f32 %v19352_v21, %v13165_v25  ;;  %v8356_v30 = vpop.f32.mrb[65].mxu1 }
 0xe39   : > { %v8357_v52 = vadd.f32 %v19352_v21, %v8356_v30 }
 0xe3b   : > { %v19356_v32 = vpack.c.bf16 %v8362_v4, %v8357_v52  ;;  %v13168_v35 = vpop.f32.mrb[66].mxu1 }
 0xe3c   : > { %v8372_v13 = vadd.f32 %v19352_v21, %v13168_v35  ;;  %v8366_v34 = vpop.f32.mrb[67].mxu1 }
 0xe3d   : > { %20938 = vst [vmem:[#allocation132_spill] sm:$0xff] %v19356_v32  ;;  %v8367_v22 = vadd.f32 %v19352_v21, %v8366_v34 }
 0xe3f   : > { %v19360_v11 = vpack.c.bf16 %v8372_v13, %v8367_v22  ;;  %v13171_v50 = vpop.f32.mrb[68].mxu1 }
 0xe40   : > { %v8382_v58 = vadd.f32 %v19352_v21, %v13171_v50  ;;  %v8376_v20 = vpop.f32.mrb[69].mxu1 }
 0xe41   : > { %20939 = vst [vmem:[#allocation154_spill] sm:$0xff] %v19360_v11  ;;  %v8377_v49 = vadd.f32 %v19352_v21, %v8376_v20 }
 0xe43   : > { %v19364_v25 = vpack.c.bf16 %v8382_v58, %v8377_v49  ;;  %v13174_v55 = vpop.f32.mrb[70].mxu1 }
 0xe44   : > { %v8392_v4 = vadd.f32 %v19352_v21, %v13174_v55  ;;  %v8386_v30 = vpop.f32.mrb[71].mxu1 }
 0xe45   : > { %20940 = vst [vmem:[#allocation135_spill] sm:$0xff] %v19364_v25  ;;  %v8387_v52 = vadd.f32 %v19352_v21, %v8386_v30 }
 0xe47   : > { %v19368_v35 = vpack.c.bf16 %v8392_v4, %v8387_v52  ;;  %v6637_v32 = vpop.xlane.xlu1 %6636  ;;  %v13177_v34 = vpop.f32.mrb[72].mxu1 }
 0xe48   : > { %v6667_v13 = vsub.f32 %v19061_v53, %v6637_v32  ;;  %v8402_v22 = vadd.f32 %v19352_v21, %v13177_v34  ;;  %v8396_v50 = vpop.f32.mrb[73].mxu1  ;;  %v6635_v11 = vpop.xlane.xlu0 %6634 }
 0xe49   : > { %20941 = vst [vmem:[#allocation134_spill] sm:$0xff] %v19368_v35  ;;  %v8397_v20 = vadd.f32 %v19352_v21, %v8396_v50  ;;  %v6666_v49 = vsub.f32 %v19066_v59, %v6635_v11 }
 0xe4a   : > { %v6684_v58 = vmul.f32 1.442695, %v6667_v13 }
 0xe4b   : > { %v19374_v25 = vpack.c.bf16 %v8402_v22, %v8397_v20  ;;  %v6682_v55 = vmul.f32 1.442695, %v6666_v49  ;;  %v6641_v56 = vpop.xlane.xlu1 %6640  ;;  %v13180_v30 = vpop.f32.mrb[74].mxu1 }
 0xe4c   : > { %15180 = vpow2.f32 %v6684_v58  ;;  %v6669_v4 = vsub.f32 %v19073_v10, %v6641_v56  ;;  %v8412_v52 = vadd.f32 %v19352_v21, %v13180_v30  ;;  %v8406_v53 = vpop.f32.mrb[75].mxu1  ;;  %v6639_v32 = vpop.xlane.xlu0 %6638 }
 0xe4d   : > { %20942 = vst [vmem:[#allocation155_spill] sm:$0xff] %v19374_v25  ;;  %15182 = vpow2.f32 %v6682_v55  ;;  %v8407_v34 = vadd.f32 %v19352_v21, %v8406_v53  ;;  %v6668_v50 = vsub.f32 %v19078_v40, %v6639_v32 }
 0xe4e   : > { %v6688_v35 = vmul.f32 1.442695, %v6669_v4 }
 0xe4f   : > { %v19380_v59 = vpack.c.bf16 %v8412_v52, %v8407_v34  ;;  %v6686_v11 = vmul.f32 1.442695, %v6668_v50  ;;  %v6645_v13 = vpop.xlane.xlu1 %6644  ;;  %v13183_v22 = vpop.f32.mrb[76].mxu1 }
 0xe50   : > { %15184 = vpow2.f32 %v6688_v35  ;;  %v6671_v20 = vsub.f32 %v19085_v9, %v6645_v13  ;;  %v8422_v56 = vadd.f32 %v19352_v21, %v13183_v22  ;;  %v8416_v10 = vpop.f32.mrb[77].mxu1  ;;  %v6643_v49 = vpop.xlane.xlu0 %6642 }
 0xe51   : > { %20943 = vst [vmem:[#allocation137_spill] sm:$0xff] %v19380_v59  ;;  %15186 = vpow2.f32 %v6686_v11  ;;  %v8417_v58 = vadd.f32 %v19352_v21, %v8416_v10  ;;  %v6670_v55 = vsub.f32 %v19090_v51, %v6643_v49 }
 0xe52   : > { %v6692_v30 = vmul.f32 1.442695, %v6671_v20 }
 0xe53   : > { %v19386_v40 = vpack.c.bf16 %v8422_v56, %v8417_v58  ;;  %v6690_v4 = vmul.f32 1.442695, %v6670_v55  ;;  %v6649_v52 = vpop.xlane.xlu1 %6648  ;;  %v13186_v53 = vpop.f32.mrb[78].mxu1 }
 0xe54   : > { %15188 = vpow2.f32 %v6692_v30  ;;  %v6673_v35 = vsub.f32 %v19097_v14, %v6649_v52  ;;  %v8432_v9 = vadd.f32 %v19352_v21, %v13186_v53  ;;  %v8426_v32 = vpop.f32.mrb[79].mxu1  ;;  %v6647_v34 = vpop.xlane.xlu0 %6646 }
 0xe55   : > { %20944 = vst [vmem:[#allocation136_spill] sm:$0xff] %v19386_v40  ;;  %15190 = vpow2.f32 %v6690_v4  ;;  %v8427_v50 = vadd.f32 %v19352_v21, %v8426_v32  ;;  %v6672_v11 = vsub.f32 %v19102_v31, %v6647_v34  ;;  %v19404_v31 = vld [vmem:[%s20291_s8 + $0x3] ss:$0 sm:$0xff] }
 0xe56   : > { %v19392_v13 = vpop.eup %15180  ;;  %v6696_v51 = vmul.f32 1.442695, %v6673_v35 }
 0xe57   : > { %v19394_v22 = vpop.eup %15182  ;;  %v19396_v20 = vpack.c.bf16 %v8432_v9, %v8427_v50  ;;  %v6694_v56 = vmul.f32 1.442695, %v6672_v11  ;;  %v6653_v10 = vpop.xlane.xlu1 %6652  ;;  %6716 = vadd.xlane.f32.xlu1 %v19392_v13 }
 0xe58   : > { %15192 = vpow2.f32 %v6696_v51  ;;  %v6675_v14 = vsub.f32 %v19109_v39, %v6653_v10  ;;  %v13221_v49 = vpop.f32.mrb[80].mxu1  ;;  %v6651_v58 = vpop.xlane.xlu0 %6650  ;;  %6714 = vadd.xlane.f32.xlu0 %v19394_v22 }
 0xe59   : > { %20945 = vst [vmem:[#allocation156_spill] sm:$0xff] %v19396_v20  ;;  %15194 = vpow2.f32 %v6694_v56  ;;  %v8507_v21 = vadd.f32 %v19404_v31, %v13221_v49  ;;  %v8501_v55 = vpop.f32.mrb[81].mxu1  ;;  %v6674_v30 = vsub.f32 %v19114_v41, %v6651_v58 }
 0xe5a   : > { %v19408_v4 = vpop.eup %15184  ;;  %v6700_v52 = vmul.f32 1.442695, %v6675_v14  ;;  %v8502_v39 = vadd.f32 %v19404_v31, %v8501_v55 }
 0xe5b   : > { %v19411_v53 = vpop.eup %15186  ;;  %v6698_v35 = vmul.f32 1.442695, %v6674_v30  ;;  %v6657_v9 = vpop.xlane.xlu1 %6656  ;;  %6720 = vadd.xlane.f32.xlu1 %v19408_v4 }
 0xe5c   : > { %15196 = vpow2.f32 %v6700_v52  ;;  %v19414_v32 = vpack.c.bf16 %v8507_v21, %v8502_v39  ;;  %v6677_v34 = vsub.f32 %v19121_v6, %v6657_v9  ;;  %v13224_v50 = vpop.f32.mrb[82].mxu1  ;;  %v6655_v11 = vpop.xlane.xlu0 %6654  ;;  %6718 = vadd.xlane.f32.xlu0 %v19411_v53 }
 0xe5d   : > { %15198 = vpow2.f32 %v6698_v35  ;;  %v8517_v41 = vadd.f32 %v19404_v31, %v13224_v50  ;;  %v8511_v51 = vpop.f32.mrb[83].mxu1  ;;  %v6676_v56 = vsub.f32 %v19126_v17, %v6655_v11 }
 0xe5e   : > { %20946 = vst [vmem:[#allocation139_spill] sm:$0xff] %v19414_v32  ;;  %v19420_v10 = vpop.eup %15188  ;;  %v6704_v14 = vmul.f32 1.442695, %v6677_v34  ;;  %v8512_v49 = vadd.f32 %v19404_v31, %v8511_v51  ;;  %14771 = vmatprep.subr.bf16.mxu1 %v19414_v32 }
 0xe5f   : > { %v19424_v58 = vpop.eup %15190  ;;  %v6702_v6 = vmul.f32 1.442695, %v6676_v56  ;;  %14779 = vmatpush3.bf16.msra.mxu1 %v19414_v32  ;;  %v6661_v21 = vpop.xlane.xlu1 %6660  ;;  %6724 = vadd.xlane.f32.xlu1 %v19420_v10 }
 0xe60   : > { %15200 = vpow2.f32 %v6704_v14  ;;  %v19428_v55 = vpack.c.bf16 %v8517_v41, %v8512_v49  ;;  %v6679_v17 = vsub.f32 %v19133_v27, %v6661_v21  ;;  %v13227_v30 = vpop.f32.mrb[84].mxu1  ;;  %v6659_v52 = vpop.xlane.xlu0 %6658  ;;  %6722 = vadd.xlane.f32.xlu0 %v19424_v58 }
 0xe61   : > { %15202 = vpow2.f32 %v6702_v6  ;;  %v8527_v39 = vadd.f32 %v19404_v31, %v13227_v30  ;;  %v8521_v35 = vpop.f32.mrb[85].mxu1  ;;  %v6678_v9 = vsub.f32 %v19138_v62, %v6659_v52 }
 0xe62   : > { %20947 = vst [vmem:[#allocation138_spill] sm:$0xff] %v19428_v55  ;;  %v19434_v34 = vpop.eup %15192  ;;  %v6708_v50 = vmul.f32 1.442695, %v6679_v17  ;;  %v8522_v11 = vadd.f32 %v19404_v31, %v8521_v35  ;;  %14772 = vmatprep.subr.bf16.mxu1 %v19428_v55 }
 0xe63   : > { %v19438_v41 = vpop.eup %15194  ;;  %v6706_v27 = vmul.f32 1.442695, %v6678_v9  ;;  %14780 = vmatpush3.bf16.msra.mxu1 %v19428_v55  ;;  %v6665_v51 = vpop.xlane.xlu1 %6664  ;;  %6728 = vadd.xlane.f32.xlu1 %v19434_v34 }
 0xe64   : > { %15204 = vpow2.f32 %v6708_v50  ;;  %v19442_v56 = vpack.c.bf16 %v8527_v39, %v8522_v11  ;;  %v6681_v62 = vsub.f32 %v19145_v42, %v6665_v51  ;;  %v13230_v14 = vpop.f32.mrb[86].mxu1  ;;  %v6663_v49 = vpop.xlane.xlu0 %6662  ;;  %6726 = vadd.xlane.f32.xlu0 %v19438_v41 }
 0xe65   : > { %15206 = vpow2.f32 %v6706_v27  ;;  %v8537_v6 = vadd.f32 %v19404_v31, %v13230_v14  ;;  %v8531_v21 = vpop.f32.mrb[87].mxu1  ;;  %v6680_v17 = vsub.f32 %v19150_v60, %v6663_v49 }
 0xe66   : > { %20948 = vst [vmem:[#allocation157_spill] sm:$0xff] %v19442_v56  ;;  %v19448_v30 = vpop.eup %15196  ;;  %v6712_v52 = vmul.f32 1.442695, %v6681_v62  ;;  %v8532_v35 = vadd.f32 %v19404_v31, %v8531_v21  ;;  %14773 = vmatprep.subr.bf16.mxu1 %v19442_v56 }
 0xe67   : > { %v19452_v39 = vpop.eup %15198  ;;  %v6710_v42 = vmul.f32 1.442695, %v6680_v17  ;;  %14781 = vmatpush3.bf16.msra.mxu1 %v19442_v56  ;;  %v5769_v9 = vpop.xlane.xlu1 %5768  ;;  %6732 = vadd.xlane.f32.xlu1 %v19448_v30 }
 0xe68   : > { %15208 = vpow2.f32 %v6712_v52  ;;  %v19456_v50 = vpack.c.bf16 %v8537_v6, %v8532_v35  ;;  %v13233_v11 = vpop.f32.mrb[88].mxu1  ;;  %v5799_v60 = vsub.f32 %v19160_v46, %v5769_v9  ;;  %v5767_v27 = vpop.xlane.xlu0 %5766  ;;  %6730 = vadd.xlane.f32.xlu0 %v19452_v39 }
 0xe69   : > { %15210 = vpow2.f32 %v6710_v42  ;;  %v8547_v51 = vadd.f32 %v19404_v31, %v13233_v11  ;;  %v8541_v62 = vpop.f32.mrb[89].mxu1  ;;  %v5798_v14 = vsub.f32 %v19168_v5, %v5767_v27 }
 0xe6a   : > { %20949 = vst [vmem:[#allocation141_spill] sm:$0xff] %v19456_v50  ;;  %v19462_v49 = vpop.eup %15200  ;;  %v5816_v21 = vmul.f32 1.442695, %v5799_v60  ;;  %v8542_v17 = vadd.f32 %v19404_v31, %v8541_v62  ;;  %14774 = vmatprep.subr.bf16.mxu1 %v19456_v50 }
 0xe6b   : > { %v19466_v6 = vpop.eup %15202  ;;  %v5814_v52 = vmul.f32 1.442695, %v5798_v14  ;;  %14782 = vmatpush3.bf16.msra.mxu1 %v19456_v50  ;;  %v5773_v46 = vpop.xlane.xlu1 %5772  ;;  %6736 = vadd.xlane.f32.xlu1 %v19462_v49 }
 0xe6c   : > { %15212 = vpow2.f32 %v5816_v21  ;;  %v19470_v35 = vpack.c.bf16 %v8547_v51, %v8542_v17  ;;  %v13236_v42 = vpop.f32.mrb[90].mxu1  ;;  %v5801_v5 = vsub.f32 %v19178_v3, %v5773_v46  ;;  %v5771_v9 = vpop.xlane.xlu0 %5770  ;;  %6734 = vadd.xlane.f32.xlu0 %v19466_v6 }
 0xe6d   : > { %15214 = vpow2.f32 %v5814_v52  ;;  %v8557_v11 = vadd.f32 %v19404_v31, %v13236_v42  ;;  %v8551_v60 = vpop.f32.mrb[91].mxu1  ;;  %v5800_v27 = vsub.f32 %v19186_v8, %v5771_v9 }
 0xe6e   : > { %20950 = vst [vmem:[#allocation140_spill] sm:$0xff] %v19470_v35  ;;  %v19476_v62 = vpop.eup %15204  ;;  %v5820_v14 = vmul.f32 1.442695, %v5801_v5  ;;  %v8552_v50 = vadd.f32 %v19404_v31, %v8551_v60  ;;  %14775 = vmatprep.subr.bf16.mxu1 %v19470_v35 }
 0xe6f   : > { %v19480_v51 = vpop.eup %15206  ;;  %v5818_v21 = vmul.f32 1.442695, %v5800_v27  ;;  %14783 = vmatpush3.bf16.msra.mxu1 %v19470_v35  ;;  %v5777_v3 = vpop.xlane.xlu1 %5776  ;;  %6740 = vadd.xlane.f32.xlu1 %v19476_v62 }
 0xe70   : > { %15216 = vpow2.f32 %v5820_v14  ;;  %v19484_v17 = vpack.c.bf16 %v8557_v11, %v8552_v50  ;;  %v13239_v52 = vpop.f32.mrb[92].mxu1  ;;  %v5803_v8 = vsub.f32 %v19196_v36, %v5777_v3  ;;  %v5775_v46 = vpop.xlane.xlu0 %5774  ;;  %6738 = vadd.xlane.f32.xlu0 %v19480_v51 }
 0xe71   : > { %15218 = vpow2.f32 %v5818_v21  ;;  %v8567_v42 = vadd.f32 %v19404_v31, %v13239_v52  ;;  %v8561_v5 = vpop.f32.mrb[93].mxu1  ;;  %v5802_v9 = vsub.f32 %v19204_v24, %v5775_v46 }
 0xe72   : > { %20951 = vst [vmem:[#allocation158_spill] sm:$0xff] %v19484_v17  ;;  %v19490_v60 = vpop.eup %15208  ;;  %v5824_v27 = vmul.f32 1.442695, %v5803_v8  ;;  %v8562_v35 = vadd.f32 %v19404_v31, %v8561_v5  ;;  %14776 = vmatprep.subr.bf16.mxu1 %v19484_v17 }
 0xe73   : > { %v19494_v50 = vpop.eup %15210  ;;  %v5822_v11 = vmul.f32 1.442695, %v5802_v9  ;;  %14784 = vmatpush3.bf16.msra.mxu1 %v19484_v17  ;;  %v5781_v36 = vpop.xlane.xlu1 %5780  ;;  %6744 = vadd.xlane.f32.xlu1 %v19490_v60 }
 0xe74   : > { %15220 = vpow2.f32 %v5824_v27  ;;  %v19498_v14 = vpack.c.bf16 %v8567_v42, %v8562_v35  ;;  %v13242_v21 = vpop.f32.mrb[94].mxu1  ;;  %v5805_v24 = vsub.f32 %v19214_v12, %v5781_v36  ;;  %v5779_v3 = vpop.xlane.xlu0 %5778  ;;  %6742 = vadd.xlane.f32.xlu0 %v19494_v50 }
 0xe75   : > { %15222 = vpow2.f32 %v5822_v11  ;;  %v8577_v52 = vadd.f32 %v19404_v31, %v13242_v21  ;;  %v8571_v8 = vpop.f32.mrb[95].mxu1  ;;  %v5804_v46 = vsub.f32 %v19222_v54, %v5779_v3 }
 0xe76   : > { %20952 = vst [vmem:[#allocation143_spill] sm:$0xff] %v19498_v14  ;;  %v19504_v5 = vpop.eup %15212  ;;  %v5828_v9 = vmul.f32 1.442695, %v5805_v24  ;;  %v8572_v17 = vadd.f32 %v19404_v31, %v8571_v8  ;;  %14777 = vmatprep.subr.bf16.mxu1 %v19498_v14 }
 0xe77   : > { %v19508_v35 = vpop.eup %15214  ;;  %v5826_v42 = vmul.f32 1.442695, %v5804_v46  ;;  %14785 = vmatpush3.bf16.msra.mxu1 %v19498_v14  ;;  %v5785_v12 = vpop.xlane.xlu1 %5784  ;;  %5848 = vadd.xlane.f32.xlu1 %v19504_v5 }
 0xe78   : > { %15224 = vpow2.f32 %v5828_v9  ;;  %v19512_v27 = vpack.c.bf16 %v8577_v52, %v8572_v17  ;;  %v5807_v54 = vsub.f32 %v19232_v63, %v5785_v12  ;;  %v5783_v11 = vpop.xlane.xlu0 %5782  ;;  %5846 = vadd.xlane.f32.xlu0 %v19508_v35 }
 0xe79   : > { %15226 = vpow2.f32 %v5826_v42  ;;  %v5806_v31 = vsub.f32 %v19240_v26, %v5783_v11 }
 0xe7a   : > { %20953 = vst [vmem:[#allocation142_spill] sm:$0xff] %v19512_v27  ;;  %v19517_v36 = vpop.eup %15216  ;;  %v5832_v21 = vmul.f32 1.442695, %v5807_v54  ;;  %14778 = vmatprep.subr.bf16.mxu1 %v19512_v27 }
 0xe7b   : > { %v19520_v24 = vpop.eup %15218  ;;  %v5830_v3 = vmul.f32 1.442695, %v5806_v31  ;;  %14786 = vmatpush3.bf16.msra.mxu1 %v19512_v27  ;;  %v5789_v17 = vpop.xlane.xlu1 %5788  ;;  %5852 = vadd.xlane.f32.xlu1 %v19517_v36 }
 0xe7c   : > { %15228 = vpow2.f32 %v5832_v21  ;;  %v5809_v63 = vsub.f32 %v19250_v23, %v5789_v17  ;;  %v5787_v52 = vpop.xlane.xlu0 %5786  ;;  %5850 = vadd.xlane.f32.xlu0 %v19520_v24 }
 0xe7d   : > { %15230 = vpow2.f32 %v5830_v3  ;;  %v5808_v26 = vsub.f32 %v19258_v19, %v5787_v52 }
 0xe7e   : > { %v19527_v8 = vpop.eup %15220  ;;  %v5836_v46 = vmul.f32 1.442695, %v5809_v63 }
 0xe7f   : > { %v19529_v9 = vpop.eup %15222  ;;  %v5834_v42 = vmul.f32 1.442695, %v5808_v26  ;;  %v5793_v12 = vpop.xlane.xlu1 %5792  ;;  %5856 = vadd.xlane.f32.xlu1 %v19527_v8 }
 0xe80   : > { %15232 = vpow2.f32 %v5836_v46  ;;  %v5811_v54 = vsub.f32 %v19268_v15, %v5793_v12  ;;  %v5791_v11 = vpop.xlane.xlu0 %5790  ;;  %5854 = vadd.xlane.f32.xlu0 %v19529_v9 }
 0xe81   : > { %15234 = vpow2.f32 %v5834_v42  ;;  %v5810_v23 = vsub.f32 %v19276_v57, %v5791_v11 }
 0xe82   : > { %v19535_v31 = vpop.eup %15224  ;;  %v5840_v19 = vmul.f32 1.442695, %v5811_v54 }
 0xe83   : > { %v19537_v21 = vpop.eup %15226  ;;  %v5838_v3 = vmul.f32 1.442695, %v5810_v23  ;;  %5860 = vadd.xlane.f32.xlu1 %v19535_v31  ;;  %v5797_v17 = vpop.xlane.xlu1 %5796 }
 0xe84   : > { %15236 = vpow2.f32 %v5840_v19  ;;  %v5813_v63 = vsub.f32 %v19286_v1, %v5797_v17  ;;  %5858 = vadd.xlane.f32.xlu0 %v19537_v21  ;;  %v5795_v15 = vpop.xlane.xlu0 %5794 }
 0xe85   : > { %15238 = vpow2.f32 %v5838_v3  ;;  %v5812_v52 = vsub.f32 %v19294_v38, %v5795_v15 }
 0xe86   : > { %v19543_v26 = vpop.eup %15228  ;;  %v5844_v57 = vmul.f32 1.442695, %v5813_v63 }
 0xe87   : > { %20954 = vst [vmem:[#allocation159_spill] sm:$0xff] %v19543_v26  ;;  %v19545_v46 = vpop.eup %15230  ;;  %v5842_v42 = vmul.f32 1.442695, %v5812_v52  ;;  %5864 = vadd.xlane.f32.xlu1 %v19543_v26 }
 0xe88   : > { %20955 = vst [vmem:[#allocation6_spill] sm:$0xff] %v19545_v46  ;;  %15240 = vpow2.f32 %v5844_v57  ;;  %5862 = vadd.xlane.f32.xlu0 %v19545_v46 }
 0xe89   : > { %15242 = vpow2.f32 %v5842_v42 }
 0xe8a   : > { %v19549_v12 = vpop.eup %15232 }
 0xe8b   : > { %20956 = vst [vmem:[#allocation9_spill] sm:$0xff] %v19549_v12  ;;  %v19551_v1 = vpop.eup %15234  ;;  %5868 = vadd.xlane.f32.xlu1 %v19549_v12 }
 0xe8c   : > { %20957 = vst [vmem:[#allocation12_spill] sm:$0xff] %v19551_v1  ;;  %5866 = vadd.xlane.f32.xlu0 %v19551_v1 }
 0xe8e   : > { %v19555_v38 = vpop.eup %15236 }
 0xe8f   : > { %20958 = vst [vmem:[#allocation15_spill] sm:$0xff] %v19555_v38  ;;  %v19557_v54 = vpop.eup %15238  ;;  %5872 = vadd.xlane.f32.xlu1 %v19555_v38 }
 0xe90   : > { %20959 = vst [vmem:[#allocation18_spill] sm:$0xff] %v19557_v54  ;;  %5870 = vadd.xlane.f32.xlu0 %v19557_v54 }
 0xe92   : > { %v19561_v11 = vpop.eup %15240 }
 0xe93   : > { %20960 = vst [vmem:[#allocation21_spill] sm:$0xff] %v19561_v11  ;;  %v19563_v23 = vpop.eup %15242  ;;  %5876 = vadd.xlane.f32.xlu1 %v19561_v11 }
 0xe94   : > { %20961 = vst [vmem:[#allocation24_spill] sm:$0xff] %v19563_v23  ;;  %5874 = vadd.xlane.f32.xlu0 %v19563_v23 }
 0xee4   : > { %v6717_v19 = vpop.xlane.xlu1 %6716 }
 0xee5   : > { %15244 = vrcp.f32 %v6717_v19  ;;  %v6715_v3 = vpop.xlane.xlu0 %6714 }
 0xee6   : > { %15246 = vrcp.f32 %v6715_v3 }
 0xee8   : > { %v6721_v17 = vpop.xlane.xlu1 %6720 }
 0xee9   : > { %15248 = vrcp.f32 %v6721_v17  ;;  %v6719_v63 = vpop.xlane.xlu0 %6718 }
 0xeea   : > { %15250 = vrcp.f32 %v6719_v63 }
 0xeec   : > { %v6725_v15 = vpop.xlane.xlu1 %6724 }
 0xeed   : > { %15252 = vrcp.f32 %v6725_v15  ;;  %v6723_v52 = vpop.xlane.xlu0 %6722 }
 0xeee   : > { %15254 = vrcp.f32 %v6723_v52 }
 0xeef   : > { %v15245_v57 = vpop.eup %15244 }
 0xef0   : > { %v15247_v42 = vpop.eup %15246  ;;  %v6763_v27 = vmul.f32 %v15245_v57, %v6717_v19  ;;  %v6729_v14 = vpop.xlane.xlu1 %6728 }
 0xef1   : > { %v6762_v56 = vmul.f32 %v15247_v42, %v6715_v3  ;;  %15256 = vrcp.f32 %v6729_v14  ;;  %v6727_v55 = vpop.xlane.xlu0 %6726 }
 0xef2   : > { %v6779_v32 = vsub.f32 2.0, %v6763_v27  ;;  %15258 = vrcp.f32 %v6727_v55 }
 0xef3   : > { %v15249_v20 = vpop.eup %15248  ;;  %v6778_v40 = vsub.f32 2.0, %v6762_v56 }
 0xef4   : > { %v15251_v59 = vpop.eup %15250  ;;  %v6795_v25 = vmul.f32 %v15245_v57, %v6779_v32  ;;  %v6765_v44 = vmul.f32 %v15249_v20, %v6721_v17  ;;  %v6733_v45 = vpop.xlane.xlu1 %6732 }
 0xef5   : > { %v6794_v47 = vmul.f32 %v15247_v42, %v6778_v40  ;;  %v6764_v11 = vmul.f32 %v15251_v59, %v6719_v63  ;;  %15260 = vrcp.f32 %v6733_v45  ;;  %v6731_v23 = vpop.xlane.xlu0 %6730 }
 0xef6   : > { %v6781_v38 = vsub.f32 2.0, %v6765_v44  ;;  %15262 = vrcp.f32 %v6731_v23  ;;  %v6811_v27 = vmul.f32 %v19392_v13, %v6795_v25 }
 0xef7   : > { %v15253_v54 = vpop.eup %15252  ;;  %v6780_v19 = vsub.f32 2.0, %v6764_v11  ;;  %v6810_v3 = vmul.f32 %v19394_v22, %v6794_v47 }
 0xef8   : > { %v15255_v12 = vpop.eup %15254  ;;  %v6797_v1 = vmul.f32 %v15249_v20, %v6781_v38  ;;  %v6767_v26 = vmul.f32 %v15253_v54, %v6725_v15  ;;  %v6737_v56 = vpop.xlane.xlu1 %6736 }
 0xef9   : > { %v6796_v46 = vmul.f32 %v15251_v59, %v6780_v19  ;;  %v6766_v32 = vmul.f32 %v15255_v12, %v6723_v52  ;;  %15264 = vrcp.f32 %v6737_v56  ;;  %12715 = vmatprep.mubr.f32.mxu0 %v6810_v3  ;;  %v6735_v40 = vpop.xlane.xlu0 %6734 }
 0xefa   : > { %v6783_v17 = vsub.f32 2.0, %v6767_v26  ;;  %15266 = vrcp.f32 %v6735_v40  ;;  %12716 = vmatmul.mubr.f32.vlgmr.msra.gmra.mrb[144].mxu0 %v6811_v27  ;;  %v6813_v59 = vmul.f32 %v19408_v4, %v6797_v1 }
 0xefb   : > { %v15257_v44 = vpop.eup %15256  ;;  %v6782_v63 = vsub.f32 2.0, %v6766_v32  ;;  %14390 = vmatpush3.bf16.msra.mxu0 %v18620_v28  ;;  %v6812_v47 = vmul.f32 %v19411_v53, %v6796_v46 }
 0xefc   : > { %v15259_v22 = vpop.eup %15258  ;;  %v6799_v11 = vmul.f32 %v15253_v54, %v6783_v17  ;;  %v6769_v25 = vmul.f32 %v15257_v44, %v6729_v14  ;;  %14392 = vmatprep.subr.bf16.mxu0 %v18624_v16  ;;  %v6741_v13 = vpop.xlane.xlu1 %6740 }
 0xefd   : > { %v6798_v20 = vmul.f32 %v15255_v12, %v6782_v63  ;;  %v6768_v38 = vmul.f32 %v15259_v22, %v6727_v55  ;;  %15268 = vrcp.f32 %v6741_v13  ;;  %12718 = vmatprep.mubr.f32.mxu0 %v6812_v47  ;;  %v6739_v26 = vpop.xlane.xlu0 %6738 }
 0xefe   : > { %v6785_v15 = vsub.f32 2.0, %v6769_v25  ;;  %15270 = vrcp.f32 %v6739_v26  ;;  %12719 = vmatmul.mubr.f32.gmra.mrb[146].mxu0 %v6813_v59  ;;  %v6815_v55 = vmul.f32 %v19420_v10, %v6799_v11 }
 0xeff   : > { %v15261_v52 = vpop.eup %15260  ;;  %v6784_v28 = vsub.f32 2.0, %v6768_v38  ;;  %14394 = vmatpush3.bf16.msra.mxu0 %v18624_v16  ;;  %v6814_v53 = vmul.f32 %v19424_v58, %v6798_v20 }
 0xf00   : > { %v15263_v14 = vpop.eup %15262  ;;  %v6801_v46 = vmul.f32 %v15257_v44, %v6785_v15  ;;  %v6771_v54 = vmul.f32 %v15261_v52, %v6733_v45  ;;  %14396 = vmatprep.subr.bf16.mxu0 %v18628_v0  ;;  %v6745_v4 = vpop.xlane.xlu1 %6744 }
 0xf01   : > { %v6800_v12 = vmul.f32 %v15259_v22, %v6784_v28  ;;  %v6770_v1 = vmul.f32 %v15263_v14, %v6731_v23  ;;  %15272 = vrcp.f32 %v6745_v4  ;;  %12721 = vmatprep.mubr.f32.mxu0 %v6814_v53  ;;  %v6743_v57 = vpop.xlane.xlu0 %6742 }
 0xf02   : > { %v6787_v42 = vsub.f32 2.0, %v6771_v54  ;;  %15274 = vrcp.f32 %v6743_v57  ;;  %12722 = vmatmul.mubr.f32.gmra.mrb[148].mxu0 %v6815_v55  ;;  %v6817_v23 = vmul.f32 %v19434_v34, %v6801_v46 }
 0xf03   : > { %v15265_v19 = vpop.eup %15264  ;;  %v6786_v16 = vsub.f32 2.0, %v6770_v1  ;;  %14398 = vmatpush3.bf16.msra.mxu0 %v18628_v0  ;;  %v6816_v58 = vmul.f32 %v19438_v41, %v6800_v12 }
 0xf04   : > { %v15267_v45 = vpop.eup %15266  ;;  %v6803_v3 = vmul.f32 %v15261_v52, %v6787_v42  ;;  %v6773_v27 = vmul.f32 %v15265_v19, %v6737_v56  ;;  %14400 = vmatprep.subr.bf16.mxu0 %v18632_v33  ;;  %v5849_v10 = vpop.xlane.xlu1 %5848 }
 0xf05   : > { %v6802_v32 = vmul.f32 %v15263_v14, %v6786_v16  ;;  %v6772_v17 = vmul.f32 %v15267_v45, %v6735_v40  ;;  %15276 = vrcp.f32 %v5849_v10  ;;  %12724 = vmatprep.mubr.f32.mxu0 %v6816_v58  ;;  %v5847_v44 = vpop.xlane.xlu0 %5846 }
 0xf06   : > { %v6789_v63 = vsub.f32 2.0, %v6773_v27  ;;  %15278 = vrcp.f32 %v5847_v44  ;;  %12725 = vmatmul.mubr.f32.gmra.mrb[150].mxu0 %v6817_v23  ;;  %v6819_v40 = vmul.f32 %v19448_v30, %v6803_v3 }
 0xf07   : > { %v15269_v47 = vpop.eup %15268  ;;  %v6788_v0 = vsub.f32 2.0, %v6772_v17  ;;  %14402 = vmatpush3.bf16.msra.mxu0 %v18632_v33  ;;  %v6818_v41 = vmul.f32 %v19452_v39, %v6802_v32 }
 0xf08   : > { %v15271_v56 = vpop.eup %15270  ;;  %v6805_v22 = vmul.f32 %v15265_v19, %v6789_v63  ;;  %v6775_v11 = vmul.f32 %v15269_v47, %v6741_v13  ;;  %14404 = vmatprep.subr.bf16.mxu0 %v18636_v61  ;;  %v5853_v34 = vpop.xlane.xlu1 %5852 }
 0xf09   : > { %v6804_v25 = vmul.f32 %v15267_v45, %v6788_v0  ;;  %v6774_v59 = vmul.f32 %v15271_v56, %v6739_v26  ;;  %15280 = vrcp.f32 %v5853_v34  ;;  %12727 = vmatprep.mubr.f32.mxu0 %v6818_v41  ;;  %v5851_v20 = vpop.xlane.xlu0 %5850 }
 0xf0a   : > { %v6791_v38 = vsub.f32 2.0, %v6775_v11  ;;  %15282 = vrcp.f32 %v5851_v20  ;;  %12728 = vmatmul.mubr.f32.gmra.mrb[152].mxu0 %v6819_v40  ;;  %v6821_v26 = vmul.f32 %v19462_v49, %v6805_v22 }
 0xf0b   : > { %v15273_v15 = vpop.eup %15272  ;;  %v6790_v33 = vsub.f32 2.0, %v6774_v59  ;;  %14406 = vmatpush3.bf16.msra.mxu0 %v18636_v61  ;;  %v6820_v39 = vmul.f32 %v19466_v6, %v6804_v25 }
 0xf0c   : > { %v15275_v13 = vpop.eup %15274  ;;  %v6807_v52 = vmul.f32 %v15269_v47, %v6791_v38  ;;  %v6777_v28 = vmul.f32 %v15273_v15, %v6745_v4  ;;  %14408 = vmatprep.subr.bf16.mxu0 %v18640_v7  ;;  %v5857_v30 = vpop.xlane.xlu1 %5856 }
 0xf0d   : > { %v6806_v53 = vmul.f32 %v15271_v56, %v6790_v33  ;;  %v6776_v14 = vmul.f32 %v15275_v13, %v6743_v57  ;;  %15284 = vrcp.f32 %v5857_v30  ;;  %12730 = vmatprep.mubr.f32.mxu0 %v6820_v39  ;;  %v5855_v46 = vpop.xlane.xlu0 %5854 }
 0xf0e   : > { %v6793_v54 = vsub.f32 2.0, %v6777_v28  ;;  %15286 = vrcp.f32 %v5855_v46  ;;  %12731 = vmatmul.mubr.f32.gmra.mrb[154].mxu0 %v6821_v26  ;;  %v6823_v57 = vmul.f32 %v19476_v62, %v6807_v52 }
 0xf0f   : > { %v15277_v55 = vpop.eup %15276  ;;  %v6792_v61 = vsub.f32 2.0, %v6776_v14  ;;  %14410 = vmatpush3.bf16.msra.mxu0 %v18640_v7  ;;  %v6822_v6 = vmul.f32 %v19480_v51, %v6806_v53 }
 0xf10   : > { %v15279_v4 = vpop.eup %15278  ;;  %v6809_v12 = vmul.f32 %v15273_v15, %v6793_v54  ;;  %v5895_v1 = vmul.f32 %v15277_v55, %v5849_v10  ;;  %14412 = vmatprep.subr.bf16.mxu0 %v18644_v37  ;;  %v5861_v49 = vpop.xlane.xlu1 %5860 }
 0xf11   : > { %v6808_v42 = vmul.f32 %v15275_v13, %v6792_v61  ;;  %v5894_v19 = vmul.f32 %v15279_v4, %v5847_v44  ;;  %15288 = vrcp.f32 %v5861_v49  ;;  %12733 = vmatprep.mubr.f32.mxu0 %v6822_v6  ;;  %v5859_v16 = vpop.xlane.xlu0 %5858 }
 0xf12   : > { %v5911_v58 = vsub.f32 2.0, %v5895_v1  ;;  %15290 = vrcp.f32 %v5859_v16  ;;  %12734 = vmatmul.mubr.f32.gmra.mrb[156].mxu0 %v6823_v57  ;;  %v6825_v23 = vmul.f32 %v19490_v60, %v6809_v12 }
 0xf13   : > { %v15281_v45 = vpop.eup %15280  ;;  %v5910_v7 = vsub.f32 2.0, %v5894_v19  ;;  %14414 = vmatpush3.bf16.msra.mxu0 %v18644_v37  ;;  %v6824_v51 = vmul.f32 %v19494_v50, %v6808_v42 }
 0xf14   : > { %v15283_v3 = vpop.eup %15282  ;;  %v5927_v27 = vmul.f32 %v15277_v55, %v5911_v58  ;;  %v5897_v10 = vmul.f32 %v15281_v45, %v5853_v34  ;;  %14416 = vmatprep.subr.bf16.mxu0 %v18648_v43  ;;  %v5865_v62 = vpop.xlane.xlu1 %5864 }
 0xf15   : > { %v5926_v32 = vmul.f32 %v15279_v4, %v5910_v7  ;;  %v5896_v17 = vmul.f32 %v15283_v3, %v5851_v20  ;;  %15292 = vrcp.f32 %v5865_v62  ;;  %12736 = vmatprep.mubr.f32.mxu0 %v6824_v51  ;;  %v5863_v44 = vpop.xlane.xlu0 %5862 }
 0xf16   : > { %v5913_v63 = vsub.f32 2.0, %v5897_v10  ;;  %15294 = vrcp.f32 %v5863_v44  ;;  %12737 = vmatmul.mubr.f32.gmra.mrb[158].mxu0 %v6825_v23  ;;  %v5943_v41 = vmul.f32 %v19504_v5, %v5927_v27  ;;  %v20964_v27 = vld [vmem:[#allocation159_spill] sm:$0xff] }
 0xf17   : > { %v15285_v47 = vpop.eup %15284  ;;  %v5912_v37 = vsub.f32 2.0, %v5896_v17  ;;  %14418 = vmatpush3.bf16.msra.mxu0 %v18648_v43  ;;  %v5942_v50 = vmul.f32 %v19508_v35, %v5926_v32 }
 0xf18   : > { %v15287_v0 = vpop.eup %15286  ;;  %v5929_v56 = vmul.f32 %v15281_v45, %v5913_v63  ;;  %v5899_v22 = vmul.f32 %v15285_v47, %v5857_v30  ;;  %v5869_v60 = vpop.xlane.xlu1 %5868  ;;  %14452 = vmatprep.subr.bf16.mxu0 %v17713_v48  ;;  %v20962_v45 = vld [vmem:[#allocation6_spill] sm:$0xff] }
 0xf19   : > { %v5928_v11 = vmul.f32 %v15283_v3, %v5912_v37  ;;  %v5898_v34 = vmul.f32 %v15287_v0, %v5855_v46  ;;  %15296 = vrcp.f32 %v5869_v60  ;;  %12771 = vmatprep.mubr.f32.mxu0 %v5942_v50  ;;  %v5867_v40 = vpop.xlane.xlu0 %5866  ;;  %v20963_v3 = vld [vmem:[#allocation56_spill] sm:$0xff]  ;;  %v20966_v50 = vld [vmem:[#allocation161_spill] sm:$0xff] }
 0xf1a   : > { %v5915_v25 = vsub.f32 2.0, %v5899_v22  ;;  %15298 = vrcp.f32 %v5867_v40  ;;  %12772 = vmatmul.mubr.f32.vlgmr.msra.gmra.mrb[144].mxu0 %v5943_v41  ;;  %v5945_v33 = vmul.f32 %v19517_v36, %v5929_v56 }
 0xf1b   : > { %v15289_v59 = vpop.eup %15288  ;;  %v5914_v43 = vsub.f32 2.0, %v5898_v34  ;;  %14454 = vmatpush3.bf16.msra.mxu0 %v17713_v48  ;;  %v5944_v35 = vmul.f32 %v19520_v24, %v5928_v11  ;;  %v20968_v34 = vld [vmem:[#allocation18_spill] sm:$0xff] }
 0xf1c   : > { %v15291_v5 = vpop.eup %15290  ;;  %v5931_v20 = vmul.f32 %v15285_v47, %v5915_v25  ;;  %v5901_v38 = vmul.f32 %v15289_v59, %v5861_v49  ;;  %v5873_v15 = vpop.xlane.xlu1 %5872  ;;  %14456 = vmatprep.subr.bf16.mxu0 %v17728_v2 }
 0xf1d   : > { %v5930_v39 = vmul.f32 %v15287_v0, %v5914_v43  ;;  %v5900_v13 = vmul.f32 %v15291_v5, %v5859_v16  ;;  %15300 = vrcp.f32 %v5873_v15  ;;  %12774 = vmatprep.mubr.f32.mxu0 %v5944_v35  ;;  %v5871_v52 = vpop.xlane.xlu0 %5870  ;;  %v20967_v0 = vld [vmem:[#allocation9_spill] sm:$0xff]  ;;  %v20970_v43 = vld [vmem:[#allocation15_spill] sm:$0xff] }
 0xf1e   : > { %v5917_v28 = vsub.f32 2.0, %v5901_v38  ;;  %15302 = vrcp.f32 %v5871_v52  ;;  %12775 = vmatmul.mubr.f32.gmra.mrb[146].mxu0 %v5945_v33  ;;  %v5947_v36 = vmul.f32 %v19527_v8, %v5931_v20  ;;  %v20971_v20 = vld [vmem:[#allocation24_spill] sm:$0xff]  ;;  %v20973_v33 = vld [vmem:[#allocation21_spill] sm:$0xff] }
 0xf1f   : > { %v15293_v30 = vpop.eup %15292  ;;  %v5916_v48 = vsub.f32 2.0, %v5900_v13  ;;  %14458 = vmatpush3.bf16.msra.mxu0 %v17728_v2  ;;  %v5946_v24 = vmul.f32 %v19529_v9, %v5930_v39  ;;  %v20974_v13 = vld [vmem:[#allocation160_spill] sm:$0xff] }
 0xf20   : > { %v15295_v26 = vpop.eup %15294  ;;  %v5933_v53 = vmul.f32 %v15289_v59, %v5917_v28  ;;  %v5903_v14 = vmul.f32 %v15293_v30, %v5865_v62  ;;  %v5877_v46 = vpop.xlane.xlu1 %5876  ;;  %14460 = vmatprep.subr.bf16.mxu0 %v17741_v18  ;;  %v20969_v59 = vld [vmem:[#allocation162_spill] sm:$0xff]  ;;  %v20976_v28 = vld [vmem:[#allocation8_spill] sm:$0xff] }
 0xf21   : > { %v5932_v54 = vmul.f32 %v15291_v5, %v5916_v48  ;;  %v5902_v55 = vmul.f32 %v15295_v26, %v5863_v44  ;;  %15304 = vrcp.f32 %v5877_v46  ;;  %12777 = vmatprep.mubr.f32.mxu0 %v5946_v24  ;;  %v5875_v61 = vpop.xlane.xlu0 %5874  ;;  %v20965_v44 = vld [vmem:[#allocation12_spill] sm:$0xff]  ;;  %v20978_v48 = vld [vmem:[#allocation11_spill] sm:$0xff]  ;;  %v20979_v24 = vld [vmem:[#allocation13_spill] sm:$0xff] }
 0xf22   : > { %v5919_v6 = vsub.f32 2.0, %v5903_v14  ;;  %15306 = vrcp.f32 %v5875_v61  ;;  %12778 = vmatmul.mubr.f32.gmra.mrb[148].mxu0 %v5947_v36  ;;  %v5949_v8 = vmul.f32 %v19535_v31, %v5933_v53  ;;  %v20981_v53 = vld [vmem:[#allocation16_spill] sm:$0xff]  ;;  %v20982_v14 = vld [vmem:[#allocation17_spill] sm:$0xff] }
 0xf23   : > { %v15297_v4 = vpop.eup %15296  ;;  %v5918_v2 = vsub.f32 2.0, %v5902_v55  ;;  %14462 = vmatpush3.bf16.msra.mxu0 %v17741_v18  ;;  %v5948_v9 = vmul.f32 %v19537_v21, %v5932_v54  ;;  %v20984_v36 = vld [vmem:[#allocation20_spill] sm:$0xff]  ;;  %v20985_v54 = vld [vmem:[#allocation22_spill] sm:$0xff]  ;;  %v20986_v55 = vld [vmem:[#allocation23_spill] sm:$0xff] }
 0xf24   : > { %v15299_v12 = vpop.eup %15298  ;;  %v5935_v1 = vmul.f32 %v15293_v30, %v5919_v6  ;;  %v5905_v49 = vmul.f32 %v15297_v4, %v5869_v60  ;;  %14464 = vmatprep.subr.bf16.mxu0 %v17754_v29  ;;  %v20977_v30 = vld [vmem:[#allocation10_spill] sm:$0xff] }
 0xf25   : > { %v5934_v57 = vmul.f32 %v15295_v26, %v5918_v2  ;;  %v5904_v42 = vmul.f32 %v15299_v12, %v5867_v40  ;;  %12780 = vmatprep.mubr.f32.mxu0 %v5948_v9  ;;  %v20980_v26 = vld [vmem:[#allocation14_spill] sm:$0xff]  ;;  %v20989_v2 = vld [vmem:[#allocation29_spill] sm:$0xff] }
 0xf26   : > { %v5921_v19 = vsub.f32 2.0, %v5905_v49  ;;  %12781 = vmatmul.mubr.f32.gmra.mrb[150].mxu0 %v5949_v8  ;;  %v5951_v10 = vmul.f32 %v20964_v27, %v5935_v1  ;;  %v20988_v6 = vld [vmem:[#allocation26_spill] sm:$0xff] }
 0xf27   : > { %v15301_v16 = vpop.eup %15300  ;;  %v5920_v58 = vsub.f32 2.0, %v5904_v42  ;;  %14466 = vmatpush3.bf16.msra.mxu0 %v17754_v29  ;;  %v5950_v18 = vmul.f32 %v20962_v45, %v5934_v57  ;;  %v15478_v49 = vld [vmem:[%s20289_s6 + $0x2] ss:$0 sm:$0xff] }
 0xf28   : > { %v15303_v7 = vpop.eup %15302  ;;  %v5937_v21 = vmul.f32 %v15297_v4, %v5921_v19  ;;  %v5907_v51 = vmul.f32 %v15301_v16, %v5873_v15  ;;  %14468 = vmatprep.subr.bf16.mxu0 %v20963_v3  ;;  %v20972_v15 = vld [vmem:[#allocation163_spill] sm:$0xff]  ;;  %v19648_v4 = vld [vmem:[%s20287_s4 + $0x2] ss:$0 sm:$0xff] }
 0xf29   : > { %v5936_v62 = vmul.f32 %v15299_v12, %v5920_v58  ;;  %v5906_v31 = vmul.f32 %v15303_v7, %v5871_v52  ;;  %12783 = vmatprep.mubr.f32.mxu0 %v5950_v18  ;;  %v20975_v52 = vld [vmem:[#allocation7_spill] sm:$0xff]  ;;  %v7183_v9 = vadd.f32 %v19648_v4, %v20989_v2  ;;  %v20990_v12 = vld [vmem:[#allocation28_spill] sm:$0xff]  ;;  %v21003_v2 = vld [vmem:[#allocation122_spill] sm:$0xff] }
 0xf2a   : > { %v5923_v23 = vsub.f32 2.0, %v5907_v51  ;;  %12784 = vmatmul.mubr.f32.gmra.mrb[152].mxu0 %v5951_v10  ;;  %v5953_v41 = vmul.f32 %v20967_v0, %v5937_v21 }
 0xf2b   : > { %v15305_v32 = vpop.eup %15304  ;;  %v5922_v17 = vsub.f32 2.0, %v5906_v31  ;;  %14470 = vmatpush3.bf16.msra.mxu0 %v20963_v3  ;;  %v5952_v29 = vmul.f32 %v20965_v44, %v5936_v62 }
 0xf2c   : > { %v15307_v63 = vpop.eup %15306  ;;  %v5939_v47 = vmul.f32 %v15301_v16, %v5923_v23  ;;  %v5909_v37 = vmul.f32 %v15305_v32, %v5877_v46  ;;  %14472 = vmatprep.subr.bf16.mxu0 %v20966_v50  ;;  %v20983_v46 = vld [vmem:[#allocation19_spill] sm:$0xff] }
 0xf2d   : > { %v5938_v56 = vmul.f32 %v15303_v7, %v5922_v17  ;;  %v5908_v22 = vmul.f32 %v15307_v63, %v5875_v61  ;;  %12786 = vmatprep.mubr.f32.mxu0 %v5952_v29  ;;  %v20987_v61 = vld [vmem:[#allocation25_spill] sm:$0xff]  ;;  %v21030_v7 = vld [vmem:[#allocation147_spill] sm:$0xff] }
 0xf2e   : > { %v5925_v60 = vsub.f32 2.0, %v5909_v37  ;;  %12787 = vmatmul.mubr.f32.gmra.mrb[154].mxu0 %v5953_v41  ;;  %v5955_v35 = vmul.f32 %v20970_v43, %v5939_v47 }
 0xf2f   : > { %v5924_v11 = vsub.f32 2.0, %v5908_v22  ;;  %14474 = vmatpush3.bf16.msra.mxu0 %v20966_v50  ;;  %v5954_v40 = vmul.f32 %v20968_v34, %v5938_v56 }
 0xf30   : > { %v5941_v25 = vmul.f32 %v15305_v32, %v5925_v60  ;;  %14476 = vmatprep.subr.bf16.mxu0 %v20969_v59 }
 0xf31   : > { %v5940_v5 = vmul.f32 %v15307_v63, %v5924_v11  ;;  %12789 = vmatprep.mubr.f32.mxu0 %v5954_v40 }
 0xf32   : > { %12790 = vmatmul.mubr.f32.gmra.mrb[156].mxu0 %v5955_v35  ;;  %v5957_v39 = vmul.f32 %v20973_v33, %v5941_v25  ;;  %v20993_v33 = vld [vmem:[#allocation105_spill] sm:$0xff] }
 0xf33   : > { %14478 = vmatpush3.bf16.msra.mxu0 %v20969_v59  ;;  %v5956_v38 = vmul.f32 %v20971_v20, %v5940_v5 }
 0xf34   : > { %14480 = vmatprep.subr.bf16.mxu0 %v20972_v15 }
 0xf35   : > { %12792 = vmatprep.mubr.f32.mxu0 %v5956_v38 }
 0xf36   : > { %12793 = vmatmul.mubr.f32.gmra.mrb[158].mxu0 %v5957_v39  ;;  %v7188_v39 = vadd.f32 %v19648_v4, %v20993_v33  ;;  %v15487_v33 = vld [vmem:[%s20292_s9 + $0x148] sm:$0xff] }
 0xf37   : > { %14482 = vmatpush3.bf16.msra.mxu0 %v20972_v15  ;;  %12883 = vmatprep.mubr.f32.mxu0 %v20974_v13  ;;  %v20992_v15 = vld [vmem:[#allocation115_spill] sm:$0xff]  ;;  %v20994_v13 = vld [vmem:[#allocation104_spill] sm:$0xff] }
 0xf3a   : > { %12884 = vmatmul.mubr.f32.vlgmr.msra.gmra.mrb[160].mxu0 %v20975_v52  ;;  %v7193_v52 = vadd.f32 %v19648_v4, %v20994_v13 }
 0xf3b   : > { %12886 = vmatprep.mubr.f32.mxu0 %v20976_v28  ;;  %v20995_v28 = vld [vmem:[#allocation120_spill] sm:$0xff] }
 0xf3e   : > { %12887 = vmatmul.mubr.f32.gmra.mrb[162].mxu0 %v20977_v30  ;;  %v7198_v30 = vadd.f32 %v19648_v4, %v20995_v28 }
 0xf3f   : > { %12889 = vmatprep.mubr.f32.mxu0 %v20978_v48  ;;  %v20996_v48 = vld [vmem:[#allocation114_spill] sm:$0xff] }
 0xf42   : > { %12890 = vmatmul.mubr.f32.gmra.mrb[164].mxu0 %v20979_v24  ;;  %v20997_v24 = vld [vmem:[#allocation106_spill] sm:$0xff] }
 0xf43   : > { %12892 = vmatprep.mubr.f32.mxu0 %v20980_v26  ;;  %v7203_v26 = vadd.f32 %v19648_v4, %v20997_v24 }
 0xf46   : > { %12893 = vmatmul.mubr.f32.gmra.mrb[166].mxu0 %v20981_v53  ;;  %v20998_v53 = vld [vmem:[#allocation107_spill] sm:$0xff] }
 0xf47   : > { %12895 = vmatprep.mubr.f32.mxu0 %v20982_v14  ;;  %v7208_v14 = vadd.f32 %v19648_v4, %v20998_v53  ;;  %v15490_v53 = vld [vmem:[%s20292_s9 + $0x150] sm:$0xff] }
 0xf4a   : > { %12896 = vmatmul.mubr.f32.gmra.mrb[168].mxu0 %v20983_v46  ;;  %v20999_v46 = vld [vmem:[#allocation125_spill] sm:$0xff] }
 0xf4b   : > { %12898 = vmatprep.mubr.f32.mxu0 %v20984_v36  ;;  %v21000_v36 = vld [vmem:[#allocation109_spill] sm:$0xff] }
 0xf4e   : > { %12899 = vmatmul.mubr.f32.gmra.mrb[170].mxu0 %v20985_v54  ;;  %v7213_v54 = vadd.f32 %v19648_v4, %v21000_v36  ;;  %v15491_v36 = vld [vmem:[%s20292_s9 + $0x168] sm:$0xff] }
 0xf4f   : > { %12901 = vmatprep.mubr.f32.mxu0 %v20986_v55  ;;  %v21001_v55 = vld [vmem:[#allocation121_spill] sm:$0xff] }
 0xf52   : > { %12902 = vmatmul.mubr.f32.gmra.mrb[172].mxu0 %v20987_v61  ;;  %v7218_v61 = vadd.f32 %v19648_v4, %v21001_v55 }
 0xf53   : > { %12904 = vmatprep.mubr.f32.mxu0 %v20988_v6  ;;  %v21002_v6 = vld [vmem:[#allocation117_spill] sm:$0xff] }
 0xf56   : > { %12905 = vmatmul.mubr.f32.gmra.mrb[174].mxu0 %v20990_v12  ;;  %v21004_v12 = vld [vmem:[#allocation108_spill] sm:$0xff] }
 0xf57   : > { %12995 = vmatprep.mubr.msk.f32.mxu0 %vm412_vm0, %v7183_v9  ;;  %v7223_v9 = vadd.f32 %v19648_v4, %v21003_v2 }
0x100d   : > { %v12885_v1 = vpop.f32.mrb[160].mxu0 }
0x100e   : > { %v7333_v8 = vadd.f32 %v15478_v49, %v12885_v1  ;;  %v7327_v57 = vpop.f32.mrb[161].mxu0  ;;  %v7228_v1 = vadd.f32 %v19648_v4, %v21004_v12 }
0x100f   : > { %v7328_v42 = vadd.f32 %v15478_v49, %v7327_v57 }
0x1011   : > { %v14515_v19 = vpack.c.bf16 %v7333_v8, %v7328_v42  ;;  %v12888_v16 = vpop.f32.mrb[162].mxu0  ;;  %v21006_v8 = vld [vmem:[#allocation110_spill] sm:$0xff]  ;;  %v21007_v42 = vld [vmem:[#allocation111_spill] sm:$0xff] }
0x1012   : > { %v7343_v58 = vadd.f32 %v15478_v49, %v12888_v16  ;;  %v7337_v45 = vpop.f32.mrb[163].mxu0  ;;  %v7233_v57 = vadd.f32 %v19648_v4, %v21006_v8  ;;  %v21008_v16 = vld [vmem:[#allocation126_spill] sm:$0xff] }
0x1013   : > { %v7338_v18 = vadd.f32 %v15478_v49, %v7337_v45  ;;  %14517 = vmatprep.subr.msk.bf16.mxu0 %vm16314_vm1, %v14515_v19 }
0x1014   : > { %14520 = vmatpush3.bf16.xpose.msk.msra.mxu0 %vm16314_vm1, %v14515_v19  ;;  %v7238_v19 = vadd.f32 %v19648_v4, %v21007_v42 }
0x1015   : > { %v14521_v21 = vpack.c.bf16 %v7343_v58, %v7338_v18  ;;  %v12891_v51 = vpop.f32.mrb[164].mxu0  ;;  %v21009_v58 = vld [vmem:[#allocation113_spill] sm:$0xff]  ;;  %v21010_v18 = vld [vmem:[#allocation123_spill] sm:$0xff] }
0x1016   : > { %v7353_v3 = vadd.f32 %v15478_v49, %v12891_v51  ;;  %v7347_v27 = vpop.f32.mrb[165].mxu0  ;;  %v7243_v45 = vadd.f32 %v19648_v4, %v21009_v58  ;;  %v21011_v51 = vld [vmem:[#allocation119_spill] sm:$0xff] }
0x1017   : > { %v7348_v10 = vadd.f32 %v15478_v49, %v7347_v27  ;;  %14523 = vmatprep.subr.msk.bf16.mxu0 %vm16314_vm1, %v14521_v21 }
0x1019   : > { %v14527_v62 = vpack.c.bf16 %v7353_v3, %v7348_v10  ;;  %v12894_v31 = vpop.f32.mrb[166].mxu0  ;;  %v21012_v3 = vld [vmem:[#allocation124_spill] sm:$0xff] }
0x101a   : > { %v7363_v23 = vadd.f32 %v15478_v49, %v12894_v31  ;;  %v7357_v32 = vpop.f32.mrb[167].mxu0  ;;  %v7253_v27 = vadd.f32 %v19648_v4, %v21012_v3  ;;  %v21013_v10 = vld [vmem:[#allocation112_spill] sm:$0xff]  ;;  %v21014_v31 = vld [vmem:[#allocation118_spill] sm:$0xff] }
0x101b   : > { %v7358_v17 = vadd.f32 %v15478_v49, %v7357_v32 }
0x101c   : > { %14526 = vmatpush3.bf16.xpose.msk.msra.mxu0 %vm16314_vm1, %v14521_v21  ;;  %v7248_v21 = vadd.f32 %v19648_v4, %v21010_v18 }
0x101d   : > { %v14533_v44 = vpack.c.bf16 %v7363_v23, %v7358_v17  ;;  %v12897_v29 = vpop.f32.mrb[168].mxu0  ;;  %14529 = vmatprep.subr.msk.bf16.mxu0 %vm16314_vm1, %v14527_v62  ;;  %v21015_v23 = vld [vmem:[#allocation132_spill] sm:$0xff]  ;;  %v15479_v17 = vld [vmem:[%s20292_s9 + $0x108] sm:$0xff] }
0x101e   : > { %v7373_v63 = vadd.f32 %v15478_v49, %v12897_v29  ;;  %v7367_v47 = vpop.f32.mrb[169].mxu0 }
0x101f   : > { %v7368_v37 = vadd.f32 %v15478_v49, %v7367_v47 }
0x1021   : > { %v14539_v50 = vpack.c.bf16 %v7373_v63, %v7368_v37  ;;  %v12900_v0 = vpop.f32.mrb[170].mxu0  ;;  %v15481_v37 = vld [vmem:[%s20292_s9 + $0x118] sm:$0xff] }
0x1022   : > { %v7383_v41 = vadd.f32 %v15478_v49, %v12900_v0  ;;  %v7377_v56 = vpop.f32.mrb[171].mxu0 }
0x1023   : > { %v7378_v22 = vadd.f32 %v15478_v49, %v7377_v56 }
0x1024   : > { %14532 = vmatpush3.bf16.xpose.msk.msra.mxu0 %vm16314_vm1, %v14527_v62  ;;  %v7258_v62 = vadd.f32 %v19648_v4, %v21013_v10  ;;  %v15480_v4 = vld [vmem:[%s20292_s9 + $0x100] sm:$0xff] }
0x1025   : > { %v14545_v60 = vpack.c.bf16 %v7383_v41, %v7378_v22  ;;  %v12903_v11 = vpop.f32.mrb[172].mxu0  ;;  %14535 = vmatprep.subr.msk.bf16.mxu0 %vm16314_vm1, %v14533_v44  ;;  %v15482_v41 = vld [vmem:[%s20292_s9 + $0x110] sm:$0xff] }
0x1026   : > { %v7393_v34 = vadd.f32 %v15478_v49, %v12903_v11  ;;  %v7387_v40 = vpop.f32.mrb[173].mxu0 }
0x1027   : > { %v7388_v25 = vadd.f32 %v15478_v49, %v7387_v40  ;;  %v15484_v40 = vld [vmem:[%s20292_s9 + $0x120] sm:$0xff] }
0x1029   : > { %v14551_v59 = vpack.c.bf16 %v7393_v34, %v7388_v25  ;;  %v12906_v43 = vpop.f32.mrb[174].mxu0 }
0x102a   : > { %v7403_v35 = vadd.f32 %v15478_v49, %v12906_v43  ;;  %v7397_v5 = vpop.f32.mrb[175].mxu0  ;;  %v15485_v43 = vld [vmem:[%s20292_s9 + $0x138] sm:$0xff] }
0x102b   : > { %v7398_v20 = vadd.f32 %v15478_v49, %v7397_v5  ;;  %v21005_v49 = vld [vmem:[#allocation116_spill] sm:$0xff] }
0x102c   : > { %14538 = vmatpush3.bf16.xpose.msk.msra.mxu0 %vm16314_vm1, %v14533_v44 }
0x102d   : > { %v14557_v38 = vpack.c.bf16 %v7403_v35, %v7398_v20  ;;  %14541 = vmatprep.subr.msk.bf16.mxu0 %vm16314_vm1, %v14539_v50  ;;  %v15486_v20 = vld [vmem:[%s20292_s9 + $0x130] sm:$0xff] }
0x1034   : > { %14544 = vmatpush3.bf16.xpose.msk.msra.mxu0 %vm16314_vm1, %v14539_v50 }
0x1035   : > { %14547 = vmatprep.subr.msk.bf16.mxu0 %vm16314_vm1, %v14545_v60 }
0x103c   : > { %14550 = vmatpush3.bf16.xpose.msk.msra.mxu0 %vm16314_vm1, %v14545_v60  ;;  %v15483_v60 = vld [vmem:[%s20292_s9 + $0x128] sm:$0xff] }
0x103d   : > { %14553 = vmatprep.subr.msk.bf16.mxu0 %vm16314_vm1, %v14551_v59 }
0x1044   : > { %14556 = vmatpush3.bf16.xpose.msk.msra.mxu0 %vm16314_vm1, %v14551_v59 }
0x1045   : > { %14559 = vmatprep.subr.msk.bf16.mxu0 %vm16314_vm1, %v14557_v38 }
0x104c   : > { %14562 = vmatpush3.bf16.xpose.msk.msra.mxu0 %vm16314_vm1, %v14557_v38 }
0x104d   : > { %14564 = vmatprep.subr.bf16.mxu0 %v20992_v15 }
0x1053   : > { %12996 = vmatmul.mubr.msk.f32.vlgmr.msra.gmra.mrb[176].mxu0 %vm412_vm0, %v7188_v39 }
0x1054   : > { %12998 = vmatprep.mubr.msk.f32.mxu0 %vm412_vm0, %v7193_v52  ;;  %14566 = vmatpush3.bf16.msra.mxu0 %v20992_v15  ;;  %v15488_v52 = vld [vmem:[%s20292_s9 + $0x140] sm:$0xff] }
0x1055   : > { %14568 = vmatprep.subr.bf16.mxu0 %v20996_v48 }
0x1057   : > { %12999 = vmatmul.mubr.msk.f32.gmra.mrb[178].mxu0 %vm412_vm0, %v7198_v30 }
0x1058   : > { %13001 = vmatprep.mubr.msk.f32.mxu0 %vm412_vm0, %v7203_v26  ;;  %14570 = vmatpush3.bf16.msra.mxu0 %v20996_v48  ;;  %v15489_v48 = vld [vmem:[%s20292_s9 + $0x158] sm:$0xff] }
0x1059   : > { %14572 = vmatprep.subr.bf16.mxu0 %v20999_v46 }
0x105b   : > { %13002 = vmatmul.mubr.msk.f32.gmra.mrb[180].mxu0 %vm412_vm0, %v7208_v14 }
0x105c   : > { %13004 = vmatprep.mubr.msk.f32.mxu0 %vm412_vm0, %v7213_v54  ;;  %14574 = vmatpush3.bf16.msra.mxu0 %v20999_v46 }
0x105d   : > { %14576 = vmatprep.subr.bf16.mxu0 %v21002_v6 }
0x105f   : > { %13005 = vmatmul.mubr.msk.f32.gmra.mrb[182].mxu0 %vm412_vm0, %v7218_v61  ;;  %v15492_v61 = vld [vmem:[%s20292_s9 + $0x160] sm:$0xff] }
0x1060   : > { %13007 = vmatprep.mubr.msk.f32.mxu0 %vm412_vm0, %v7223_v9  ;;  %14578 = vmatpush3.bf16.msra.mxu0 %v21002_v6  ;;  %v15493_v9 = vld [vmem:[%s20292_s9 + $0x178] sm:$0xff] }
0x1061   : > { %14580 = vmatprep.subr.bf16.mxu0 %v21005_v49 }
0x1063   : > { %13008 = vmatmul.mubr.msk.f32.gmra.mrb[184].mxu0 %vm412_vm0, %v7228_v1 }
0x1064   : > { %13010 = vmatprep.mubr.msk.f32.mxu0 %vm412_vm0, %v7233_v57  ;;  %14582 = vmatpush3.bf16.msra.mxu0 %v21005_v49  ;;  %v15494_v49 = vld [vmem:[%s20292_s9 + $0x170] sm:$0xff] }
0x1065   : > { %14584 = vmatprep.subr.bf16.mxu0 %v21008_v16 }
0x1067   : > { %13011 = vmatmul.mubr.msk.f32.gmra.mrb[186].mxu0 %vm412_vm0, %v7238_v19 }
0x1068   : > { %13013 = vmatprep.mubr.msk.f32.mxu0 %vm412_vm0, %v7243_v45  ;;  %14586 = vmatpush3.bf16.msra.mxu0 %v21008_v16 }
0x1069   : > { %14588 = vmatprep.subr.bf16.mxu0 %v21011_v51 }
0x106b   : > { %13014 = vmatmul.mubr.msk.f32.gmra.mrb[188].mxu0 %vm412_vm0, %v7248_v21 }
0x106c   : > { %13016 = vmatprep.mubr.msk.f32.mxu0 %vm412_vm0, %v7253_v27  ;;  %14590 = vmatpush3.bf16.msra.mxu0 %v21011_v51 }
0x106d   : > { %14592 = vmatprep.subr.bf16.mxu0 %v21014_v31 }
0x106f   : > { %13017 = vmatmul.mubr.msk.f32.gmra.mrb[190].mxu0 %vm412_vm0, %v7258_v62 }
0x1070   : > { %14594 = vmatpush3.bf16.msra.mxu0 %v21014_v31 }
0x1071   : > { %14693 = vmatprep.subr.msk.bf16.mxu0 %vm16314_vm1, %v21015_v23 }
0x1126   : > { %v12997_v32 = vpop.f32.mrb[176].mxu0 }
0x1127   : > { %v19756_v44 = vadd.f32 %v15479_v17, %v12997_v32  ;;  %v7713_v29 = vpop.f32.mrb[177].mxu0 }
0x1128   : > { %v19761_v63 = vadd.f32 %v15480_v4, %v7713_v29 }
0x1129   : > { %7794 = vmax.xlane.f32.xlu1 %v19756_v44 }
0x112a   : > { %v13000_v47 = vpop.f32.mrb[178].mxu0  ;;  %7792 = vmax.xlane.f32.xlu0 %v19761_v63 }
0x112b   : > { %v19768_v50 = vadd.f32 %v15481_v37, %v13000_v47  ;;  %v7723_v0 = vpop.f32.mrb[179].mxu0 }
0x112c   : > { %v19773_v56 = vadd.f32 %v15482_v41, %v7723_v0 }
0x112d   : > { %7798 = vmax.xlane.f32.xlu1 %v19768_v50 }
0x112e   : > { %v13003_v22 = vpop.f32.mrb[180].mxu0  ;;  %7796 = vmax.xlane.f32.xlu0 %v19773_v56 }
0x112f   : > { %v19780_v11 = vadd.f32 %v15483_v60, %v13003_v22  ;;  %v7733_v34 = vpop.f32.mrb[181].mxu0 }
0x1130   : > { %v19785_v25 = vadd.f32 %v15484_v40, %v7733_v34 }
0x1131   : > { %7802 = vmax.xlane.f32.xlu1 %v19780_v11 }
0x1132   : > { %v13006_v59 = vpop.f32.mrb[182].mxu0  ;;  %7800 = vmax.xlane.f32.xlu0 %v19785_v25 }
0x1133   : > { %v19792_v35 = vadd.f32 %v15485_v43, %v13006_v59  ;;  %v7743_v5 = vpop.f32.mrb[183].mxu0 }
0x1134   : > { %v19797_v38 = vadd.f32 %v15486_v20, %v7743_v5 }
0x1135   : > { %7806 = vmax.xlane.f32.xlu1 %v19792_v35 }
0x1136   : > { %v13009_v15 = vpop.f32.mrb[184].mxu0  ;;  %7804 = vmax.xlane.f32.xlu0 %v19797_v38 }
0x1137   : > { %v19804_v39 = vadd.f32 %v15487_v33, %v13009_v15  ;;  %v7753_v13 = vpop.f32.mrb[185].mxu0 }
0x1138   : > { %v19809_v28 = vadd.f32 %v15488_v52, %v7753_v13 }
0x1139   : > { %7810 = vmax.xlane.f32.xlu1 %v19804_v39 }
0x113a   : > { %v13012_v30 = vpop.f32.mrb[186].mxu0  ;;  %7808 = vmax.xlane.f32.xlu0 %v19809_v28 }
0x113b   : > { %v19816_v24 = vadd.f32 %v15489_v48, %v13012_v30  ;;  %v7763_v26 = vpop.f32.mrb[187].mxu0 }
0x113c   : > { %v19821_v14 = vadd.f32 %v15490_v53, %v7763_v26 }
0x113d   : > { %7814 = vmax.xlane.f32.xlu1 %v19816_v24 }
0x113e   : > { %v13015_v46 = vpop.f32.mrb[188].mxu0  ;;  %7812 = vmax.xlane.f32.xlu0 %v19821_v14 }
0x113f   : > { %v19828_v54 = vadd.f32 %v15491_v36, %v13015_v46  ;;  %v7773_v55 = vpop.f32.mrb[189].mxu0 }
0x1140   : > { %v19833_v6 = vadd.f32 %v15492_v61, %v7773_v55 }
0x1141   : > { %7818 = vmax.xlane.f32.xlu1 %v19828_v54 }
0x1142   : > { %v13018_v2 = vpop.f32.mrb[190].mxu0  ;;  %7816 = vmax.xlane.f32.xlu0 %v19833_v6 }
0x1143   : > { %v19840_v12 = vadd.f32 %v15493_v9, %v13018_v2  ;;  %v7783_v1 = vpop.f32.mrb[191].mxu0 }
0x1144   : > { %v19845_v8 = vadd.f32 %v15494_v49, %v7783_v1 }
0x1145   : > { %7822 = vmax.xlane.f32.xlu1 %v19840_v12 }
0x1146   : > { %7820 = vmax.xlane.f32.xlu0 %v19845_v8 }
0x11b6   : > { %v7795_v57 = vpop.xlane.xlu1 %7794 }
0x11b7   : > { %v7825_v42 = vsub.f32 %v19756_v44, %v7795_v57  ;;  %v7793_v19 = vpop.xlane.xlu0 %7792 }
0x11b8   : > { %v7824_v16 = vsub.f32 %v19761_v63, %v7793_v19 }
0x11b9   : > { %v7842_v58 = vmul.f32 1.442695, %v7825_v42 }
0x11ba   : > { %v7840_v45 = vmul.f32 1.442695, %v7824_v16  ;;  %v7799_v18 = vpop.xlane.xlu1 %7798 }
0x11bb   : > { %15308 = vpow2.f32 %v7842_v58  ;;  %v7827_v21 = vsub.f32 %v19768_v50, %v7799_v18  ;;  %v7797_v51 = vpop.xlane.xlu0 %7796 }
0x11bc   : > { %15310 = vpow2.f32 %v7840_v45  ;;  %v7826_v3 = vsub.f32 %v19773_v56, %v7797_v51 }
0x11bd   : > { %v7846_v27 = vmul.f32 1.442695, %v7827_v21 }
0x11be   : > { %v7844_v10 = vmul.f32 1.442695, %v7826_v3  ;;  %v7803_v62 = vpop.xlane.xlu1 %7802 }
0x11bf   : > { %15312 = vpow2.f32 %v7846_v27  ;;  %v7829_v31 = vsub.f32 %v19780_v11, %v7803_v62  ;;  %v7801_v32 = vpop.xlane.xlu0 %7800 }
0x11c0   : > { %15314 = vpow2.f32 %v7844_v10  ;;  %v7828_v17 = vsub.f32 %v19785_v25, %v7801_v32 }
0x11c1   : > { %v7850_v44 = vmul.f32 1.442695, %v7829_v31 }
0x11c2   : > { %v7848_v29 = vmul.f32 1.442695, %v7828_v17  ;;  %v7807_v4 = vpop.xlane.xlu1 %7806 }
0x11c3   : > { %15316 = vpow2.f32 %v7850_v44  ;;  %v7831_v63 = vsub.f32 %v19792_v35, %v7807_v4  ;;  %v7805_v47 = vpop.xlane.xlu0 %7804 }
0x11c4   : > { %15318 = vpow2.f32 %v7848_v29  ;;  %v7830_v37 = vsub.f32 %v19797_v38, %v7805_v47 }
0x11c5   : > { %v19857_v50 = vpop.eup %15308  ;;  %v7854_v0 = vmul.f32 1.442695, %v7831_v63 }
0x11c6   : > { %v19859_v41 = vpop.eup %15310  ;;  %v7852_v56 = vmul.f32 1.442695, %v7830_v37  ;;  %v7811_v22 = vpop.xlane.xlu1 %7810  ;;  %7874 = vadd.xlane.f32.xlu1 %v19857_v50 }
0x11c7   : > { %15320 = vpow2.f32 %v7854_v0  ;;  %v7833_v60 = vsub.f32 %v19804_v39, %v7811_v22  ;;  %7872 = vadd.xlane.f32.xlu0 %v19859_v41  ;;  %v7809_v11 = vpop.xlane.xlu0 %7808 }
0x11c8   : > { %15322 = vpow2.f32 %v7852_v56  ;;  %v7832_v34 = vsub.f32 %v19809_v28, %v7809_v11 }
0x11c9   : > { %v19865_v40 = vpop.eup %15312  ;;  %v7858_v25 = vmul.f32 1.442695, %v7833_v60 }
0x11ca   : > { %v19867_v59 = vpop.eup %15314  ;;  %v7856_v43 = vmul.f32 1.442695, %v7832_v34  ;;  %v7815_v35 = vpop.xlane.xlu1 %7814  ;;  %7878 = vadd.xlane.f32.xlu1 %v19865_v40 }
0x11cb   : > { %15324 = vpow2.f32 %v7858_v25  ;;  %v7835_v5 = vsub.f32 %v19816_v24, %v7815_v35  ;;  %7876 = vadd.xlane.f32.xlu0 %v19867_v59  ;;  %v7813_v20 = vpop.xlane.xlu0 %7812 }
0x11cc   : > { %15326 = vpow2.f32 %v7856_v43  ;;  %v7834_v38 = vsub.f32 %v19821_v14, %v7813_v20 }
0x11cd   : > { %v19873_v15 = vpop.eup %15316  ;;  %v7862_v33 = vmul.f32 1.442695, %v7835_v5 }
0x11ce   : > { %v19875_v39 = vpop.eup %15318  ;;  %v7860_v13 = vmul.f32 1.442695, %v7834_v38  ;;  %v7819_v52 = vpop.xlane.xlu1 %7818  ;;  %7882 = vadd.xlane.f32.xlu1 %v19873_v15 }
0x11cf   : > { %15328 = vpow2.f32 %v7862_v33  ;;  %v7837_v28 = vsub.f32 %v19828_v54, %v7819_v52  ;;  %7880 = vadd.xlane.f32.xlu0 %v19875_v39  ;;  %v7817_v30 = vpop.xlane.xlu0 %7816 }
0x11d0   : > { %15330 = vpow2.f32 %v7860_v13  ;;  %v7836_v48 = vsub.f32 %v19833_v6, %v7817_v30 }
0x11d1   : > { %v19881_v24 = vpop.eup %15320  ;;  %v7866_v26 = vmul.f32 1.442695, %v7837_v28 }
0x11d2   : > { %v19883_v53 = vpop.eup %15322  ;;  %v7864_v14 = vmul.f32 1.442695, %v7836_v48  ;;  %7886 = vadd.xlane.f32.xlu1 %v19881_v24  ;;  %v7823_v46 = vpop.xlane.xlu1 %7822 }
0x11d3   : > { %15332 = vpow2.f32 %v7866_v26  ;;  %v7839_v36 = vsub.f32 %v19840_v12, %v7823_v46  ;;  %7884 = vadd.xlane.f32.xlu0 %v19883_v53  ;;  %v7821_v54 = vpop.xlane.xlu0 %7820 }
0x11d4   : > { %15334 = vpow2.f32 %v7864_v14  ;;  %v7838_v55 = vsub.f32 %v19845_v8, %v7821_v54  ;;  %v21016_v14 = vld [vmem:[#allocation154_spill] sm:$0xff] }
0x11d5   : > { %v19889_v61 = vpop.eup %15324  ;;  %v7870_v6 = vmul.f32 1.442695, %v7839_v36 }
0x11d6   : > { %v19891_v2 = vpop.eup %15326  ;;  %v7868_v9 = vmul.f32 1.442695, %v7838_v55  ;;  %7890 = vadd.xlane.f32.xlu1 %v19889_v61 }
0x11d7   : > { %15336 = vpow2.f32 %v7870_v6  ;;  %7888 = vadd.xlane.f32.xlu0 %v19891_v2 }
0x11d8   : > { %15338 = vpow2.f32 %v7868_v9 }
0x11d9   : > { %v19895_v1 = vpop.eup %15328 }
0x11da   : > { %v19897_v12 = vpop.eup %15330  ;;  %7894 = vadd.xlane.f32.xlu1 %v19895_v1 }
0x11db   : > { %7892 = vadd.xlane.f32.xlu0 %v19897_v12 }
0x11dd   : > { %v19901_v49 = vpop.eup %15332 }
0x11de   : > { %v19903_v8 = vpop.eup %15334  ;;  %7898 = vadd.xlane.f32.xlu1 %v19901_v49 }
0x11df   : > { %7896 = vadd.xlane.f32.xlu0 %v19903_v8 }
0x11e1   : > { %v19907_v57 = vpop.eup %15336 }
0x11e2   : > { %v19909_v42 = vpop.eup %15338  ;;  %7902 = vadd.xlane.f32.xlu1 %v19907_v57 }
0x11e3   : > { %7900 = vadd.xlane.f32.xlu0 %v19909_v42 }
0x1253   : > { %v7875_v19 = vpop.xlane.xlu1 %7874 }
0x1254   : > { %15340 = vrcp.f32 %v7875_v19  ;;  %v7873_v16 = vpop.xlane.xlu0 %7872 }
0x1255   : > { %15342 = vrcp.f32 %v7873_v16 }
0x1257   : > { %v7879_v58 = vpop.xlane.xlu1 %7878 }
0x1258   : > { %15344 = vrcp.f32 %v7879_v58  ;;  %v7877_v45 = vpop.xlane.xlu0 %7876 }
0x1259   : > { %15346 = vrcp.f32 %v7877_v45 }
0x125b   : > { %v7883_v18 = vpop.xlane.xlu1 %7882 }
0x125c   : > { %15348 = vrcp.f32 %v7883_v18  ;;  %v7881_v21 = vpop.xlane.xlu0 %7880 }
0x125d   : > { %15350 = vrcp.f32 %v7881_v21 }
0x125e   : > { %v15341_v51 = vpop.eup %15340 }
0x125f   : > { %v15343_v3 = vpop.eup %15342  ;;  %v7921_v27 = vmul.f32 %v15341_v51, %v7875_v19  ;;  %v7887_v10 = vpop.xlane.xlu1 %7886 }
0x1260   : > { %v7920_v62 = vmul.f32 %v15343_v3, %v7873_v16  ;;  %15352 = vrcp.f32 %v7887_v10  ;;  %v7885_v31 = vpop.xlane.xlu0 %7884 }
0x1261   : > { %v7937_v32 = vsub.f32 2.0, %v7921_v27  ;;  %15354 = vrcp.f32 %v7885_v31 }
0x1262   : > { %v15345_v17 = vpop.eup %15344  ;;  %v7936_v44 = vsub.f32 2.0, %v7920_v62 }
0x1263   : > { %v15347_v29 = vpop.eup %15346  ;;  %v7953_v4 = vmul.f32 %v15341_v51, %v7937_v32  ;;  %v7923_v63 = vmul.f32 %v15345_v17, %v7879_v58  ;;  %v7891_v47 = vpop.xlane.xlu1 %7890 }
0x1264   : > { %v7952_v37 = vmul.f32 %v15343_v3, %v7936_v44  ;;  %v7922_v0 = vmul.f32 %v15347_v29, %v7877_v45  ;;  %15356 = vrcp.f32 %v7891_v47  ;;  %v7889_v56 = vpop.xlane.xlu0 %7888 }
0x1265   : > { %v7939_v22 = vsub.f32 2.0, %v7923_v63  ;;  %15358 = vrcp.f32 %v7889_v56  ;;  %v7969_v43 = vmul.f32 %v19857_v50, %v7953_v4 }
0x1266   : > { %v15349_v60 = vpop.eup %15348  ;;  %v7938_v11 = vsub.f32 2.0, %v7922_v0  ;;  %v7968_v34 = vmul.f32 %v19859_v41, %v7952_v37 }
0x1267   : > { %v15351_v25 = vpop.eup %15350  ;;  %v7955_v35 = vmul.f32 %v15345_v17, %v7939_v22  ;;  %v7925_v5 = vmul.f32 %v15349_v60, %v7883_v18  ;;  %v7895_v20 = vpop.xlane.xlu1 %7894 }
0x1268   : > { %v7954_v38 = vmul.f32 %v15347_v29, %v7938_v11  ;;  %v7924_v33 = vmul.f32 %v15351_v25, %v7881_v21  ;;  %15360 = vrcp.f32 %v7895_v20  ;;  %13051 = vmatprep.mubr.f32.mxu0 %v7968_v34  ;;  %v7893_v13 = vpop.xlane.xlu0 %7892 }
0x1269   : > { %v7941_v52 = vsub.f32 2.0, %v7925_v5  ;;  %15362 = vrcp.f32 %v7893_v13  ;;  %13052 = vmatmul.mubr.f32.vlgmr.msra.gmra.mrb[144].mxu0 %v7969_v43  ;;  %v7971_v36 = vmul.f32 %v19865_v40, %v7955_v35 }
0x126a   : > { %v15353_v28 = vpop.eup %15352  ;;  %v7940_v30 = vsub.f32 2.0, %v7924_v33  ;;  %14696 = vmatpush3.bf16.xpose.msk.msra.mxu0 %vm16314_vm1, %v21015_v23  ;;  %v7970_v41 = vmul.f32 %v19867_v59, %v7954_v38  ;;  %v21018_v38 = vld [vmem:[#allocation134_spill] sm:$0xff] }
0x126b   : > { %v15355_v50 = vpop.eup %15354  ;;  %v7957_v48 = vmul.f32 %v15349_v60, %v7941_v52  ;;  %v7927_v26 = vmul.f32 %v15353_v28, %v7887_v10  ;;  %14699 = vmatprep.subr.msk.bf16.mxu0 %vm16314_vm1, %v21016_v14  ;;  %v7899_v46 = vpop.xlane.xlu1 %7898 }
0x126c   : > { %v7956_v54 = vmul.f32 %v15351_v25, %v7940_v30  ;;  %v7926_v55 = vmul.f32 %v15355_v50, %v7885_v31  ;;  %15364 = vrcp.f32 %v7899_v46  ;;  %13054 = vmatprep.mubr.f32.mxu0 %v7970_v41  ;;  %v7897_v6 = vpop.xlane.xlu0 %7896 }
0x126d   : > { %v7943_v9 = vsub.f32 2.0, %v7927_v26  ;;  %15366 = vrcp.f32 %v7897_v6  ;;  %13055 = vmatmul.mubr.f32.gmra.mrb[146].mxu0 %v7971_v36  ;;  %v7973_v21 = vmul.f32 %v19873_v15, %v7957_v48  ;;  %v21017_v15 = vld [vmem:[#allocation135_spill] sm:$0xff] }
0x126e   : > { %v15357_v23 = vpop.eup %15356  ;;  %v7942_v59 = vsub.f32 2.0, %v7926_v55  ;;  %v7972_v19 = vmul.f32 %v19875_v39, %v7956_v54  ;;  %v21019_v48 = vld [vmem:[#allocation155_spill] sm:$0xff] }
0x126f   : > { %v15359_v16 = vpop.eup %15358  ;;  %v7959_v58 = vmul.f32 %v15353_v28, %v7943_v9  ;;  %v7929_v45 = vmul.f32 %v15357_v23, %v7891_v47  ;;  %v7903_v18 = vpop.xlane.xlu1 %7902  ;;  %v21024_v36 = vld [vmem:[#allocation139_spill] sm:$0xff] }
0x1270   : > { %v7958_v51 = vmul.f32 %v15355_v50, %v7942_v59  ;;  %v7928_v40 = vmul.f32 %v15359_v16, %v7889_v56  ;;  %15368 = vrcp.f32 %v7903_v18  ;;  %13057 = vmatprep.mubr.f32.mxu0 %v7972_v19  ;;  %v7901_v3 = vpop.xlane.xlu0 %7900  ;;  %v21025_v54 = vld [vmem:[#allocation127_spill] sm:$0xff]  ;;  %v21028_v19 = vld [vmem:[#allocation138_spill] sm:$0xff] }
0x1271   : > { %v7945_v27 = vsub.f32 2.0, %v7929_v45  ;;  %15370 = vrcp.f32 %v7901_v3  ;;  %13058 = vmatmul.mubr.f32.gmra.mrb[148].mxu0 %v7973_v21  ;;  %v7975_v44 = vmul.f32 %v19881_v24, %v7959_v58  ;;  %v21032_v21 = vld [vmem:[#allocation149_spill] sm:$0xff] }
0x1272   : > { %v15361_v10 = vpop.eup %15360  ;;  %v7944_v62 = vsub.f32 2.0, %v7928_v40  ;;  %14702 = vmatpush3.bf16.xpose.msk.msra.mxu0 %vm16314_vm1, %v21016_v14  ;;  %v7974_v39 = vmul.f32 %v19883_v53, %v7958_v51  ;;  %v21033_v40 = vld [vmem:[#allocation129_spill] sm:$0xff] }
0x1273   : > { %v15363_v31 = vpop.eup %15362  ;;  %v7961_v32 = vmul.f32 %v15357_v23, %v7945_v27  ;;  %v7931_v17 = vmul.f32 %v15361_v10, %v7895_v20  ;;  %14705 = vmatprep.subr.msk.bf16.mxu0 %vm16314_vm1, %v21017_v15  ;;  %v21027_v23 = vld [vmem:[#allocation145_spill] sm:$0xff] }
0x1274   : > { %v7960_v29 = vmul.f32 %v15359_v16, %v7944_v62  ;;  %v7930_v4 = vmul.f32 %v15363_v31, %v7893_v13  ;;  %13060 = vmatprep.mubr.f32.mxu0 %v7974_v39  ;;  %v21029_v16 = vld [vmem:[#allocation148_spill] sm:$0xff]  ;;  %v21034_v27 = vld [vmem:[#allocation141_spill] sm:$0xff]  ;;  %v21036_v39 = vld [vmem:[#allocation150_spill] sm:$0xff] }
0x1275   : > { %v7947_v63 = vsub.f32 2.0, %v7931_v17  ;;  %13061 = vmatmul.mubr.f32.gmra.mrb[150].mxu0 %v7975_v44  ;;  %v7977_v60 = vmul.f32 %v19889_v61, %v7961_v32  ;;  %v21037_v32 = vld [vmem:[#allocation140_spill] sm:$0xff] }
0x1276   : > { %v15365_v47 = vpop.eup %15364  ;;  %v7946_v37 = vsub.f32 2.0, %v7930_v4  ;;  %v7976_v0 = vmul.f32 %v19891_v2, %v7960_v29  ;;  %v21038_v17 = vld [vmem:[#allocation128_spill] sm:$0xff]  ;;  %v21040_v4 = vld [vmem:[#allocation158_spill] sm:$0xff] }
0x1277   : > { %v15367_v56 = vpop.eup %15366  ;;  %v7963_v53 = vmul.f32 %v15361_v10, %v7947_v63  ;;  %v7933_v22 = vmul.f32 %v15365_v47, %v7899_v46  ;;  %v21023_v46 = vld [vmem:[#allocation156_spill] sm:$0xff]  ;;  %v21035_v10 = vld [vmem:[#allocation151_spill] sm:$0xff]  ;;  %v21041_v63 = vld [vmem:[#allocation130_spill] sm:$0xff] }
0x1278   : > { %v7962_v11 = vmul.f32 %v15363_v31, %v7946_v37  ;;  %v7932_v34 = vmul.f32 %v15367_v56, %v7897_v6  ;;  %13063 = vmatprep.mubr.f32.mxu0 %v7976_v0  ;;  %v21026_v6 = vld [vmem:[#allocation146_spill] sm:$0xff]  ;;  %v21039_v44 = vld [vmem:[#allocation152_spill] sm:$0xff]  ;;  %v21042_v37 = vld [vmem:[#allocation131_spill] sm:$0xff] }
0x1279   : > { %v7949_v25 = vsub.f32 2.0, %v7933_v22  ;;  %13064 = vmatmul.mubr.f32.gmra.mrb[152].mxu0 %v7977_v60  ;;  %v7979_v61 = vmul.f32 %v19895_v1, %v7963_v53  ;;  %v21044_v53 = vld [vmem:[#allocation133_spill] sm:$0xff] }
0x127a   : > { %v15369_v24 = vpop.eup %15368  ;;  %v7948_v43 = vsub.f32 2.0, %v7932_v34  ;;  %14708 = vmatpush3.bf16.xpose.msk.msra.mxu0 %vm16314_vm1, %v21017_v15  ;;  %v7978_v35 = vmul.f32 %v19897_v12, %v7962_v11  ;;  %v21045_v60 = vld [vmem:[#allocation153_spill] sm:$0xff]  ;;  %v21046_v34 = vld [vmem:[#allocation142_spill] sm:$0xff] }
0x127b   : > { %v15371_v5 = vpop.eup %15370  ;;  %v7965_v2 = vmul.f32 %v15365_v47, %v7949_v25  ;;  %v7935_v20 = vmul.f32 %v15369_v24, %v7903_v18  ;;  %14711 = vmatprep.subr.msk.bf16.mxu0 %vm16314_vm1, %v21018_v38  ;;  %v21031_v18 = vld [vmem:[#allocation157_spill] sm:$0xff] }
0x127c   : > { %v7964_v33 = vmul.f32 %v15367_v56, %v7948_v43  ;;  %v7934_v13 = vmul.f32 %v15371_v5, %v7901_v3  ;;  %13066 = vmatprep.mubr.f32.mxu0 %v7978_v35  ;;  %v21043_v56 = vld [vmem:[#allocation143_spill] sm:$0xff] }
0x127d   : > { %v7951_v52 = vsub.f32 2.0, %v7935_v20  ;;  %13067 = vmatmul.mubr.f32.gmra.mrb[154].mxu0 %v7979_v61  ;;  %v7981_v12 = vmul.f32 %v19901_v49, %v7965_v2  ;;  %v21020_v49 = vld [vmem:[#allocation144_spill] sm:$0xff]  ;;  %v15496_v35 = vld [vmem:[%s20292_s9 + $0x188] sm:$0xff]  ;;  %v15497_v20 = vld [vmem:[%s20292_s9 + $0x180] sm:$0xff] }
0x127e   : > { %v7950_v28 = vsub.f32 2.0, %v7934_v13  ;;  %v7980_v30 = vmul.f32 %v19903_v8, %v7964_v33  ;;  %v15495_v8 = vld [vmem:[%s20287_s4 + $0x3] ss:$0 sm:$0xff]  ;;  %v15498_v33 = vld [vmem:[%s20292_s9 + $0x198] sm:$0xff] }
0x127f   : > { %v7967_v41 = vmul.f32 %v15369_v24, %v7951_v52  ;;  %v8212_v14 = vadd.f32 %v15495_v8, %v21020_v49  ;;  %v8217_v55 = vadd.f32 %v15495_v8, %v21025_v54  ;;  %v8222_v9 = vadd.f32 %v15495_v8, %v21026_v6  ;;  %v15502_v49 = vld [vmem:[%s20292_s9 + $0x1b8] sm:$0xff]  ;;  %v15504_v54 = vld [vmem:[%s20292_s9 + $0x1c8] sm:$0xff] }
0x1280   : > { %v7966_v50 = vmul.f32 %v15371_v5, %v7950_v28  ;;  %13069 = vmatprep.mubr.f32.mxu0 %v7980_v30  ;;  %v8227_v59 = vadd.f32 %v15495_v8, %v21027_v23  ;;  %v8232_v58 = vadd.f32 %v15495_v8, %v21029_v16  ;;  %v8237_v45 = vadd.f32 %v15495_v8, %v21030_v7  ;;  %v15499_v28 = vld [vmem:[%s20292_s9 + $0x190] sm:$0xff] }
0x1281   : > { %13070 = vmatmul.mubr.f32.gmra.mrb[156].mxu0 %v7981_v12  ;;  %v7983_v26 = vmul.f32 %v19907_v57, %v7967_v41  ;;  %v21022_v57 = vld [vmem:[#allocation136_spill] sm:$0xff]  ;;  %v8242_v51 = vadd.f32 %v15495_v8, %v21032_v21  ;;  %v8247_v3 = vadd.f32 %v15495_v8, %v21033_v40  ;;  %v8252_v62 = vadd.f32 %v15495_v8, %v21035_v10  ;;  %v15500_v12 = vld [vmem:[%s20292_s9 + $0x1a8] sm:$0xff]  ;;  %v15508_v40 = vld [vmem:[%s20292_s9 + $0x1f8] sm:$0xff] }
0x1282   : > { %14714 = vmatpush3.bf16.xpose.msk.msra.mxu0 %vm16314_vm1, %v21018_v38  ;;  %v7982_v1 = vmul.f32 %v19909_v42, %v7966_v50  ;;  %v21021_v42 = vld [vmem:[#allocation137_spill] sm:$0xff]  ;;  %v8257_v31 = vadd.f32 %v15495_v8, %v21036_v39  ;;  %v8262_v15 = vadd.f32 %v15495_v8, %v21038_v17  ;;  %v8267_v29 = vadd.f32 %v15495_v8, %v21039_v44  ;;  %v15507_v7 = vld [vmem:[%s20292_s9 + $0x1d0] sm:$0xff]  ;;  %v15510_v39 = vld [vmem:[%s20292_s9 + $0x1e8] sm:$0xff] }
0x1283   : > { %14717 = vmatprep.subr.msk.bf16.mxu0 %vm16314_vm1, %v21019_v48  ;;  %v8272_v47 = vadd.f32 %v15495_v8, %v21041_v63  ;;  %v8277_v0 = vadd.f32 %v15495_v8, %v21042_v37  ;;  %v8282_v22 = vadd.f32 %v15495_v8, %v21044_v53  ;;  %v8287_v11 = vadd.f32 %v15495_v8, %v21045_v60  ;;  %v15509_v10 = vld [vmem:[%s20292_s9 + $0x1f0] sm:$0xff] }
0x1284   : > { %13072 = vmatprep.mubr.f32.mxu0 %v7982_v1 }
0x1285   : > { %13073 = vmatmul.mubr.f32.gmra.mrb[158].mxu0 %v7983_v26 }
0x1286   : > { %13275 = vmatprep.mubr.msk.f32.mxu0 %vm412_vm0, %v8212_v14 }
0x128a   : > { %14720 = vmatpush3.bf16.xpose.msk.msra.mxu0 %vm16314_vm1, %v21019_v48  ;;  %v15501_v48 = vld [vmem:[%s20292_s9 + $0x1a0] sm:$0xff] }
0x128b   : > { %14723 = vmatprep.subr.msk.bf16.mxu0 %vm16314_vm1, %v21021_v42 }
0x1292   : > { %14726 = vmatpush3.bf16.xpose.msk.msra.mxu0 %vm16314_vm1, %v21021_v42 }
0x1293   : > { %14729 = vmatprep.subr.msk.bf16.mxu0 %vm16314_vm1, %v21022_v57 }
0x129a   : > { %14732 = vmatpush3.bf16.xpose.msk.msra.mxu0 %vm16314_vm1, %v21022_v57  ;;  %v15503_v57 = vld [vmem:[%s20292_s9 + $0x1b0] sm:$0xff] }
0x129b   : > { %14735 = vmatprep.subr.msk.bf16.mxu0 %vm16314_vm1, %v21023_v46 }
0x12a2   : > { %14738 = vmatpush3.bf16.xpose.msk.msra.mxu0 %vm16314_vm1, %v21023_v46 }
0x12a3   : > { %14740 = vmatprep.subr.bf16.mxu0 %v21024_v36 }
0x12a9   : > { %13276 = vmatmul.mubr.msk.f32.vlgmr.msra.gmra.mrb[192].mxu0 %vm412_vm0, %v8217_v55 }
0x12aa   : > { %13278 = vmatprep.mubr.msk.f32.mxu0 %vm412_vm0, %v8222_v9  ;;  %14742 = vmatpush3.bf16.msra.mxu0 %v21024_v36  ;;  %v15505_v9 = vld [vmem:[%s20292_s9 + $0x1c0] sm:$0xff] }
0x12ab   : > { %14744 = vmatprep.subr.bf16.mxu0 %v21028_v19 }
0x12ad   : > { %13279 = vmatmul.mubr.msk.f32.gmra.mrb[194].mxu0 %vm412_vm0, %v8227_v59 }
0x12ae   : > { %13281 = vmatprep.mubr.msk.f32.mxu0 %vm412_vm0, %v8232_v58  ;;  %14746 = vmatpush3.bf16.msra.mxu0 %v21028_v19  ;;  %v15506_v19 = vld [vmem:[%s20292_s9 + $0x1d8] sm:$0xff] }
0x12af   : > { %14748 = vmatprep.subr.bf16.mxu0 %v21031_v18 }
0x12b1   : > { %13282 = vmatmul.mubr.msk.f32.gmra.mrb[196].mxu0 %vm412_vm0, %v8237_v45 }
0x12b2   : > { %13284 = vmatprep.mubr.msk.f32.mxu0 %vm412_vm0, %v8242_v51  ;;  %14750 = vmatpush3.bf16.msra.mxu0 %v21031_v18 }
0x12b3   : > { %14752 = vmatprep.subr.bf16.mxu0 %v21034_v27 }
0x12b5   : > { %13285 = vmatmul.mubr.msk.f32.gmra.mrb[198].mxu0 %vm412_vm0, %v8247_v3 }
0x12b6   : > { %13287 = vmatprep.mubr.msk.f32.mxu0 %vm412_vm0, %v8252_v62  ;;  %14754 = vmatpush3.bf16.msra.mxu0 %v21034_v27 }
0x12b7   : > { %14756 = vmatprep.subr.bf16.mxu0 %v21037_v32 }
0x12b9   : > { %13288 = vmatmul.mubr.msk.f32.gmra.mrb[200].mxu0 %vm412_vm0, %v8257_v31 }
0x12ba   : > { %13290 = vmatprep.mubr.msk.f32.mxu0 %vm412_vm0, %v8262_v15  ;;  %14758 = vmatpush3.bf16.msra.mxu0 %v21037_v32  ;;  %v15511_v32 = vld [vmem:[%s20292_s9 + $0x1e0] sm:$0xff] }
0x12bb   : > { %14760 = vmatprep.subr.bf16.mxu0 %v21040_v4 }
0x12bd   : > { %13291 = vmatmul.mubr.msk.f32.gmra.mrb[202].mxu0 %vm412_vm0, %v8267_v29 }
0x12be   : > { %13293 = vmatprep.mubr.msk.f32.mxu0 %vm412_vm0, %v8272_v47  ;;  %14762 = vmatpush3.bf16.msra.mxu0 %v21040_v4 }
0x12bf   : > { %14764 = vmatprep.subr.bf16.mxu0 %v21043_v56 }
0x12c1   : > { %13294 = vmatmul.mubr.msk.f32.gmra.mrb[204].mxu0 %vm412_vm0, %v8277_v0 }
0x12c2   : > { %13296 = vmatprep.mubr.msk.f32.mxu0 %vm412_vm0, %v8282_v22  ;;  %14766 = vmatpush3.bf16.msra.mxu0 %v21043_v56 }
0x12c3   : > { %14768 = vmatprep.subr.bf16.mxu0 %v21046_v34 }
0x12c5   : > { %13297 = vmatmul.mubr.msk.f32.gmra.mrb[206].mxu0 %vm412_vm0, %v8287_v11 }
0x12c6   : > { %14770 = vmatpush3.bf16.msra.mxu0 %v21046_v34 }
0x1358   : > { %v20025_v25 = vpop.f32.mrb[158].mxu0 }
0x1359   : > { %v20027_v24 = vpop.f32.mrb[159].mxu0 }
0x137c   : > { %v13277_v43 = vpop.f32.mrb[192].mxu0 }
0x137d   : > { %v20032_v5 = vadd.f32 %v15496_v35, %v13277_v43  ;;  %v8742_v2 = vpop.f32.mrb[193].mxu0 }
0x137e   : > { %v20037_v38 = vadd.f32 %v15497_v20, %v8742_v2 }
0x137f   : > { %8823 = vmax.xlane.f32.xlu1 %v20032_v5 }
0x1380   : > { %v13280_v61 = vpop.f32.mrb[194].mxu0  ;;  %8821 = vmax.xlane.f32.xlu0 %v20037_v38 }
0x1381   : > { %v20044_v13 = vadd.f32 %v15498_v33, %v13280_v61  ;;  %v8752_v52 = vpop.f32.mrb[195].mxu0 }
0x1382   : > { %v20049_v30 = vadd.f32 %v15499_v28, %v8752_v52 }
0x1383   : > { %8827 = vmax.xlane.f32.xlu1 %v20044_v13 }
0x1384   : > { %v13283_v41 = vpop.f32.mrb[196].mxu0  ;;  %8825 = vmax.xlane.f32.xlu0 %v20049_v30 }
0x1385   : > { %v20056_v50 = vadd.f32 %v15500_v12, %v13283_v41  ;;  %v8762_v1 = vpop.f32.mrb[197].mxu0 }
0x1386   : > { %v20061_v26 = vadd.f32 %v15501_v48, %v8762_v1 }
0x1387   : > { %8831 = vmax.xlane.f32.xlu1 %v20056_v50 }
0x1388   : > { %v13286_v8 = vpop.f32.mrb[198].mxu0  ;;  %8829 = vmax.xlane.f32.xlu0 %v20061_v26 }
0x1389   : > { %v20068_v14 = vadd.f32 %v15502_v49, %v13286_v8  ;;  %v8772_v42 = vpop.f32.mrb[199].mxu0 }
0x138a   : > { %v20073_v46 = vadd.f32 %v15503_v57, %v8772_v42 }
0x138b   : > { %8835 = vmax.xlane.f32.xlu1 %v20068_v14 }
0x138c   : > { %v13289_v36 = vpop.f32.mrb[200].mxu0  ;;  %8833 = vmax.xlane.f32.xlu0 %v20073_v46 }
0x138d   : > { %v20080_v55 = vadd.f32 %v15504_v54, %v13289_v36  ;;  %v8782_v6 = vpop.f32.mrb[201].mxu0 }
0x138e   : > { %v20085_v23 = vadd.f32 %v15505_v9, %v8782_v6 }
0x138f   : > { %8839 = vmax.xlane.f32.xlu1 %v20080_v55 }
0x1390   : > { %v13292_v59 = vpop.f32.mrb[202].mxu0  ;;  %8837 = vmax.xlane.f32.xlu0 %v20085_v23 }
0x1391   : > { %v20092_v16 = vadd.f32 %v15506_v19, %v13292_v59  ;;  %v8792_v58 = vpop.f32.mrb[203].mxu0 }
0x1392   : > { %v20097_v45 = vadd.f32 %v15507_v7, %v8792_v58 }
0x1393   : > { %8843 = vmax.xlane.f32.xlu1 %v20092_v16 }
0x1394   : > { %v13295_v18 = vpop.f32.mrb[204].mxu0  ;;  %8841 = vmax.xlane.f32.xlu0 %v20097_v45 }
0x1395   : > { %v8802_v21 = vpop.f32.mrb[205].mxu0  ;;  %v20116_v31 = vadd.f32 %v15510_v39, %v13295_v18 }
0x1396   : > { %v20121_v17 = vadd.f32 %v15511_v32, %v8802_v21 }
0x1398   : > { %v13298_v51 = vpop.f32.mrb[206].mxu0 }
0x1399   : > { %v20104_v3 = vadd.f32 %v15508_v40, %v13298_v51  ;;  %v8812_v27 = vpop.f32.mrb[207].mxu0 }
0x139a   : > { %v20109_v62 = vadd.f32 %v15509_v10, %v8812_v27 }
0x139b   : > { %8851 = vmax.xlane.f32.xlu1 %v20104_v3 }
0x139c   : > { %8849 = vmax.xlane.f32.xlu0 %v20109_v62 }
0x139f   : > { %8847 = vmax.xlane.f32.xlu1 %v20116_v31 }
0x13a0   : > { %8845 = vmax.xlane.f32.xlu0 %v20121_v17 }
0x140c   : > { %v8824_v15 = vpop.xlane.xlu1 %8823 }
0x140d   : > { %v8854_v44 = vsub.f32 %v20032_v5, %v8824_v15  ;;  %v8822_v29 = vpop.xlane.xlu0 %8821 }
0x140e   : > { %v8853_v4 = vsub.f32 %v20037_v38, %v8822_v29 }
0x140f   : > { %v8871_v63 = vmul.f32 1.442695, %v8854_v44 }
0x1410   : > { %v8869_v47 = vmul.f32 1.442695, %v8853_v4  ;;  %v8828_v37 = vpop.xlane.xlu1 %8827 }
0x1411   : > { %15372 = vpow2.f32 %v8871_v63  ;;  %v8856_v0 = vsub.f32 %v20044_v13, %v8828_v37  ;;  %v8826_v56 = vpop.xlane.xlu0 %8825 }
0x1412   : > { %15374 = vpow2.f32 %v8869_v47  ;;  %v8855_v53 = vsub.f32 %v20049_v30, %v8826_v56 }
0x1413   : > { %v8875_v22 = vmul.f32 1.442695, %v8856_v0 }
0x1414   : > { %v8873_v60 = vmul.f32 1.442695, %v8855_v53  ;;  %v8832_v11 = vpop.xlane.xlu1 %8831 }
0x1415   : > { %15376 = vpow2.f32 %v8875_v22  ;;  %v8858_v34 = vsub.f32 %v20056_v50, %v8832_v11  ;;  %v8830_v43 = vpop.xlane.xlu0 %8829 }
0x1416   : > { %15378 = vpow2.f32 %v8873_v60  ;;  %v8857_v35 = vsub.f32 %v20061_v26, %v8830_v43 }
0x1417   : > { %v8879_v5 = vmul.f32 1.442695, %v8858_v34 }
0x1418   : > { %v8877_v2 = vmul.f32 1.442695, %v8857_v35  ;;  %v8836_v20 = vpop.xlane.xlu1 %8835 }
0x1419   : > { %15380 = vpow2.f32 %v8879_v5  ;;  %v8860_v38 = vsub.f32 %v20068_v14, %v8836_v20  ;;  %v8834_v61 = vpop.xlane.xlu0 %8833 }
0x141a   : > { %15382 = vpow2.f32 %v8877_v2  ;;  %v8859_v33 = vsub.f32 %v20073_v46, %v8834_v61 }
0x141b   : > { %v20133_v13 = vpop.eup %15372  ;;  %v8883_v52 = vmul.f32 1.442695, %v8860_v38 }
0x141c   : > { %v20135_v28 = vpop.eup %15374  ;;  %v8881_v30 = vmul.f32 1.442695, %v8859_v33  ;;  %v8840_v41 = vpop.xlane.xlu1 %8839  ;;  %8903 = vadd.xlane.f32.xlu1 %v20133_v13 }
0x141d   : > { %15384 = vpow2.f32 %v8883_v52  ;;  %v8862_v12 = vsub.f32 %v20080_v55, %v8840_v41  ;;  %8901 = vadd.xlane.f32.xlu0 %v20135_v28  ;;  %v8838_v50 = vpop.xlane.xlu0 %8837 }
0x141e   : > { %15386 = vpow2.f32 %v8881_v30  ;;  %v8861_v1 = vsub.f32 %v20085_v23, %v8838_v50 }
0x141f   : > { %v20141_v48 = vpop.eup %15376  ;;  %v8887_v26 = vmul.f32 1.442695, %v8862_v12 }
0x1420   : > { %v20143_v8 = vpop.eup %15378  ;;  %v8885_v49 = vmul.f32 1.442695, %v8861_v1  ;;  %v8844_v14 = vpop.xlane.xlu1 %8843  ;;  %8907 = vadd.xlane.f32.xlu1 %v20141_v48 }
0x1421   : > { %15388 = vpow2.f32 %v8887_v26  ;;  %v8864_v42 = vsub.f32 %v20092_v16, %v8844_v14  ;;  %8905 = vadd.xlane.f32.xlu0 %v20143_v8  ;;  %v8842_v57 = vpop.xlane.xlu0 %8841 }
0x1422   : > { %15390 = vpow2.f32 %v8885_v49  ;;  %v8863_v46 = vsub.f32 %v20097_v45, %v8842_v57 }
0x1423   : > { %v20149_v36 = vpop.eup %15380  ;;  %v8891_v54 = vmul.f32 1.442695, %v8864_v42 }
0x1424   : > { %v20151_v55 = vpop.eup %15382  ;;  %v8889_v6 = vmul.f32 1.442695, %v8863_v46  ;;  %8911 = vadd.xlane.f32.xlu1 %v20149_v36 }
0x1425   : > { %15392 = vpow2.f32 %v8891_v54  ;;  %8909 = vadd.xlane.f32.xlu0 %v20151_v55 }
0x1426   : > { %15394 = vpow2.f32 %v8889_v6 }
0x1427   : > { %v20155_v9 = vpop.eup %15384 }
0x1428   : > { %v20157_v23 = vpop.eup %15386  ;;  %8915 = vadd.xlane.f32.xlu1 %v20155_v9  ;;  %v8852_v59 = vpop.xlane.xlu1 %8851 }
0x1429   : > { %v8868_v19 = vsub.f32 %v20104_v3, %v8852_v59  ;;  %8913 = vadd.xlane.f32.xlu0 %v20157_v23  ;;  %v8850_v16 = vpop.xlane.xlu0 %8849 }
0x142a   : > { %v8867_v58 = vsub.f32 %v20109_v62, %v8850_v16 }
0x142b   : > { %v20163_v7 = vpop.eup %15388  ;;  %v8899_v45 = vmul.f32 1.442695, %v8868_v19 }
0x142c   : > { %v20165_v18 = vpop.eup %15390  ;;  %v8897_v21 = vmul.f32 1.442695, %v8867_v58  ;;  %8919 = vadd.xlane.f32.xlu1 %v20163_v7  ;;  %v8848_v51 = vpop.xlane.xlu1 %8847 }
0x142d   : > { %15396 = vpow2.f32 %v8899_v45  ;;  %v8866_v40 = vsub.f32 %v20116_v31, %v8848_v51  ;;  %8917 = vadd.xlane.f32.xlu0 %v20165_v18  ;;  %v8846_v3 = vpop.xlane.xlu0 %8845 }
0x142e   : > { %15398 = vpow2.f32 %v8897_v21  ;;  %v8865_v27 = vsub.f32 %v20121_v17, %v8846_v3 }
0x142f   : > { %v20171_v10 = vpop.eup %15392  ;;  %v8895_v62 = vmul.f32 1.442695, %v8866_v40 }
0x1430   : > { %v20173_v39 = vpop.eup %15394  ;;  %v8893_v32 = vmul.f32 1.442695, %v8865_v27  ;;  %8923 = vadd.xlane.f32.xlu1 %v20171_v10 }
0x1431   : > { %15400 = vpow2.f32 %v8895_v62  ;;  %8921 = vadd.xlane.f32.xlu0 %v20173_v39 }
0x1432   : > { %15402 = vpow2.f32 %v8893_v32 }
0x1437   : > { %v20177_v15 = vpop.eup %15396 }
0x1438   : > { %v20179_v31 = vpop.eup %15398  ;;  %8931 = vadd.xlane.f32.xlu1 %v20177_v15 }
0x1439   : > { %8929 = vadd.xlane.f32.xlu0 %v20179_v31 }
0x143b   : > { %v20183_v17 = vpop.eup %15400 }
0x143c   : > { %v20185_v44 = vpop.eup %15402  ;;  %8927 = vadd.xlane.f32.xlu1 %v20183_v17 }
0x143d   : > { %8925 = vadd.xlane.f32.xlu0 %v20185_v44 }
0x14a9   : > { %v8904_v29 = vpop.xlane.xlu1 %8903 }
0x14aa   : > { %15404 = vrcp.f32 %v8904_v29  ;;  %v8902_v4 = vpop.xlane.xlu0 %8901 }
0x14ab   : > { %15406 = vrcp.f32 %v8902_v4 }
0x14ad   : > { %v8908_v63 = vpop.xlane.xlu1 %8907 }
0x14ae   : > { %15408 = vrcp.f32 %v8908_v63  ;;  %v8906_v47 = vpop.xlane.xlu0 %8905 }
0x14af   : > { %15410 = vrcp.f32 %v8906_v47 }
0x14b1   : > { %v8912_v37 = vpop.xlane.xlu1 %8911 }
0x14b2   : > { %15412 = vrcp.f32 %v8912_v37  ;;  %v8910_v0 = vpop.xlane.xlu0 %8909 }
0x14b3   : > { %15414 = vrcp.f32 %v8910_v0 }
0x14b4   : > { %v15405_v56 = vpop.eup %15404 }
0x14b5   : > { %v15407_v53 = vpop.eup %15406  ;;  %v8950_v22 = vmul.f32 %v15405_v56, %v8904_v29  ;;  %v8916_v60 = vpop.xlane.xlu1 %8915 }
0x14b6   : > { %v8949_v11 = vmul.f32 %v15407_v53, %v8902_v4  ;;  %15416 = vrcp.f32 %v8916_v60  ;;  %v8914_v34 = vpop.xlane.xlu0 %8913 }
0x14b7   : > { %v8966_v43 = vsub.f32 2.0, %v8950_v22  ;;  %15418 = vrcp.f32 %v8914_v34 }
0x14b8   : > { %v15409_v35 = vpop.eup %15408  ;;  %v8965_v5 = vsub.f32 2.0, %v8949_v11 }
0x14b9   : > { %v15411_v2 = vpop.eup %15410  ;;  %v8982_v20 = vmul.f32 %v15405_v56, %v8966_v43  ;;  %v8952_v38 = vmul.f32 %v15409_v35, %v8908_v63  ;;  %v8920_v61 = vpop.xlane.xlu1 %8919 }
0x14ba   : > { %v8981_v33 = vmul.f32 %v15407_v53, %v8965_v5  ;;  %v8951_v52 = vmul.f32 %v15411_v2, %v8906_v47  ;;  %15420 = vrcp.f32 %v8920_v61  ;;  %v8918_v30 = vpop.xlane.xlu0 %8917 }
0x14bb   : > { %v8968_v41 = vsub.f32 2.0, %v8952_v38  ;;  %15422 = vrcp.f32 %v8918_v30  ;;  %v8998_v49 = vmul.f32 %v20133_v13, %v8982_v20 }
0x14bc   : > { %v15413_v12 = vpop.eup %15412  ;;  %v8967_v50 = vsub.f32 2.0, %v8951_v52  ;;  %v8997_v1 = vmul.f32 %v20135_v28, %v8981_v33 }
0x14bd   : > { %v15415_v26 = vpop.eup %15414  ;;  %v8984_v14 = vmul.f32 %v15409_v35, %v8968_v41  ;;  %v8954_v42 = vmul.f32 %v15413_v12, %v8912_v37  ;;  %v8924_v57 = vpop.xlane.xlu1 %8923 }
0x14be   : > { %v8983_v46 = vmul.f32 %v15411_v2, %v8967_v50  ;;  %v8953_v54 = vmul.f32 %v15415_v26, %v8910_v0  ;;  %15424 = vrcp.f32 %v8924_v57  ;;  %13331 = vmatprep.mubr.f32.mxu0 %v8997_v1  ;;  %v8922_v6 = vpop.xlane.xlu0 %8921 }
0x14bf   : > { %v8970_v59 = vsub.f32 2.0, %v8954_v42  ;;  %15426 = vrcp.f32 %v8922_v6  ;;  %13332 = vmatmul.mubr.f32.vlgmr.msra.gmra.mrb[144].mxu0 %v8998_v49  ;;  %v9000_v13 = vmul.f32 %v20141_v48, %v8984_v14 }
0x14c0   : > { %v15417_v19 = vpop.eup %15416  ;;  %v8969_v16 = vsub.f32 2.0, %v8953_v54  ;;  %v8999_v58 = vmul.f32 %v20143_v8, %v8983_v46 }
0x14c1   : > { %v15419_v45 = vpop.eup %15418  ;;  %v8986_v28 = vmul.f32 %v15413_v12, %v8970_v59  ;;  %v8956_v21 = vmul.f32 %v15417_v19, %v8916_v60 }
0x14c2   : > { %v8985_v51 = vmul.f32 %v15415_v26, %v8969_v16  ;;  %v8955_v40 = vmul.f32 %v15419_v45, %v8914_v34  ;;  %13334 = vmatprep.mubr.f32.mxu0 %v8999_v58 }
0x14c3   : > { %v8972_v3 = vsub.f32 2.0, %v8956_v21  ;;  %13335 = vmatmul.mubr.f32.gmra.mrb[146].mxu0 %v9000_v13  ;;  %v9002_v8 = vmul.f32 %v20149_v36, %v8986_v28 }
0x14c4   : > { %v15421_v27 = vpop.eup %15420  ;;  %v8971_v62 = vsub.f32 2.0, %v8955_v40  ;;  %v9001_v32 = vmul.f32 %v20151_v55, %v8985_v51 }
0x14c5   : > { %v15423_v29 = vpop.eup %15422  ;;  %v8988_v4 = vmul.f32 %v15417_v19, %v8972_v3  ;;  %v8958_v63 = vmul.f32 %v15421_v27, %v8920_v61  ;;  %v8932_v47 = vpop.xlane.xlu1 %8931 }
0x14c6   : > { %v8987_v37 = vmul.f32 %v15419_v45, %v8971_v62  ;;  %v8957_v0 = vmul.f32 %v15423_v29, %v8918_v30  ;;  %15428 = vrcp.f32 %v8932_v47  ;;  %13337 = vmatprep.mubr.f32.mxu0 %v9001_v32  ;;  %v8930_v48 = vpop.xlane.xlu0 %8929 }
0x14c7   : > { %v8974_v56 = vsub.f32 2.0, %v8958_v63  ;;  %15430 = vrcp.f32 %v8930_v48  ;;  %13338 = vmatmul.mubr.f32.gmra.mrb[148].mxu0 %v9002_v8  ;;  %v9004_v35 = vmul.f32 %v20155_v9, %v8988_v4 }
0x14c8   : > { %v15425_v53 = vpop.eup %15424  ;;  %v8973_v22 = vsub.f32 2.0, %v8957_v0  ;;  %v9003_v60 = vmul.f32 %v20157_v23, %v8987_v37 }
0x14c9   : > { %v15427_v11 = vpop.eup %15426  ;;  %v8990_v55 = vmul.f32 %v15421_v27, %v8974_v56  ;;  %v8960_v34 = vmul.f32 %v15425_v53, %v8924_v57  ;;  %v8928_v43 = vpop.xlane.xlu1 %8927 }
0x14ca   : > { %v8989_v5 = vmul.f32 %v15423_v29, %v8973_v22  ;;  %v8959_v36 = vmul.f32 %v15427_v11, %v8922_v6  ;;  %15432 = vrcp.f32 %v8928_v43  ;;  %13340 = vmatprep.mubr.f32.mxu0 %v9003_v60  ;;  %v8926_v2 = vpop.xlane.xlu0 %8925 }
0x14cb   : > { %v8976_v20 = vsub.f32 2.0, %v8960_v34  ;;  %15434 = vrcp.f32 %v8926_v2  ;;  %13341 = vmatmul.mubr.f32.gmra.mrb[150].mxu0 %v9004_v35  ;;  %v9006_v23 = vmul.f32 %v20163_v7, %v8990_v55 }
0x14cc   : > { %v8975_v38 = vsub.f32 2.0, %v8959_v36  ;;  %v9005_v61 = vmul.f32 %v20165_v18, %v8989_v5 }
0x14cd   : > { %v8992_v33 = vmul.f32 %v15425_v53, %v8976_v20 }
0x14ce   : > { %v8991_v52 = vmul.f32 %v15427_v11, %v8975_v38  ;;  %13343 = vmatprep.mubr.f32.mxu0 %v9005_v61 }
0x14cf   : > { %13344 = vmatmul.mubr.f32.gmra.mrb[152].mxu0 %v9006_v23  ;;  %v9008_v50 = vmul.f32 %v20171_v10, %v8992_v33 }
0x14d0   : > { %v15429_v30 = vpop.eup %15428  ;;  %v9007_v9 = vmul.f32 %v20173_v39, %v8991_v52 }
0x14d1   : > { %v15431_v41 = vpop.eup %15430  ;;  %v8964_v12 = vmul.f32 %v15429_v30, %v8932_v47 }
0x14d2   : > { %v8963_v1 = vmul.f32 %v15431_v41, %v8930_v48  ;;  %13346 = vmatprep.mubr.f32.mxu0 %v9007_v9 }
0x14d3   : > { %v8980_v26 = vsub.f32 2.0, %v8964_v12  ;;  %13347 = vmatmul.mubr.f32.gmra.mrb[154].mxu0 %v9008_v50 }
0x14d4   : > { %v15433_v49 = vpop.eup %15432  ;;  %v8979_v14 = vsub.f32 2.0, %v8963_v1 }
0x14d5   : > { %v15435_v18 = vpop.eup %15434  ;;  %v8996_v42 = vmul.f32 %v15429_v30, %v8980_v26  ;;  %v8962_v7 = vmul.f32 %v15433_v49, %v8928_v43 }
0x14d6   : > { %v8995_v57 = vmul.f32 %v15431_v41, %v8979_v14  ;;  %v8961_v46 = vmul.f32 %v15435_v18, %v8926_v2 }
0x14d7   : > { %v8978_v54 = vsub.f32 2.0, %v8962_v7  ;;  %v9012_v59 = vmul.f32 %v20177_v15, %v8996_v42 }
0x14d8   : > { %v8977_v6 = vsub.f32 2.0, %v8961_v46  ;;  %v9011_v39 = vmul.f32 %v20179_v31, %v8995_v57  ;;  %v15512_v31 = vld [vmem:[%s20293_s10] ss:$0 sm:$0xff] }
0x14d9   : > { %v8994_v10 = vmul.f32 %v15433_v49, %v8978_v54 }
0x14da   : > { %v8993_v19 = vmul.f32 %v15435_v18, %v8977_v6  ;;  %13352 = vmatprep.mubr.f32.mxu1 %v9011_v39 }
0x14db   : > { %13353 = vmatmul.mubr.f32.vlgmr.msra.gmra.mrb[96].mxu1 %v9012_v59  ;;  %v9010_v58 = vmul.f32 %v20183_v17, %v8994_v10 }
0x14dc   : > { %v9009_v16 = vmul.f32 %v20185_v44, %v8993_v19 }
0x14de   : > { %13349 = vmatprep.mubr.f32.mxu0 %v9009_v16 }
0x14df   : > { %13350 = vmatmul.mubr.f32.gmra.mrb[156].mxu0 %v9010_v58 }
0x1592   : > { %v13333_v45 = vpop.f32.mrb[144].mxu0 }
0x1593   : > { %v9175_v28 = vadd.f32 %v15512_v31, %v13333_v45  ;;  %v9079_v15 = vpop.f32.mrb[145].mxu0 }
0x1594   : > { %v9174_v21 = vadd.f32 %v15512_v31, %v9079_v15 }
0x1595   : > { %9191 = vst [vmem:[%s20211_s16 + $0x8] sm:$0xff] %v9175_v28 }
0x1596   : > { %9190 = vst [vmem:[%s20211_s16] sm:$0xff] %v9174_v21  ;;  %v13336_v17 = vpop.f32.mrb[146].mxu0 }
0x1597   : > { %v9177_v44 = vadd.f32 %v15512_v31, %v13336_v17  ;;  %v9089_v13 = vpop.f32.mrb[147].mxu0 }
0x1598   : > { %v9176_v51 = vadd.f32 %v15512_v31, %v9089_v13 }
0x1599   : > { %9193 = vst [vmem:[%s20211_s16 + $0x18] sm:$0xff] %v9177_v44 }
0x159a   : > { %9192 = vst [vmem:[%s20211_s16 + $0x10] sm:$0xff] %v9176_v51  ;;  %v13339_v40 = vpop.f32.mrb[148].mxu0 }
0x159b   : > { %v9179_v3 = vadd.f32 %v15512_v31, %v13339_v40  ;;  %v9099_v27 = vpop.f32.mrb[149].mxu0 }
0x159c   : > { %v9178_v62 = vadd.f32 %v15512_v31, %v9099_v27 }
0x159d   : > { %9195 = vst [vmem:[%s20211_s16 + $0x28] sm:$0xff] %v9179_v3 }
0x159e   : > { %9194 = vst [vmem:[%s20211_s16 + $0x20] sm:$0xff] %v9178_v62  ;;  %v13342_v32 = vpop.f32.mrb[150].mxu0 }
0x159f   : > { %v9181_v29 = vadd.f32 %v15512_v31, %v13342_v32  ;;  %v9109_v4 = vpop.f32.mrb[151].mxu0 }
0x15a0   : > { %v9180_v63 = vadd.f32 %v15512_v31, %v9109_v4 }
0x15a1   : > { %9197 = vst [vmem:[%s20211_s16 + $0x38] sm:$0xff] %v9181_v29 }
0x15a2   : > { %9196 = vst [vmem:[%s20211_s16 + $0x30] sm:$0xff] %v9180_v63  ;;  %v13345_v47 = vpop.f32.mrb[152].mxu0 }
0x15a3   : > { %v9183_v8 = vadd.f32 %v15512_v31, %v13345_v47  ;;  %v9119_v37 = vpop.f32.mrb[153].mxu0 }
0x15a4   : > { %v9182_v0 = vadd.f32 %v15512_v31, %v9119_v37 }
0x15a5   : > { %9199 = vst [vmem:[%s20211_s16 + $0x48] sm:$0xff] %v9183_v8 }
0x15a6   : > { %9198 = vst [vmem:[%s20211_s16 + $0x40] sm:$0xff] %v9182_v0  ;;  %v13348_v48 = vpop.f32.mrb[154].mxu0 }
0x15a7   : > { %v9185_v56 = vadd.f32 %v15512_v31, %v13348_v48  ;;  %v9129_v53 = vpop.f32.mrb[155].mxu0 }
0x15a8   : > { %v9184_v22 = vadd.f32 %v15512_v31, %v9129_v53 }
0x15a9   : > { %9201 = vst [vmem:[%s20211_s16 + $0x58] sm:$0xff] %v9185_v56 }
0x15aa   : > { %9200 = vst [vmem:[%s20211_s16 + $0x50] sm:$0xff] %v9184_v22 }
0x15ae   : > { %v13354_v60 = vpop.f32.mrb[96].mxu1 }
0x15af   : > { %v14787_v11 = vadd.f32 %v13354_v60, %v20025_v25  ;;  %v9149_v55 = vpop.f32.mrb[97].mxu1 }
0x15b0   : > { %v14788_v34 = vadd.f32 %v9149_v55, %v20027_v24 }
0x15b1   : > { %v9189_v43 = vadd.f32 %v15512_v31, %v14787_v11 }
0x15b2   : > { %v9188_v35 = vadd.f32 %v15512_v31, %v14788_v34  ;;  %v13351_v5 = vpop.f32.mrb[156].mxu0 }
0x15b3   : > { %9205 = vst [vmem:[%s20211_s16 + $0x78] sm:$0xff] %v9189_v43  ;;  %v9187_v36 = vadd.f32 %v15512_v31, %v13351_v5  ;;  %v9139_v2 = vpop.f32.mrb[157].mxu0 }
0x15b4   : > { %9204 = vst [vmem:[%s20211_s16 + $0x70] sm:$0xff] %v9188_v35  ;;  %v9186_v25 = vadd.f32 %v15512_v31, %v9139_v2 }
0x15b5   : > { %9203 = vst [vmem:[%s20211_s16 + $0x68] sm:$0xff] %v9187_v36 }
0x15b6   : > { %9202 = vst [vmem:[%s20211_s16 + $0x60] sm:$0xff] %v9186_v25 }
0x15b7   : > { %15526 = shalt.err (!%p15523_p3)
}
0x15b8   : > { %s15527_s12 = scalar_lea.hbm %s20233_s30, 2048  ;;  %s15531_s25 = scalar_lea.hbm %s20294_s11, 4096 }
0x15b9   : > { %p15528_p4 = scmp.ne.s32.totalorder %s20233_s30, %s15527_s12  ;;  %p15532_p9 = scmp.lt.u32.totalorder %s20233_s30, %s20294_s11 }
0x15ba   : > { %p15533_p10 = scmp.lt.u32.totalorder %s15531_s25, %s15527_s12  ;;  %p15535_p12 = scmp.lt.u32.totalorder %s15527_s12, %s20233_s30 }
0x15bb   : > { %p15529_p7 = pnand %p15528_p4, %p15678_p5 }
0x15bc   : > { %p15534_p11 = por %p15533_p10, %p15532_p9 }
0x15bd   : > { %p15530_p8 = pneg %p15529_p7 }
0x15be   : > { %p15536_p13 = por %p15535_p12, %p15534_p11 }
0x15c0   : > { %p15537_p0 = pnand %p15536_p13, %p15530_p8 }
0x15c2   : > { %15540 = shalt.err (!%p15537_p0)
}
0x15c3   : > { %s15578_s26 = smov 128   ;;  %s15579_s13 = smov 8  }
0x15c4   : > { %14883 = dma.vmem_to_hbm [thread:$0]  (%p15678_p5), %s20235_s24, 2048, %s20233_s30, %s20242_s21, %s15578_s26, %s15578_s26, %s15579_s13  }
0x15c5 PF: > { %p14889_p1 = scmp.ge.s32.totalorder %s15575_s20, 2  ;;  %s9235_s15 = sand.u32 1, %s15563_s17  }
0x15c6   : > { %s9236_s12 = scalar_lea.sflag [#allocation3], %s9235_s15 }
0x15c7   : > { %p14886_p2 = pnand %p14889_p1, %p15682_p6 }
0x15c9   : > { %15558 = dma.done.wait (!%p14886_p2), %s9236_s12, 2048  }
0x15ca   : > { %15560 = vsyncadd (!%p14886_p2), %s9236_s12, 4294965248  ;;  %s21047_s16 = sld [smem:[#allocation5_spill]]  ;;  %p21_p3 = scmp.ge.s32.totalorder %s15665_s23, 4  }
0x15cb   : > { %s21048_s17 = smov %s15567_s18  ;;  %s21049_s18 = smov %s15571_s19 }
0x15cc   : > { %s21051_s20 = smov %s15665_s23  ;;  %23 = sbr.rel (!%p21_p3) target bundleno = 3 (0x3), region = 120 }
0x15d0   : > { %s21050_s19 = smov %s21047_s16 }
0x15d3   :  { %9241 = vsyncpa [#allocation3], 1 }
0x15d4   :  { %9243 = vsyncpa [#allocation3 + $0x1], 1 }

</bundles_post_ra>
